<compile_context>
chip_gen: v7x
topology: tpu7x:2x2x1
jax: 0.10.0
libtpu: 0.0.40
codegen_flags: <defaults>
</compile_context>

<pallas_src>
import math
import functools

import jax
import jax.numpy as jnp
from jax import lax
from jax.experimental import pallas as pl
from jax.experimental.pallas import tpu as pltpu

# ----------------------------------------------------------------------------- config
CONFIG = {
    "data": {"vocab_size": 64},
    "tf": {
        "embedding_dim": 32,
        "num_head": 4,
        "num_encoder_layers": 2,
        "num_decoder_layers": 2,
        "dropout_prob": 0.0,          # dropout disabled (eval semantics)
        "dim_feedforward": 2048,      # PyTorch nn.Transformer default
    },
}

VOCAB = CONFIG["data"]["vocab_size"]
D_MODEL = CONFIG["tf"]["embedding_dim"]
N_HEAD = CONFIG["tf"]["num_head"]
N_ENC = CONFIG["tf"]["num_encoder_layers"]
N_DEC = CONFIG["tf"]["num_decoder_layers"]
D_FF = CONFIG["tf"]["dim_feedforward"]
D_HEAD = D_MODEL // N_HEAD
LN_EPS = 1e-5
VPAD = ((VOCAB + 127) // 128) * 128      # lane-dense (128-multiple) padded vocab width
FF_CHUNK = min(512, D_FF)                # D_FF chunk width (>=256 keeps MXU passes full)

_VMEM = pl.BlockSpec(memory_space=pltpu.MemorySpace.VMEM)

# batched dot_general dimension numbers (leading batch dim = heads)
_DN_PROJ = (((2,), (1,)), ((0,), (0,)))   # (H,S,D) x (H,D,E)  -> (H,S,E)
_DN_QK = (((2,), (2,)), ((0,), (0,)))     # (H,Sq,Dh) x (H,Sk,Dh) -> (H,Sq,Sk)

# Kernel argument order (activations/masks first, then all resident weights).
_WEIGHT_ARG_NAMES = (
    # encoder layers, stacked over N_ENC
    "e_wq", "e_wk", "e_wv", "e_bq", "e_bk", "e_bv", "e_wo", "e_bo",
    "e_ln1g", "e_ln1b", "e_w1", "e_b1", "e_w2", "e_b2", "e_ln2g", "e_ln2b",
    "enc_ng", "enc_nb",
    # decoder layers, stacked over N_DEC
    "d_sa_wq", "d_sa_wk", "d_sa_wv", "d_sa_bq", "d_sa_bk", "d_sa_bv", "d_sa_wo", "d_sa_bo",
    "d_ln1g", "d_ln1b",
    "d_ca_wq", "d_ca_wk", "d_ca_wv", "d_ca_bq", "d_ca_bk", "d_ca_bv", "d_ca_wo", "d_ca_bo",
    "d_ln2g", "d_ln2b",
    "d_w1", "d_b1", "d_w2", "d_b2", "d_ln3g", "d_ln3b",
    "dec_ng", "dec_nb",
    "out_w", "out_b",
)
_ARG_NAMES = ("x_src", "x_tgt", "enc_bias", "dec_bias") + _WEIGHT_ARG_NAMES


# ----------------------------------------------------------------------------- in-kernel helpers
def _layer_norm(x, g, b):
    """LayerNorm over last dim (PyTorch semantics, eps=1e-5), f32.  g/b are (1, D)."""
    mean = jnp.mean(x, axis=-1, keepdims=True)
    var = jnp.mean((x - mean) ** 2, axis=-1, keepdims=True)
    return (x - mean) * lax.rsqrt(var + LN_EPS) * g + b


def _attention(xq, xkv, wq, bq, wk, bk, wv, bv, wo, bo, bias, *, H, Dh):
    """All-heads attention for one batch element, heads batched in the leading dim.

    xq: (Sq, D) f32, xkv: (Sk, D) f32.
    wq/wk/wv: (H, D, Dh) bf16, bq/bk/bv: (H, 1, Dh) f32,
    wo: (H, Dh, D) bf16, bo: (1, D) f32.
    bias: additive f32, broadcastable to (H, Sq, Sk), or None.
    Returns the out-projected attention output (Sq, D) f32 (residual NOT added here).
    No transposes / lane concatenates: every contraction is a leading-batch 3-D dot_general.
    """
    Sq, D = xq.shape
    Sk = xkv.shape[0]
    xqb = jnp.broadcast_to(xq.astype(jnp.bfloat16)[None], (H, Sq, D))
    xkb = xqb if xkv is xq else jnp.broadcast_to(xkv.astype(jnp.bfloat16)[None], (H, Sk, D))

    q = lax.dot_general(xqb, wq, _DN_PROJ, preferred_element_type=jnp.float32) + bq  # (H,Sq,Dh)
    k = lax.dot_general(xkb, wk, _DN_PROJ, preferred_element_type=jnp.float32) + bk  # (H,Sk,Dh)
    v = lax.dot_general(xkb, wv, _DN_PROJ, preferred_element_type=jnp.float32) + bv  # (H,Sk,Dh)

    s = lax.dot_general(q.astype(jnp.bfloat16), k.astype(jnp.bfloat16), _DN_QK,
                        preferred_element_type=jnp.float32) * (1.0 / math.sqrt(Dh))  # (H,Sq,Sk)
    if bias is not None:
        s = s + bias
    s = s - jnp.max(s, axis=-1, keepdims=True)          # softmax in f32 (v5e has no bf16 VPU/EUP)
    p = jnp.exp(s)
    p = p / jnp.sum(p, axis=-1, keepdims=True)

    o = lax.dot_general(p.astype(jnp.bfloat16), v.astype(jnp.bfloat16), _DN_PROJ,
                        preferred_element_type=jnp.float32)                          # (H,Sq,Dh)
    # head merge folded into a batched out-projection + reduce over heads (no concatenate)
    y = lax.dot_general(o.astype(jnp.bfloat16), wo, _DN_PROJ,
                        preferred_element_type=jnp.float32)                          # (H,Sq,D)
    return jnp.sum(y, axis=0) + bo                                                   # (Sq,D)


def _ffn(h, w1_ref, b1_ref, w2_ref, layer, d_ff, chunk):
    """w1 + ReLU + w2, chunked over D_FF so the wide intermediate is never fully live.
    (layer FFN bias b2 is added by the caller).  Returns (S, D) f32."""
    S, D = h.shape
    hb = h.astype(jnp.bfloat16)
    acc = jnp.zeros((S, D), jnp.float32)
    for c in range(d_ff // chunk):
        lo = c * chunk
        f = jnp.dot(hb, w1_ref[layer, :, lo:lo + chunk],
                    preferred_element_type=jnp.float32) + b1_ref[layer, :, lo:lo + chunk]
        f = jnp.maximum(f, 0.0).astype(jnp.bfloat16)
        acc = acc + jnp.dot(f, w2_ref[layer, lo:lo + chunk, :],
                            preferred_element_type=jnp.float32)
    return acc


# ----------------------------------------------------------------------------- fused forward kernel
def _transformer_fwd_kernel(*refs, H, Dh, n_enc, n_dec, d_ff, ff_chunk,
                            has_enc_bias, has_dec_bias):
    r = dict(zip(_ARG_NAMES, refs[:len(_ARG_NAMES)]))
    o_ref = refs[len(_ARG_NAMES)]

    enc_bias = r["enc_bias"][...] if has_enc_bias else None    # (1, Ss) additive
    dec_bias = r["dec_bias"][...] if has_dec_bias else None    # (St, St) additive

    # ------------------ encoder stack (post-LN, ReLU FFN) ------------------
    x = r["x_src"][...]                                        # (Ss, D) f32
    for l in range(n_enc):
        att = _attention(x, x,
                         r["e_wq"][l], r["e_bq"][l], r["e_wk"][l], r["e_bk"][l],
                         r["e_wv"][l], r["e_bv"][l], r["e_wo"][l], r["e_bo"][l],
                         enc_bias, H=H, Dh=Dh)
        h1 = _layer_norm(x + att, r["e_ln1g"][l], r["e_ln1b"][l])
        f = _ffn(h1, r["e_w1"], r["e_b1"], r["e_w2"], l, d_ff, ff_chunk)
        x = _layer_norm(h1 + f + r["e_b2"][l], r["e_ln2g"][l], r["e_ln2b"][l])
    mem = _layer_norm(x, r["enc_ng"][...], r["enc_nb"][...])   # encoder final norm, (Ss, D)

    # ------------------ decoder stack ------------------
    x = r["x_tgt"][...]                                        # (St, D) f32
    for l in range(n_dec):
        sa = _attention(x, x,
                        r["d_sa_wq"][l], r["d_sa_bq"][l], r["d_sa_wk"][l], r["d_sa_bk"][l],
                        r["d_sa_wv"][l], r["d_sa_bv"][l], r["d_sa_wo"][l], r["d_sa_bo"][l],
                        dec_bias, H=H, Dh=Dh)
        h1 = _layer_norm(x + sa, r["d_ln1g"][l], r["d_ln1b"][l])
        ca = _attention(h1, mem,
                        r["d_ca_wq"][l], r["d_ca_bq"][l], r["d_ca_wk"][l], r["d_ca_bk"][l],
                        r["d_ca_wv"][l], r["d_ca_bv"][l], r["d_ca_wo"][l], r["d_ca_bo"][l],
                        None, H=H, Dh=Dh)                      # cross-attn has no mask in nn.Transformer here
        h2 = _layer_norm(h1 + ca, r["d_ln2g"][l], r["d_ln2b"][l])
        f = _ffn(h2, r["d_w1"], r["d_b1"], r["d_w2"], l, d_ff, ff_chunk)
        x = _layer_norm(h2 + f + r["d_b2"][l], r["d_ln3g"][l], r["d_ln3b"][l])

    # -------- final decoder LN + vocab head, single lane-dense (St, 128) store --------
    hf = _layer_norm(x, r["dec_ng"][...], r["dec_nb"][...])
    o_ref[...] = (jnp.dot(hf.astype(jnp.bfloat16), r["out_w"][...],
                          preferred_element_type=jnp.float32) + r["out_b"][...])


# ----------------------------------------------------------------------------- wrapper
def _cost_numbers(B, Ss, St):
    D, F, H, Dh = D_MODEL, D_FF, N_HEAD, D_HEAD

    def attn(Sq, Sk):
        return 2 * Sq * D * D + 4 * Sk * D * D + 4 * H * Sq * Sk * Dh + 2 * Sq * D * D

    per_b = (N_ENC * (attn(Ss, Ss) + 4 * Ss * D * F)
             + N_DEC * (attn(St, St) + attn(St, Ss) + 4 * St * D * F)
             + 2 * St * D * VPAD)
    trans = B * H * (N_ENC * Ss * Ss + N_DEC * (St * St + St * Ss))
    w_elems = (N_ENC * (4 * D * D + 2 * D * F) + N_DEC * (8 * D * D + 2 * D * F) + D * VPAD)
    byts = 2 * w_elems + 4 * B * (Ss * D + St * D + St * VPAD + St * St + Ss)
    return int(B * per_b), int(trans), int(byts)


def transformer_ed_forward(kp, src, tgt, tgt_mask=None, src_pad_mask=None, tgt_pad_mask=None):
    """src, tgt: (B, S) int32 token ids.  kp: kernel-ready params (prepare_kernel_params).
    Returns (S_tgt, B, vocab_size) logits (PyTorch batch_first=False layout)."""
    B, Ss = src.shape
    _, St = tgt.shape
    emb_scale = math.sqrt(D_MODEL)

    # embedding gather + positional encoding (plain-JAX glue; dropout p=0)
    src_x = (kp["embedding"][src] * emb_scale + sinusoidal_pe(Ss, D_MODEL)[None]).astype(jnp.float32)
    tgt_x = (kp["embedding"][tgt] * emb_scale + sinusoidal_pe(St, D_MODEL)[None]).astype(jnp.float32)

    # tiny additive masks, combined once in the wrapper; statically skipped if absent
    has_enc_bias = src_pad_mask is not None
    has_dec_bias = (tgt_mask is not None) or (tgt_pad_mask is not None)
    if has_enc_bias:
        enc_bias = jnp.where(src_pad_mask, -jnp.inf, 0.0).astype(jnp.float32)[:, None, :]
    else:
        enc_bias = jnp.zeros((B, 1, Ss), jnp.float32)
    dec_bias = jnp.zeros((B, St, St), jnp.float32)
    if tgt_mask is not None:
        dec_bias = dec_bias + tgt_mask.astype(jnp.float32)[None, :, :]
    if tgt_pad_mask is not None:
        dec_bias = dec_bias + jnp.where(tgt_pad_mask, -jnp.inf, 0.0).astype(jnp.float32)[:, None, :]

    kern = functools.partial(
        _transformer_fwd_kernel, H=N_HEAD, Dh=D_HEAD, n_enc=N_ENC, n_dec=N_DEC,
        d_ff=D_FF, ff_chunk=FF_CHUNK,
        has_enc_bias=has_enc_bias, has_dec_bias=has_dec_bias)

    in_specs = ([
        pl.BlockSpec((None, Ss, D_MODEL), lambda b: (b, 0, 0)),   # x_src   (one batch / grid step)
        pl.BlockSpec((None, St, D_MODEL), lambda b: (b, 0, 0)),   # x_tgt
        pl.BlockSpec((None, 1, Ss), lambda b: (b, 0, 0)),         # enc pad bias
        pl.BlockSpec((None, St, St), lambda b: (b, 0, 0)),        # dec self-attn bias
    ] + [_VMEM] * len(_WEIGHT_ARG_NAMES))                         # all weights resident in VMEM

    flops, trans, byts = _cost_numbers(B, Ss, St)

    out = pl.pallas_call(
        kern,
        out_shape=jax.ShapeDtypeStruct((B, St, VPAD), jnp.float32),
        grid=(B,),
        in_specs=in_specs,
        out_specs=pl.BlockSpec((None, St, VPAD), lambda b: (b, 0, 0)),
        compiler_params=pltpu.CompilerParams(
            dimension_semantics=("parallel",),            # v7x: one batch element per TensorCore
            vmem_limit_bytes=32 * 1024 * 1024),
        cost_estimate=pl.CostEstimate(flops=flops, transcendentals=trans, bytes_accessed=byts),
    )(src_x, tgt_x, enc_bias, dec_bias, *[kp[n] for n in _WEIGHT_ARG_NAMES])

    # slice off vocab padding, restore PyTorch batch_first=False layout: (S_tgt, B, V)
    return out[:, :, :VOCAB].transpose(1, 0, 2)


# ----------------------------------------------------------------------------- model glue
def sinusoidal_pe(seq_len, d):
    pos = jnp.arange(seq_len, dtype=jnp.float32)[:, None]
    div = jnp.exp(jnp.arange(0, d, 2, dtype=jnp.float32) * (-math.log(10000.0) / d))
    pe = jnp.zeros((seq_len, d), jnp.float32)
    pe = pe.at[:, 0::2].set(jnp.sin(pos * div))
    pe = pe.at[:, 1::2].set(jnp.cos(pos * div))
    return pe


def get_tgt_mask(size):
    tri = jnp.tril(jnp.ones((size, size), dtype=bool))
    return jnp.where(tri, 0.0, -jnp.inf).astype(jnp.float32)


def create_pad_mask(matrix, pad_token):
    return matrix == pad_token


# ----------------------------------------------------------------------------- param prep
def prepare_kernel_params(p):
    """Rearrange module params into the kernel-resident layout (done ONCE, outside jit):
    stacked over layers, projections split per head to (H, D, Dh)/(H, Dh, D), matmul weights
    in bf16 (MXU-native), biases/LN params in f32, vocab head zero-padded to 128 lanes.
    Logical weights are right-multiply form (y = x @ W + b), i.e. transposes of torch Linear."""
    bf16, f32 = jnp.bfloat16, jnp.float32
    H, Dh, D = N_HEAD, D_HEAD, D_MODEL

    phw = lambda w: jnp.transpose(w.reshape(D, H, Dh), (1, 0, 2)).astype(bf16)    # (H, D, Dh)
    phb = lambda b: b.reshape(H, 1, Dh).astype(f32)                               # (H, 1, Dh)
    phwo = lambda w: w.reshape(H, Dh, D).astype(bf16)                             # (H, Dh, D)
    row = lambda v: v.reshape(1, -1).astype(f32)                                  # (1, N)
    asbf = lambda w: w.astype(bf16)

    def st(layers, name, fn):
        return jnp.stack([fn(lp[name]) for lp in layers], axis=0)

    enc, dec = p["enc_layers"], p["dec_layers"]
    return {
        "embedding": p["embedding"].astype(f32),
        # encoder
        "e_wq": st(enc, "wq", phw), "e_wk": st(enc, "wk", phw), "e_wv": st(enc, "wv", phw),
        "e_bq": st(enc, "bq", phb), "e_bk": st(enc, "bk", phb), "e_bv": st(enc, "bv", phb),
        "e_wo": st(enc, "wo", phwo), "e_bo": st(enc, "bo", row),
        "e_ln1g": st(enc, "ln1_g", row), "e_ln1b": st(enc, "ln1_b", row),
        "e_w1": st(enc, "ff_w1", asbf), "e_b1": st(enc, "ff_b1", row),
        "e_w2": st(enc, "ff_w2", asbf), "e_b2": st(enc, "ff_b2", row),
        "e_ln2g": st(enc, "ln2_g", row), "e_ln2b": st(enc, "ln2_b", row),
        "enc_ng": row(p["enc_norm_g"]), "enc_nb": row(p["enc_norm_b"]),
        # decoder
        "d_sa_wq": st(dec, "sa_wq", phw), "d_sa_wk": st(dec, "sa_wk", phw), "d_sa_wv": st(dec, "sa_wv", phw),
        "d_sa_bq": st(dec, "sa_bq", phb), "d_sa_bk": st(dec, "sa_bk", phb), "d_sa_bv": st(dec, "sa_bv", phb),
        "d_sa_wo": st(dec, "sa_wo", phwo), "d_sa_bo": st(dec, "sa_bo", row),
        "d_ln1g": st(dec, "ln1_g", row), "d_ln1b": st(dec, "ln1_b", row),
        "d_ca_wq": st(dec, "ca_wq", phw), "d_ca_wk": st(dec, "ca_wk", phw), "d_ca_wv": st(dec, "ca_wv", phw),
        "d_ca_bq": st(dec, "ca_bq", phb), "d_ca_bk": st(dec, "ca_bk", phb), "d_ca_bv": st(dec, "ca_bv", phb),
        "d_ca_wo": st(dec, "ca_wo", phwo), "d_ca_bo": st(dec, "ca_bo", row),
        "d_ln2g": st(dec, "ln2_g", row), "d_ln2b": st(dec, "ln2_b", row),
        "d_w1": st(dec, "ff_w1", asbf), "d_b1": st(dec, "ff_b1", row),
        "d_w2": st(dec, "ff_w2", asbf), "d_b2": st(dec, "ff_b2", row),
        "d_ln3g": st(dec, "ln3_g", row), "d_ln3b": st(dec, "ln3_b", row),
        "dec_ng": row(p["dec_norm_g"]), "dec_nb": row(p["dec_norm_b"]),
        # vocab head padded to lane-dense 128-wide output
        "out_w": jnp.pad(p["out_w"], ((0, 0), (0, VPAD - VOCAB))).astype(bf16),
        "out_b": jnp.pad(p["out_b"], (0, VPAD - VOCAB)).reshape(1, VPAD).astype(f32),
    }


# ----------------------------------------------------------------------------- deterministic init
def _init_params(seed=42):
    key = jax.random.PRNGKey(seed)

    def nxt():
        nonlocal key
        key, sub = jax.random.split(key)
        return sub

    def w(shape):
        return jax.random.normal(nxt(), shape, jnp.float32) * 0.05

    D, F = D_MODEL, D_FF
    zeros = lambda *s: jnp.zeros(s, jnp.float32)
    ones = lambda *s: jnp.ones(s, jnp.float32)

    def enc_layer():
        return dict(
            wq=w((D, D)), wk=w((D, D)), wv=w((D, D)),
            bq=zeros(D), bk=zeros(D), bv=zeros(D),
            wo=w((D, D)), bo=zeros(D),
            ln1_g=ones(D), ln1_b=zeros(D),
            ff_w1=w((D, F)), ff_b1=zeros(F), ff_w2=w((F, D)), ff_b2=zeros(D),
            ln2_g=ones(D), ln2_b=zeros(D),
        )

    def dec_layer():
        return dict(
            sa_wq=w((D, D)), sa_wk=w((D, D)), sa_wv=w((D, D)),
            sa_bq=zeros(D), sa_bk=zeros(D), sa_bv=zeros(D),
            sa_wo=w((D, D)), sa_bo=zeros(D),
            ln1_g=ones(D), ln1_b=zeros(D),
            ca_wq=w((D, D)), ca_wk=w((D, D)), ca_wv=w((D, D)),
            ca_bq=zeros(D), ca_bk=zeros(D), ca_bv=zeros(D),
            ca_wo=w((D, D)), ca_bo=zeros(D),
            ln2_g=ones(D), ln2_b=zeros(D),
            ff_w1=w((D, F)), ff_b1=zeros(F), ff_w2=w((F, D)), ff_b2=zeros(D),
            ln3_g=ones(D), ln3_b=zeros(D),
        )

    return dict(
        embedding=w((VOCAB, D)),
        enc_layers=[enc_layer() for _ in range(N_ENC)],
        dec_layers=[dec_layer() for _ in range(N_DEC)],
        enc_norm_g=ones(D), enc_norm_b=zeros(D),
        dec_norm_g=ones(D), dec_norm_b=zeros(D),
        out_w=w((D, VOCAB)), out_b=zeros(VOCAB),
    )


# ----------------------------------------------------------------------------- main
if __name__ == "__main__":
    B, S_SRC, S_TGT = 2, 8, 8
    key = jax.random.PRNGKey(0)
    k_src, k_tgt = jax.random.split(key)
    src_tokens = jax.random.randint(k_src, (B, S_SRC), 0, VOCAB, dtype=jnp.int32)
    tgt_tokens = jax.random.randint(k_tgt, (B, S_TGT), 0, VOCAB, dtype=jnp.int32)

    params = _init_params(42)
    kparams = prepare_kernel_params(params)            # weight re-layout done once, outside jit

    tgt_mask = get_tgt_mask(S_TGT)
    src_pad_mask = jnp.zeros((B, S_SRC), dtype=bool)   # no padding in demo
    tgt_pad_mask = jnp.zeros((B, S_TGT), dtype=bool)

    fwd = jax.jit(transformer_ed_forward)
    logits = fwd(kparams, src_tokens, tgt_tokens, tgt_mask, src_pad_mask, tgt_pad_mask)
    logits = jax.block_until_ready(logits)

    assert logits.shape == (S_TGT, B, VOCAB), logits.shape
    assert bool(jnp.all(jnp.isfinite(logits)))
    # TODO(synk): dropout layers are identity (dropout_prob=0.0 / eval mode), so no RNG kernel.
    print("KERNEL_OK")
</pallas_src>

<mosaic_0001>
module attributes {stable_mosaic.version = 11 : i64} {
  func.func @_transformer_fwd_kernel(%arg0: i32, %arg1: memref<1x8x32xf32, #tpu.memory_space<vmem>>, %arg2: memref<1x8x32xf32, #tpu.memory_space<vmem>>, %arg3: memref<1x1x8xf32, #tpu.memory_space<vmem>>, %arg4: memref<1x8x8xf32, #tpu.memory_space<vmem>>, %arg5: memref<2x4x32x8xbf16, #tpu.memory_space<vmem>>, %arg6: memref<2x4x32x8xbf16, #tpu.memory_space<vmem>>, %arg7: memref<2x4x32x8xbf16, #tpu.memory_space<vmem>>, %arg8: memref<2x4x1x8xf32, #tpu.memory_space<vmem>>, %arg9: memref<2x4x1x8xf32, #tpu.memory_space<vmem>>, %arg10: memref<2x4x1x8xf32, #tpu.memory_space<vmem>>, %arg11: memref<2x4x8x32xbf16, #tpu.memory_space<vmem>>, %arg12: memref<2x1x32xf32, #tpu.memory_space<vmem>>, %arg13: memref<2x1x32xf32, #tpu.memory_space<vmem>>, %arg14: memref<2x1x32xf32, #tpu.memory_space<vmem>>, %arg15: memref<2x32x2048xbf16, #tpu.memory_space<vmem>>, %arg16: memref<2x1x2048xf32, #tpu.memory_space<vmem>>, %arg17: memref<2x2048x32xbf16, #tpu.memory_space<vmem>>, %arg18: memref<2x1x32xf32, #tpu.memory_space<vmem>>, %arg19: memref<2x1x32xf32, #tpu.memory_space<vmem>>, %arg20: memref<2x1x32xf32, #tpu.memory_space<vmem>>, %arg21: memref<1x32xf32, #tpu.memory_space<vmem>>, %arg22: memref<1x32xf32, #tpu.memory_space<vmem>>, %arg23: memref<2x4x32x8xbf16, #tpu.memory_space<vmem>>, %arg24: memref<2x4x32x8xbf16, #tpu.memory_space<vmem>>, %arg25: memref<2x4x32x8xbf16, #tpu.memory_space<vmem>>, %arg26: memref<2x4x1x8xf32, #tpu.memory_space<vmem>>, %arg27: memref<2x4x1x8xf32, #tpu.memory_space<vmem>>, %arg28: memref<2x4x1x8xf32, #tpu.memory_space<vmem>>, %arg29: memref<2x4x8x32xbf16, #tpu.memory_space<vmem>>, %arg30: memref<2x1x32xf32, #tpu.memory_space<vmem>>, %arg31: memref<2x1x32xf32, #tpu.memory_space<vmem>>, %arg32: memref<2x1x32xf32, #tpu.memory_space<vmem>>, %arg33: memref<2x4x32x8xbf16, #tpu.memory_space<vmem>>, %arg34: memref<2x4x32x8xbf16, #tpu.memory_space<vmem>>, %arg35: memref<2x4x32x8xbf16, #tpu.memory_space<vmem>>, %arg36: memref<2x4x1x8xf32, #tpu.memory_space<vmem>>, %arg37: memref<2x4x1x8xf32, #tpu.memory_space<vmem>>, %arg38: memref<2x4x1x8xf32, #tpu.memory_space<vmem>>, %arg39: memref<2x4x8x32xbf16, #tpu.memory_space<vmem>>, %arg40: memref<2x1x32xf32, #tpu.memory_space<vmem>>, %arg41: memref<2x1x32xf32, #tpu.memory_space<vmem>>, %arg42: memref<2x1x32xf32, #tpu.memory_space<vmem>>, %arg43: memref<2x32x2048xbf16, #tpu.memory_space<vmem>>, %arg44: memref<2x1x2048xf32, #tpu.memory_space<vmem>>, %arg45: memref<2x2048x32xbf16, #tpu.memory_space<vmem>>, %arg46: memref<2x1x32xf32, #tpu.memory_space<vmem>>, %arg47: memref<2x1x32xf32, #tpu.memory_space<vmem>>, %arg48: memref<2x1x32xf32, #tpu.memory_space<vmem>>, %arg49: memref<1x32xf32, #tpu.memory_space<vmem>>, %arg50: memref<1x32xf32, #tpu.memory_space<vmem>>, %arg51: memref<32x128xbf16, #tpu.memory_space<vmem>>, %arg52: memref<1x128xf32, #tpu.memory_space<vmem>>, %arg53: memref<1x8x128xf32, #tpu.memory_space<vmem>>) attributes {dimension_semantics = [#tpu.dimension_semantics<parallel>], iteration_bounds = array<i64: 2>, scalar_prefetch = 0 : i64, scratch_operands = 0 : i64, tpu.core_type = #tpu.core_type<tc>, window_params = [{transform_indices = @transform_0, window_bounds = array<i64: 1, 8, 32>}, {transform_indices = @transform_1, window_bounds = array<i64: 1, 8, 32>}, {transform_indices = @transform_2, window_bounds = array<i64: 1, 1, 8>}, {transform_indices = @transform_3, window_bounds = array<i64: 1, 8, 8>}, {pipeline_mode = #tpu.pipeline_mode<synchronous>, transform_indices = @transform_4, window_bounds = array<i64: 2, 4, 32, 8>}, {pipeline_mode = #tpu.pipeline_mode<synchronous>, transform_indices = @transform_5, window_bounds = array<i64: 2, 4, 32, 8>}, {pipeline_mode = #tpu.pipeline_mode<synchronous>, transform_indices = @transform_6, window_bounds = array<i64: 2, 4, 32, 8>}, {pipeline_mode = #tpu.pipeline_mode<synchronous>, transform_indices = @transform_7, window_bounds = array<i64: 2, 4, 1, 8>}, {pipeline_mode = #tpu.pipeline_mode<synchronous>, transform_indices = @transform_8, window_bounds = array<i64: 2, 4, 1, 8>}, {pipeline_mode = #tpu.pipeline_mode<synchronous>, transform_indices = @transform_9, window_bounds = array<i64: 2, 4, 1, 8>}, {pipeline_mode = #tpu.pipeline_mode<synchronous>, transform_indices = @transform_10, window_bounds = array<i64: 2, 4, 8, 32>}, {pipeline_mode = #tpu.pipeline_mode<synchronous>, transform_indices = @transform_11, window_bounds = array<i64: 2, 1, 32>}, {pipeline_mode = #tpu.pipeline_mode<synchronous>, transform_indices = @transform_12, window_bounds = array<i64: 2, 1, 32>}, {pipeline_mode = #tpu.pipeline_mode<synchronous>, transform_indices = @transform_13, window_bounds = array<i64: 2, 1, 32>}, {pipeline_mode = #tpu.pipeline_mode<synchronous>, transform_indices = @transform_14, window_bounds = array<i64: 2, 32, 2048>}, {pipeline_mode = #tpu.pipeline_mode<synchronous>, transform_indices = @transform_15, window_bounds = array<i64: 2, 1, 2048>}, {pipeline_mode = #tpu.pipeline_mode<synchronous>, transform_indices = @transform_16, window_bounds = array<i64: 2, 2048, 32>}, {pipeline_mode = #tpu.pipeline_mode<synchronous>, transform_indices = @transform_17, window_bounds = array<i64: 2, 1, 32>}, {pipeline_mode = #tpu.pipeline_mode<synchronous>, transform_indices = @transform_18, window_bounds = array<i64: 2, 1, 32>}, {pipeline_mode = #tpu.pipeline_mode<synchronous>, transform_indices = @transform_19, window_bounds = array<i64: 2, 1, 32>}, {pipeline_mode = #tpu.pipeline_mode<synchronous>, transform_indices = @transform_20, window_bounds = array<i64: 1, 32>}, {pipeline_mode = #tpu.pipeline_mode<synchronous>, transform_indices = @transform_21, window_bounds = array<i64: 1, 32>}, {pipeline_mode = #tpu.pipeline_mode<synchronous>, transform_indices = @transform_22, window_bounds = array<i64: 2, 4, 32, 8>}, {pipeline_mode = #tpu.pipeline_mode<synchronous>, transform_indices = @transform_23, window_bounds = array<i64: 2, 4, 32, 8>}, {pipeline_mode = #tpu.pipeline_mode<synchronous>, transform_indices = @transform_24, window_bounds = array<i64: 2, 4, 32, 8>}, {pipeline_mode = #tpu.pipeline_mode<synchronous>, transform_indices = @transform_25, window_bounds = array<i64: 2, 4, 1, 8>}, {pipeline_mode = #tpu.pipeline_mode<synchronous>, transform_indices = @transform_26, window_bounds = array<i64: 2, 4, 1, 8>}, {pipeline_mode = #tpu.pipeline_mode<synchronous>, transform_indices = @transform_27, window_bounds = array<i64: 2, 4, 1, 8>}, {pipeline_mode = #tpu.pipeline_mode<synchronous>, transform_indices = @transform_28, window_bounds = array<i64: 2, 4, 8, 32>}, {pipeline_mode = #tpu.pipeline_mode<synchronous>, transform_indices = @transform_29, window_bounds = array<i64: 2, 1, 32>}, {pipeline_mode = #tpu.pipeline_mode<synchronous>, transform_indices = @transform_30, window_bounds = array<i64: 2, 1, 32>}, {pipeline_mode = #tpu.pipeline_mode<synchronous>, transform_indices = @transform_31, window_bounds = array<i64: 2, 1, 32>}, {pipeline_mode = #tpu.pipeline_mode<synchronous>, transform_indices = @transform_32, window_bounds = array<i64: 2, 4, 32, 8>}, {pipeline_mode = #tpu.pipeline_mode<synchronous>, transform_indices = @transform_33, window_bounds = array<i64: 2, 4, 32, 8>}, {pipeline_mode = #tpu.pipeline_mode<synchronous>, transform_indices = @transform_34, window_bounds = array<i64: 2, 4, 32, 8>}, {pipeline_mode = #tpu.pipeline_mode<synchronous>, transform_indices = @transform_35, window_bounds = array<i64: 2, 4, 1, 8>}, {pipeline_mode = #tpu.pipeline_mode<synchronous>, transform_indices = @transform_36, window_bounds = array<i64: 2, 4, 1, 8>}, {pipeline_mode = #tpu.pipeline_mode<synchronous>, transform_indices = @transform_37, window_bounds = array<i64: 2, 4, 1, 8>}, {pipeline_mode = #tpu.pipeline_mode<synchronous>, transform_indices = @transform_38, window_bounds = array<i64: 2, 4, 8, 32>}, {pipeline_mode = #tpu.pipeline_mode<synchronous>, transform_indices = @transform_39, window_bounds = array<i64: 2, 1, 32>}, {pipeline_mode = #tpu.pipeline_mode<synchronous>, transform_indices = @transform_40, window_bounds = array<i64: 2, 1, 32>}, {pipeline_mode = #tpu.pipeline_mode<synchronous>, transform_indices = @transform_41, window_bounds = array<i64: 2, 1, 32>}, {pipeline_mode = #tpu.pipeline_mode<synchronous>, transform_indices = @transform_42, window_bounds = array<i64: 2, 32, 2048>}, {pipeline_mode = #tpu.pipeline_mode<synchronous>, transform_indices = @transform_43, window_bounds = array<i64: 2, 1, 2048>}, {pipeline_mode = #tpu.pipeline_mode<synchronous>, transform_indices = @transform_44, window_bounds = array<i64: 2, 2048, 32>}, {pipeline_mode = #tpu.pipeline_mode<synchronous>, transform_indices = @transform_45, window_bounds = array<i64: 2, 1, 32>}, {pipeline_mode = #tpu.pipeline_mode<synchronous>, transform_indices = @transform_46, window_bounds = array<i64: 2, 1, 32>}, {pipeline_mode = #tpu.pipeline_mode<synchronous>, transform_indices = @transform_47, window_bounds = array<i64: 2, 1, 32>}, {pipeline_mode = #tpu.pipeline_mode<synchronous>, transform_indices = @transform_48, window_bounds = array<i64: 1, 32>}, {pipeline_mode = #tpu.pipeline_mode<synchronous>, transform_indices = @transform_49, window_bounds = array<i64: 1, 32>}, {pipeline_mode = #tpu.pipeline_mode<synchronous>, transform_indices = @transform_50, window_bounds = array<i64: 32, 128>}, {pipeline_mode = #tpu.pipeline_mode<synchronous>, transform_indices = @transform_51, window_bounds = array<i64: 1, 128>}, {transform_indices = @transform_52, window_bounds = array<i64: 1, 8, 128>}]} {
    %c0 = arith.constant 0 : index
    %c0_0 = arith.constant 0 : index
    %c0_1 = arith.constant 0 : index
    %0 = vector.load %arg3[%c0, %c0_0, %c0_1] : memref<1x1x8xf32, #tpu.memory_space<vmem>>, vector<1x1x8xf32>
    %1 = vector.shape_cast %0 : vector<1x1x8xf32> to vector<1x8xf32>
    %c0_2 = arith.constant 0 : index
    %c0_3 = arith.constant 0 : index
    %c0_4 = arith.constant 0 : index
    %2 = vector.load %arg4[%c0_2, %c0_3, %c0_4] : memref<1x8x8xf32, #tpu.memory_space<vmem>>, vector<1x8x8xf32>
    %3 = vector.shape_cast %2 : vector<1x8x8xf32> to vector<8x8xf32>
    %c0_5 = arith.constant 0 : index
    %c0_6 = arith.constant 0 : index
    %c0_7 = arith.constant 0 : index
    %4 = vector.load %arg1[%c0_5, %c0_6, %c0_7] : memref<1x8x32xf32, #tpu.memory_space<vmem>>, vector<1x8x32xf32>
    %5 = vector.shape_cast %4 : vector<1x8x32xf32> to vector<8x32xf32>
    %c0_8 = arith.constant 0 : index
    %c0_9 = arith.constant 0 : index
    %c0_10 = arith.constant 0 : index
    %c0_11 = arith.constant 0 : index
    %6 = vector.load %arg5[%c0_8, %c0_9, %c0_10, %c0_11] : memref<2x4x32x8xbf16, #tpu.memory_space<vmem>>, vector<1x4x32x8xbf16>
    %7 = vector.shape_cast %6 : vector<1x4x32x8xbf16> to vector<4x32x8xbf16>
    %c0_12 = arith.constant 0 : index
    %c0_13 = arith.constant 0 : index
    %c0_14 = arith.constant 0 : index
    %c0_15 = arith.constant 0 : index
    %8 = vector.load %arg8[%c0_12, %c0_13, %c0_14, %c0_15] : memref<2x4x1x8xf32, #tpu.memory_space<vmem>>, vector<1x4x1x8xf32>
    %9 = vector.shape_cast %8 : vector<1x4x1x8xf32> to vector<4x1x8xf32>
    %c0_16 = arith.constant 0 : index
    %c0_17 = arith.constant 0 : index
    %c0_18 = arith.constant 0 : index
    %c0_19 = arith.constant 0 : index
    %10 = vector.load %arg6[%c0_16, %c0_17, %c0_18, %c0_19] : memref<2x4x32x8xbf16, #tpu.memory_space<vmem>>, vector<1x4x32x8xbf16>
    %11 = vector.shape_cast %10 : vector<1x4x32x8xbf16> to vector<4x32x8xbf16>
    %c0_20 = arith.constant 0 : index
    %c0_21 = arith.constant 0 : index
    %c0_22 = arith.constant 0 : index
    %c0_23 = arith.constant 0 : index
    %12 = vector.load %arg9[%c0_20, %c0_21, %c0_22, %c0_23] : memref<2x4x1x8xf32, #tpu.memory_space<vmem>>, vector<1x4x1x8xf32>
    %13 = vector.shape_cast %12 : vector<1x4x1x8xf32> to vector<4x1x8xf32>
    %c0_24 = arith.constant 0 : index
    %c0_25 = arith.constant 0 : index
    %c0_26 = arith.constant 0 : index
    %c0_27 = arith.constant 0 : index
    %14 = vector.load %arg7[%c0_24, %c0_25, %c0_26, %c0_27] : memref<2x4x32x8xbf16, #tpu.memory_space<vmem>>, vector<1x4x32x8xbf16>
    %15 = vector.shape_cast %14 : vector<1x4x32x8xbf16> to vector<4x32x8xbf16>
    %c0_28 = arith.constant 0 : index
    %c0_29 = arith.constant 0 : index
    %c0_30 = arith.constant 0 : index
    %c0_31 = arith.constant 0 : index
    %16 = vector.load %arg10[%c0_28, %c0_29, %c0_30, %c0_31] : memref<2x4x1x8xf32, #tpu.memory_space<vmem>>, vector<1x4x1x8xf32>
    %17 = vector.shape_cast %16 : vector<1x4x1x8xf32> to vector<4x1x8xf32>
    %c0_32 = arith.constant 0 : index
    %c0_33 = arith.constant 0 : index
    %c0_34 = arith.constant 0 : index
    %c0_35 = arith.constant 0 : index
    %18 = vector.load %arg11[%c0_32, %c0_33, %c0_34, %c0_35] : memref<2x4x8x32xbf16, #tpu.memory_space<vmem>>, vector<1x4x8x32xbf16>
    %19 = vector.shape_cast %18 : vector<1x4x8x32xbf16> to vector<4x8x32xbf16>
    %c0_36 = arith.constant 0 : index
    %c0_37 = arith.constant 0 : index
    %c0_38 = arith.constant 0 : index
    %20 = vector.load %arg12[%c0_36, %c0_37, %c0_38] : memref<2x1x32xf32, #tpu.memory_space<vmem>>, vector<1x1x32xf32>
    %21 = vector.shape_cast %20 : vector<1x1x32xf32> to vector<1x32xf32>
    %22 = arith.truncf %5 : vector<8x32xf32> to vector<8x32xbf16>
    %23 = vector.shape_cast %22 : vector<8x32xbf16> to vector<1x8x32xbf16>
    %24 = vector.shape_cast %23 : vector<1x8x32xbf16> to vector<1x8x32xbf16>
    %25 = vector.broadcast %24 : vector<1x8x32xbf16> to vector<4x8x32xbf16>
    %cst = arith.constant dense<0.000000e+00> : vector<4x8x8xf32>
    %26 = tpu.matmul %25, %7, %cst {dimension_numbers = #tpu.dot_dimension_numbers<[2], [1], [1], [2], [0, 0, 0, 1, 1, 2], [0], [0]>} : vector<4x8x32xbf16>, vector<4x32x8xbf16>, vector<4x8x8xf32> -> vector<4x8x8xf32>
    %27 = vector.broadcast %9 : vector<4x1x8xf32> to vector<4x8x8xf32>
    %28 = arith.addf %26, %27 : vector<4x8x8xf32>
    %cst_39 = arith.constant dense<0.000000e+00> : vector<4x8x8xf32>
    %29 = tpu.matmul %25, %11, %cst_39 {dimension_numbers = #tpu.dot_dimension_numbers<[2], [1], [1], [2], [0, 0, 0, 1, 1, 2], [0], [0]>} : vector<4x8x32xbf16>, vector<4x32x8xbf16>, vector<4x8x8xf32> -> vector<4x8x8xf32>
    %30 = vector.broadcast %13 : vector<4x1x8xf32> to vector<4x8x8xf32>
    %31 = arith.addf %29, %30 : vector<4x8x8xf32>
    %cst_40 = arith.constant dense<0.000000e+00> : vector<4x8x8xf32>
    %32 = tpu.matmul %25, %15, %cst_40 {dimension_numbers = #tpu.dot_dimension_numbers<[2], [1], [1], [2], [0, 0, 0, 1, 1, 2], [0], [0]>} : vector<4x8x32xbf16>, vector<4x32x8xbf16>, vector<4x8x8xf32> -> vector<4x8x8xf32>
    %33 = vector.broadcast %17 : vector<4x1x8xf32> to vector<4x8x8xf32>
    %34 = arith.addf %32, %33 : vector<4x8x8xf32>
    %35 = arith.truncf %28 : vector<4x8x8xf32> to vector<4x8x8xbf16>
    %36 = arith.truncf %31 : vector<4x8x8xf32> to vector<4x8x8xbf16>
    %cst_41 = arith.constant dense<0.000000e+00> : vector<4x8x8xf32>
    %37 = tpu.matmul %35, %36, %cst_41 {dimension_numbers = #tpu.dot_dimension_numbers<[2], [2], [1], [1], [0, 0, 0, 1, 1, 1], [0], [0]>} : vector<4x8x8xbf16>, vector<4x8x8xbf16>, vector<4x8x8xf32> -> vector<4x8x8xf32>
    %cst_42 = arith.constant 0.353553385 : f32
    %38 = vector.broadcast %cst_42 : f32 to vector<4x8x8xf32>
    %39 = arith.mulf %37, %38 : vector<4x8x8xf32>
    %40 = vector.shape_cast %1 : vector<1x8xf32> to vector<1x1x8xf32>
    %41 = vector.broadcast %40 : vector<1x1x8xf32> to vector<4x8x8xf32>
    %42 = arith.addf %39, %41 : vector<4x8x8xf32>
    %cst_43 = arith.constant dense<0xFF800000> : vector<4x8xf32>
    %43 = vector.multi_reduction <maximumf>, %42, %cst_43 [2] : vector<4x8x8xf32> to vector<4x8xf32>
    %44 = vector.shape_cast %43 : vector<4x8xf32> to vector<4x8x1xf32>
    %45 = vector.broadcast %44 : vector<4x8x1xf32> to vector<4x8x8xf32>
    %46 = arith.subf %42, %45 : vector<4x8x8xf32>
    %47 = math.exp %46 : vector<4x8x8xf32>
    %cst_44 = arith.constant dense<0.000000e+00> : vector<4x8xf32>
    %48 = vector.multi_reduction <add>, %47, %cst_44 [2] : vector<4x8x8xf32> to vector<4x8xf32>
    %49 = vector.shape_cast %48 : vector<4x8xf32> to vector<4x8x1xf32>
    %50 = vector.broadcast %49 : vector<4x8x1xf32> to vector<4x8x8xf32>
    %51 = arith.divf %47, %50 : vector<4x8x8xf32>
    %52 = arith.truncf %51 : vector<4x8x8xf32> to vector<4x8x8xbf16>
    %53 = arith.truncf %34 : vector<4x8x8xf32> to vector<4x8x8xbf16>
    %cst_45 = arith.constant dense<0.000000e+00> : vector<4x8x8xf32>
    %54 = tpu.matmul %52, %53, %cst_45 {dimension_numbers = #tpu.dot_dimension_numbers<[2], [1], [1], [2], [0, 0, 0, 1, 1, 2], [0], [0]>} : vector<4x8x8xbf16>, vector<4x8x8xbf16>, vector<4x8x8xf32> -> vector<4x8x8xf32>
    %55 = arith.truncf %54 : vector<4x8x8xf32> to vector<4x8x8xbf16>
    %cst_46 = arith.constant dense<0.000000e+00> : vector<4x8x32xf32>
    %56 = tpu.matmul %55, %19, %cst_46 {dimension_numbers = #tpu.dot_dimension_numbers<[2], [1], [1], [2], [0, 0, 0, 1, 1, 2], [0], [0]>} : vector<4x8x8xbf16>, vector<4x8x32xbf16>, vector<4x8x32xf32> -> vector<4x8x32xf32>
    %cst_47 = arith.constant dense<0.000000e+00> : vector<8x32xf32>
    %57 = vector.multi_reduction <add>, %56, %cst_47 [0] : vector<4x8x32xf32> to vector<8x32xf32>
    %58 = vector.broadcast %21 : vector<1x32xf32> to vector<8x32xf32>
    %59 = arith.addf %57, %58 : vector<8x32xf32>
    %60 = arith.addf %5, %59 : vector<8x32xf32>
    %c0_48 = arith.constant 0 : index
    %c0_49 = arith.constant 0 : index
    %c0_50 = arith.constant 0 : index
    %61 = vector.load %arg13[%c0_48, %c0_49, %c0_50] : memref<2x1x32xf32, #tpu.memory_space<vmem>>, vector<1x1x32xf32>
    %62 = vector.shape_cast %61 : vector<1x1x32xf32> to vector<1x32xf32>
    %c0_51 = arith.constant 0 : index
    %c0_52 = arith.constant 0 : index
    %c0_53 = arith.constant 0 : index
    %63 = vector.load %arg14[%c0_51, %c0_52, %c0_53] : memref<2x1x32xf32, #tpu.memory_space<vmem>>, vector<1x1x32xf32>
    %64 = vector.shape_cast %63 : vector<1x1x32xf32> to vector<1x32xf32>
    %cst_54 = arith.constant dense<0.000000e+00> : vector<8xf32>
    %65 = vector.multi_reduction <add>, %60, %cst_54 [1] : vector<8x32xf32> to vector<8xf32>
    %66 = vector.shape_cast %65 : vector<8xf32> to vector<8x1xf32>
    %cst_55 = arith.constant 3.200000e+01 : f32
    %67 = vector.broadcast %cst_55 : f32 to vector<8x1xf32>
    %68 = arith.divf %66, %67 : vector<8x1xf32>
    %69 = vector.broadcast %68 : vector<8x1xf32> to vector<8x32xf32>
    %70 = arith.subf %60, %69 : vector<8x32xf32>
    %71 = arith.mulf %70, %70 : vector<8x32xf32>
    %cst_56 = arith.constant dense<0.000000e+00> : vector<8xf32>
    %72 = vector.multi_reduction <add>, %71, %cst_56 [1] : vector<8x32xf32> to vector<8xf32>
    %73 = vector.shape_cast %72 : vector<8xf32> to vector<8x1xf32>
    %cst_57 = arith.constant 3.200000e+01 : f32
    %74 = vector.broadcast %cst_57 : f32 to vector<8x1xf32>
    %75 = arith.divf %73, %74 : vector<8x1xf32>
    %76 = vector.broadcast %68 : vector<8x1xf32> to vector<8x32xf32>
    %77 = arith.subf %60, %76 : vector<8x32xf32>
    %cst_58 = arith.constant 9.99999974E-6 : f32
    %78 = vector.broadcast %cst_58 : f32 to vector<8x1xf32>
    %79 = arith.addf %75, %78 : vector<8x1xf32>
    %80 = math.rsqrt %79 : vector<8x1xf32>
    %81 = vector.broadcast %80 : vector<8x1xf32> to vector<8x32xf32>
    %82 = arith.mulf %77, %81 : vector<8x32xf32>
    %83 = vector.broadcast %62 : vector<1x32xf32> to vector<8x32xf32>
    %84 = arith.mulf %82, %83 : vector<8x32xf32>
    %85 = vector.broadcast %64 : vector<1x32xf32> to vector<8x32xf32>
    %86 = arith.addf %84, %85 : vector<8x32xf32>
    %87 = arith.truncf %86 : vector<8x32xf32> to vector<8x32xbf16>
    %cst_59 = arith.constant 0.000000e+00 : f32
    %88 = vector.broadcast %cst_59 : f32 to vector<8x32xf32>
    %c0_60 = arith.constant 0 : index
    %c0_61 = arith.constant 0 : index
    %c0_62 = arith.constant 0 : index
    %89 = vector.load %arg15[%c0_60, %c0_61, %c0_62] : memref<2x32x2048xbf16, #tpu.memory_space<vmem>>, vector<1x32x512xbf16>
    %90 = vector.shape_cast %89 : vector<1x32x512xbf16> to vector<32x512xbf16>
    %cst_63 = arith.constant dense<0.000000e+00> : vector<8x512xf32>
    %91 = tpu.matmul %87, %90, %cst_63 {dimension_numbers = #tpu.dot_dimension_numbers<[1], [0], [0], [1], [0, 0, 1, 1], [], []>} : vector<8x32xbf16>, vector<32x512xbf16>, vector<8x512xf32> -> vector<8x512xf32>
    %c0_64 = arith.constant 0 : index
    %c0_65 = arith.constant 0 : index
    %c0_66 = arith.constant 0 : index
    %92 = vector.load %arg16[%c0_64, %c0_65, %c0_66] : memref<2x1x2048xf32, #tpu.memory_space<vmem>>, vector<1x1x512xf32>
    %93 = vector.shape_cast %92 : vector<1x1x512xf32> to vector<1x512xf32>
    %94 = vector.broadcast %93 : vector<1x512xf32> to vector<8x512xf32>
    %95 = arith.addf %91, %94 : vector<8x512xf32>
    %cst_67 = arith.constant 0.000000e+00 : f32
    %96 = vector.broadcast %cst_67 : f32 to vector<8x512xf32>
    %97 = arith.maximumf %95, %96 : vector<8x512xf32>
    %98 = arith.truncf %97 : vector<8x512xf32> to vector<8x512xbf16>
    %c0_68 = arith.constant 0 : index
    %c0_69 = arith.constant 0 : index
    %c0_70 = arith.constant 0 : index
    %99 = vector.load %arg17[%c0_68, %c0_69, %c0_70] : memref<2x2048x32xbf16, #tpu.memory_space<vmem>>, vector<1x512x32xbf16>
    %100 = vector.shape_cast %99 : vector<1x512x32xbf16> to vector<512x32xbf16>
    %cst_71 = arith.constant dense<0.000000e+00> : vector<8x32xf32>
    %101 = tpu.matmul %98, %100, %cst_71 {dimension_numbers = #tpu.dot_dimension_numbers<[1], [0], [0], [1], [0, 0, 1, 1], [], []>} : vector<8x512xbf16>, vector<512x32xbf16>, vector<8x32xf32> -> vector<8x32xf32>
    %102 = arith.addf %88, %101 : vector<8x32xf32>
    %c0_72 = arith.constant 0 : index
    %c0_73 = arith.constant 0 : index
    %c512 = arith.constant 512 : index
    %103 = vector.load %arg15[%c0_72, %c0_73, %c512] : memref<2x32x2048xbf16, #tpu.memory_space<vmem>>, vector<1x32x512xbf16>
    %104 = vector.shape_cast %103 : vector<1x32x512xbf16> to vector<32x512xbf16>
    %cst_74 = arith.constant dense<0.000000e+00> : vector<8x512xf32>
    %105 = tpu.matmul %87, %104, %cst_74 {dimension_numbers = #tpu.dot_dimension_numbers<[1], [0], [0], [1], [0, 0, 1, 1], [], []>} : vector<8x32xbf16>, vector<32x512xbf16>, vector<8x512xf32> -> vector<8x512xf32>
    %c0_75 = arith.constant 0 : index
    %c0_76 = arith.constant 0 : index
    %c512_77 = arith.constant 512 : index
    %106 = vector.load %arg16[%c0_75, %c0_76, %c512_77] : memref<2x1x2048xf32, #tpu.memory_space<vmem>>, vector<1x1x512xf32>
    %107 = vector.shape_cast %106 : vector<1x1x512xf32> to vector<1x512xf32>
    %108 = vector.broadcast %107 : vector<1x512xf32> to vector<8x512xf32>
    %109 = arith.addf %105, %108 : vector<8x512xf32>
    %cst_78 = arith.constant 0.000000e+00 : f32
    %110 = vector.broadcast %cst_78 : f32 to vector<8x512xf32>
    %111 = arith.maximumf %109, %110 : vector<8x512xf32>
    %112 = arith.truncf %111 : vector<8x512xf32> to vector<8x512xbf16>
    %c0_79 = arith.constant 0 : index
    %c512_80 = arith.constant 512 : index
    %c0_81 = arith.constant 0 : index
    %113 = vector.load %arg17[%c0_79, %c512_80, %c0_81] : memref<2x2048x32xbf16, #tpu.memory_space<vmem>>, vector<1x512x32xbf16>
    %114 = vector.shape_cast %113 : vector<1x512x32xbf16> to vector<512x32xbf16>
    %cst_82 = arith.constant dense<0.000000e+00> : vector<8x32xf32>
    %115 = tpu.matmul %112, %114, %cst_82 {dimension_numbers = #tpu.dot_dimension_numbers<[1], [0], [0], [1], [0, 0, 1, 1], [], []>} : vector<8x512xbf16>, vector<512x32xbf16>, vector<8x32xf32> -> vector<8x32xf32>
    %116 = arith.addf %102, %115 : vector<8x32xf32>
    %c0_83 = arith.constant 0 : index
    %c0_84 = arith.constant 0 : index
    %c1024 = arith.constant 1024 : index
    %117 = vector.load %arg15[%c0_83, %c0_84, %c1024] : memref<2x32x2048xbf16, #tpu.memory_space<vmem>>, vector<1x32x512xbf16>
    %118 = vector.shape_cast %117 : vector<1x32x512xbf16> to vector<32x512xbf16>
    %cst_85 = arith.constant dense<0.000000e+00> : vector<8x512xf32>
    %119 = tpu.matmul %87, %118, %cst_85 {dimension_numbers = #tpu.dot_dimension_numbers<[1], [0], [0], [1], [0, 0, 1, 1], [], []>} : vector<8x32xbf16>, vector<32x512xbf16>, vector<8x512xf32> -> vector<8x512xf32>
    %c0_86 = arith.constant 0 : index
    %c0_87 = arith.constant 0 : index
    %c1024_88 = arith.constant 1024 : index
    %120 = vector.load %arg16[%c0_86, %c0_87, %c1024_88] : memref<2x1x2048xf32, #tpu.memory_space<vmem>>, vector<1x1x512xf32>
    %121 = vector.shape_cast %120 : vector<1x1x512xf32> to vector<1x512xf32>
    %122 = vector.broadcast %121 : vector<1x512xf32> to vector<8x512xf32>
    %123 = arith.addf %119, %122 : vector<8x512xf32>
    %cst_89 = arith.constant 0.000000e+00 : f32
    %124 = vector.broadcast %cst_89 : f32 to vector<8x512xf32>
    %125 = arith.maximumf %123, %124 : vector<8x512xf32>
    %126 = arith.truncf %125 : vector<8x512xf32> to vector<8x512xbf16>
    %c0_90 = arith.constant 0 : index
    %c1024_91 = arith.constant 1024 : index
    %c0_92 = arith.constant 0 : index
    %127 = vector.load %arg17[%c0_90, %c1024_91, %c0_92] : memref<2x2048x32xbf16, #tpu.memory_space<vmem>>, vector<1x512x32xbf16>
    %128 = vector.shape_cast %127 : vector<1x512x32xbf16> to vector<512x32xbf16>
    %cst_93 = arith.constant dense<0.000000e+00> : vector<8x32xf32>
    %129 = tpu.matmul %126, %128, %cst_93 {dimension_numbers = #tpu.dot_dimension_numbers<[1], [0], [0], [1], [0, 0, 1, 1], [], []>} : vector<8x512xbf16>, vector<512x32xbf16>, vector<8x32xf32> -> vector<8x32xf32>
    %130 = arith.addf %116, %129 : vector<8x32xf32>
    %c0_94 = arith.constant 0 : index
    %c0_95 = arith.constant 0 : index
    %c1536 = arith.constant 1536 : index
    %131 = vector.load %arg15[%c0_94, %c0_95, %c1536] : memref<2x32x2048xbf16, #tpu.memory_space<vmem>>, vector<1x32x512xbf16>
    %132 = vector.shape_cast %131 : vector<1x32x512xbf16> to vector<32x512xbf16>
    %cst_96 = arith.constant dense<0.000000e+00> : vector<8x512xf32>
    %133 = tpu.matmul %87, %132, %cst_96 {dimension_numbers = #tpu.dot_dimension_numbers<[1], [0], [0], [1], [0, 0, 1, 1], [], []>} : vector<8x32xbf16>, vector<32x512xbf16>, vector<8x512xf32> -> vector<8x512xf32>
    %c0_97 = arith.constant 0 : index
    %c0_98 = arith.constant 0 : index
    %c1536_99 = arith.constant 1536 : index
    %134 = vector.load %arg16[%c0_97, %c0_98, %c1536_99] : memref<2x1x2048xf32, #tpu.memory_space<vmem>>, vector<1x1x512xf32>
    %135 = vector.shape_cast %134 : vector<1x1x512xf32> to vector<1x512xf32>
    %136 = vector.broadcast %135 : vector<1x512xf32> to vector<8x512xf32>
    %137 = arith.addf %133, %136 : vector<8x512xf32>
    %cst_100 = arith.constant 0.000000e+00 : f32
    %138 = vector.broadcast %cst_100 : f32 to vector<8x512xf32>
    %139 = arith.maximumf %137, %138 : vector<8x512xf32>
    %140 = arith.truncf %139 : vector<8x512xf32> to vector<8x512xbf16>
    %c0_101 = arith.constant 0 : index
    %c1536_102 = arith.constant 1536 : index
    %c0_103 = arith.constant 0 : index
    %141 = vector.load %arg17[%c0_101, %c1536_102, %c0_103] : memref<2x2048x32xbf16, #tpu.memory_space<vmem>>, vector<1x512x32xbf16>
    %142 = vector.shape_cast %141 : vector<1x512x32xbf16> to vector<512x32xbf16>
    %cst_104 = arith.constant dense<0.000000e+00> : vector<8x32xf32>
    %143 = tpu.matmul %140, %142, %cst_104 {dimension_numbers = #tpu.dot_dimension_numbers<[1], [0], [0], [1], [0, 0, 1, 1], [], []>} : vector<8x512xbf16>, vector<512x32xbf16>, vector<8x32xf32> -> vector<8x32xf32>
    %144 = arith.addf %130, %143 : vector<8x32xf32>
    %145 = arith.addf %86, %144 : vector<8x32xf32>
    %c0_105 = arith.constant 0 : index
    %c0_106 = arith.constant 0 : index
    %c0_107 = arith.constant 0 : index
    %146 = vector.load %arg18[%c0_105, %c0_106, %c0_107] : memref<2x1x32xf32, #tpu.memory_space<vmem>>, vector<1x1x32xf32>
    %147 = vector.shape_cast %146 : vector<1x1x32xf32> to vector<1x32xf32>
    %148 = vector.broadcast %147 : vector<1x32xf32> to vector<8x32xf32>
    %149 = arith.addf %145, %148 : vector<8x32xf32>
    %c0_108 = arith.constant 0 : index
    %c0_109 = arith.constant 0 : index
    %c0_110 = arith.constant 0 : index
    %150 = vector.load %arg19[%c0_108, %c0_109, %c0_110] : memref<2x1x32xf32, #tpu.memory_space<vmem>>, vector<1x1x32xf32>
    %151 = vector.shape_cast %150 : vector<1x1x32xf32> to vector<1x32xf32>
    %c0_111 = arith.constant 0 : index
    %c0_112 = arith.constant 0 : index
    %c0_113 = arith.constant 0 : index
    %152 = vector.load %arg20[%c0_111, %c0_112, %c0_113] : memref<2x1x32xf32, #tpu.memory_space<vmem>>, vector<1x1x32xf32>
    %153 = vector.shape_cast %152 : vector<1x1x32xf32> to vector<1x32xf32>
    %cst_114 = arith.constant dense<0.000000e+00> : vector<8xf32>
    %154 = vector.multi_reduction <add>, %149, %cst_114 [1] : vector<8x32xf32> to vector<8xf32>
    %155 = vector.shape_cast %154 : vector<8xf32> to vector<8x1xf32>
    %cst_115 = arith.constant 3.200000e+01 : f32
    %156 = vector.broadcast %cst_115 : f32 to vector<8x1xf32>
    %157 = arith.divf %155, %156 : vector<8x1xf32>
    %158 = vector.broadcast %157 : vector<8x1xf32> to vector<8x32xf32>
    %159 = arith.subf %149, %158 : vector<8x32xf32>
    %160 = arith.mulf %159, %159 : vector<8x32xf32>
    %cst_116 = arith.constant dense<0.000000e+00> : vector<8xf32>
    %161 = vector.multi_reduction <add>, %160, %cst_116 [1] : vector<8x32xf32> to vector<8xf32>
    %162 = vector.shape_cast %161 : vector<8xf32> to vector<8x1xf32>
    %cst_117 = arith.constant 3.200000e+01 : f32
    %163 = vector.broadcast %cst_117 : f32 to vector<8x1xf32>
    %164 = arith.divf %162, %163 : vector<8x1xf32>
    %165 = vector.broadcast %157 : vector<8x1xf32> to vector<8x32xf32>
    %166 = arith.subf %149, %165 : vector<8x32xf32>
    %cst_118 = arith.constant 9.99999974E-6 : f32
    %167 = vector.broadcast %cst_118 : f32 to vector<8x1xf32>
    %168 = arith.addf %164, %167 : vector<8x1xf32>
    %169 = math.rsqrt %168 : vector<8x1xf32>
    %170 = vector.broadcast %169 : vector<8x1xf32> to vector<8x32xf32>
    %171 = arith.mulf %166, %170 : vector<8x32xf32>
    %172 = vector.broadcast %151 : vector<1x32xf32> to vector<8x32xf32>
    %173 = arith.mulf %171, %172 : vector<8x32xf32>
    %174 = vector.broadcast %153 : vector<1x32xf32> to vector<8x32xf32>
    %175 = arith.addf %173, %174 : vector<8x32xf32>
    %c1 = arith.constant 1 : index
    %c0_119 = arith.constant 0 : index
    %c0_120 = arith.constant 0 : index
    %c0_121 = arith.constant 0 : index
    %176 = vector.load %arg5[%c1, %c0_119, %c0_120, %c0_121] : memref<2x4x32x8xbf16, #tpu.memory_space<vmem>>, vector<1x4x32x8xbf16>
    %177 = vector.shape_cast %176 : vector<1x4x32x8xbf16> to vector<4x32x8xbf16>
    %c1_122 = arith.constant 1 : index
    %c0_123 = arith.constant 0 : index
    %c0_124 = arith.constant 0 : index
    %c0_125 = arith.constant 0 : index
    %178 = vector.load %arg8[%c1_122, %c0_123, %c0_124, %c0_125] : memref<2x4x1x8xf32, #tpu.memory_space<vmem>>, vector<1x4x1x8xf32>
    %179 = vector.shape_cast %178 : vector<1x4x1x8xf32> to vector<4x1x8xf32>
    %c1_126 = arith.constant 1 : index
    %c0_127 = arith.constant 0 : index
    %c0_128 = arith.constant 0 : index
    %c0_129 = arith.constant 0 : index
    %180 = vector.load %arg6[%c1_126, %c0_127, %c0_128, %c0_129] : memref<2x4x32x8xbf16, #tpu.memory_space<vmem>>, vector<1x4x32x8xbf16>
    %181 = vector.shape_cast %180 : vector<1x4x32x8xbf16> to vector<4x32x8xbf16>
    %c1_130 = arith.constant 1 : index
    %c0_131 = arith.constant 0 : index
    %c0_132 = arith.constant 0 : index
    %c0_133 = arith.constant 0 : index
    %182 = vector.load %arg9[%c1_130, %c0_131, %c0_132, %c0_133] : memref<2x4x1x8xf32, #tpu.memory_space<vmem>>, vector<1x4x1x8xf32>
    %183 = vector.shape_cast %182 : vector<1x4x1x8xf32> to vector<4x1x8xf32>
    %c1_134 = arith.constant 1 : index
    %c0_135 = arith.constant 0 : index
    %c0_136 = arith.constant 0 : index
    %c0_137 = arith.constant 0 : index
    %184 = vector.load %arg7[%c1_134, %c0_135, %c0_136, %c0_137] : memref<2x4x32x8xbf16, #tpu.memory_space<vmem>>, vector<1x4x32x8xbf16>
    %185 = vector.shape_cast %184 : vector<1x4x32x8xbf16> to vector<4x32x8xbf16>
    %c1_138 = arith.constant 1 : index
    %c0_139 = arith.constant 0 : index
    %c0_140 = arith.constant 0 : index
    %c0_141 = arith.constant 0 : index
    %186 = vector.load %arg10[%c1_138, %c0_139, %c0_140, %c0_141] : memref<2x4x1x8xf32, #tpu.memory_space<vmem>>, vector<1x4x1x8xf32>
    %187 = vector.shape_cast %186 : vector<1x4x1x8xf32> to vector<4x1x8xf32>
    %c1_142 = arith.constant 1 : index
    %c0_143 = arith.constant 0 : index
    %c0_144 = arith.constant 0 : index
    %c0_145 = arith.constant 0 : index
    %188 = vector.load %arg11[%c1_142, %c0_143, %c0_144, %c0_145] : memref<2x4x8x32xbf16, #tpu.memory_space<vmem>>, vector<1x4x8x32xbf16>
    %189 = vector.shape_cast %188 : vector<1x4x8x32xbf16> to vector<4x8x32xbf16>
    %c1_146 = arith.constant 1 : index
    %c0_147 = arith.constant 0 : index
    %c0_148 = arith.constant 0 : index
    %190 = vector.load %arg12[%c1_146, %c0_147, %c0_148] : memref<2x1x32xf32, #tpu.memory_space<vmem>>, vector<1x1x32xf32>
    %191 = vector.shape_cast %190 : vector<1x1x32xf32> to vector<1x32xf32>
    %192 = arith.truncf %175 : vector<8x32xf32> to vector<8x32xbf16>
    %193 = vector.shape_cast %192 : vector<8x32xbf16> to vector<1x8x32xbf16>
    %194 = vector.shape_cast %193 : vector<1x8x32xbf16> to vector<1x8x32xbf16>
    %195 = vector.broadcast %194 : vector<1x8x32xbf16> to vector<4x8x32xbf16>
    %cst_149 = arith.constant dense<0.000000e+00> : vector<4x8x8xf32>
    %196 = tpu.matmul %195, %177, %cst_149 {dimension_numbers = #tpu.dot_dimension_numbers<[2], [1], [1], [2], [0, 0, 0, 1, 1, 2], [0], [0]>} : vector<4x8x32xbf16>, vector<4x32x8xbf16>, vector<4x8x8xf32> -> vector<4x8x8xf32>
    %197 = vector.broadcast %179 : vector<4x1x8xf32> to vector<4x8x8xf32>
    %198 = arith.addf %196, %197 : vector<4x8x8xf32>
    %cst_150 = arith.constant dense<0.000000e+00> : vector<4x8x8xf32>
    %199 = tpu.matmul %195, %181, %cst_150 {dimension_numbers = #tpu.dot_dimension_numbers<[2], [1], [1], [2], [0, 0, 0, 1, 1, 2], [0], [0]>} : vector<4x8x32xbf16>, vector<4x32x8xbf16>, vector<4x8x8xf32> -> vector<4x8x8xf32>
    %200 = vector.broadcast %183 : vector<4x1x8xf32> to vector<4x8x8xf32>
    %201 = arith.addf %199, %200 : vector<4x8x8xf32>
    %cst_151 = arith.constant dense<0.000000e+00> : vector<4x8x8xf32>
    %202 = tpu.matmul %195, %185, %cst_151 {dimension_numbers = #tpu.dot_dimension_numbers<[2], [1], [1], [2], [0, 0, 0, 1, 1, 2], [0], [0]>} : vector<4x8x32xbf16>, vector<4x32x8xbf16>, vector<4x8x8xf32> -> vector<4x8x8xf32>
    %203 = vector.broadcast %187 : vector<4x1x8xf32> to vector<4x8x8xf32>
    %204 = arith.addf %202, %203 : vector<4x8x8xf32>
    %205 = arith.truncf %198 : vector<4x8x8xf32> to vector<4x8x8xbf16>
    %206 = arith.truncf %201 : vector<4x8x8xf32> to vector<4x8x8xbf16>
    %cst_152 = arith.constant dense<0.000000e+00> : vector<4x8x8xf32>
    %207 = tpu.matmul %205, %206, %cst_152 {dimension_numbers = #tpu.dot_dimension_numbers<[2], [2], [1], [1], [0, 0, 0, 1, 1, 1], [0], [0]>} : vector<4x8x8xbf16>, vector<4x8x8xbf16>, vector<4x8x8xf32> -> vector<4x8x8xf32>
    %cst_153 = arith.constant 0.353553385 : f32
    %208 = vector.broadcast %cst_153 : f32 to vector<4x8x8xf32>
    %209 = arith.mulf %207, %208 : vector<4x8x8xf32>
    %210 = vector.shape_cast %1 : vector<1x8xf32> to vector<1x1x8xf32>
    %211 = vector.broadcast %210 : vector<1x1x8xf32> to vector<4x8x8xf32>
    %212 = arith.addf %209, %211 : vector<4x8x8xf32>
    %cst_154 = arith.constant dense<0xFF800000> : vector<4x8xf32>
    %213 = vector.multi_reduction <maximumf>, %212, %cst_154 [2] : vector<4x8x8xf32> to vector<4x8xf32>
    %214 = vector.shape_cast %213 : vector<4x8xf32> to vector<4x8x1xf32>
    %215 = vector.broadcast %214 : vector<4x8x1xf32> to vector<4x8x8xf32>
    %216 = arith.subf %212, %215 : vector<4x8x8xf32>
    %217 = math.exp %216 : vector<4x8x8xf32>
    %cst_155 = arith.constant dense<0.000000e+00> : vector<4x8xf32>
    %218 = vector.multi_reduction <add>, %217, %cst_155 [2] : vector<4x8x8xf32> to vector<4x8xf32>
    %219 = vector.shape_cast %218 : vector<4x8xf32> to vector<4x8x1xf32>
    %220 = vector.broadcast %219 : vector<4x8x1xf32> to vector<4x8x8xf32>
    %221 = arith.divf %217, %220 : vector<4x8x8xf32>
    %222 = arith.truncf %221 : vector<4x8x8xf32> to vector<4x8x8xbf16>
    %223 = arith.truncf %204 : vector<4x8x8xf32> to vector<4x8x8xbf16>
    %cst_156 = arith.constant dense<0.000000e+00> : vector<4x8x8xf32>
    %224 = tpu.matmul %222, %223, %cst_156 {dimension_numbers = #tpu.dot_dimension_numbers<[2], [1], [1], [2], [0, 0, 0, 1, 1, 2], [0], [0]>} : vector<4x8x8xbf16>, vector<4x8x8xbf16>, vector<4x8x8xf32> -> vector<4x8x8xf32>
    %225 = arith.truncf %224 : vector<4x8x8xf32> to vector<4x8x8xbf16>
    %cst_157 = arith.constant dense<0.000000e+00> : vector<4x8x32xf32>
    %226 = tpu.matmul %225, %189, %cst_157 {dimension_numbers = #tpu.dot_dimension_numbers<[2], [1], [1], [2], [0, 0, 0, 1, 1, 2], [0], [0]>} : vector<4x8x8xbf16>, vector<4x8x32xbf16>, vector<4x8x32xf32> -> vector<4x8x32xf32>
    %cst_158 = arith.constant dense<0.000000e+00> : vector<8x32xf32>
    %227 = vector.multi_reduction <add>, %226, %cst_158 [0] : vector<4x8x32xf32> to vector<8x32xf32>
    %228 = vector.broadcast %191 : vector<1x32xf32> to vector<8x32xf32>
    %229 = arith.addf %227, %228 : vector<8x32xf32>
    %230 = arith.addf %175, %229 : vector<8x32xf32>
    %c1_159 = arith.constant 1 : index
    %c0_160 = arith.constant 0 : index
    %c0_161 = arith.constant 0 : index
    %231 = vector.load %arg13[%c1_159, %c0_160, %c0_161] : memref<2x1x32xf32, #tpu.memory_space<vmem>>, vector<1x1x32xf32>
    %232 = vector.shape_cast %231 : vector<1x1x32xf32> to vector<1x32xf32>
    %c1_162 = arith.constant 1 : index
    %c0_163 = arith.constant 0 : index
    %c0_164 = arith.constant 0 : index
    %233 = vector.load %arg14[%c1_162, %c0_163, %c0_164] : memref<2x1x32xf32, #tpu.memory_space<vmem>>, vector<1x1x32xf32>
    %234 = vector.shape_cast %233 : vector<1x1x32xf32> to vector<1x32xf32>
    %cst_165 = arith.constant dense<0.000000e+00> : vector<8xf32>
    %235 = vector.multi_reduction <add>, %230, %cst_165 [1] : vector<8x32xf32> to vector<8xf32>
    %236 = vector.shape_cast %235 : vector<8xf32> to vector<8x1xf32>
    %cst_166 = arith.constant 3.200000e+01 : f32
    %237 = vector.broadcast %cst_166 : f32 to vector<8x1xf32>
    %238 = arith.divf %236, %237 : vector<8x1xf32>
    %239 = vector.broadcast %238 : vector<8x1xf32> to vector<8x32xf32>
    %240 = arith.subf %230, %239 : vector<8x32xf32>
    %241 = arith.mulf %240, %240 : vector<8x32xf32>
    %cst_167 = arith.constant dense<0.000000e+00> : vector<8xf32>
    %242 = vector.multi_reduction <add>, %241, %cst_167 [1] : vector<8x32xf32> to vector<8xf32>
    %243 = vector.shape_cast %242 : vector<8xf32> to vector<8x1xf32>
    %cst_168 = arith.constant 3.200000e+01 : f32
    %244 = vector.broadcast %cst_168 : f32 to vector<8x1xf32>
    %245 = arith.divf %243, %244 : vector<8x1xf32>
    %246 = vector.broadcast %238 : vector<8x1xf32> to vector<8x32xf32>
    %247 = arith.subf %230, %246 : vector<8x32xf32>
    %cst_169 = arith.constant 9.99999974E-6 : f32
    %248 = vector.broadcast %cst_169 : f32 to vector<8x1xf32>
    %249 = arith.addf %245, %248 : vector<8x1xf32>
    %250 = math.rsqrt %249 : vector<8x1xf32>
    %251 = vector.broadcast %250 : vector<8x1xf32> to vector<8x32xf32>
    %252 = arith.mulf %247, %251 : vector<8x32xf32>
    %253 = vector.broadcast %232 : vector<1x32xf32> to vector<8x32xf32>
    %254 = arith.mulf %252, %253 : vector<8x32xf32>
    %255 = vector.broadcast %234 : vector<1x32xf32> to vector<8x32xf32>
    %256 = arith.addf %254, %255 : vector<8x32xf32>
    %257 = arith.truncf %256 : vector<8x32xf32> to vector<8x32xbf16>
    %cst_170 = arith.constant 0.000000e+00 : f32
    %258 = vector.broadcast %cst_170 : f32 to vector<8x32xf32>
    %c1_171 = arith.constant 1 : index
    %c0_172 = arith.constant 0 : index
    %c0_173 = arith.constant 0 : index
    %259 = vector.load %arg15[%c1_171, %c0_172, %c0_173] : memref<2x32x2048xbf16, #tpu.memory_space<vmem>>, vector<1x32x512xbf16>
    %260 = vector.shape_cast %259 : vector<1x32x512xbf16> to vector<32x512xbf16>
    %cst_174 = arith.constant dense<0.000000e+00> : vector<8x512xf32>
    %261 = tpu.matmul %257, %260, %cst_174 {dimension_numbers = #tpu.dot_dimension_numbers<[1], [0], [0], [1], [0, 0, 1, 1], [], []>} : vector<8x32xbf16>, vector<32x512xbf16>, vector<8x512xf32> -> vector<8x512xf32>
    %c1_175 = arith.constant 1 : index
    %c0_176 = arith.constant 0 : index
    %c0_177 = arith.constant 0 : index
    %262 = vector.load %arg16[%c1_175, %c0_176, %c0_177] : memref<2x1x2048xf32, #tpu.memory_space<vmem>>, vector<1x1x512xf32>
    %263 = vector.shape_cast %262 : vector<1x1x512xf32> to vector<1x512xf32>
    %264 = vector.broadcast %263 : vector<1x512xf32> to vector<8x512xf32>
    %265 = arith.addf %261, %264 : vector<8x512xf32>
    %cst_178 = arith.constant 0.000000e+00 : f32
    %266 = vector.broadcast %cst_178 : f32 to vector<8x512xf32>
    %267 = arith.maximumf %265, %266 : vector<8x512xf32>
    %268 = arith.truncf %267 : vector<8x512xf32> to vector<8x512xbf16>
    %c1_179 = arith.constant 1 : index
    %c0_180 = arith.constant 0 : index
    %c0_181 = arith.constant 0 : index
    %269 = vector.load %arg17[%c1_179, %c0_180, %c0_181] : memref<2x2048x32xbf16, #tpu.memory_space<vmem>>, vector<1x512x32xbf16>
    %270 = vector.shape_cast %269 : vector<1x512x32xbf16> to vector<512x32xbf16>
    %cst_182 = arith.constant dense<0.000000e+00> : vector<8x32xf32>
    %271 = tpu.matmul %268, %270, %cst_182 {dimension_numbers = #tpu.dot_dimension_numbers<[1], [0], [0], [1], [0, 0, 1, 1], [], []>} : vector<8x512xbf16>, vector<512x32xbf16>, vector<8x32xf32> -> vector<8x32xf32>
    %272 = arith.addf %258, %271 : vector<8x32xf32>
    %c1_183 = arith.constant 1 : index
    %c0_184 = arith.constant 0 : index
    %c512_185 = arith.constant 512 : index
    %273 = vector.load %arg15[%c1_183, %c0_184, %c512_185] : memref<2x32x2048xbf16, #tpu.memory_space<vmem>>, vector<1x32x512xbf16>
    %274 = vector.shape_cast %273 : vector<1x32x512xbf16> to vector<32x512xbf16>
    %cst_186 = arith.constant dense<0.000000e+00> : vector<8x512xf32>
    %275 = tpu.matmul %257, %274, %cst_186 {dimension_numbers = #tpu.dot_dimension_numbers<[1], [0], [0], [1], [0, 0, 1, 1], [], []>} : vector<8x32xbf16>, vector<32x512xbf16>, vector<8x512xf32> -> vector<8x512xf32>
    %c1_187 = arith.constant 1 : index
    %c0_188 = arith.constant 0 : index
    %c512_189 = arith.constant 512 : index
    %276 = vector.load %arg16[%c1_187, %c0_188, %c512_189] : memref<2x1x2048xf32, #tpu.memory_space<vmem>>, vector<1x1x512xf32>
    %277 = vector.shape_cast %276 : vector<1x1x512xf32> to vector<1x512xf32>
    %278 = vector.broadcast %277 : vector<1x512xf32> to vector<8x512xf32>
    %279 = arith.addf %275, %278 : vector<8x512xf32>
    %cst_190 = arith.constant 0.000000e+00 : f32
    %280 = vector.broadcast %cst_190 : f32 to vector<8x512xf32>
    %281 = arith.maximumf %279, %280 : vector<8x512xf32>
    %282 = arith.truncf %281 : vector<8x512xf32> to vector<8x512xbf16>
    %c1_191 = arith.constant 1 : index
    %c512_192 = arith.constant 512 : index
    %c0_193 = arith.constant 0 : index
    %283 = vector.load %arg17[%c1_191, %c512_192, %c0_193] : memref<2x2048x32xbf16, #tpu.memory_space<vmem>>, vector<1x512x32xbf16>
    %284 = vector.shape_cast %283 : vector<1x512x32xbf16> to vector<512x32xbf16>
    %cst_194 = arith.constant dense<0.000000e+00> : vector<8x32xf32>
    %285 = tpu.matmul %282, %284, %cst_194 {dimension_numbers = #tpu.dot_dimension_numbers<[1], [0], [0], [1], [0, 0, 1, 1], [], []>} : vector<8x512xbf16>, vector<512x32xbf16>, vector<8x32xf32> -> vector<8x32xf32>
    %286 = arith.addf %272, %285 : vector<8x32xf32>
    %c1_195 = arith.constant 1 : index
    %c0_196 = arith.constant 0 : index
    %c1024_197 = arith.constant 1024 : index
    %287 = vector.load %arg15[%c1_195, %c0_196, %c1024_197] : memref<2x32x2048xbf16, #tpu.memory_space<vmem>>, vector<1x32x512xbf16>
    %288 = vector.shape_cast %287 : vector<1x32x512xbf16> to vector<32x512xbf16>
    %cst_198 = arith.constant dense<0.000000e+00> : vector<8x512xf32>
    %289 = tpu.matmul %257, %288, %cst_198 {dimension_numbers = #tpu.dot_dimension_numbers<[1], [0], [0], [1], [0, 0, 1, 1], [], []>} : vector<8x32xbf16>, vector<32x512xbf16>, vector<8x512xf32> -> vector<8x512xf32>
    %c1_199 = arith.constant 1 : index
    %c0_200 = arith.constant 0 : index
    %c1024_201 = arith.constant 1024 : index
    %290 = vector.load %arg16[%c1_199, %c0_200, %c1024_201] : memref<2x1x2048xf32, #tpu.memory_space<vmem>>, vector<1x1x512xf32>
    %291 = vector.shape_cast %290 : vector<1x1x512xf32> to vector<1x512xf32>
    %292 = vector.broadcast %291 : vector<1x512xf32> to vector<8x512xf32>
    %293 = arith.addf %289, %292 : vector<8x512xf32>
    %cst_202 = arith.constant 0.000000e+00 : f32
    %294 = vector.broadcast %cst_202 : f32 to vector<8x512xf32>
    %295 = arith.maximumf %293, %294 : vector<8x512xf32>
    %296 = arith.truncf %295 : vector<8x512xf32> to vector<8x512xbf16>
    %c1_203 = arith.constant 1 : index
    %c1024_204 = arith.constant 1024 : index
    %c0_205 = arith.constant 0 : index
    %297 = vector.load %arg17[%c1_203, %c1024_204, %c0_205] : memref<2x2048x32xbf16, #tpu.memory_space<vmem>>, vector<1x512x32xbf16>
    %298 = vector.shape_cast %297 : vector<1x512x32xbf16> to vector<512x32xbf16>
    %cst_206 = arith.constant dense<0.000000e+00> : vector<8x32xf32>
    %299 = tpu.matmul %296, %298, %cst_206 {dimension_numbers = #tpu.dot_dimension_numbers<[1], [0], [0], [1], [0, 0, 1, 1], [], []>} : vector<8x512xbf16>, vector<512x32xbf16>, vector<8x32xf32> -> vector<8x32xf32>
    %300 = arith.addf %286, %299 : vector<8x32xf32>
    %c1_207 = arith.constant 1 : index
    %c0_208 = arith.constant 0 : index
    %c1536_209 = arith.constant 1536 : index
    %301 = vector.load %arg15[%c1_207, %c0_208, %c1536_209] : memref<2x32x2048xbf16, #tpu.memory_space<vmem>>, vector<1x32x512xbf16>
    %302 = vector.shape_cast %301 : vector<1x32x512xbf16> to vector<32x512xbf16>
    %cst_210 = arith.constant dense<0.000000e+00> : vector<8x512xf32>
    %303 = tpu.matmul %257, %302, %cst_210 {dimension_numbers = #tpu.dot_dimension_numbers<[1], [0], [0], [1], [0, 0, 1, 1], [], []>} : vector<8x32xbf16>, vector<32x512xbf16>, vector<8x512xf32> -> vector<8x512xf32>
    %c1_211 = arith.constant 1 : index
    %c0_212 = arith.constant 0 : index
    %c1536_213 = arith.constant 1536 : index
    %304 = vector.load %arg16[%c1_211, %c0_212, %c1536_213] : memref<2x1x2048xf32, #tpu.memory_space<vmem>>, vector<1x1x512xf32>
    %305 = vector.shape_cast %304 : vector<1x1x512xf32> to vector<1x512xf32>
    %306 = vector.broadcast %305 : vector<1x512xf32> to vector<8x512xf32>
    %307 = arith.addf %303, %306 : vector<8x512xf32>
    %cst_214 = arith.constant 0.000000e+00 : f32
    %308 = vector.broadcast %cst_214 : f32 to vector<8x512xf32>
    %309 = arith.maximumf %307, %308 : vector<8x512xf32>
    %310 = arith.truncf %309 : vector<8x512xf32> to vector<8x512xbf16>
    %c1_215 = arith.constant 1 : index
    %c1536_216 = arith.constant 1536 : index
    %c0_217 = arith.constant 0 : index
    %311 = vector.load %arg17[%c1_215, %c1536_216, %c0_217] : memref<2x2048x32xbf16, #tpu.memory_space<vmem>>, vector<1x512x32xbf16>
    %312 = vector.shape_cast %311 : vector<1x512x32xbf16> to vector<512x32xbf16>
    %cst_218 = arith.constant dense<0.000000e+00> : vector<8x32xf32>
    %313 = tpu.matmul %310, %312, %cst_218 {dimension_numbers = #tpu.dot_dimension_numbers<[1], [0], [0], [1], [0, 0, 1, 1], [], []>} : vector<8x512xbf16>, vector<512x32xbf16>, vector<8x32xf32> -> vector<8x32xf32>
    %314 = arith.addf %300, %313 : vector<8x32xf32>
    %315 = arith.addf %256, %314 : vector<8x32xf32>
    %c1_219 = arith.constant 1 : index
    %c0_220 = arith.constant 0 : index
    %c0_221 = arith.constant 0 : index
    %316 = vector.load %arg18[%c1_219, %c0_220, %c0_221] : memref<2x1x32xf32, #tpu.memory_space<vmem>>, vector<1x1x32xf32>
    %317 = vector.shape_cast %316 : vector<1x1x32xf32> to vector<1x32xf32>
    %318 = vector.broadcast %317 : vector<1x32xf32> to vector<8x32xf32>
    %319 = arith.addf %315, %318 : vector<8x32xf32>
    %c1_222 = arith.constant 1 : index
    %c0_223 = arith.constant 0 : index
    %c0_224 = arith.constant 0 : index
    %320 = vector.load %arg19[%c1_222, %c0_223, %c0_224] : memref<2x1x32xf32, #tpu.memory_space<vmem>>, vector<1x1x32xf32>
    %321 = vector.shape_cast %320 : vector<1x1x32xf32> to vector<1x32xf32>
    %c1_225 = arith.constant 1 : index
    %c0_226 = arith.constant 0 : index
    %c0_227 = arith.constant 0 : index
    %322 = vector.load %arg20[%c1_225, %c0_226, %c0_227] : memref<2x1x32xf32, #tpu.memory_space<vmem>>, vector<1x1x32xf32>
    %323 = vector.shape_cast %322 : vector<1x1x32xf32> to vector<1x32xf32>
    %cst_228 = arith.constant dense<0.000000e+00> : vector<8xf32>
    %324 = vector.multi_reduction <add>, %319, %cst_228 [1] : vector<8x32xf32> to vector<8xf32>
    %325 = vector.shape_cast %324 : vector<8xf32> to vector<8x1xf32>
    %cst_229 = arith.constant 3.200000e+01 : f32
    %326 = vector.broadcast %cst_229 : f32 to vector<8x1xf32>
    %327 = arith.divf %325, %326 : vector<8x1xf32>
    %328 = vector.broadcast %327 : vector<8x1xf32> to vector<8x32xf32>
    %329 = arith.subf %319, %328 : vector<8x32xf32>
    %330 = arith.mulf %329, %329 : vector<8x32xf32>
    %cst_230 = arith.constant dense<0.000000e+00> : vector<8xf32>
    %331 = vector.multi_reduction <add>, %330, %cst_230 [1] : vector<8x32xf32> to vector<8xf32>
    %332 = vector.shape_cast %331 : vector<8xf32> to vector<8x1xf32>
    %cst_231 = arith.constant 3.200000e+01 : f32
    %333 = vector.broadcast %cst_231 : f32 to vector<8x1xf32>
    %334 = arith.divf %332, %333 : vector<8x1xf32>
    %335 = vector.broadcast %327 : vector<8x1xf32> to vector<8x32xf32>
    %336 = arith.subf %319, %335 : vector<8x32xf32>
    %cst_232 = arith.constant 9.99999974E-6 : f32
    %337 = vector.broadcast %cst_232 : f32 to vector<8x1xf32>
    %338 = arith.addf %334, %337 : vector<8x1xf32>
    %339 = math.rsqrt %338 : vector<8x1xf32>
    %340 = vector.broadcast %339 : vector<8x1xf32> to vector<8x32xf32>
    %341 = arith.mulf %336, %340 : vector<8x32xf32>
    %342 = vector.broadcast %321 : vector<1x32xf32> to vector<8x32xf32>
    %343 = arith.mulf %341, %342 : vector<8x32xf32>
    %344 = vector.broadcast %323 : vector<1x32xf32> to vector<8x32xf32>
    %345 = arith.addf %343, %344 : vector<8x32xf32>
    %c0_233 = arith.constant 0 : index
    %c0_234 = arith.constant 0 : index
    %346 = vector.load %arg21[%c0_233, %c0_234] : memref<1x32xf32, #tpu.memory_space<vmem>>, vector<1x32xf32>
    %c0_235 = arith.constant 0 : index
    %c0_236 = arith.constant 0 : index
    %347 = vector.load %arg22[%c0_235, %c0_236] : memref<1x32xf32, #tpu.memory_space<vmem>>, vector<1x32xf32>
    %cst_237 = arith.constant dense<0.000000e+00> : vector<8xf32>
    %348 = vector.multi_reduction <add>, %345, %cst_237 [1] : vector<8x32xf32> to vector<8xf32>
    %349 = vector.shape_cast %348 : vector<8xf32> to vector<8x1xf32>
    %cst_238 = arith.constant 3.200000e+01 : f32
    %350 = vector.broadcast %cst_238 : f32 to vector<8x1xf32>
    %351 = arith.divf %349, %350 : vector<8x1xf32>
    %352 = vector.broadcast %351 : vector<8x1xf32> to vector<8x32xf32>
    %353 = arith.subf %345, %352 : vector<8x32xf32>
    %354 = arith.mulf %353, %353 : vector<8x32xf32>
    %cst_239 = arith.constant dense<0.000000e+00> : vector<8xf32>
    %355 = vector.multi_reduction <add>, %354, %cst_239 [1] : vector<8x32xf32> to vector<8xf32>
    %356 = vector.shape_cast %355 : vector<8xf32> to vector<8x1xf32>
    %cst_240 = arith.constant 3.200000e+01 : f32
    %357 = vector.broadcast %cst_240 : f32 to vector<8x1xf32>
    %358 = arith.divf %356, %357 : vector<8x1xf32>
    %359 = vector.broadcast %351 : vector<8x1xf32> to vector<8x32xf32>
    %360 = arith.subf %345, %359 : vector<8x32xf32>
    %cst_241 = arith.constant 9.99999974E-6 : f32
    %361 = vector.broadcast %cst_241 : f32 to vector<8x1xf32>
    %362 = arith.addf %358, %361 : vector<8x1xf32>
    %363 = math.rsqrt %362 : vector<8x1xf32>
    %364 = vector.broadcast %363 : vector<8x1xf32> to vector<8x32xf32>
    %365 = arith.mulf %360, %364 : vector<8x32xf32>
    %366 = vector.broadcast %346 : vector<1x32xf32> to vector<8x32xf32>
    %367 = arith.mulf %365, %366 : vector<8x32xf32>
    %368 = vector.broadcast %347 : vector<1x32xf32> to vector<8x32xf32>
    %369 = arith.addf %367, %368 : vector<8x32xf32>
    %c0_242 = arith.constant 0 : index
    %c0_243 = arith.constant 0 : index
    %c0_244 = arith.constant 0 : index
    %370 = vector.load %arg2[%c0_242, %c0_243, %c0_244] : memref<1x8x32xf32, #tpu.memory_space<vmem>>, vector<1x8x32xf32>
    %371 = vector.shape_cast %370 : vector<1x8x32xf32> to vector<8x32xf32>
    %c0_245 = arith.constant 0 : index
    %c0_246 = arith.constant 0 : index
    %c0_247 = arith.constant 0 : index
    %c0_248 = arith.constant 0 : index
    %372 = vector.load %arg23[%c0_245, %c0_246, %c0_247, %c0_248] : memref<2x4x32x8xbf16, #tpu.memory_space<vmem>>, vector<1x4x32x8xbf16>
    %373 = vector.shape_cast %372 : vector<1x4x32x8xbf16> to vector<4x32x8xbf16>
    %c0_249 = arith.constant 0 : index
    %c0_250 = arith.constant 0 : index
    %c0_251 = arith.constant 0 : index
    %c0_252 = arith.constant 0 : index
    %374 = vector.load %arg26[%c0_249, %c0_250, %c0_251, %c0_252] : memref<2x4x1x8xf32, #tpu.memory_space<vmem>>, vector<1x4x1x8xf32>
    %375 = vector.shape_cast %374 : vector<1x4x1x8xf32> to vector<4x1x8xf32>
    %c0_253 = arith.constant 0 : index
    %c0_254 = arith.constant 0 : index
    %c0_255 = arith.constant 0 : index
    %c0_256 = arith.constant 0 : index
    %376 = vector.load %arg24[%c0_253, %c0_254, %c0_255, %c0_256] : memref<2x4x32x8xbf16, #tpu.memory_space<vmem>>, vector<1x4x32x8xbf16>
    %377 = vector.shape_cast %376 : vector<1x4x32x8xbf16> to vector<4x32x8xbf16>
    %c0_257 = arith.constant 0 : index
    %c0_258 = arith.constant 0 : index
    %c0_259 = arith.constant 0 : index
    %c0_260 = arith.constant 0 : index
    %378 = vector.load %arg27[%c0_257, %c0_258, %c0_259, %c0_260] : memref<2x4x1x8xf32, #tpu.memory_space<vmem>>, vector<1x4x1x8xf32>
    %379 = vector.shape_cast %378 : vector<1x4x1x8xf32> to vector<4x1x8xf32>
    %c0_261 = arith.constant 0 : index
    %c0_262 = arith.constant 0 : index
    %c0_263 = arith.constant 0 : index
    %c0_264 = arith.constant 0 : index
    %380 = vector.load %arg25[%c0_261, %c0_262, %c0_263, %c0_264] : memref<2x4x32x8xbf16, #tpu.memory_space<vmem>>, vector<1x4x32x8xbf16>
    %381 = vector.shape_cast %380 : vector<1x4x32x8xbf16> to vector<4x32x8xbf16>
    %c0_265 = arith.constant 0 : index
    %c0_266 = arith.constant 0 : index
    %c0_267 = arith.constant 0 : index
    %c0_268 = arith.constant 0 : index
    %382 = vector.load %arg28[%c0_265, %c0_266, %c0_267, %c0_268] : memref<2x4x1x8xf32, #tpu.memory_space<vmem>>, vector<1x4x1x8xf32>
    %383 = vector.shape_cast %382 : vector<1x4x1x8xf32> to vector<4x1x8xf32>
    %c0_269 = arith.constant 0 : index
    %c0_270 = arith.constant 0 : index
    %c0_271 = arith.constant 0 : index
    %c0_272 = arith.constant 0 : index
    %384 = vector.load %arg29[%c0_269, %c0_270, %c0_271, %c0_272] : memref<2x4x8x32xbf16, #tpu.memory_space<vmem>>, vector<1x4x8x32xbf16>
    %385 = vector.shape_cast %384 : vector<1x4x8x32xbf16> to vector<4x8x32xbf16>
    %c0_273 = arith.constant 0 : index
    %c0_274 = arith.constant 0 : index
    %c0_275 = arith.constant 0 : index
    %386 = vector.load %arg30[%c0_273, %c0_274, %c0_275] : memref<2x1x32xf32, #tpu.memory_space<vmem>>, vector<1x1x32xf32>
    %387 = vector.shape_cast %386 : vector<1x1x32xf32> to vector<1x32xf32>
    %388 = arith.truncf %371 : vector<8x32xf32> to vector<8x32xbf16>
    %389 = vector.shape_cast %388 : vector<8x32xbf16> to vector<1x8x32xbf16>
    %390 = vector.shape_cast %389 : vector<1x8x32xbf16> to vector<1x8x32xbf16>
    %391 = vector.broadcast %390 : vector<1x8x32xbf16> to vector<4x8x32xbf16>
    %cst_276 = arith.constant dense<0.000000e+00> : vector<4x8x8xf32>
    %392 = tpu.matmul %391, %373, %cst_276 {dimension_numbers = #tpu.dot_dimension_numbers<[2], [1], [1], [2], [0, 0, 0, 1, 1, 2], [0], [0]>} : vector<4x8x32xbf16>, vector<4x32x8xbf16>, vector<4x8x8xf32> -> vector<4x8x8xf32>
    %393 = vector.broadcast %375 : vector<4x1x8xf32> to vector<4x8x8xf32>
    %394 = arith.addf %392, %393 : vector<4x8x8xf32>
    %cst_277 = arith.constant dense<0.000000e+00> : vector<4x8x8xf32>
    %395 = tpu.matmul %391, %377, %cst_277 {dimension_numbers = #tpu.dot_dimension_numbers<[2], [1], [1], [2], [0, 0, 0, 1, 1, 2], [0], [0]>} : vector<4x8x32xbf16>, vector<4x32x8xbf16>, vector<4x8x8xf32> -> vector<4x8x8xf32>
    %396 = vector.broadcast %379 : vector<4x1x8xf32> to vector<4x8x8xf32>
    %397 = arith.addf %395, %396 : vector<4x8x8xf32>
    %cst_278 = arith.constant dense<0.000000e+00> : vector<4x8x8xf32>
    %398 = tpu.matmul %391, %381, %cst_278 {dimension_numbers = #tpu.dot_dimension_numbers<[2], [1], [1], [2], [0, 0, 0, 1, 1, 2], [0], [0]>} : vector<4x8x32xbf16>, vector<4x32x8xbf16>, vector<4x8x8xf32> -> vector<4x8x8xf32>
    %399 = vector.broadcast %383 : vector<4x1x8xf32> to vector<4x8x8xf32>
    %400 = arith.addf %398, %399 : vector<4x8x8xf32>
    %401 = arith.truncf %394 : vector<4x8x8xf32> to vector<4x8x8xbf16>
    %402 = arith.truncf %397 : vector<4x8x8xf32> to vector<4x8x8xbf16>
    %cst_279 = arith.constant dense<0.000000e+00> : vector<4x8x8xf32>
    %403 = tpu.matmul %401, %402, %cst_279 {dimension_numbers = #tpu.dot_dimension_numbers<[2], [2], [1], [1], [0, 0, 0, 1, 1, 1], [0], [0]>} : vector<4x8x8xbf16>, vector<4x8x8xbf16>, vector<4x8x8xf32> -> vector<4x8x8xf32>
    %cst_280 = arith.constant 0.353553385 : f32
    %404 = vector.broadcast %cst_280 : f32 to vector<4x8x8xf32>
    %405 = arith.mulf %403, %404 : vector<4x8x8xf32>
    %406 = vector.shape_cast %3 : vector<8x8xf32> to vector<1x8x8xf32>
    %407 = vector.broadcast %406 : vector<1x8x8xf32> to vector<4x8x8xf32>
    %408 = arith.addf %405, %407 : vector<4x8x8xf32>
    %cst_281 = arith.constant dense<0xFF800000> : vector<4x8xf32>
    %409 = vector.multi_reduction <maximumf>, %408, %cst_281 [2] : vector<4x8x8xf32> to vector<4x8xf32>
    %410 = vector.shape_cast %409 : vector<4x8xf32> to vector<4x8x1xf32>
    %411 = vector.broadcast %410 : vector<4x8x1xf32> to vector<4x8x8xf32>
    %412 = arith.subf %408, %411 : vector<4x8x8xf32>
    %413 = math.exp %412 : vector<4x8x8xf32>
    %cst_282 = arith.constant dense<0.000000e+00> : vector<4x8xf32>
    %414 = vector.multi_reduction <add>, %413, %cst_282 [2] : vector<4x8x8xf32> to vector<4x8xf32>
    %415 = vector.shape_cast %414 : vector<4x8xf32> to vector<4x8x1xf32>
    %416 = vector.broadcast %415 : vector<4x8x1xf32> to vector<4x8x8xf32>
    %417 = arith.divf %413, %416 : vector<4x8x8xf32>
    %418 = arith.truncf %417 : vector<4x8x8xf32> to vector<4x8x8xbf16>
    %419 = arith.truncf %400 : vector<4x8x8xf32> to vector<4x8x8xbf16>
    %cst_283 = arith.constant dense<0.000000e+00> : vector<4x8x8xf32>
    %420 = tpu.matmul %418, %419, %cst_283 {dimension_numbers = #tpu.dot_dimension_numbers<[2], [1], [1], [2], [0, 0, 0, 1, 1, 2], [0], [0]>} : vector<4x8x8xbf16>, vector<4x8x8xbf16>, vector<4x8x8xf32> -> vector<4x8x8xf32>
    %421 = arith.truncf %420 : vector<4x8x8xf32> to vector<4x8x8xbf16>
    %cst_284 = arith.constant dense<0.000000e+00> : vector<4x8x32xf32>
    %422 = tpu.matmul %421, %385, %cst_284 {dimension_numbers = #tpu.dot_dimension_numbers<[2], [1], [1], [2], [0, 0, 0, 1, 1, 2], [0], [0]>} : vector<4x8x8xbf16>, vector<4x8x32xbf16>, vector<4x8x32xf32> -> vector<4x8x32xf32>
    %cst_285 = arith.constant dense<0.000000e+00> : vector<8x32xf32>
    %423 = vector.multi_reduction <add>, %422, %cst_285 [0] : vector<4x8x32xf32> to vector<8x32xf32>
    %424 = vector.broadcast %387 : vector<1x32xf32> to vector<8x32xf32>
    %425 = arith.addf %423, %424 : vector<8x32xf32>
    %426 = arith.addf %371, %425 : vector<8x32xf32>
    %c0_286 = arith.constant 0 : index
    %c0_287 = arith.constant 0 : index
    %c0_288 = arith.constant 0 : index
    %427 = vector.load %arg31[%c0_286, %c0_287, %c0_288] : memref<2x1x32xf32, #tpu.memory_space<vmem>>, vector<1x1x32xf32>
    %428 = vector.shape_cast %427 : vector<1x1x32xf32> to vector<1x32xf32>
    %c0_289 = arith.constant 0 : index
    %c0_290 = arith.constant 0 : index
    %c0_291 = arith.constant 0 : index
    %429 = vector.load %arg32[%c0_289, %c0_290, %c0_291] : memref<2x1x32xf32, #tpu.memory_space<vmem>>, vector<1x1x32xf32>
    %430 = vector.shape_cast %429 : vector<1x1x32xf32> to vector<1x32xf32>
    %cst_292 = arith.constant dense<0.000000e+00> : vector<8xf32>
    %431 = vector.multi_reduction <add>, %426, %cst_292 [1] : vector<8x32xf32> to vector<8xf32>
    %432 = vector.shape_cast %431 : vector<8xf32> to vector<8x1xf32>
    %cst_293 = arith.constant 3.200000e+01 : f32
    %433 = vector.broadcast %cst_293 : f32 to vector<8x1xf32>
    %434 = arith.divf %432, %433 : vector<8x1xf32>
    %435 = vector.broadcast %434 : vector<8x1xf32> to vector<8x32xf32>
    %436 = arith.subf %426, %435 : vector<8x32xf32>
    %437 = arith.mulf %436, %436 : vector<8x32xf32>
    %cst_294 = arith.constant dense<0.000000e+00> : vector<8xf32>
    %438 = vector.multi_reduction <add>, %437, %cst_294 [1] : vector<8x32xf32> to vector<8xf32>
    %439 = vector.shape_cast %438 : vector<8xf32> to vector<8x1xf32>
    %cst_295 = arith.constant 3.200000e+01 : f32
    %440 = vector.broadcast %cst_295 : f32 to vector<8x1xf32>
    %441 = arith.divf %439, %440 : vector<8x1xf32>
    %442 = vector.broadcast %434 : vector<8x1xf32> to vector<8x32xf32>
    %443 = arith.subf %426, %442 : vector<8x32xf32>
    %cst_296 = arith.constant 9.99999974E-6 : f32
    %444 = vector.broadcast %cst_296 : f32 to vector<8x1xf32>
    %445 = arith.addf %441, %444 : vector<8x1xf32>
    %446 = math.rsqrt %445 : vector<8x1xf32>
    %447 = vector.broadcast %446 : vector<8x1xf32> to vector<8x32xf32>
    %448 = arith.mulf %443, %447 : vector<8x32xf32>
    %449 = vector.broadcast %428 : vector<1x32xf32> to vector<8x32xf32>
    %450 = arith.mulf %448, %449 : vector<8x32xf32>
    %451 = vector.broadcast %430 : vector<1x32xf32> to vector<8x32xf32>
    %452 = arith.addf %450, %451 : vector<8x32xf32>
    %c0_297 = arith.constant 0 : index
    %c0_298 = arith.constant 0 : index
    %c0_299 = arith.constant 0 : index
    %c0_300 = arith.constant 0 : index
    %453 = vector.load %arg33[%c0_297, %c0_298, %c0_299, %c0_300] : memref<2x4x32x8xbf16, #tpu.memory_space<vmem>>, vector<1x4x32x8xbf16>
    %454 = vector.shape_cast %453 : vector<1x4x32x8xbf16> to vector<4x32x8xbf16>
    %c0_301 = arith.constant 0 : index
    %c0_302 = arith.constant 0 : index
    %c0_303 = arith.constant 0 : index
    %c0_304 = arith.constant 0 : index
    %455 = vector.load %arg36[%c0_301, %c0_302, %c0_303, %c0_304] : memref<2x4x1x8xf32, #tpu.memory_space<vmem>>, vector<1x4x1x8xf32>
    %456 = vector.shape_cast %455 : vector<1x4x1x8xf32> to vector<4x1x8xf32>
    %c0_305 = arith.constant 0 : index
    %c0_306 = arith.constant 0 : index
    %c0_307 = arith.constant 0 : index
    %c0_308 = arith.constant 0 : index
    %457 = vector.load %arg34[%c0_305, %c0_306, %c0_307, %c0_308] : memref<2x4x32x8xbf16, #tpu.memory_space<vmem>>, vector<1x4x32x8xbf16>
    %458 = vector.shape_cast %457 : vector<1x4x32x8xbf16> to vector<4x32x8xbf16>
    %c0_309 = arith.constant 0 : index
    %c0_310 = arith.constant 0 : index
    %c0_311 = arith.constant 0 : index
    %c0_312 = arith.constant 0 : index
    %459 = vector.load %arg37[%c0_309, %c0_310, %c0_311, %c0_312] : memref<2x4x1x8xf32, #tpu.memory_space<vmem>>, vector<1x4x1x8xf32>
    %460 = vector.shape_cast %459 : vector<1x4x1x8xf32> to vector<4x1x8xf32>
    %c0_313 = arith.constant 0 : index
    %c0_314 = arith.constant 0 : index
    %c0_315 = arith.constant 0 : index
    %c0_316 = arith.constant 0 : index
    %461 = vector.load %arg35[%c0_313, %c0_314, %c0_315, %c0_316] : memref<2x4x32x8xbf16, #tpu.memory_space<vmem>>, vector<1x4x32x8xbf16>
    %462 = vector.shape_cast %461 : vector<1x4x32x8xbf16> to vector<4x32x8xbf16>
    %c0_317 = arith.constant 0 : index
    %c0_318 = arith.constant 0 : index
    %c0_319 = arith.constant 0 : index
    %c0_320 = arith.constant 0 : index
    %463 = vector.load %arg38[%c0_317, %c0_318, %c0_319, %c0_320] : memref<2x4x1x8xf32, #tpu.memory_space<vmem>>, vector<1x4x1x8xf32>
    %464 = vector.shape_cast %463 : vector<1x4x1x8xf32> to vector<4x1x8xf32>
    %c0_321 = arith.constant 0 : index
    %c0_322 = arith.constant 0 : index
    %c0_323 = arith.constant 0 : index
    %c0_324 = arith.constant 0 : index
    %465 = vector.load %arg39[%c0_321, %c0_322, %c0_323, %c0_324] : memref<2x4x8x32xbf16, #tpu.memory_space<vmem>>, vector<1x4x8x32xbf16>
    %466 = vector.shape_cast %465 : vector<1x4x8x32xbf16> to vector<4x8x32xbf16>
    %c0_325 = arith.constant 0 : index
    %c0_326 = arith.constant 0 : index
    %c0_327 = arith.constant 0 : index
    %467 = vector.load %arg40[%c0_325, %c0_326, %c0_327] : memref<2x1x32xf32, #tpu.memory_space<vmem>>, vector<1x1x32xf32>
    %468 = vector.shape_cast %467 : vector<1x1x32xf32> to vector<1x32xf32>
    %469 = arith.truncf %452 : vector<8x32xf32> to vector<8x32xbf16>
    %470 = vector.shape_cast %469 : vector<8x32xbf16> to vector<1x8x32xbf16>
    %471 = vector.shape_cast %470 : vector<1x8x32xbf16> to vector<1x8x32xbf16>
    %472 = vector.broadcast %471 : vector<1x8x32xbf16> to vector<4x8x32xbf16>
    %473 = arith.truncf %369 : vector<8x32xf32> to vector<8x32xbf16>
    %474 = vector.shape_cast %473 : vector<8x32xbf16> to vector<1x8x32xbf16>
    %475 = vector.shape_cast %474 : vector<1x8x32xbf16> to vector<1x8x32xbf16>
    %476 = vector.broadcast %475 : vector<1x8x32xbf16> to vector<4x8x32xbf16>
    %cst_328 = arith.constant dense<0.000000e+00> : vector<4x8x8xf32>
    %477 = tpu.matmul %472, %454, %cst_328 {dimension_numbers = #tpu.dot_dimension_numbers<[2], [1], [1], [2], [0, 0, 0, 1, 1, 2], [0], [0]>} : vector<4x8x32xbf16>, vector<4x32x8xbf16>, vector<4x8x8xf32> -> vector<4x8x8xf32>
    %478 = vector.broadcast %456 : vector<4x1x8xf32> to vector<4x8x8xf32>
    %479 = arith.addf %477, %478 : vector<4x8x8xf32>
    %cst_329 = arith.constant dense<0.000000e+00> : vector<4x8x8xf32>
    %480 = tpu.matmul %476, %458, %cst_329 {dimension_numbers = #tpu.dot_dimension_numbers<[2], [1], [1], [2], [0, 0, 0, 1, 1, 2], [0], [0]>} : vector<4x8x32xbf16>, vector<4x32x8xbf16>, vector<4x8x8xf32> -> vector<4x8x8xf32>
    %481 = vector.broadcast %460 : vector<4x1x8xf32> to vector<4x8x8xf32>
    %482 = arith.addf %480, %481 : vector<4x8x8xf32>
    %cst_330 = arith.constant dense<0.000000e+00> : vector<4x8x8xf32>
    %483 = tpu.matmul %476, %462, %cst_330 {dimension_numbers = #tpu.dot_dimension_numbers<[2], [1], [1], [2], [0, 0, 0, 1, 1, 2], [0], [0]>} : vector<4x8x32xbf16>, vector<4x32x8xbf16>, vector<4x8x8xf32> -> vector<4x8x8xf32>
    %484 = vector.broadcast %464 : vector<4x1x8xf32> to vector<4x8x8xf32>
    %485 = arith.addf %483, %484 : vector<4x8x8xf32>
    %486 = arith.truncf %479 : vector<4x8x8xf32> to vector<4x8x8xbf16>
    %487 = arith.truncf %482 : vector<4x8x8xf32> to vector<4x8x8xbf16>
    %cst_331 = arith.constant dense<0.000000e+00> : vector<4x8x8xf32>
    %488 = tpu.matmul %486, %487, %cst_331 {dimension_numbers = #tpu.dot_dimension_numbers<[2], [2], [1], [1], [0, 0, 0, 1, 1, 1], [0], [0]>} : vector<4x8x8xbf16>, vector<4x8x8xbf16>, vector<4x8x8xf32> -> vector<4x8x8xf32>
    %cst_332 = arith.constant 0.353553385 : f32
    %489 = vector.broadcast %cst_332 : f32 to vector<4x8x8xf32>
    %490 = arith.mulf %488, %489 : vector<4x8x8xf32>
    %cst_333 = arith.constant dense<0xFF800000> : vector<4x8xf32>
    %491 = vector.multi_reduction <maximumf>, %490, %cst_333 [2] : vector<4x8x8xf32> to vector<4x8xf32>
    %492 = vector.shape_cast %491 : vector<4x8xf32> to vector<4x8x1xf32>
    %493 = vector.broadcast %492 : vector<4x8x1xf32> to vector<4x8x8xf32>
    %494 = arith.subf %490, %493 : vector<4x8x8xf32>
    %495 = math.exp %494 : vector<4x8x8xf32>
    %cst_334 = arith.constant dense<0.000000e+00> : vector<4x8xf32>
    %496 = vector.multi_reduction <add>, %495, %cst_334 [2] : vector<4x8x8xf32> to vector<4x8xf32>
    %497 = vector.shape_cast %496 : vector<4x8xf32> to vector<4x8x1xf32>
    %498 = vector.broadcast %497 : vector<4x8x1xf32> to vector<4x8x8xf32>
    %499 = arith.divf %495, %498 : vector<4x8x8xf32>
    %500 = arith.truncf %499 : vector<4x8x8xf32> to vector<4x8x8xbf16>
    %501 = arith.truncf %485 : vector<4x8x8xf32> to vector<4x8x8xbf16>
    %cst_335 = arith.constant dense<0.000000e+00> : vector<4x8x8xf32>
    %502 = tpu.matmul %500, %501, %cst_335 {dimension_numbers = #tpu.dot_dimension_numbers<[2], [1], [1], [2], [0, 0, 0, 1, 1, 2], [0], [0]>} : vector<4x8x8xbf16>, vector<4x8x8xbf16>, vector<4x8x8xf32> -> vector<4x8x8xf32>
    %503 = arith.truncf %502 : vector<4x8x8xf32> to vector<4x8x8xbf16>
    %cst_336 = arith.constant dense<0.000000e+00> : vector<4x8x32xf32>
    %504 = tpu.matmul %503, %466, %cst_336 {dimension_numbers = #tpu.dot_dimension_numbers<[2], [1], [1], [2], [0, 0, 0, 1, 1, 2], [0], [0]>} : vector<4x8x8xbf16>, vector<4x8x32xbf16>, vector<4x8x32xf32> -> vector<4x8x32xf32>
    %cst_337 = arith.constant dense<0.000000e+00> : vector<8x32xf32>
    %505 = vector.multi_reduction <add>, %504, %cst_337 [0] : vector<4x8x32xf32> to vector<8x32xf32>
    %506 = vector.broadcast %468 : vector<1x32xf32> to vector<8x32xf32>
    %507 = arith.addf %505, %506 : vector<8x32xf32>
    %508 = arith.addf %452, %507 : vector<8x32xf32>
    %c0_338 = arith.constant 0 : index
    %c0_339 = arith.constant 0 : index
    %c0_340 = arith.constant 0 : index
    %509 = vector.load %arg41[%c0_338, %c0_339, %c0_340] : memref<2x1x32xf32, #tpu.memory_space<vmem>>, vector<1x1x32xf32>
    %510 = vector.shape_cast %509 : vector<1x1x32xf32> to vector<1x32xf32>
    %c0_341 = arith.constant 0 : index
    %c0_342 = arith.constant 0 : index
    %c0_343 = arith.constant 0 : index
    %511 = vector.load %arg42[%c0_341, %c0_342, %c0_343] : memref<2x1x32xf32, #tpu.memory_space<vmem>>, vector<1x1x32xf32>
    %512 = vector.shape_cast %511 : vector<1x1x32xf32> to vector<1x32xf32>
    %cst_344 = arith.constant dense<0.000000e+00> : vector<8xf32>
    %513 = vector.multi_reduction <add>, %508, %cst_344 [1] : vector<8x32xf32> to vector<8xf32>
    %514 = vector.shape_cast %513 : vector<8xf32> to vector<8x1xf32>
    %cst_345 = arith.constant 3.200000e+01 : f32
    %515 = vector.broadcast %cst_345 : f32 to vector<8x1xf32>
    %516 = arith.divf %514, %515 : vector<8x1xf32>
    %517 = vector.broadcast %516 : vector<8x1xf32> to vector<8x32xf32>
    %518 = arith.subf %508, %517 : vector<8x32xf32>
    %519 = arith.mulf %518, %518 : vector<8x32xf32>
    %cst_346 = arith.constant dense<0.000000e+00> : vector<8xf32>
    %520 = vector.multi_reduction <add>, %519, %cst_346 [1] : vector<8x32xf32> to vector<8xf32>
    %521 = vector.shape_cast %520 : vector<8xf32> to vector<8x1xf32>
    %cst_347 = arith.constant 3.200000e+01 : f32
    %522 = vector.broadcast %cst_347 : f32 to vector<8x1xf32>
    %523 = arith.divf %521, %522 : vector<8x1xf32>
    %524 = vector.broadcast %516 : vector<8x1xf32> to vector<8x32xf32>
    %525 = arith.subf %508, %524 : vector<8x32xf32>
    %cst_348 = arith.constant 9.99999974E-6 : f32
    %526 = vector.broadcast %cst_348 : f32 to vector<8x1xf32>
    %527 = arith.addf %523, %526 : vector<8x1xf32>
    %528 = math.rsqrt %527 : vector<8x1xf32>
    %529 = vector.broadcast %528 : vector<8x1xf32> to vector<8x32xf32>
    %530 = arith.mulf %525, %529 : vector<8x32xf32>
    %531 = vector.broadcast %510 : vector<1x32xf32> to vector<8x32xf32>
    %532 = arith.mulf %530, %531 : vector<8x32xf32>
    %533 = vector.broadcast %512 : vector<1x32xf32> to vector<8x32xf32>
    %534 = arith.addf %532, %533 : vector<8x32xf32>
    %535 = arith.truncf %534 : vector<8x32xf32> to vector<8x32xbf16>
    %cst_349 = arith.constant 0.000000e+00 : f32
    %536 = vector.broadcast %cst_349 : f32 to vector<8x32xf32>
    %c0_350 = arith.constant 0 : index
    %c0_351 = arith.constant 0 : index
    %c0_352 = arith.constant 0 : index
    %537 = vector.load %arg43[%c0_350, %c0_351, %c0_352] : memref<2x32x2048xbf16, #tpu.memory_space<vmem>>, vector<1x32x512xbf16>
    %538 = vector.shape_cast %537 : vector<1x32x512xbf16> to vector<32x512xbf16>
    %cst_353 = arith.constant dense<0.000000e+00> : vector<8x512xf32>
    %539 = tpu.matmul %535, %538, %cst_353 {dimension_numbers = #tpu.dot_dimension_numbers<[1], [0], [0], [1], [0, 0, 1, 1], [], []>} : vector<8x32xbf16>, vector<32x512xbf16>, vector<8x512xf32> -> vector<8x512xf32>
    %c0_354 = arith.constant 0 : index
    %c0_355 = arith.constant 0 : index
    %c0_356 = arith.constant 0 : index
    %540 = vector.load %arg44[%c0_354, %c0_355, %c0_356] : memref<2x1x2048xf32, #tpu.memory_space<vmem>>, vector<1x1x512xf32>
    %541 = vector.shape_cast %540 : vector<1x1x512xf32> to vector<1x512xf32>
    %542 = vector.broadcast %541 : vector<1x512xf32> to vector<8x512xf32>
    %543 = arith.addf %539, %542 : vector<8x512xf32>
    %cst_357 = arith.constant 0.000000e+00 : f32
    %544 = vector.broadcast %cst_357 : f32 to vector<8x512xf32>
    %545 = arith.maximumf %543, %544 : vector<8x512xf32>
    %546 = arith.truncf %545 : vector<8x512xf32> to vector<8x512xbf16>
    %c0_358 = arith.constant 0 : index
    %c0_359 = arith.constant 0 : index
    %c0_360 = arith.constant 0 : index
    %547 = vector.load %arg45[%c0_358, %c0_359, %c0_360] : memref<2x2048x32xbf16, #tpu.memory_space<vmem>>, vector<1x512x32xbf16>
    %548 = vector.shape_cast %547 : vector<1x512x32xbf16> to vector<512x32xbf16>
    %cst_361 = arith.constant dense<0.000000e+00> : vector<8x32xf32>
    %549 = tpu.matmul %546, %548, %cst_361 {dimension_numbers = #tpu.dot_dimension_numbers<[1], [0], [0], [1], [0, 0, 1, 1], [], []>} : vector<8x512xbf16>, vector<512x32xbf16>, vector<8x32xf32> -> vector<8x32xf32>
    %550 = arith.addf %536, %549 : vector<8x32xf32>
    %c0_362 = arith.constant 0 : index
    %c0_363 = arith.constant 0 : index
    %c512_364 = arith.constant 512 : index
    %551 = vector.load %arg43[%c0_362, %c0_363, %c512_364] : memref<2x32x2048xbf16, #tpu.memory_space<vmem>>, vector<1x32x512xbf16>
    %552 = vector.shape_cast %551 : vector<1x32x512xbf16> to vector<32x512xbf16>
    %cst_365 = arith.constant dense<0.000000e+00> : vector<8x512xf32>
    %553 = tpu.matmul %535, %552, %cst_365 {dimension_numbers = #tpu.dot_dimension_numbers<[1], [0], [0], [1], [0, 0, 1, 1], [], []>} : vector<8x32xbf16>, vector<32x512xbf16>, vector<8x512xf32> -> vector<8x512xf32>
    %c0_366 = arith.constant 0 : index
    %c0_367 = arith.constant 0 : index
    %c512_368 = arith.constant 512 : index
    %554 = vector.load %arg44[%c0_366, %c0_367, %c512_368] : memref<2x1x2048xf32, #tpu.memory_space<vmem>>, vector<1x1x512xf32>
    %555 = vector.shape_cast %554 : vector<1x1x512xf32> to vector<1x512xf32>
    %556 = vector.broadcast %555 : vector<1x512xf32> to vector<8x512xf32>
    %557 = arith.addf %553, %556 : vector<8x512xf32>
    %cst_369 = arith.constant 0.000000e+00 : f32
    %558 = vector.broadcast %cst_369 : f32 to vector<8x512xf32>
    %559 = arith.maximumf %557, %558 : vector<8x512xf32>
    %560 = arith.truncf %559 : vector<8x512xf32> to vector<8x512xbf16>
    %c0_370 = arith.constant 0 : index
    %c512_371 = arith.constant 512 : index
    %c0_372 = arith.constant 0 : index
    %561 = vector.load %arg45[%c0_370, %c512_371, %c0_372] : memref<2x2048x32xbf16, #tpu.memory_space<vmem>>, vector<1x512x32xbf16>
    %562 = vector.shape_cast %561 : vector<1x512x32xbf16> to vector<512x32xbf16>
    %cst_373 = arith.constant dense<0.000000e+00> : vector<8x32xf32>
    %563 = tpu.matmul %560, %562, %cst_373 {dimension_numbers = #tpu.dot_dimension_numbers<[1], [0], [0], [1], [0, 0, 1, 1], [], []>} : vector<8x512xbf16>, vector<512x32xbf16>, vector<8x32xf32> -> vector<8x32xf32>
    %564 = arith.addf %550, %563 : vector<8x32xf32>
    %c0_374 = arith.constant 0 : index
    %c0_375 = arith.constant 0 : index
    %c1024_376 = arith.constant 1024 : index
    %565 = vector.load %arg43[%c0_374, %c0_375, %c1024_376] : memref<2x32x2048xbf16, #tpu.memory_space<vmem>>, vector<1x32x512xbf16>
    %566 = vector.shape_cast %565 : vector<1x32x512xbf16> to vector<32x512xbf16>
    %cst_377 = arith.constant dense<0.000000e+00> : vector<8x512xf32>
    %567 = tpu.matmul %535, %566, %cst_377 {dimension_numbers = #tpu.dot_dimension_numbers<[1], [0], [0], [1], [0, 0, 1, 1], [], []>} : vector<8x32xbf16>, vector<32x512xbf16>, vector<8x512xf32> -> vector<8x512xf32>
    %c0_378 = arith.constant 0 : index
    %c0_379 = arith.constant 0 : index
    %c1024_380 = arith.constant 1024 : index
    %568 = vector.load %arg44[%c0_378, %c0_379, %c1024_380] : memref<2x1x2048xf32, #tpu.memory_space<vmem>>, vector<1x1x512xf32>
    %569 = vector.shape_cast %568 : vector<1x1x512xf32> to vector<1x512xf32>
    %570 = vector.broadcast %569 : vector<1x512xf32> to vector<8x512xf32>
    %571 = arith.addf %567, %570 : vector<8x512xf32>
    %cst_381 = arith.constant 0.000000e+00 : f32
    %572 = vector.broadcast %cst_381 : f32 to vector<8x512xf32>
    %573 = arith.maximumf %571, %572 : vector<8x512xf32>
    %574 = arith.truncf %573 : vector<8x512xf32> to vector<8x512xbf16>
    %c0_382 = arith.constant 0 : index
    %c1024_383 = arith.constant 1024 : index
    %c0_384 = arith.constant 0 : index
    %575 = vector.load %arg45[%c0_382, %c1024_383, %c0_384] : memref<2x2048x32xbf16, #tpu.memory_space<vmem>>, vector<1x512x32xbf16>
    %576 = vector.shape_cast %575 : vector<1x512x32xbf16> to vector<512x32xbf16>
    %cst_385 = arith.constant dense<0.000000e+00> : vector<8x32xf32>
    %577 = tpu.matmul %574, %576, %cst_385 {dimension_numbers = #tpu.dot_dimension_numbers<[1], [0], [0], [1], [0, 0, 1, 1], [], []>} : vector<8x512xbf16>, vector<512x32xbf16>, vector<8x32xf32> -> vector<8x32xf32>
    %578 = arith.addf %564, %577 : vector<8x32xf32>
    %c0_386 = arith.constant 0 : index
    %c0_387 = arith.constant 0 : index
    %c1536_388 = arith.constant 1536 : index
    %579 = vector.load %arg43[%c0_386, %c0_387, %c1536_388] : memref<2x32x2048xbf16, #tpu.memory_space<vmem>>, vector<1x32x512xbf16>
    %580 = vector.shape_cast %579 : vector<1x32x512xbf16> to vector<32x512xbf16>
    %cst_389 = arith.constant dense<0.000000e+00> : vector<8x512xf32>
    %581 = tpu.matmul %535, %580, %cst_389 {dimension_numbers = #tpu.dot_dimension_numbers<[1], [0], [0], [1], [0, 0, 1, 1], [], []>} : vector<8x32xbf16>, vector<32x512xbf16>, vector<8x512xf32> -> vector<8x512xf32>
    %c0_390 = arith.constant 0 : index
    %c0_391 = arith.constant 0 : index
    %c1536_392 = arith.constant 1536 : index
    %582 = vector.load %arg44[%c0_390, %c0_391, %c1536_392] : memref<2x1x2048xf32, #tpu.memory_space<vmem>>, vector<1x1x512xf32>
    %583 = vector.shape_cast %582 : vector<1x1x512xf32> to vector<1x512xf32>
    %584 = vector.broadcast %583 : vector<1x512xf32> to vector<8x512xf32>
    %585 = arith.addf %581, %584 : vector<8x512xf32>
    %cst_393 = arith.constant 0.000000e+00 : f32
    %586 = vector.broadcast %cst_393 : f32 to vector<8x512xf32>
    %587 = arith.maximumf %585, %586 : vector<8x512xf32>
    %588 = arith.truncf %587 : vector<8x512xf32> to vector<8x512xbf16>
    %c0_394 = arith.constant 0 : index
    %c1536_395 = arith.constant 1536 : index
    %c0_396 = arith.constant 0 : index
    %589 = vector.load %arg45[%c0_394, %c1536_395, %c0_396] : memref<2x2048x32xbf16, #tpu.memory_space<vmem>>, vector<1x512x32xbf16>
    %590 = vector.shape_cast %589 : vector<1x512x32xbf16> to vector<512x32xbf16>
    %cst_397 = arith.constant dense<0.000000e+00> : vector<8x32xf32>
    %591 = tpu.matmul %588, %590, %cst_397 {dimension_numbers = #tpu.dot_dimension_numbers<[1], [0], [0], [1], [0, 0, 1, 1], [], []>} : vector<8x512xbf16>, vector<512x32xbf16>, vector<8x32xf32> -> vector<8x32xf32>
    %592 = arith.addf %578, %591 : vector<8x32xf32>
    %593 = arith.addf %534, %592 : vector<8x32xf32>
    %c0_398 = arith.constant 0 : index
    %c0_399 = arith.constant 0 : index
    %c0_400 = arith.constant 0 : index
    %594 = vector.load %arg46[%c0_398, %c0_399, %c0_400] : memref<2x1x32xf32, #tpu.memory_space<vmem>>, vector<1x1x32xf32>
    %595 = vector.shape_cast %594 : vector<1x1x32xf32> to vector<1x32xf32>
    %596 = vector.broadcast %595 : vector<1x32xf32> to vector<8x32xf32>
    %597 = arith.addf %593, %596 : vector<8x32xf32>
    %c0_401 = arith.constant 0 : index
    %c0_402 = arith.constant 0 : index
    %c0_403 = arith.constant 0 : index
    %598 = vector.load %arg47[%c0_401, %c0_402, %c0_403] : memref<2x1x32xf32, #tpu.memory_space<vmem>>, vector<1x1x32xf32>
    %599 = vector.shape_cast %598 : vector<1x1x32xf32> to vector<1x32xf32>
    %c0_404 = arith.constant 0 : index
    %c0_405 = arith.constant 0 : index
    %c0_406 = arith.constant 0 : index
    %600 = vector.load %arg48[%c0_404, %c0_405, %c0_406] : memref<2x1x32xf32, #tpu.memory_space<vmem>>, vector<1x1x32xf32>
    %601 = vector.shape_cast %600 : vector<1x1x32xf32> to vector<1x32xf32>
    %cst_407 = arith.constant dense<0.000000e+00> : vector<8xf32>
    %602 = vector.multi_reduction <add>, %597, %cst_407 [1] : vector<8x32xf32> to vector<8xf32>
    %603 = vector.shape_cast %602 : vector<8xf32> to vector<8x1xf32>
    %cst_408 = arith.constant 3.200000e+01 : f32
    %604 = vector.broadcast %cst_408 : f32 to vector<8x1xf32>
    %605 = arith.divf %603, %604 : vector<8x1xf32>
    %606 = vector.broadcast %605 : vector<8x1xf32> to vector<8x32xf32>
    %607 = arith.subf %597, %606 : vector<8x32xf32>
    %608 = arith.mulf %607, %607 : vector<8x32xf32>
    %cst_409 = arith.constant dense<0.000000e+00> : vector<8xf32>
    %609 = vector.multi_reduction <add>, %608, %cst_409 [1] : vector<8x32xf32> to vector<8xf32>
    %610 = vector.shape_cast %609 : vector<8xf32> to vector<8x1xf32>
    %cst_410 = arith.constant 3.200000e+01 : f32
    %611 = vector.broadcast %cst_410 : f32 to vector<8x1xf32>
    %612 = arith.divf %610, %611 : vector<8x1xf32>
    %613 = vector.broadcast %605 : vector<8x1xf32> to vector<8x32xf32>
    %614 = arith.subf %597, %613 : vector<8x32xf32>
    %cst_411 = arith.constant 9.99999974E-6 : f32
    %615 = vector.broadcast %cst_411 : f32 to vector<8x1xf32>
    %616 = arith.addf %612, %615 : vector<8x1xf32>
    %617 = math.rsqrt %616 : vector<8x1xf32>
    %618 = vector.broadcast %617 : vector<8x1xf32> to vector<8x32xf32>
    %619 = arith.mulf %614, %618 : vector<8x32xf32>
    %620 = vector.broadcast %599 : vector<1x32xf32> to vector<8x32xf32>
    %621 = arith.mulf %619, %620 : vector<8x32xf32>
    %622 = vector.broadcast %601 : vector<1x32xf32> to vector<8x32xf32>
    %623 = arith.addf %621, %622 : vector<8x32xf32>
    %c1_412 = arith.constant 1 : index
    %c0_413 = arith.constant 0 : index
    %c0_414 = arith.constant 0 : index
    %c0_415 = arith.constant 0 : index
    %624 = vector.load %arg23[%c1_412, %c0_413, %c0_414, %c0_415] : memref<2x4x32x8xbf16, #tpu.memory_space<vmem>>, vector<1x4x32x8xbf16>
    %625 = vector.shape_cast %624 : vector<1x4x32x8xbf16> to vector<4x32x8xbf16>
    %c1_416 = arith.constant 1 : index
    %c0_417 = arith.constant 0 : index
    %c0_418 = arith.constant 0 : index
    %c0_419 = arith.constant 0 : index
    %626 = vector.load %arg26[%c1_416, %c0_417, %c0_418, %c0_419] : memref<2x4x1x8xf32, #tpu.memory_space<vmem>>, vector<1x4x1x8xf32>
    %627 = vector.shape_cast %626 : vector<1x4x1x8xf32> to vector<4x1x8xf32>
    %c1_420 = arith.constant 1 : index
    %c0_421 = arith.constant 0 : index
    %c0_422 = arith.constant 0 : index
    %c0_423 = arith.constant 0 : index
    %628 = vector.load %arg24[%c1_420, %c0_421, %c0_422, %c0_423] : memref<2x4x32x8xbf16, #tpu.memory_space<vmem>>, vector<1x4x32x8xbf16>
    %629 = vector.shape_cast %628 : vector<1x4x32x8xbf16> to vector<4x32x8xbf16>
    %c1_424 = arith.constant 1 : index
    %c0_425 = arith.constant 0 : index
    %c0_426 = arith.constant 0 : index
    %c0_427 = arith.constant 0 : index
    %630 = vector.load %arg27[%c1_424, %c0_425, %c0_426, %c0_427] : memref<2x4x1x8xf32, #tpu.memory_space<vmem>>, vector<1x4x1x8xf32>
    %631 = vector.shape_cast %630 : vector<1x4x1x8xf32> to vector<4x1x8xf32>
    %c1_428 = arith.constant 1 : index
    %c0_429 = arith.constant 0 : index
    %c0_430 = arith.constant 0 : index
    %c0_431 = arith.constant 0 : index
    %632 = vector.load %arg25[%c1_428, %c0_429, %c0_430, %c0_431] : memref<2x4x32x8xbf16, #tpu.memory_space<vmem>>, vector<1x4x32x8xbf16>
    %633 = vector.shape_cast %632 : vector<1x4x32x8xbf16> to vector<4x32x8xbf16>
    %c1_432 = arith.constant 1 : index
    %c0_433 = arith.constant 0 : index
    %c0_434 = arith.constant 0 : index
    %c0_435 = arith.constant 0 : index
    %634 = vector.load %arg28[%c1_432, %c0_433, %c0_434, %c0_435] : memref<2x4x1x8xf32, #tpu.memory_space<vmem>>, vector<1x4x1x8xf32>
    %635 = vector.shape_cast %634 : vector<1x4x1x8xf32> to vector<4x1x8xf32>
    %c1_436 = arith.constant 1 : index
    %c0_437 = arith.constant 0 : index
    %c0_438 = arith.constant 0 : index
    %c0_439 = arith.constant 0 : index
    %636 = vector.load %arg29[%c1_436, %c0_437, %c0_438, %c0_439] : memref<2x4x8x32xbf16, #tpu.memory_space<vmem>>, vector<1x4x8x32xbf16>
    %637 = vector.shape_cast %636 : vector<1x4x8x32xbf16> to vector<4x8x32xbf16>
    %c1_440 = arith.constant 1 : index
    %c0_441 = arith.constant 0 : index
    %c0_442 = arith.constant 0 : index
    %638 = vector.load %arg30[%c1_440, %c0_441, %c0_442] : memref<2x1x32xf32, #tpu.memory_space<vmem>>, vector<1x1x32xf32>
    %639 = vector.shape_cast %638 : vector<1x1x32xf32> to vector<1x32xf32>
    %640 = arith.truncf %623 : vector<8x32xf32> to vector<8x32xbf16>
    %641 = vector.shape_cast %640 : vector<8x32xbf16> to vector<1x8x32xbf16>
    %642 = vector.shape_cast %641 : vector<1x8x32xbf16> to vector<1x8x32xbf16>
    %643 = vector.broadcast %642 : vector<1x8x32xbf16> to vector<4x8x32xbf16>
    %cst_443 = arith.constant dense<0.000000e+00> : vector<4x8x8xf32>
    %644 = tpu.matmul %643, %625, %cst_443 {dimension_numbers = #tpu.dot_dimension_numbers<[2], [1], [1], [2], [0, 0, 0, 1, 1, 2], [0], [0]>} : vector<4x8x32xbf16>, vector<4x32x8xbf16>, vector<4x8x8xf32> -> vector<4x8x8xf32>
    %645 = vector.broadcast %627 : vector<4x1x8xf32> to vector<4x8x8xf32>
    %646 = arith.addf %644, %645 : vector<4x8x8xf32>
    %cst_444 = arith.constant dense<0.000000e+00> : vector<4x8x8xf32>
    %647 = tpu.matmul %643, %629, %cst_444 {dimension_numbers = #tpu.dot_dimension_numbers<[2], [1], [1], [2], [0, 0, 0, 1, 1, 2], [0], [0]>} : vector<4x8x32xbf16>, vector<4x32x8xbf16>, vector<4x8x8xf32> -> vector<4x8x8xf32>
    %648 = vector.broadcast %631 : vector<4x1x8xf32> to vector<4x8x8xf32>
    %649 = arith.addf %647, %648 : vector<4x8x8xf32>
    %cst_445 = arith.constant dense<0.000000e+00> : vector<4x8x8xf32>
    %650 = tpu.matmul %643, %633, %cst_445 {dimension_numbers = #tpu.dot_dimension_numbers<[2], [1], [1], [2], [0, 0, 0, 1, 1, 2], [0], [0]>} : vector<4x8x32xbf16>, vector<4x32x8xbf16>, vector<4x8x8xf32> -> vector<4x8x8xf32>
    %651 = vector.broadcast %635 : vector<4x1x8xf32> to vector<4x8x8xf32>
    %652 = arith.addf %650, %651 : vector<4x8x8xf32>
    %653 = arith.truncf %646 : vector<4x8x8xf32> to vector<4x8x8xbf16>
    %654 = arith.truncf %649 : vector<4x8x8xf32> to vector<4x8x8xbf16>
    %cst_446 = arith.constant dense<0.000000e+00> : vector<4x8x8xf32>
    %655 = tpu.matmul %653, %654, %cst_446 {dimension_numbers = #tpu.dot_dimension_numbers<[2], [2], [1], [1], [0, 0, 0, 1, 1, 1], [0], [0]>} : vector<4x8x8xbf16>, vector<4x8x8xbf16>, vector<4x8x8xf32> -> vector<4x8x8xf32>
    %cst_447 = arith.constant 0.353553385 : f32
    %656 = vector.broadcast %cst_447 : f32 to vector<4x8x8xf32>
    %657 = arith.mulf %655, %656 : vector<4x8x8xf32>
    %658 = vector.shape_cast %3 : vector<8x8xf32> to vector<1x8x8xf32>
    %659 = vector.broadcast %658 : vector<1x8x8xf32> to vector<4x8x8xf32>
    %660 = arith.addf %657, %659 : vector<4x8x8xf32>
    %cst_448 = arith.constant dense<0xFF800000> : vector<4x8xf32>
    %661 = vector.multi_reduction <maximumf>, %660, %cst_448 [2] : vector<4x8x8xf32> to vector<4x8xf32>
    %662 = vector.shape_cast %661 : vector<4x8xf32> to vector<4x8x1xf32>
    %663 = vector.broadcast %662 : vector<4x8x1xf32> to vector<4x8x8xf32>
    %664 = arith.subf %660, %663 : vector<4x8x8xf32>
    %665 = math.exp %664 : vector<4x8x8xf32>
    %cst_449 = arith.constant dense<0.000000e+00> : vector<4x8xf32>
    %666 = vector.multi_reduction <add>, %665, %cst_449 [2] : vector<4x8x8xf32> to vector<4x8xf32>
    %667 = vector.shape_cast %666 : vector<4x8xf32> to vector<4x8x1xf32>
    %668 = vector.broadcast %667 : vector<4x8x1xf32> to vector<4x8x8xf32>
    %669 = arith.divf %665, %668 : vector<4x8x8xf32>
    %670 = arith.truncf %669 : vector<4x8x8xf32> to vector<4x8x8xbf16>
    %671 = arith.truncf %652 : vector<4x8x8xf32> to vector<4x8x8xbf16>
    %cst_450 = arith.constant dense<0.000000e+00> : vector<4x8x8xf32>
    %672 = tpu.matmul %670, %671, %cst_450 {dimension_numbers = #tpu.dot_dimension_numbers<[2], [1], [1], [2], [0, 0, 0, 1, 1, 2], [0], [0]>} : vector<4x8x8xbf16>, vector<4x8x8xbf16>, vector<4x8x8xf32> -> vector<4x8x8xf32>
    %673 = arith.truncf %672 : vector<4x8x8xf32> to vector<4x8x8xbf16>
    %cst_451 = arith.constant dense<0.000000e+00> : vector<4x8x32xf32>
    %674 = tpu.matmul %673, %637, %cst_451 {dimension_numbers = #tpu.dot_dimension_numbers<[2], [1], [1], [2], [0, 0, 0, 1, 1, 2], [0], [0]>} : vector<4x8x8xbf16>, vector<4x8x32xbf16>, vector<4x8x32xf32> -> vector<4x8x32xf32>
    %cst_452 = arith.constant dense<0.000000e+00> : vector<8x32xf32>
    %675 = vector.multi_reduction <add>, %674, %cst_452 [0] : vector<4x8x32xf32> to vector<8x32xf32>
    %676 = vector.broadcast %639 : vector<1x32xf32> to vector<8x32xf32>
    %677 = arith.addf %675, %676 : vector<8x32xf32>
    %678 = arith.addf %623, %677 : vector<8x32xf32>
    %c1_453 = arith.constant 1 : index
    %c0_454 = arith.constant 0 : index
    %c0_455 = arith.constant 0 : index
    %679 = vector.load %arg31[%c1_453, %c0_454, %c0_455] : memref<2x1x32xf32, #tpu.memory_space<vmem>>, vector<1x1x32xf32>
    %680 = vector.shape_cast %679 : vector<1x1x32xf32> to vector<1x32xf32>
    %c1_456 = arith.constant 1 : index
    %c0_457 = arith.constant 0 : index
    %c0_458 = arith.constant 0 : index
    %681 = vector.load %arg32[%c1_456, %c0_457, %c0_458] : memref<2x1x32xf32, #tpu.memory_space<vmem>>, vector<1x1x32xf32>
    %682 = vector.shape_cast %681 : vector<1x1x32xf32> to vector<1x32xf32>
    %cst_459 = arith.constant dense<0.000000e+00> : vector<8xf32>
    %683 = vector.multi_reduction <add>, %678, %cst_459 [1] : vector<8x32xf32> to vector<8xf32>
    %684 = vector.shape_cast %683 : vector<8xf32> to vector<8x1xf32>
    %cst_460 = arith.constant 3.200000e+01 : f32
    %685 = vector.broadcast %cst_460 : f32 to vector<8x1xf32>
    %686 = arith.divf %684, %685 : vector<8x1xf32>
    %687 = vector.broadcast %686 : vector<8x1xf32> to vector<8x32xf32>
    %688 = arith.subf %678, %687 : vector<8x32xf32>
    %689 = arith.mulf %688, %688 : vector<8x32xf32>
    %cst_461 = arith.constant dense<0.000000e+00> : vector<8xf32>
    %690 = vector.multi_reduction <add>, %689, %cst_461 [1] : vector<8x32xf32> to vector<8xf32>
    %691 = vector.shape_cast %690 : vector<8xf32> to vector<8x1xf32>
    %cst_462 = arith.constant 3.200000e+01 : f32
    %692 = vector.broadcast %cst_462 : f32 to vector<8x1xf32>
    %693 = arith.divf %691, %692 : vector<8x1xf32>
    %694 = vector.broadcast %686 : vector<8x1xf32> to vector<8x32xf32>
    %695 = arith.subf %678, %694 : vector<8x32xf32>
    %cst_463 = arith.constant 9.99999974E-6 : f32
    %696 = vector.broadcast %cst_463 : f32 to vector<8x1xf32>
    %697 = arith.addf %693, %696 : vector<8x1xf32>
    %698 = math.rsqrt %697 : vector<8x1xf32>
    %699 = vector.broadcast %698 : vector<8x1xf32> to vector<8x32xf32>
    %700 = arith.mulf %695, %699 : vector<8x32xf32>
    %701 = vector.broadcast %680 : vector<1x32xf32> to vector<8x32xf32>
    %702 = arith.mulf %700, %701 : vector<8x32xf32>
    %703 = vector.broadcast %682 : vector<1x32xf32> to vector<8x32xf32>
    %704 = arith.addf %702, %703 : vector<8x32xf32>
    %c1_464 = arith.constant 1 : index
    %c0_465 = arith.constant 0 : index
    %c0_466 = arith.constant 0 : index
    %c0_467 = arith.constant 0 : index
    %705 = vector.load %arg33[%c1_464, %c0_465, %c0_466, %c0_467] : memref<2x4x32x8xbf16, #tpu.memory_space<vmem>>, vector<1x4x32x8xbf16>
    %706 = vector.shape_cast %705 : vector<1x4x32x8xbf16> to vector<4x32x8xbf16>
    %c1_468 = arith.constant 1 : index
    %c0_469 = arith.constant 0 : index
    %c0_470 = arith.constant 0 : index
    %c0_471 = arith.constant 0 : index
    %707 = vector.load %arg36[%c1_468, %c0_469, %c0_470, %c0_471] : memref<2x4x1x8xf32, #tpu.memory_space<vmem>>, vector<1x4x1x8xf32>
    %708 = vector.shape_cast %707 : vector<1x4x1x8xf32> to vector<4x1x8xf32>
    %c1_472 = arith.constant 1 : index
    %c0_473 = arith.constant 0 : index
    %c0_474 = arith.constant 0 : index
    %c0_475 = arith.constant 0 : index
    %709 = vector.load %arg34[%c1_472, %c0_473, %c0_474, %c0_475] : memref<2x4x32x8xbf16, #tpu.memory_space<vmem>>, vector<1x4x32x8xbf16>
    %710 = vector.shape_cast %709 : vector<1x4x32x8xbf16> to vector<4x32x8xbf16>
    %c1_476 = arith.constant 1 : index
    %c0_477 = arith.constant 0 : index
    %c0_478 = arith.constant 0 : index
    %c0_479 = arith.constant 0 : index
    %711 = vector.load %arg37[%c1_476, %c0_477, %c0_478, %c0_479] : memref<2x4x1x8xf32, #tpu.memory_space<vmem>>, vector<1x4x1x8xf32>
    %712 = vector.shape_cast %711 : vector<1x4x1x8xf32> to vector<4x1x8xf32>
    %c1_480 = arith.constant 1 : index
    %c0_481 = arith.constant 0 : index
    %c0_482 = arith.constant 0 : index
    %c0_483 = arith.constant 0 : index
    %713 = vector.load %arg35[%c1_480, %c0_481, %c0_482, %c0_483] : memref<2x4x32x8xbf16, #tpu.memory_space<vmem>>, vector<1x4x32x8xbf16>
    %714 = vector.shape_cast %713 : vector<1x4x32x8xbf16> to vector<4x32x8xbf16>
    %c1_484 = arith.constant 1 : index
    %c0_485 = arith.constant 0 : index
    %c0_486 = arith.constant 0 : index
    %c0_487 = arith.constant 0 : index
    %715 = vector.load %arg38[%c1_484, %c0_485, %c0_486, %c0_487] : memref<2x4x1x8xf32, #tpu.memory_space<vmem>>, vector<1x4x1x8xf32>
    %716 = vector.shape_cast %715 : vector<1x4x1x8xf32> to vector<4x1x8xf32>
    %c1_488 = arith.constant 1 : index
    %c0_489 = arith.constant 0 : index
    %c0_490 = arith.constant 0 : index
    %c0_491 = arith.constant 0 : index
    %717 = vector.load %arg39[%c1_488, %c0_489, %c0_490, %c0_491] : memref<2x4x8x32xbf16, #tpu.memory_space<vmem>>, vector<1x4x8x32xbf16>
    %718 = vector.shape_cast %717 : vector<1x4x8x32xbf16> to vector<4x8x32xbf16>
    %c1_492 = arith.constant 1 : index
    %c0_493 = arith.constant 0 : index
    %c0_494 = arith.constant 0 : index
    %719 = vector.load %arg40[%c1_492, %c0_493, %c0_494] : memref<2x1x32xf32, #tpu.memory_space<vmem>>, vector<1x1x32xf32>
    %720 = vector.shape_cast %719 : vector<1x1x32xf32> to vector<1x32xf32>
    %721 = arith.truncf %704 : vector<8x32xf32> to vector<8x32xbf16>
    %722 = vector.shape_cast %721 : vector<8x32xbf16> to vector<1x8x32xbf16>
    %723 = vector.shape_cast %722 : vector<1x8x32xbf16> to vector<1x8x32xbf16>
    %724 = vector.broadcast %723 : vector<1x8x32xbf16> to vector<4x8x32xbf16>
    %725 = arith.truncf %369 : vector<8x32xf32> to vector<8x32xbf16>
    %726 = vector.shape_cast %725 : vector<8x32xbf16> to vector<1x8x32xbf16>
    %727 = vector.shape_cast %726 : vector<1x8x32xbf16> to vector<1x8x32xbf16>
    %728 = vector.broadcast %727 : vector<1x8x32xbf16> to vector<4x8x32xbf16>
    %cst_495 = arith.constant dense<0.000000e+00> : vector<4x8x8xf32>
    %729 = tpu.matmul %724, %706, %cst_495 {dimension_numbers = #tpu.dot_dimension_numbers<[2], [1], [1], [2], [0, 0, 0, 1, 1, 2], [0], [0]>} : vector<4x8x32xbf16>, vector<4x32x8xbf16>, vector<4x8x8xf32> -> vector<4x8x8xf32>
    %730 = vector.broadcast %708 : vector<4x1x8xf32> to vector<4x8x8xf32>
    %731 = arith.addf %729, %730 : vector<4x8x8xf32>
    %cst_496 = arith.constant dense<0.000000e+00> : vector<4x8x8xf32>
    %732 = tpu.matmul %728, %710, %cst_496 {dimension_numbers = #tpu.dot_dimension_numbers<[2], [1], [1], [2], [0, 0, 0, 1, 1, 2], [0], [0]>} : vector<4x8x32xbf16>, vector<4x32x8xbf16>, vector<4x8x8xf32> -> vector<4x8x8xf32>
    %733 = vector.broadcast %712 : vector<4x1x8xf32> to vector<4x8x8xf32>
    %734 = arith.addf %732, %733 : vector<4x8x8xf32>
    %cst_497 = arith.constant dense<0.000000e+00> : vector<4x8x8xf32>
    %735 = tpu.matmul %728, %714, %cst_497 {dimension_numbers = #tpu.dot_dimension_numbers<[2], [1], [1], [2], [0, 0, 0, 1, 1, 2], [0], [0]>} : vector<4x8x32xbf16>, vector<4x32x8xbf16>, vector<4x8x8xf32> -> vector<4x8x8xf32>
    %736 = vector.broadcast %716 : vector<4x1x8xf32> to vector<4x8x8xf32>
    %737 = arith.addf %735, %736 : vector<4x8x8xf32>
    %738 = arith.truncf %731 : vector<4x8x8xf32> to vector<4x8x8xbf16>
    %739 = arith.truncf %734 : vector<4x8x8xf32> to vector<4x8x8xbf16>
    %cst_498 = arith.constant dense<0.000000e+00> : vector<4x8x8xf32>
    %740 = tpu.matmul %738, %739, %cst_498 {dimension_numbers = #tpu.dot_dimension_numbers<[2], [2], [1], [1], [0, 0, 0, 1, 1, 1], [0], [0]>} : vector<4x8x8xbf16>, vector<4x8x8xbf16>, vector<4x8x8xf32> -> vector<4x8x8xf32>
    %cst_499 = arith.constant 0.353553385 : f32
    %741 = vector.broadcast %cst_499 : f32 to vector<4x8x8xf32>
    %742 = arith.mulf %740, %741 : vector<4x8x8xf32>
    %cst_500 = arith.constant dense<0xFF800000> : vector<4x8xf32>
    %743 = vector.multi_reduction <maximumf>, %742, %cst_500 [2] : vector<4x8x8xf32> to vector<4x8xf32>
    %744 = vector.shape_cast %743 : vector<4x8xf32> to vector<4x8x1xf32>
    %745 = vector.broadcast %744 : vector<4x8x1xf32> to vector<4x8x8xf32>
    %746 = arith.subf %742, %745 : vector<4x8x8xf32>
    %747 = math.exp %746 : vector<4x8x8xf32>
    %cst_501 = arith.constant dense<0.000000e+00> : vector<4x8xf32>
    %748 = vector.multi_reduction <add>, %747, %cst_501 [2] : vector<4x8x8xf32> to vector<4x8xf32>
    %749 = vector.shape_cast %748 : vector<4x8xf32> to vector<4x8x1xf32>
    %750 = vector.broadcast %749 : vector<4x8x1xf32> to vector<4x8x8xf32>
    %751 = arith.divf %747, %750 : vector<4x8x8xf32>
    %752 = arith.truncf %751 : vector<4x8x8xf32> to vector<4x8x8xbf16>
    %753 = arith.truncf %737 : vector<4x8x8xf32> to vector<4x8x8xbf16>
    %cst_502 = arith.constant dense<0.000000e+00> : vector<4x8x8xf32>
    %754 = tpu.matmul %752, %753, %cst_502 {dimension_numbers = #tpu.dot_dimension_numbers<[2], [1], [1], [2], [0, 0, 0, 1, 1, 2], [0], [0]>} : vector<4x8x8xbf16>, vector<4x8x8xbf16>, vector<4x8x8xf32> -> vector<4x8x8xf32>
    %755 = arith.truncf %754 : vector<4x8x8xf32> to vector<4x8x8xbf16>
    %cst_503 = arith.constant dense<0.000000e+00> : vector<4x8x32xf32>
    %756 = tpu.matmul %755, %718, %cst_503 {dimension_numbers = #tpu.dot_dimension_numbers<[2], [1], [1], [2], [0, 0, 0, 1, 1, 2], [0], [0]>} : vector<4x8x8xbf16>, vector<4x8x32xbf16>, vector<4x8x32xf32> -> vector<4x8x32xf32>
    %cst_504 = arith.constant dense<0.000000e+00> : vector<8x32xf32>
    %757 = vector.multi_reduction <add>, %756, %cst_504 [0] : vector<4x8x32xf32> to vector<8x32xf32>
    %758 = vector.broadcast %720 : vector<1x32xf32> to vector<8x32xf32>
    %759 = arith.addf %757, %758 : vector<8x32xf32>
    %760 = arith.addf %704, %759 : vector<8x32xf32>
    %c1_505 = arith.constant 1 : index
    %c0_506 = arith.constant 0 : index
    %c0_507 = arith.constant 0 : index
    %761 = vector.load %arg41[%c1_505, %c0_506, %c0_507] : memref<2x1x32xf32, #tpu.memory_space<vmem>>, vector<1x1x32xf32>
    %762 = vector.shape_cast %761 : vector<1x1x32xf32> to vector<1x32xf32>
    %c1_508 = arith.constant 1 : index
    %c0_509 = arith.constant 0 : index
    %c0_510 = arith.constant 0 : index
    %763 = vector.load %arg42[%c1_508, %c0_509, %c0_510] : memref<2x1x32xf32, #tpu.memory_space<vmem>>, vector<1x1x32xf32>
    %764 = vector.shape_cast %763 : vector<1x1x32xf32> to vector<1x32xf32>
    %cst_511 = arith.constant dense<0.000000e+00> : vector<8xf32>
    %765 = vector.multi_reduction <add>, %760, %cst_511 [1] : vector<8x32xf32> to vector<8xf32>
    %766 = vector.shape_cast %765 : vector<8xf32> to vector<8x1xf32>
    %cst_512 = arith.constant 3.200000e+01 : f32
    %767 = vector.broadcast %cst_512 : f32 to vector<8x1xf32>
    %768 = arith.divf %766, %767 : vector<8x1xf32>
    %769 = vector.broadcast %768 : vector<8x1xf32> to vector<8x32xf32>
    %770 = arith.subf %760, %769 : vector<8x32xf32>
    %771 = arith.mulf %770, %770 : vector<8x32xf32>
    %cst_513 = arith.constant dense<0.000000e+00> : vector<8xf32>
    %772 = vector.multi_reduction <add>, %771, %cst_513 [1] : vector<8x32xf32> to vector<8xf32>
    %773 = vector.shape_cast %772 : vector<8xf32> to vector<8x1xf32>
    %cst_514 = arith.constant 3.200000e+01 : f32
    %774 = vector.broadcast %cst_514 : f32 to vector<8x1xf32>
    %775 = arith.divf %773, %774 : vector<8x1xf32>
    %776 = vector.broadcast %768 : vector<8x1xf32> to vector<8x32xf32>
    %777 = arith.subf %760, %776 : vector<8x32xf32>
    %cst_515 = arith.constant 9.99999974E-6 : f32
    %778 = vector.broadcast %cst_515 : f32 to vector<8x1xf32>
    %779 = arith.addf %775, %778 : vector<8x1xf32>
    %780 = math.rsqrt %779 : vector<8x1xf32>
    %781 = vector.broadcast %780 : vector<8x1xf32> to vector<8x32xf32>
    %782 = arith.mulf %777, %781 : vector<8x32xf32>
    %783 = vector.broadcast %762 : vector<1x32xf32> to vector<8x32xf32>
    %784 = arith.mulf %782, %783 : vector<8x32xf32>
    %785 = vector.broadcast %764 : vector<1x32xf32> to vector<8x32xf32>
    %786 = arith.addf %784, %785 : vector<8x32xf32>
    %787 = arith.truncf %786 : vector<8x32xf32> to vector<8x32xbf16>
    %cst_516 = arith.constant 0.000000e+00 : f32
    %788 = vector.broadcast %cst_516 : f32 to vector<8x32xf32>
    %c1_517 = arith.constant 1 : index
    %c0_518 = arith.constant 0 : index
    %c0_519 = arith.constant 0 : index
    %789 = vector.load %arg43[%c1_517, %c0_518, %c0_519] : memref<2x32x2048xbf16, #tpu.memory_space<vmem>>, vector<1x32x512xbf16>
    %790 = vector.shape_cast %789 : vector<1x32x512xbf16> to vector<32x512xbf16>
    %cst_520 = arith.constant dense<0.000000e+00> : vector<8x512xf32>
    %791 = tpu.matmul %787, %790, %cst_520 {dimension_numbers = #tpu.dot_dimension_numbers<[1], [0], [0], [1], [0, 0, 1, 1], [], []>} : vector<8x32xbf16>, vector<32x512xbf16>, vector<8x512xf32> -> vector<8x512xf32>
    %c1_521 = arith.constant 1 : index
    %c0_522 = arith.constant 0 : index
    %c0_523 = arith.constant 0 : index
    %792 = vector.load %arg44[%c1_521, %c0_522, %c0_523] : memref<2x1x2048xf32, #tpu.memory_space<vmem>>, vector<1x1x512xf32>
    %793 = vector.shape_cast %792 : vector<1x1x512xf32> to vector<1x512xf32>
    %794 = vector.broadcast %793 : vector<1x512xf32> to vector<8x512xf32>
    %795 = arith.addf %791, %794 : vector<8x512xf32>
    %cst_524 = arith.constant 0.000000e+00 : f32
    %796 = vector.broadcast %cst_524 : f32 to vector<8x512xf32>
    %797 = arith.maximumf %795, %796 : vector<8x512xf32>
    %798 = arith.truncf %797 : vector<8x512xf32> to vector<8x512xbf16>
    %c1_525 = arith.constant 1 : index
    %c0_526 = arith.constant 0 : index
    %c0_527 = arith.constant 0 : index
    %799 = vector.load %arg45[%c1_525, %c0_526, %c0_527] : memref<2x2048x32xbf16, #tpu.memory_space<vmem>>, vector<1x512x32xbf16>
    %800 = vector.shape_cast %799 : vector<1x512x32xbf16> to vector<512x32xbf16>
    %cst_528 = arith.constant dense<0.000000e+00> : vector<8x32xf32>
    %801 = tpu.matmul %798, %800, %cst_528 {dimension_numbers = #tpu.dot_dimension_numbers<[1], [0], [0], [1], [0, 0, 1, 1], [], []>} : vector<8x512xbf16>, vector<512x32xbf16>, vector<8x32xf32> -> vector<8x32xf32>
    %802 = arith.addf %788, %801 : vector<8x32xf32>
    %c1_529 = arith.constant 1 : index
    %c0_530 = arith.constant 0 : index
    %c512_531 = arith.constant 512 : index
    %803 = vector.load %arg43[%c1_529, %c0_530, %c512_531] : memref<2x32x2048xbf16, #tpu.memory_space<vmem>>, vector<1x32x512xbf16>
    %804 = vector.shape_cast %803 : vector<1x32x512xbf16> to vector<32x512xbf16>
    %cst_532 = arith.constant dense<0.000000e+00> : vector<8x512xf32>
    %805 = tpu.matmul %787, %804, %cst_532 {dimension_numbers = #tpu.dot_dimension_numbers<[1], [0], [0], [1], [0, 0, 1, 1], [], []>} : vector<8x32xbf16>, vector<32x512xbf16>, vector<8x512xf32> -> vector<8x512xf32>
    %c1_533 = arith.constant 1 : index
    %c0_534 = arith.constant 0 : index
    %c512_535 = arith.constant 512 : index
    %806 = vector.load %arg44[%c1_533, %c0_534, %c512_535] : memref<2x1x2048xf32, #tpu.memory_space<vmem>>, vector<1x1x512xf32>
    %807 = vector.shape_cast %806 : vector<1x1x512xf32> to vector<1x512xf32>
    %808 = vector.broadcast %807 : vector<1x512xf32> to vector<8x512xf32>
    %809 = arith.addf %805, %808 : vector<8x512xf32>
    %cst_536 = arith.constant 0.000000e+00 : f32
    %810 = vector.broadcast %cst_536 : f32 to vector<8x512xf32>
    %811 = arith.maximumf %809, %810 : vector<8x512xf32>
    %812 = arith.truncf %811 : vector<8x512xf32> to vector<8x512xbf16>
    %c1_537 = arith.constant 1 : index
    %c512_538 = arith.constant 512 : index
    %c0_539 = arith.constant 0 : index
    %813 = vector.load %arg45[%c1_537, %c512_538, %c0_539] : memref<2x2048x32xbf16, #tpu.memory_space<vmem>>, vector<1x512x32xbf16>
    %814 = vector.shape_cast %813 : vector<1x512x32xbf16> to vector<512x32xbf16>
    %cst_540 = arith.constant dense<0.000000e+00> : vector<8x32xf32>
    %815 = tpu.matmul %812, %814, %cst_540 {dimension_numbers = #tpu.dot_dimension_numbers<[1], [0], [0], [1], [0, 0, 1, 1], [], []>} : vector<8x512xbf16>, vector<512x32xbf16>, vector<8x32xf32> -> vector<8x32xf32>
    %816 = arith.addf %802, %815 : vector<8x32xf32>
    %c1_541 = arith.constant 1 : index
    %c0_542 = arith.constant 0 : index
    %c1024_543 = arith.constant 1024 : index
    %817 = vector.load %arg43[%c1_541, %c0_542, %c1024_543] : memref<2x32x2048xbf16, #tpu.memory_space<vmem>>, vector<1x32x512xbf16>
    %818 = vector.shape_cast %817 : vector<1x32x512xbf16> to vector<32x512xbf16>
    %cst_544 = arith.constant dense<0.000000e+00> : vector<8x512xf32>
    %819 = tpu.matmul %787, %818, %cst_544 {dimension_numbers = #tpu.dot_dimension_numbers<[1], [0], [0], [1], [0, 0, 1, 1], [], []>} : vector<8x32xbf16>, vector<32x512xbf16>, vector<8x512xf32> -> vector<8x512xf32>
    %c1_545 = arith.constant 1 : index
    %c0_546 = arith.constant 0 : index
    %c1024_547 = arith.constant 1024 : index
    %820 = vector.load %arg44[%c1_545, %c0_546, %c1024_547] : memref<2x1x2048xf32, #tpu.memory_space<vmem>>, vector<1x1x512xf32>
    %821 = vector.shape_cast %820 : vector<1x1x512xf32> to vector<1x512xf32>
    %822 = vector.broadcast %821 : vector<1x512xf32> to vector<8x512xf32>
    %823 = arith.addf %819, %822 : vector<8x512xf32>
    %cst_548 = arith.constant 0.000000e+00 : f32
    %824 = vector.broadcast %cst_548 : f32 to vector<8x512xf32>
    %825 = arith.maximumf %823, %824 : vector<8x512xf32>
    %826 = arith.truncf %825 : vector<8x512xf32> to vector<8x512xbf16>
    %c1_549 = arith.constant 1 : index
    %c1024_550 = arith.constant 1024 : index
    %c0_551 = arith.constant 0 : index
    %827 = vector.load %arg45[%c1_549, %c1024_550, %c0_551] : memref<2x2048x32xbf16, #tpu.memory_space<vmem>>, vector<1x512x32xbf16>
    %828 = vector.shape_cast %827 : vector<1x512x32xbf16> to vector<512x32xbf16>
    %cst_552 = arith.constant dense<0.000000e+00> : vector<8x32xf32>
    %829 = tpu.matmul %826, %828, %cst_552 {dimension_numbers = #tpu.dot_dimension_numbers<[1], [0], [0], [1], [0, 0, 1, 1], [], []>} : vector<8x512xbf16>, vector<512x32xbf16>, vector<8x32xf32> -> vector<8x32xf32>
    %830 = arith.addf %816, %829 : vector<8x32xf32>
    %c1_553 = arith.constant 1 : index
    %c0_554 = arith.constant 0 : index
    %c1536_555 = arith.constant 1536 : index
    %831 = vector.load %arg43[%c1_553, %c0_554, %c1536_555] : memref<2x32x2048xbf16, #tpu.memory_space<vmem>>, vector<1x32x512xbf16>
    %832 = vector.shape_cast %831 : vector<1x32x512xbf16> to vector<32x512xbf16>
    %cst_556 = arith.constant dense<0.000000e+00> : vector<8x512xf32>
    %833 = tpu.matmul %787, %832, %cst_556 {dimension_numbers = #tpu.dot_dimension_numbers<[1], [0], [0], [1], [0, 0, 1, 1], [], []>} : vector<8x32xbf16>, vector<32x512xbf16>, vector<8x512xf32> -> vector<8x512xf32>
    %c1_557 = arith.constant 1 : index
    %c0_558 = arith.constant 0 : index
    %c1536_559 = arith.constant 1536 : index
    %834 = vector.load %arg44[%c1_557, %c0_558, %c1536_559] : memref<2x1x2048xf32, #tpu.memory_space<vmem>>, vector<1x1x512xf32>
    %835 = vector.shape_cast %834 : vector<1x1x512xf32> to vector<1x512xf32>
    %836 = vector.broadcast %835 : vector<1x512xf32> to vector<8x512xf32>
    %837 = arith.addf %833, %836 : vector<8x512xf32>
    %cst_560 = arith.constant 0.000000e+00 : f32
    %838 = vector.broadcast %cst_560 : f32 to vector<8x512xf32>
    %839 = arith.maximumf %837, %838 : vector<8x512xf32>
    %840 = arith.truncf %839 : vector<8x512xf32> to vector<8x512xbf16>
    %c1_561 = arith.constant 1 : index
    %c1536_562 = arith.constant 1536 : index
    %c0_563 = arith.constant 0 : index
    %841 = vector.load %arg45[%c1_561, %c1536_562, %c0_563] : memref<2x2048x32xbf16, #tpu.memory_space<vmem>>, vector<1x512x32xbf16>
    %842 = vector.shape_cast %841 : vector<1x512x32xbf16> to vector<512x32xbf16>
    %cst_564 = arith.constant dense<0.000000e+00> : vector<8x32xf32>
    %843 = tpu.matmul %840, %842, %cst_564 {dimension_numbers = #tpu.dot_dimension_numbers<[1], [0], [0], [1], [0, 0, 1, 1], [], []>} : vector<8x512xbf16>, vector<512x32xbf16>, vector<8x32xf32> -> vector<8x32xf32>
    %844 = arith.addf %830, %843 : vector<8x32xf32>
    %845 = arith.addf %786, %844 : vector<8x32xf32>
    %c1_565 = arith.constant 1 : index
    %c0_566 = arith.constant 0 : index
    %c0_567 = arith.constant 0 : index
    %846 = vector.load %arg46[%c1_565, %c0_566, %c0_567] : memref<2x1x32xf32, #tpu.memory_space<vmem>>, vector<1x1x32xf32>
    %847 = vector.shape_cast %846 : vector<1x1x32xf32> to vector<1x32xf32>
    %848 = vector.broadcast %847 : vector<1x32xf32> to vector<8x32xf32>
    %849 = arith.addf %845, %848 : vector<8x32xf32>
    %c1_568 = arith.constant 1 : index
    %c0_569 = arith.constant 0 : index
    %c0_570 = arith.constant 0 : index
    %850 = vector.load %arg47[%c1_568, %c0_569, %c0_570] : memref<2x1x32xf32, #tpu.memory_space<vmem>>, vector<1x1x32xf32>
    %851 = vector.shape_cast %850 : vector<1x1x32xf32> to vector<1x32xf32>
    %c1_571 = arith.constant 1 : index
    %c0_572 = arith.constant 0 : index
    %c0_573 = arith.constant 0 : index
    %852 = vector.load %arg48[%c1_571, %c0_572, %c0_573] : memref<2x1x32xf32, #tpu.memory_space<vmem>>, vector<1x1x32xf32>
    %853 = vector.shape_cast %852 : vector<1x1x32xf32> to vector<1x32xf32>
    %cst_574 = arith.constant dense<0.000000e+00> : vector<8xf32>
    %854 = vector.multi_reduction <add>, %849, %cst_574 [1] : vector<8x32xf32> to vector<8xf32>
    %855 = vector.shape_cast %854 : vector<8xf32> to vector<8x1xf32>
    %cst_575 = arith.constant 3.200000e+01 : f32
    %856 = vector.broadcast %cst_575 : f32 to vector<8x1xf32>
    %857 = arith.divf %855, %856 : vector<8x1xf32>
    %858 = vector.broadcast %857 : vector<8x1xf32> to vector<8x32xf32>
    %859 = arith.subf %849, %858 : vector<8x32xf32>
    %860 = arith.mulf %859, %859 : vector<8x32xf32>
    %cst_576 = arith.constant dense<0.000000e+00> : vector<8xf32>
    %861 = vector.multi_reduction <add>, %860, %cst_576 [1] : vector<8x32xf32> to vector<8xf32>
    %862 = vector.shape_cast %861 : vector<8xf32> to vector<8x1xf32>
    %cst_577 = arith.constant 3.200000e+01 : f32
    %863 = vector.broadcast %cst_577 : f32 to vector<8x1xf32>
    %864 = arith.divf %862, %863 : vector<8x1xf32>
    %865 = vector.broadcast %857 : vector<8x1xf32> to vector<8x32xf32>
    %866 = arith.subf %849, %865 : vector<8x32xf32>
    %cst_578 = arith.constant 9.99999974E-6 : f32
    %867 = vector.broadcast %cst_578 : f32 to vector<8x1xf32>
    %868 = arith.addf %864, %867 : vector<8x1xf32>
    %869 = math.rsqrt %868 : vector<8x1xf32>
    %870 = vector.broadcast %869 : vector<8x1xf32> to vector<8x32xf32>
    %871 = arith.mulf %866, %870 : vector<8x32xf32>
    %872 = vector.broadcast %851 : vector<1x32xf32> to vector<8x32xf32>
    %873 = arith.mulf %871, %872 : vector<8x32xf32>
    %874 = vector.broadcast %853 : vector<1x32xf32> to vector<8x32xf32>
    %875 = arith.addf %873, %874 : vector<8x32xf32>
    %c0_579 = arith.constant 0 : index
    %c0_580 = arith.constant 0 : index
    %876 = vector.load %arg49[%c0_579, %c0_580] : memref<1x32xf32, #tpu.memory_space<vmem>>, vector<1x32xf32>
    %c0_581 = arith.constant 0 : index
    %c0_582 = arith.constant 0 : index
    %877 = vector.load %arg50[%c0_581, %c0_582] : memref<1x32xf32, #tpu.memory_space<vmem>>, vector<1x32xf32>
    %cst_583 = arith.constant dense<0.000000e+00> : vector<8xf32>
    %878 = vector.multi_reduction <add>, %875, %cst_583 [1] : vector<8x32xf32> to vector<8xf32>
    %879 = vector.shape_cast %878 : vector<8xf32> to vector<8x1xf32>
    %cst_584 = arith.constant 3.200000e+01 : f32
    %880 = vector.broadcast %cst_584 : f32 to vector<8x1xf32>
    %881 = arith.divf %879, %880 : vector<8x1xf32>
    %882 = vector.broadcast %881 : vector<8x1xf32> to vector<8x32xf32>
    %883 = arith.subf %875, %882 : vector<8x32xf32>
    %884 = arith.mulf %883, %883 : vector<8x32xf32>
    %cst_585 = arith.constant dense<0.000000e+00> : vector<8xf32>
    %885 = vector.multi_reduction <add>, %884, %cst_585 [1] : vector<8x32xf32> to vector<8xf32>
    %886 = vector.shape_cast %885 : vector<8xf32> to vector<8x1xf32>
    %cst_586 = arith.constant 3.200000e+01 : f32
    %887 = vector.broadcast %cst_586 : f32 to vector<8x1xf32>
    %888 = arith.divf %886, %887 : vector<8x1xf32>
    %889 = vector.broadcast %881 : vector<8x1xf32> to vector<8x32xf32>
    %890 = arith.subf %875, %889 : vector<8x32xf32>
    %cst_587 = arith.constant 9.99999974E-6 : f32
    %891 = vector.broadcast %cst_587 : f32 to vector<8x1xf32>
    %892 = arith.addf %888, %891 : vector<8x1xf32>
    %893 = math.rsqrt %892 : vector<8x1xf32>
    %894 = vector.broadcast %893 : vector<8x1xf32> to vector<8x32xf32>
    %895 = arith.mulf %890, %894 : vector<8x32xf32>
    %896 = vector.broadcast %876 : vector<1x32xf32> to vector<8x32xf32>
    %897 = arith.mulf %895, %896 : vector<8x32xf32>
    %898 = vector.broadcast %877 : vector<1x32xf32> to vector<8x32xf32>
    %899 = arith.addf %897, %898 : vector<8x32xf32>
    %900 = arith.truncf %899 : vector<8x32xf32> to vector<8x32xbf16>
    %c0_588 = arith.constant 0 : index
    %c0_589 = arith.constant 0 : index
    %901 = vector.load %arg51[%c0_588, %c0_589] : memref<32x128xbf16, #tpu.memory_space<vmem>>, vector<32x128xbf16>
    %cst_590 = arith.constant dense<0.000000e+00> : vector<8x128xf32>
    %902 = tpu.matmul %900, %901, %cst_590 {dimension_numbers = #tpu.dot_dimension_numbers<[1], [0], [0], [1], [0, 0, 1, 1], [], []>} : vector<8x32xbf16>, vector<32x128xbf16>, vector<8x128xf32> -> vector<8x128xf32>
    %c0_591 = arith.constant 0 : index
    %c0_592 = arith.constant 0 : index
    %903 = vector.load %arg52[%c0_591, %c0_592] : memref<1x128xf32, #tpu.memory_space<vmem>>, vector<1x128xf32>
    %904 = vector.broadcast %903 : vector<1x128xf32> to vector<8x128xf32>
    %905 = arith.addf %902, %904 : vector<8x128xf32>
    %c0_593 = arith.constant 0 : index
    %c0_594 = arith.constant 0 : index
    %c0_595 = arith.constant 0 : index
    %906 = vector.load %arg53[%c0_593, %c0_594, %c0_595] : memref<1x8x128xf32, #tpu.memory_space<vmem>>, vector<1x8x128xf32>
    %907 = vector.shape_cast %906 : vector<1x8x128xf32> to vector<8x128xf32>
    %908 = vector.shape_cast %905 : vector<8x128xf32> to vector<1x8x128xf32>
    tpu.vector_store %arg53[%c0_593, %c0_594, %c0_595], %908 {strides = array<i32>} : memref<1x8x128xf32, #tpu.memory_space<vmem>>, vector<1x8x128xf32>,
    return
  }
  func.func @transform_0(%arg0: i32) -> (i32, i32, i32) {
    %c0_i32 = arith.constant 0 : i32
    %c0_i32_0 = arith.constant 0 : i32
    %c0_i32_1 = arith.constant 0 : i32
    return %arg0, %c0_i32, %c0_i32_0 : i32, i32, i32
  }
  func.func @transform_1(%arg0: i32) -> (i32, i32, i32) {
    %c0_i32 = arith.constant 0 : i32
    %c0_i32_0 = arith.constant 0 : i32
    %c0_i32_1 = arith.constant 0 : i32
    return %arg0, %c0_i32, %c0_i32_0 : i32, i32, i32
  }
  func.func @transform_2(%arg0: i32) -> (i32, i32, i32) {
    %c0_i32 = arith.constant 0 : i32
    %c0_i32_0 = arith.constant 0 : i32
    %c0_i32_1 = arith.constant 0 : i32
    return %arg0, %c0_i32, %c0_i32_0 : i32, i32, i32
  }
  func.func @transform_3(%arg0: i32) -> (i32, i32, i32) {
    %c0_i32 = arith.constant 0 : i32
    %c0_i32_0 = arith.constant 0 : i32
    %c0_i32_1 = arith.constant 0 : i32
    return %arg0, %c0_i32, %c0_i32_0 : i32, i32, i32
  }
  func.func @transform_4(%arg0: i32) -> (i32, i32, i32, i32) {
    %c0_i32 = arith.constant 0 : i32
    %c0_i32_0 = arith.constant 0 : i32
    %c0_i32_1 = arith.constant 0 : i32
    %c0_i32_2 = arith.constant 0 : i32
    %c0_i32_3 = arith.constant 0 : i32
    return %c0_i32, %c0_i32_0, %c0_i32_1, %c0_i32_2 : i32, i32, i32, i32
  }
  func.func @transform_5(%arg0: i32) -> (i32, i32, i32, i32) {
    %c0_i32 = arith.constant 0 : i32
    %c0_i32_0 = arith.constant 0 : i32
    %c0_i32_1 = arith.constant 0 : i32
    %c0_i32_2 = arith.constant 0 : i32
    %c0_i32_3 = arith.constant 0 : i32
    return %c0_i32, %c0_i32_0, %c0_i32_1, %c0_i32_2 : i32, i32, i32, i32
  }
  func.func @transform_6(%arg0: i32) -> (i32, i32, i32, i32) {
    %c0_i32 = arith.constant 0 : i32
    %c0_i32_0 = arith.constant 0 : i32
    %c0_i32_1 = arith.constant 0 : i32
    %c0_i32_2 = arith.constant 0 : i32
    %c0_i32_3 = arith.constant 0 : i32
    return %c0_i32, %c0_i32_0, %c0_i32_1, %c0_i32_2 : i32, i32, i32, i32
  }
  func.func @transform_7(%arg0: i32) -> (i32, i32, i32, i32) {
    %c0_i32 = arith.constant 0 : i32
    %c0_i32_0 = arith.constant 0 : i32
    %c0_i32_1 = arith.constant 0 : i32
    %c0_i32_2 = arith.constant 0 : i32
    %c0_i32_3 = arith.constant 0 : i32
    return %c0_i32, %c0_i32_0, %c0_i32_1, %c0_i32_2 : i32, i32, i32, i32
  }
  func.func @transform_8(%arg0: i32) -> (i32, i32, i32, i32) {
    %c0_i32 = arith.constant 0 : i32
    %c0_i32_0 = arith.constant 0 : i32
    %c0_i32_1 = arith.constant 0 : i32
    %c0_i32_2 = arith.constant 0 : i32
    %c0_i32_3 = arith.constant 0 : i32
    return %c0_i32, %c0_i32_0, %c0_i32_1, %c0_i32_2 : i32, i32, i32, i32
  }
  func.func @transform_9(%arg0: i32) -> (i32, i32, i32, i32) {
    %c0_i32 = arith.constant 0 : i32
    %c0_i32_0 = arith.constant 0 : i32
    %c0_i32_1 = arith.constant 0 : i32
    %c0_i32_2 = arith.constant 0 : i32
    %c0_i32_3 = arith.constant 0 : i32
    return %c0_i32, %c0_i32_0, %c0_i32_1, %c0_i32_2 : i32, i32, i32, i32
  }
  func.func @transform_10(%arg0: i32) -> (i32, i32, i32, i32) {
    %c0_i32 = arith.constant 0 : i32
    %c0_i32_0 = arith.constant 0 : i32
    %c0_i32_1 = arith.constant 0 : i32
    %c0_i32_2 = arith.constant 0 : i32
    %c0_i32_3 = arith.constant 0 : i32
    return %c0_i32, %c0_i32_0, %c0_i32_1, %c0_i32_2 : i32, i32, i32, i32
  }
  func.func @transform_11(%arg0: i32) -> (i32, i32, i32) {
    %c0_i32 = arith.constant 0 : i32
    %c0_i32_0 = arith.constant 0 : i32
    %c0_i32_1 = arith.constant 0 : i32
    %c0_i32_2 = arith.constant 0 : i32
    return %c0_i32, %c0_i32_0, %c0_i32_1 : i32, i32, i32
  }
  func.func @transform_12(%arg0: i32) -> (i32, i32, i32) {
    %c0_i32 = arith.constant 0 : i32
    %c0_i32_0 = arith.constant 0 : i32
    %c0_i32_1 = arith.constant 0 : i32
    %c0_i32_2 = arith.constant 0 : i32
    return %c0_i32, %c0_i32_0, %c0_i32_1 : i32, i32, i32
  }
  func.func @transform_13(%arg0: i32) -> (i32, i32, i32) {
    %c0_i32 = arith.constant 0 : i32
    %c0_i32_0 = arith.constant 0 : i32
    %c0_i32_1 = arith.constant 0 : i32
    %c0_i32_2 = arith.constant 0 : i32
    return %c0_i32, %c0_i32_0, %c0_i32_1 : i32, i32, i32
  }
  func.func @transform_14(%arg0: i32) -> (i32, i32, i32) {
    %c0_i32 = arith.constant 0 : i32
    %c0_i32_0 = arith.constant 0 : i32
    %c0_i32_1 = arith.constant 0 : i32
    %c0_i32_2 = arith.constant 0 : i32
    return %c0_i32, %c0_i32_0, %c0_i32_1 : i32, i32, i32
  }
  func.func @transform_15(%arg0: i32) -> (i32, i32, i32) {
    %c0_i32 = arith.constant 0 : i32
    %c0_i32_0 = arith.constant 0 : i32
    %c0_i32_1 = arith.constant 0 : i32
    %c0_i32_2 = arith.constant 0 : i32
    return %c0_i32, %c0_i32_0, %c0_i32_1 : i32, i32, i32
  }
  func.func @transform_16(%arg0: i32) -> (i32, i32, i32) {
    %c0_i32 = arith.constant 0 : i32
    %c0_i32_0 = arith.constant 0 : i32
    %c0_i32_1 = arith.constant 0 : i32
    %c0_i32_2 = arith.constant 0 : i32
    return %c0_i32, %c0_i32_0, %c0_i32_1 : i32, i32, i32
  }
  func.func @transform_17(%arg0: i32) -> (i32, i32, i32) {
    %c0_i32 = arith.constant 0 : i32
    %c0_i32_0 = arith.constant 0 : i32
    %c0_i32_1 = arith.constant 0 : i32
    %c0_i32_2 = arith.constant 0 : i32
    return %c0_i32, %c0_i32_0, %c0_i32_1 : i32, i32, i32
  }
  func.func @transform_18(%arg0: i32) -> (i32, i32, i32) {
    %c0_i32 = arith.constant 0 : i32
    %c0_i32_0 = arith.constant 0 : i32
    %c0_i32_1 = arith.constant 0 : i32
    %c0_i32_2 = arith.constant 0 : i32
    return %c0_i32, %c0_i32_0, %c0_i32_1 : i32, i32, i32
  }
  func.func @transform_19(%arg0: i32) -> (i32, i32, i32) {
    %c0_i32 = arith.constant 0 : i32
    %c0_i32_0 = arith.constant 0 : i32
    %c0_i32_1 = arith.constant 0 : i32
    %c0_i32_2 = arith.constant 0 : i32
    return %c0_i32, %c0_i32_0, %c0_i32_1 : i32, i32, i32
  }
  func.func @transform_20(%arg0: i32) -> (i32, i32) {
    %c0_i32 = arith.constant 0 : i32
    %c0_i32_0 = arith.constant 0 : i32
    %c0_i32_1 = arith.constant 0 : i32
    return %c0_i32, %c0_i32_0 : i32, i32
  }
  func.func @transform_21(%arg0: i32) -> (i32, i32) {
    %c0_i32 = arith.constant 0 : i32
    %c0_i32_0 = arith.constant 0 : i32
    %c0_i32_1 = arith.constant 0 : i32
    return %c0_i32, %c0_i32_0 : i32, i32
  }
  func.func @transform_22(%arg0: i32) -> (i32, i32, i32, i32) {
    %c0_i32 = arith.constant 0 : i32
    %c0_i32_0 = arith.constant 0 : i32
    %c0_i32_1 = arith.constant 0 : i32
    %c0_i32_2 = arith.constant 0 : i32
    %c0_i32_3 = arith.constant 0 : i32
    return %c0_i32, %c0_i32_0, %c0_i32_1, %c0_i32_2 : i32, i32, i32, i32
  }
  func.func @transform_23(%arg0: i32) -> (i32, i32, i32, i32) {
    %c0_i32 = arith.constant 0 : i32
    %c0_i32_0 = arith.constant 0 : i32
    %c0_i32_1 = arith.constant 0 : i32
    %c0_i32_2 = arith.constant 0 : i32
    %c0_i32_3 = arith.constant 0 : i32
    return %c0_i32, %c0_i32_0, %c0_i32_1, %c0_i32_2 : i32, i32, i32, i32
  }
  func.func @transform_24(%arg0: i32) -> (i32, i32, i32, i32) {
    %c0_i32 = arith.constant 0 : i32
    %c0_i32_0 = arith.constant 0 : i32
    %c0_i32_1 = arith.constant 0 : i32
    %c0_i32_2 = arith.constant 0 : i32
    %c0_i32_3 = arith.constant 0 : i32
    return %c0_i32, %c0_i32_0, %c0_i32_1, %c0_i32_2 : i32, i32, i32, i32
  }
  func.func @transform_25(%arg0: i32) -> (i32, i32, i32, i32) {
    %c0_i32 = arith.constant 0 : i32
    %c0_i32_0 = arith.constant 0 : i32
    %c0_i32_1 = arith.constant 0 : i32
    %c0_i32_2 = arith.constant 0 : i32
    %c0_i32_3 = arith.constant 0 : i32
    return %c0_i32, %c0_i32_0, %c0_i32_1, %c0_i32_2 : i32, i32, i32, i32
  }
  func.func @transform_26(%arg0: i32) -> (i32, i32, i32, i32) {
    %c0_i32 = arith.constant 0 : i32
    %c0_i32_0 = arith.constant 0 : i32
    %c0_i32_1 = arith.constant 0 : i32
    %c0_i32_2 = arith.constant 0 : i32
    %c0_i32_3 = arith.constant 0 : i32
    return %c0_i32, %c0_i32_0, %c0_i32_1, %c0_i32_2 : i32, i32, i32, i32
  }
  func.func @transform_27(%arg0: i32) -> (i32, i32, i32, i32) {
    %c0_i32 = arith.constant 0 : i32
    %c0_i32_0 = arith.constant 0 : i32
    %c0_i32_1 = arith.constant 0 : i32
    %c0_i32_2 = arith.constant 0 : i32
    %c0_i32_3 = arith.constant 0 : i32
    return %c0_i32, %c0_i32_0, %c0_i32_1, %c0_i32_2 : i32, i32, i32, i32
  }
  func.func @transform_28(%arg0: i32) -> (i32, i32, i32, i32) {
    %c0_i32 = arith.constant 0 : i32
    %c0_i32_0 = arith.constant 0 : i32
    %c0_i32_1 = arith.constant 0 : i32
    %c0_i32_2 = arith.constant 0 : i32
    %c0_i32_3 = arith.constant 0 : i32
    return %c0_i32, %c0_i32_0, %c0_i32_1, %c0_i32_2 : i32, i32, i32, i32
  }
  func.func @transform_29(%arg0: i32) -> (i32, i32, i32) {
    %c0_i32 = arith.constant 0 : i32
    %c0_i32_0 = arith.constant 0 : i32
    %c0_i32_1 = arith.constant 0 : i32
    %c0_i32_2 = arith.constant 0 : i32
    return %c0_i32, %c0_i32_0, %c0_i32_1 : i32, i32, i32
  }
  func.func @transform_30(%arg0: i32) -> (i32, i32, i32) {
    %c0_i32 = arith.constant 0 : i32
    %c0_i32_0 = arith.constant 0 : i32
    %c0_i32_1 = arith.constant 0 : i32
    %c0_i32_2 = arith.constant 0 : i32
    return %c0_i32, %c0_i32_0, %c0_i32_1 : i32, i32, i32
  }
  func.func @transform_31(%arg0: i32) -> (i32, i32, i32) {
    %c0_i32 = arith.constant 0 : i32
    %c0_i32_0 = arith.constant 0 : i32
    %c0_i32_1 = arith.constant 0 : i32
    %c0_i32_2 = arith.constant 0 : i32
    return %c0_i32, %c0_i32_0, %c0_i32_1 : i32, i32, i32
  }
  func.func @transform_32(%arg0: i32) -> (i32, i32, i32, i32) {
    %c0_i32 = arith.constant 0 : i32
    %c0_i32_0 = arith.constant 0 : i32
    %c0_i32_1 = arith.constant 0 : i32
    %c0_i32_2 = arith.constant 0 : i32
    %c0_i32_3 = arith.constant 0 : i32
    return %c0_i32, %c0_i32_0, %c0_i32_1, %c0_i32_2 : i32, i32, i32, i32
  }
  func.func @transform_33(%arg0: i32) -> (i32, i32, i32, i32) {
    %c0_i32 = arith.constant 0 : i32
    %c0_i32_0 = arith.constant 0 : i32
    %c0_i32_1 = arith.constant 0 : i32
    %c0_i32_2 = arith.constant 0 : i32
    %c0_i32_3 = arith.constant 0 : i32
    return %c0_i32, %c0_i32_0, %c0_i32_1, %c0_i32_2 : i32, i32, i32, i32
  }
  func.func @transform_34(%arg0: i32) -> (i32, i32, i32, i32) {
    %c0_i32 = arith.constant 0 : i32
    %c0_i32_0 = arith.constant 0 : i32
    %c0_i32_1 = arith.constant 0 : i32
    %c0_i32_2 = arith.constant 0 : i32
    %c0_i32_3 = arith.constant 0 : i32
    return %c0_i32, %c0_i32_0, %c0_i32_1, %c0_i32_2 : i32, i32, i32, i32
  }
  func.func @transform_35(%arg0: i32) -> (i32, i32, i32, i32) {
    %c0_i32 = arith.constant 0 : i32
    %c0_i32_0 = arith.constant 0 : i32
    %c0_i32_1 = arith.constant 0 : i32
    %c0_i32_2 = arith.constant 0 : i32
    %c0_i32_3 = arith.constant 0 : i32
    return %c0_i32, %c0_i32_0, %c0_i32_1, %c0_i32_2 : i32, i32, i32, i32
  }
  func.func @transform_36(%arg0: i32) -> (i32, i32, i32, i32) {
    %c0_i32 = arith.constant 0 : i32
    %c0_i32_0 = arith.constant 0 : i32
    %c0_i32_1 = arith.constant 0 : i32
    %c0_i32_2 = arith.constant 0 : i32
    %c0_i32_3 = arith.constant 0 : i32
    return %c0_i32, %c0_i32_0, %c0_i32_1, %c0_i32_2 : i32, i32, i32, i32
  }
  func.func @transform_37(%arg0: i32) -> (i32, i32, i32, i32) {
    %c0_i32 = arith.constant 0 : i32
    %c0_i32_0 = arith.constant 0 : i32
    %c0_i32_1 = arith.constant 0 : i32
    %c0_i32_2 = arith.constant 0 : i32
    %c0_i32_3 = arith.constant 0 : i32
    return %c0_i32, %c0_i32_0, %c0_i32_1, %c0_i32_2 : i32, i32, i32, i32
  }
  func.func @transform_38(%arg0: i32) -> (i32, i32, i32, i32) {
    %c0_i32 = arith.constant 0 : i32
    %c0_i32_0 = arith.constant 0 : i32
    %c0_i32_1 = arith.constant 0 : i32
    %c0_i32_2 = arith.constant 0 : i32
    %c0_i32_3 = arith.constant 0 : i32
    return %c0_i32, %c0_i32_0, %c0_i32_1, %c0_i32_2 : i32, i32, i32, i32
  }
  func.func @transform_39(%arg0: i32) -> (i32, i32, i32) {
    %c0_i32 = arith.constant 0 : i32
    %c0_i32_0 = arith.constant 0 : i32
    %c0_i32_1 = arith.constant 0 : i32
    %c0_i32_2 = arith.constant 0 : i32
    return %c0_i32, %c0_i32_0, %c0_i32_1 : i32, i32, i32
  }
  func.func @transform_40(%arg0: i32) -> (i32, i32, i32) {
    %c0_i32 = arith.constant 0 : i32
    %c0_i32_0 = arith.constant 0 : i32
    %c0_i32_1 = arith.constant 0 : i32
    %c0_i32_2 = arith.constant 0 : i32
    return %c0_i32, %c0_i32_0, %c0_i32_1 : i32, i32, i32
  }
  func.func @transform_41(%arg0: i32) -> (i32, i32, i32) {
    %c0_i32 = arith.constant 0 : i32
    %c0_i32_0 = arith.constant 0 : i32
    %c0_i32_1 = arith.constant 0 : i32
    %c0_i32_2 = arith.constant 0 : i32
    return %c0_i32, %c0_i32_0, %c0_i32_1 : i32, i32, i32
  }
  func.func @transform_42(%arg0: i32) -> (i32, i32, i32) {
    %c0_i32 = arith.constant 0 : i32
    %c0_i32_0 = arith.constant 0 : i32
    %c0_i32_1 = arith.constant 0 : i32
    %c0_i32_2 = arith.constant 0 : i32
    return %c0_i32, %c0_i32_0, %c0_i32_1 : i32, i32, i32
  }
  func.func @transform_43(%arg0: i32) -> (i32, i32, i32) {
    %c0_i32 = arith.constant 0 : i32
    %c0_i32_0 = arith.constant 0 : i32
    %c0_i32_1 = arith.constant 0 : i32
    %c0_i32_2 = arith.constant 0 : i32
    return %c0_i32, %c0_i32_0, %c0_i32_1 : i32, i32, i32
  }
  func.func @transform_44(%arg0: i32) -> (i32, i32, i32) {
    %c0_i32 = arith.constant 0 : i32
    %c0_i32_0 = arith.constant 0 : i32
    %c0_i32_1 = arith.constant 0 : i32
    %c0_i32_2 = arith.constant 0 : i32
    return %c0_i32, %c0_i32_0, %c0_i32_1 : i32, i32, i32
  }
  func.func @transform_45(%arg0: i32) -> (i32, i32, i32) {
    %c0_i32 = arith.constant 0 : i32
    %c0_i32_0 = arith.constant 0 : i32
    %c0_i32_1 = arith.constant 0 : i32
    %c0_i32_2 = arith.constant 0 : i32
    return %c0_i32, %c0_i32_0, %c0_i32_1 : i32, i32, i32
  }
  func.func @transform_46(%arg0: i32) -> (i32, i32, i32) {
    %c0_i32 = arith.constant 0 : i32
    %c0_i32_0 = arith.constant 0 : i32
    %c0_i32_1 = arith.constant 0 : i32
    %c0_i32_2 = arith.constant 0 : i32
    return %c0_i32, %c0_i32_0, %c0_i32_1 : i32, i32, i32
  }
  func.func @transform_47(%arg0: i32) -> (i32, i32, i32) {
    %c0_i32 = arith.constant 0 : i32
    %c0_i32_0 = arith.constant 0 : i32
    %c0_i32_1 = arith.constant 0 : i32
    %c0_i32_2 = arith.constant 0 : i32
    return %c0_i32, %c0_i32_0, %c0_i32_1 : i32, i32, i32
  }
  func.func @transform_48(%arg0: i32) -> (i32, i32) {
    %c0_i32 = arith.constant 0 : i32
    %c0_i32_0 = arith.constant 0 : i32
    %c0_i32_1 = arith.constant 0 : i32
    return %c0_i32, %c0_i32_0 : i32, i32
  }
  func.func @transform_49(%arg0: i32) -> (i32, i32) {
    %c0_i32 = arith.constant 0 : i32
    %c0_i32_0 = arith.constant 0 : i32
    %c0_i32_1 = arith.constant 0 : i32
    return %c0_i32, %c0_i32_0 : i32, i32
  }
  func.func @transform_50(%arg0: i32) -> (i32, i32) {
    %c0_i32 = arith.constant 0 : i32
    %c0_i32_0 = arith.constant 0 : i32
    %c0_i32_1 = arith.constant 0 : i32
    return %c0_i32, %c0_i32_0 : i32, i32
  }
  func.func @transform_51(%arg0: i32) -> (i32, i32) {
    %c0_i32 = arith.constant 0 : i32
    %c0_i32_0 = arith.constant 0 : i32
    %c0_i32_1 = arith.constant 0 : i32
    return %c0_i32, %c0_i32_0 : i32, i32
  }
  func.func @transform_52(%arg0: i32) -> (i32, i32, i32) {
    %c0_i32 = arith.constant 0 : i32
    %c0_i32_0 = arith.constant 0 : i32
    %c0_i32_1 = arith.constant 0 : i32
    return %arg0, %c0_i32, %c0_i32_0 : i32, i32, i32
  }
}

</mosaic_0001>

<bundles_post_ra>
// kernel: transformer_ed_forward.1
= control target key start
LH: loop header
LB: loop body
LE: loop exit
PB: predicated region body
PF: predicated region fallthrough
CT: control target
= control target key end

     0   :  { %s23425_s6 = smov 1   ;;  %s23426_s10 = smov 2   ;;  %s26008_s0 = inlined_call_operand.smem [shape: u32[53], index: -1, kind: input, shape index: {}] }
   0x1   :  { %s23488_s5 = sld [smem:[%s26008_s0]]   ;;  %s23427_s14 = smov 3  }
   0x2   :  { %s23493_s9 = sld [smem:[%s26008_s0 + %s23425_s6]]   ;;  %s23428_s18 = smov 4  }
   0x3   :  { %s23498_s13 = sld [smem:[%s26008_s0 + %s23426_s10]]   ;;  %s23429_s22 = smov 5  }
   0x4   :  { %s23503_s17 = sld [smem:[%s26008_s0 + %s23427_s14]]   ;;  %s23430_s26 = smov 6  }
   0x5   :  { %s23508_s21 = sld [smem:[%s26008_s0 + %s23428_s18]]   ;;  %s23431_s30 = smov 7  }
   0x6   :  { %s23513_s25 = sld [smem:[%s26008_s0 + %s23429_s22]]   ;;  %s23432_s4 = smov 8  }
   0x7   :  { %26060 = sst [smem:[#allocation2_spill]] %s23488_s5  ;;  %s23433_s10 = smov 9  }
   0x8   :  { %26061 = sst [smem:[#allocation3_spill]] %s23493_s9  ;;  %s23434_s15 = smov 10  }
   0x9   :  { %26062 = sst [smem:[#allocation4_spill]] %s23498_s13  ;;  %s23435_s20 = smov 11  }
   0xa   :  { %26063 = sst [smem:[#allocation5_spill]] %s23503_s17  ;;  %s23437_s1 = smov 13  }
   0xb   :  { %26064 = sst [smem:[#allocation6_spill]] %s23508_s21  ;;  %s23438_s7 = smov 14  }
   0xc   :  { %26065 = sst [smem:[#allocation7_spill]] %s23513_s25  ;;  %s23440_s22 = smov 16  }
   0xd   :  { %s23518_s29 = sld [smem:[%s26008_s0 + %s23430_s26]]   ;;  %s23436_s26 = smov 12  }
   0xe   :  { %s23523_s3 = sld [smem:[%s26008_s0 + %s23431_s30]]   ;;  %s23441_s28 = smov 17  }
   0xf   :  { %s23528_s8 = sld [smem:[%s26008_s0 + %s23432_s4]]  }
  0x10   :  { %s23533_s14 = sld [smem:[%s26008_s0 + %s23433_s10]]  }
  0x11   :  { %s23538_s19 = sld [smem:[%s26008_s0 + %s23434_s15]]   ;;  %s23439_s15 = smov 15  }
  0x12   :  { %s23543_s24 = sld [smem:[%s26008_s0 + %s23435_s20]]  }
  0x13   :  { %26066 = sst [smem:[#allocation8_spill]] %s23518_s29 }
  0x14   :  { %26067 = sst [smem:[#allocation9_spill]] %s23523_s3 }
  0x15   :  { %26068 = sst [smem:[#allocation10_spill]] %s23528_s8 }
  0x16   :  { %26069 = sst [smem:[#allocation11_spill]] %s23533_s14 }
  0x17   :  { %26070 = sst [smem:[#allocation12_spill]] %s23538_s19 }
  0x18   :  { %26071 = sst [smem:[#allocation13_spill]] %s23543_s24 }
  0x19   :  { %s23548_s30 = sld [smem:[%s26008_s0 + %s23436_s26]]  }
  0x1a   :  { %s23553_s6 = sld [smem:[%s26008_s0 + %s23437_s1]]  }
  0x1b   :  { %s23558_s12 = sld [smem:[%s26008_s0 + %s23438_s7]]   ;;  %s23442_s7 = smov 18  }
  0x1c   :  { %s23563_s20 = sld [smem:[%s26008_s0 + %s23439_s15]]   ;;  %s23443_s15 = smov 19  }
  0x1d   :  { %s23568_s27 = sld [smem:[%s26008_s0 + %s23440_s22]]   ;;  %s23444_s22 = smov 20  }
  0x1e   :  { %s23573_s4 = sld [smem:[%s26008_s0 + %s23441_s28]]   ;;  %s23445_s28 = smov 21  }
  0x1f   :  { %26072 = sst [smem:[#allocation14_spill]] %s23548_s30 }
  0x20   :  { %26073 = sst [smem:[#allocation15_spill]] %s23553_s6 }
  0x21   :  { %26074 = sst [smem:[#allocation16_spill]] %s23558_s12 }
  0x22   :  { %26075 = sst [smem:[#allocation17_spill]] %s23563_s20 }
  0x23   :  { %26076 = sst [smem:[#allocation18_spill]] %s23568_s27 }
  0x24   :  { %26077 = sst [smem:[#allocation19_spill]] %s23573_s4 }
  0x25   :  { %s23578_s17 = sld [smem:[%s26008_s0 + %s23442_s7]]   ;;  %s23446_s7 = smov 22  }
  0x26   :  { %s23583_s9 = sld [smem:[%s26008_s0 + %s23443_s15]]   ;;  %s23447_s15 = smov 23  }
  0x27   :  { %s23588_s20 = sld [smem:[%s26008_s0 + %s23444_s22]]   ;;  %s23448_s22 = smov 24  }
  0x28   :  { %s23593_s4 = sld [smem:[%s26008_s0 + %s23445_s28]]   ;;  %s23449_s28 = smov 25  }
  0x2b   :  { %26078 = sst [smem:[#allocation20_spill]] %s23578_s17 }
  0x2c   :  { %26079 = sst [smem:[#allocation21_spill]] %s23583_s9 }
  0x2d   :  { %26080 = sst [smem:[#allocation22_spill]] %s23588_s20 }
  0x2e   :  { %26081 = sst [smem:[#allocation23_spill]] %s23593_s4 }
  0x2f   :  { %s23598_s17 = sld [smem:[%s26008_s0 + %s23446_s7]]   ;;  %s23450_s7 = smov 26  }
  0x30   :  { %s23603_s9 = sld [smem:[%s26008_s0 + %s23447_s15]]   ;;  %s23451_s15 = smov 27  }
  0x31   :  { %s23608_s20 = sld [smem:[%s26008_s0 + %s23448_s22]]   ;;  %s23452_s22 = smov 28  }
  0x32   :  { %s23613_s4 = sld [smem:[%s26008_s0 + %s23449_s28]]   ;;  %s23453_s28 = smov 29  }
  0x35   :  { %26082 = sst [smem:[#allocation24_spill]] %s23598_s17 }
  0x36   :  { %26083 = sst [smem:[#allocation25_spill]] %s23603_s9 }
  0x37   :  { %26084 = sst [smem:[#allocation26_spill]] %s23608_s20 }
  0x38   :  { %26085 = sst [smem:[#allocation27_spill]] %s23613_s4 }
  0x39   :  { %s23618_s17 = sld [smem:[%s26008_s0 + %s23450_s7]]   ;;  %s23454_s7 = smov 30  }
  0x3a   :  { %s23623_s9 = sld [smem:[%s26008_s0 + %s23451_s15]]   ;;  %s23455_s15 = smov 31  }
  0x3b   :  { %s23628_s20 = sld [smem:[%s26008_s0 + %s23452_s22]]   ;;  %s23456_s22 = smov 32  }
  0x3c   :  { %s23633_s4 = sld [smem:[%s26008_s0 + %s23453_s28]]   ;;  %s23457_s28 = smov 33  }
  0x3f   :  { %26086 = sst [smem:[#allocation28_spill]] %s23618_s17 }
  0x40   :  { %26087 = sst [smem:[#allocation29_spill]] %s23623_s9 }
  0x41   :  { %26088 = sst [smem:[#allocation30_spill]] %s23628_s20 }
  0x42   :  { %26089 = sst [smem:[#allocation31_spill]] %s23633_s4 }
  0x43   :  { %s23638_s17 = sld [smem:[%s26008_s0 + %s23454_s7]]   ;;  %s23458_s7 = smov 34  }
  0x44   :  { %s23643_s9 = sld [smem:[%s26008_s0 + %s23455_s15]]   ;;  %s23459_s15 = smov 35  }
  0x45   :  { %s23648_s20 = sld [smem:[%s26008_s0 + %s23456_s22]]   ;;  %s23460_s22 = smov 36  }
  0x46   :  { %s23653_s4 = sld [smem:[%s26008_s0 + %s23457_s28]]   ;;  %s23461_s28 = smov 37  }
  0x49   :  { %26090 = sst [smem:[#allocation32_spill]] %s23638_s17 }
  0x4a   :  { %26091 = sst [smem:[#allocation33_spill]] %s23643_s9 }
  0x4b   :  { %26092 = sst [smem:[#allocation34_spill]] %s23648_s20 }
  0x4c   :  { %26093 = sst [smem:[#allocation35_spill]] %s23653_s4 }
  0x4d   :  { %s23658_s17 = sld [smem:[%s26008_s0 + %s23458_s7]]   ;;  %s23462_s7 = smov 38  }
  0x4e   :  { %s23663_s9 = sld [smem:[%s26008_s0 + %s23459_s15]]   ;;  %s23463_s15 = smov 39  }
  0x4f   :  { %s23668_s20 = sld [smem:[%s26008_s0 + %s23460_s22]]   ;;  %s23464_s22 = smov 40  }
  0x50   :  { %s23673_s4 = sld [smem:[%s26008_s0 + %s23461_s28]]   ;;  %s23465_s28 = smov 41  }
  0x53   :  { %26094 = sst [smem:[#allocation36_spill]] %s23658_s17 }
  0x54   :  { %26095 = sst [smem:[#allocation37_spill]] %s23663_s9 }
  0x55   :  { %26096 = sst [smem:[#allocation38_spill]] %s23668_s20 }
  0x56   :  { %26097 = sst [smem:[#allocation39_spill]] %s23673_s4 }
  0x57   :  { %s23678_s17 = sld [smem:[%s26008_s0 + %s23462_s7]]   ;;  %s23466_s7 = smov 42  }
  0x58   :  { %s23683_s9 = sld [smem:[%s26008_s0 + %s23463_s15]]   ;;  %s23467_s15 = smov 43  }
  0x59   :  { %s23688_s20 = sld [smem:[%s26008_s0 + %s23464_s22]]   ;;  %s23468_s22 = smov 44  }
  0x5a   :  { %s23693_s4 = sld [smem:[%s26008_s0 + %s23465_s28]]   ;;  %s23469_s28 = smov 45  }
  0x5d   :  { %26098 = sst [smem:[#allocation40_spill]] %s23678_s17 }
  0x5e   :  { %26099 = sst [smem:[#allocation41_spill]] %s23683_s9 }
  0x5f   :  { %26100 = sst [smem:[#allocation42_spill]] %s23688_s20 }
  0x60   :  { %26101 = sst [smem:[#allocation43_spill]] %s23693_s4 }
  0x61   :  { %s23698_s17 = sld [smem:[%s26008_s0 + %s23466_s7]]   ;;  %s23470_s7 = smov 46  }
  0x62   :  { %s23703_s9 = sld [smem:[%s26008_s0 + %s23467_s15]]   ;;  %s23471_s15 = smov 47  }
  0x63   :  { %s23708_s20 = sld [smem:[%s26008_s0 + %s23468_s22]]   ;;  %s23472_s22 = smov 48  }
  0x64   :  { %s23713_s4 = sld [smem:[%s26008_s0 + %s23469_s28]]   ;;  %s23473_s28 = smov 49  }
  0x67   :  { %26102 = sst [smem:[#allocation44_spill]] %s23698_s17 }
  0x68   :  { %26103 = sst [smem:[#allocation45_spill]] %s23703_s9 }
  0x69   :  { %26104 = sst [smem:[#allocation46_spill]] %s23708_s20 }
  0x6a   :  { %26105 = sst [smem:[#allocation47_spill]] %s23713_s4 }
  0x6b   :  { %s23718_s17 = sld [smem:[%s26008_s0 + %s23470_s7]]   ;;  %s23474_s7 = smov 50  }
  0x6c   :  { %s23723_s9 = sld [smem:[%s26008_s0 + %s23471_s15]]   ;;  %s23475_s15 = smov 51  }
  0x6d   :  { %s23728_s20 = sld [smem:[%s26008_s0 + %s23472_s22]]   ;;  %s23476_s22 = smov 52  }
  0x6e   :  { %s23733_s4 = sld [smem:[%s26008_s0 + %s23473_s28]]   ;;  %s23750_s28 = smov 0  }
  0x71   :  { %26106 = sst [smem:[#allocation48_spill]] %s23718_s17 }
  0x72   :  { %26107 = sst [smem:[#allocation49_spill]] %s23723_s9 }
  0x73   :  { %26108 = sst [smem:[#allocation50_spill]] %s23728_s20 }
  0x74   :  { %s23738_s17 = sld [smem:[%s26008_s0 + %s23474_s7]]  }
  0x75   :  { %s23743_s9 = sld [smem:[%s26008_s0 + %s23475_s15]]  }
  0x76   :  { %s23748_s20 = sld [smem:[%s26008_s0 + %s23476_s22]]  }
  0x7c   :  { %26109 = sst [smem:[#allocation51_spill]] %s23748_s20 }
  0x7d LB: > { %s26110_s30 = sld [smem:[#allocation14_spill]]  ;;  %s26111_s29 = sld [smem:[#allocation8_spill]]  ;;  %s23423_s28 = sphi %s23750_s28, %s115_s28  }
  0x7e   : > { %s26112_s27 = sld [smem:[#allocation18_spill]]  ;;  %s26113_s25 = sld [smem:[#allocation7_spill]] }
  0x7f   : > { %s26114_s24 = sld [smem:[#allocation13_spill]]  ;;  %s26115_s21 = sld [smem:[#allocation6_spill]] }
  0x80   : > { %s26116_s19 = sld [smem:[#allocation12_spill]]  ;;  %s26117_s14 = sld [smem:[#allocation11_spill]] }
  0x81   : > { %s26118_s12 = sld [smem:[#allocation16_spill]]  ;;  %s26119_s8 = sld [smem:[#allocation10_spill]] }
  0x82   : > { %s26120_s6 = sld [smem:[#allocation15_spill]]  ;;  %s26121_s3 = sld [smem:[#allocation9_spill]] }
  0x83   : > { %26122 = sst [smem:[#allocation52_spill]] %s23423_s28  ;;  %s18617_s1 = sadd.s32 4294967295, %s23423_s28  }
  0x84   : > { %p18621_p0 = scmp.ge.s32.totalorder %s23423_s28, 1  ;;  %p1440_p1 = scmp.lt.s32.totalorder %s23423_s28, 3 }
  0x86   : > { %p1441_p2 = pnand %p18621_p0, %p1440_p1 }
  0x88   : > { %1444 = sbr.rel (%p1441_p2) target bundleno = 14350 (0x380e), region = 228 }
  0x8f   : > { %v22636_v0 = vld [vmem:[%s26115_s21] sm:$0xff]   ;;  %v23477_v1 = vmov 0.0   ;;  %v22637_v2 = vld [vmem:[%s26115_s21 + $0x10] sm:$0xff]   ;;  %s26123_s5 = sld [smem:[#allocation2_spill]]  ;;  %v22638_v3 = vld [vmem:[%s26115_s21 + $0x8] sm:$0xff]   ;;  %vm23478_vm0 = vmmov 0  }
  0x90   : > { %21557 = vmatprep.subr.bf16.mxu0 %v23477_v1  ;;  %21565 = vmatprep.subr.bf16.mxu1 %v23477_v1  ;;  %p1571_p3 = scmp.lt.s32.totalorder %s18617_s1, 1  ;;  %v22639_v4 = vld [vmem:[%s26115_s21 + $0x18] sm:$0xff]   ;;  %v22640_v5 = vld [vmem:[%s26115_s21 + $0x20] sm:$0xff]   ;;  %v22641_v6 = vld [vmem:[%s26115_s21 + $0x30] sm:$0xff]   ;;  %vm1696_vm1 = vcmask 261120   ;;  %vm2368_vm2 = vcmask 64512  }
  0x91   : > { %21558 = vmatpush3.bf16.msra.mxu0 %v22636_v0  ;;  %21561 = vmatprep.mubr.msk.bf16.mxu0 %vm23478_vm0, %v23477_v1  ;;  %v22642_v9 = vld [vmem:[%s26115_s21 + $0x28] sm:$0xff]   ;;  %v22643_v10 = vld [vmem:[%s26115_s21 + $0x38] sm:$0xff]   ;;  %v22644_v11 = vld [vmem:[%s26113_s25] sm:$0xff]   ;;  %vm2622_vm3 = vcmask 1043456   ;;  %s26125_s13 = sld [smem:[#allocation4_spill]]  ;;  %s26126_s10 = sld [smem:[#allocation17_spill]] }
  0x92   : > { %21566 = vmatpush3.bf16.msra.mxu1 %v22637_v2  ;;  %21559 = vmatprep.subr.bf16.mxu0 %v23477_v1  ;;  %s26166_s1 = smov (!%p1571_p3, %s18617_s1), 1  ;;  %v22645_v12 = vld [vmem:[%s26113_s25 + $0x10] sm:$0xff]   ;;  %v22646_v13 = vld [vmem:[%s26113_s25 + $0x8] sm:$0xff]   ;;  %v22647_v14 = vld [vmem:[%s26113_s25 + $0x18] sm:$0xff]   ;;  %s26127_s11 = sld [smem:[#allocation19_spill]] }
  0x93   : > { %21567 = vmatprep.subr.bf16.mxu1 %v23477_v1  ;;  %21569 = vmatprep.mubr.msk.bf16.mxu1 %vm23478_vm0, %v23477_v1  ;;  %s23773_s0 = sshll.u32 %s26166_s1, 3  ;;  %v22648_v15 = vld [vmem:[%s26113_s25 + $0x20] sm:$0xff]   ;;  %v22649_v16 = vld [vmem:[%s26113_s25 + $0x30] sm:$0xff]   ;;  %v22650_v17 = vld [vmem:[%s26113_s25 + $0x28] sm:$0xff]   ;;  %s26128_s15 = sld [smem:[#allocation20_spill]] }
  0x94   : > { %26124 = sst [smem:[#allocation53_spill]] %s23773_s0  ;;  %v22651_v18 = vld [vmem:[%s26113_s25 + $0x38] sm:$0xff]   ;;  %v22652_v19 = vld [vmem:[%s26111_s29] sm:$0xff]   ;;  %v22653_v20 = vld [vmem:[%s26111_s29 + $0x10] sm:$0xff]   ;;  %s26130_s18 = sld [smem:[#allocation24_spill]] }
  0x95   : > { %21560 = vmatpush3.bf16.msra.mxu0 %v22638_v3  ;;  %s23778_s2 = scalar_lea.vmem %s26123_s5, %s23773_s0  ;;  %v22654_v21 = vld [vmem:[%s26111_s29 + $0x8] sm:$0xff]   ;;  %v22655_v22 = vld [vmem:[%s26111_s29 + $0x18] sm:$0xff]   ;;  %v22656_v23 = vld [vmem:[%s26111_s29 + $0x20] sm:$0xff]   ;;  %s26129_s16 = sld [smem:[#allocation21_spill]] }
  0x96   : > { %21568 = vmatpush3.bf16.msra.mxu1 %v22639_v4  ;;  %21573 = vmatprep.subr.bf16.mxu0 %v23477_v1  ;;  %v1593_v7 = vld [vmem:[%s23778_s2] sm:$0xff]  ;;  %v22657_v24 = vld [vmem:[%s26111_s29 + $0x30] sm:$0xff]   ;;  %v22658_v25 = vld [vmem:[%s26111_s29 + $0x28] sm:$0xff]   ;;  %s26131_s22 = sld [smem:[#allocation3_spill]]  ;;  %s26132_s26 = sld [smem:[#allocation25_spill]] }
  0x97   : > { %21581 = vmatprep.subr.bf16.mxu1 %v23477_v1  ;;  %v23784_v8 = vpack.c.bf16 %v1593_v7, %v1593_v7  ;;  %v22659_v26 = vld [vmem:[%s26111_s29 + $0x38] sm:$0xff]   ;;  %v18642_v43 = vld [vmem:[%s26119_s8] ss:$0 sm:$0xff]  ;;  %v18643_v44 = vld [vmem:[%s26119_s8 + $0x1] ss:$0 sm:$0xff]  ;;  %s23912_s7 = scalar_lea.vmem %s26125_s13, %s26166_s1  ;;  %s26133_s1 = sld [smem:[#allocation26_spill]] }
  0x98   : > { %v18626_v51 = vld [vmem:[%s26121_s3] ss:$0 sm:$0xff]  ;;  %v18627_v52 = vld [vmem:[%s26121_s3 + $0x1] ss:$0 sm:$0xff]  ;;  %v18644_v59 = vld [vmem:[%s26119_s8 + $0x2] ss:$0 sm:$0xff] }
  0x99   : > { %21562 = vmatmul.mubr.msk.bf16.vlgmr.msra.gmra.mrb[0].mxu0 %vm1696_vm1, %v23784_v8  ;;  %21570 = vmatmul.mubr.msk.bf16.vlgmr.msra.gmra.mrb[0].mxu1 %vm1696_vm1, %v23784_v8  ;;  %v18645_v60 = vld [vmem:[%s26119_s8 + $0x3] ss:$0 sm:$0xff]  ;;  %s26139_s5 = sld [smem:[#allocation31_spill]]  ;;  %s26158_s28 = sld [smem:[#allocation48_spill]] }
  0x9a   : > { %21574 = vmatpush3.bf16.msra.mxu0 %v22640_v5  ;;  %21582 = vmatpush3.bf16.msra.mxu1 %v22641_v6  ;;  %s26145_s13 = sld [smem:[#allocation23_spill]] }
  0x9b   : > { %21575 = vmatprep.subr.bf16.mxu0 %v23477_v1  ;;  %21583 = vmatprep.subr.bf16.mxu1 %v23477_v1 }
  0x9c   : > { %21577 = vmatprep.mubr.msk.bf16.mxu0 %vm23478_vm0, %v23477_v1  ;;  %21585 = vmatprep.mubr.msk.bf16.mxu1 %vm23478_vm0, %v23477_v1  ;;  %s1578_s23 = scalar_lea.vmem %s26131_s22, %s23773_s0  ;;  %s26136_s22 = sld [smem:[#allocation29_spill]] }
  0x9e   : > { %21576 = vmatpush3.bf16.msra.mxu0 %v22642_v9  ;;  %21584 = vmatpush3.bf16.msra.mxu1 %v22643_v10  ;;  %v18629_v9 = vld [vmem:[%s26121_s3 + $0x3] ss:$0 sm:$0xff] }
  0x9f   : > { %21589 = vmatprep.subr.bf16.mxu0 %v23477_v1  ;;  %21597 = vmatprep.subr.bf16.mxu1 %v23477_v1  ;;  %s26159_s20 = smov %s26158_s28 }
  0xa1   : > { %21578 = vmatmul.mubr.msk.bf16.vlgmr.msra.gmra.mrb[4].mxu0 %vm1696_vm1, %v23784_v8  ;;  %21586 = vmatmul.mubr.msk.bf16.vlgmr.msra.gmra.mrb[4].mxu1 %vm1696_vm1, %v23784_v8 }
  0xa2   : > { %21590 = vmatpush3.bf16.msra.mxu0 %v22644_v11  ;;  %21598 = vmatpush3.bf16.msra.mxu1 %v22645_v12 }
  0xa3   : > { %21591 = vmatprep.subr.bf16.mxu0 %v23477_v1  ;;  %21599 = vmatprep.subr.bf16.mxu1 %v23477_v1 }
  0xa4   : > { %21593 = vmatprep.mubr.msk.bf16.mxu0 %vm23478_vm0, %v23477_v1  ;;  %21601 = vmatprep.mubr.msk.bf16.mxu1 %vm23478_vm0, %v23477_v1 }
  0xa6   : > { %21592 = vmatpush3.bf16.msra.mxu0 %v22646_v13  ;;  %21600 = vmatpush3.bf16.msra.mxu1 %v22647_v14 }
  0xa7   : > { %21605 = vmatprep.subr.bf16.mxu0 %v23477_v1  ;;  %21613 = vmatprep.subr.bf16.mxu1 %v23477_v1 }
  0xa9   : > { %21594 = vmatmul.mubr.msk.bf16.vlgmr.msra.gmra.mrb[8].mxu0 %vm1696_vm1, %v23784_v8  ;;  %21602 = vmatmul.mubr.msk.bf16.vlgmr.msra.gmra.mrb[8].mxu1 %vm1696_vm1, %v23784_v8 }
  0xaa   : > { %21606 = vmatpush3.bf16.msra.mxu0 %v22648_v15  ;;  %21614 = vmatpush3.bf16.msra.mxu1 %v22649_v16 }
  0xab   : > { %21607 = vmatprep.subr.bf16.mxu0 %v23477_v1  ;;  %21615 = vmatprep.subr.bf16.mxu1 %v23477_v1 }
  0xac   : > { %21609 = vmatprep.mubr.msk.bf16.mxu0 %vm23478_vm0, %v23477_v1  ;;  %21617 = vmatprep.mubr.msk.bf16.mxu1 %vm23478_vm0, %v23477_v1 }
  0xae   : > { %21608 = vmatpush3.bf16.msra.mxu0 %v22650_v17  ;;  %21616 = vmatpush3.bf16.msra.mxu1 %v22651_v18 }
  0xaf   : > { %21621 = vmatprep.subr.bf16.mxu0 %v23477_v1  ;;  %21629 = vmatprep.subr.bf16.mxu1 %v23477_v1 }
  0xb1   : > { %21610 = vmatmul.mubr.msk.bf16.vlgmr.msra.gmra.mrb[12].mxu0 %vm1696_vm1, %v23784_v8  ;;  %21618 = vmatmul.mubr.msk.bf16.vlgmr.msra.gmra.mrb[12].mxu1 %vm1696_vm1, %v23784_v8 }
  0xb2   : > { %21622 = vmatpush3.bf16.msra.mxu0 %v22652_v19  ;;  %21625 = vmatprep.mubr.msk.bf16.mxu0 %vm23478_vm0, %v23477_v1 }
  0xb3   : > { %21623 = vmatprep.subr.bf16.mxu0 %v23477_v1  ;;  %21633 = vmatprep.mubr.msk.bf16.mxu1 %vm23478_vm0, %v23477_v1 }
  0xb4   : > { %21630 = vmatpush3.bf16.msra.mxu1 %v22653_v20 }
  0xb5   : > { %21631 = vmatprep.subr.bf16.mxu1 %v23477_v1 }
  0xb6   : > { %21624 = vmatpush3.bf16.msra.mxu0 %v22654_v21 }
  0xb7   : > { %21637 = vmatprep.subr.bf16.mxu0 %v23477_v1 }
  0xb8   : > { %21632 = vmatpush3.bf16.msra.mxu1 %v22655_v22 }
  0xb9   : > { %21626 = vmatmul.mubr.msk.bf16.vlgmr.msra.gmra.mrb[16].mxu0 %vm1696_vm1, %v23784_v8  ;;  %21645 = vmatprep.subr.bf16.mxu1 %v23477_v1 }
  0xba   : > { %21641 = vmatprep.mubr.msk.bf16.mxu0 %vm23478_vm0, %v23477_v1  ;;  %21638 = vmatpush3.bf16.msra.mxu0 %v22656_v23 }
  0xbb   : > { %21634 = vmatmul.mubr.msk.bf16.vlgmr.msra.gmra.mrb[16].mxu1 %vm1696_vm1, %v23784_v8  ;;  %21639 = vmatprep.subr.bf16.mxu0 %v23477_v1 }
  0xbc   : > { %21646 = vmatpush3.bf16.msra.mxu1 %v22657_v24  ;;  %21649 = vmatprep.mubr.msk.bf16.mxu1 %vm23478_vm0, %v23477_v1  ;;  %v18658_v24 = vld [vmem:[%s26117_s14] ss:$0 sm:$0xff] }
  0xbd   : > { %21647 = vmatprep.subr.bf16.mxu1 %v23477_v1 }
  0xbe   : > { %21640 = vmatpush3.bf16.msra.mxu0 %v22658_v25  ;;  %v18659_v25 = vld [vmem:[%s26117_s14 + $0x1] ss:$0 sm:$0xff] }
  0xbf   : > { %21653 = vmatprep.subr.bf16.mxu0 %v23477_v1 }
  0xc0   : > { %21648 = vmatpush3.bf16.msra.mxu1 %v22659_v26 }
  0xc1   : > { %21659 = vmatprep.subr.bf16.mxu1 %v23477_v1  ;;  %21642 = vmatmul.mubr.msk.bf16.vlgmr.msra.gmra.mrb[20].mxu0 %vm1696_vm1, %v23784_v8 }
  0xc2   : > { %21655 = vmatprep.mubr.msk.bf16.mxu0 %vm23478_vm0, %v23477_v1 }
  0xc3   : > { %21650 = vmatmul.mubr.msk.bf16.vlgmr.msra.gmra.mrb[20].mxu1 %vm1696_vm1, %v23784_v8  ;;  %v18628_v8 = vld [vmem:[%s26121_s3 + $0x2] ss:$0 sm:$0xff] }
  0xc4   : > { %21661 = vmatprep.mubr.msk.bf16.mxu1 %vm23478_vm0, %v23477_v1 }
 0x16c   : > { %v1734_v27 = vpop.f32.mrb[0].mxu0  ;;  %v1786_v28 = vpop.f32.mrb[0].mxu1 }
 0x16d   : > { %v21563_v29 = vpop.f32.mrb[1].mxu0  ;;  %v21571_v30 = vpop.f32.mrb[1].mxu1  ;;  %v1735_v63 = vadd.f32 %v18626_v51, %v1734_v27  ;;  %v1787_v0 = vadd.f32 %v18627_v52, %v1786_v28 }
 0x16e   : > { %v1737_v31 = vpop.f32.mrb[2].mxu0  ;;  %v1789_v32 = vpop.f32.mrb[2].mxu1 }
 0x16f   : > { %v21564_v33 = vpop.f32.mrb[3].mxu0  ;;  %v21572_v34 = vpop.f32.mrb[3].mxu1  ;;  %v2360_v12 = vpack.c.bf16 %v1735_v63, %v1735_v63  ;;  %v2361_v13 = vpack.c.bf16 %v1787_v0, %v1787_v0 }
 0x174   : > { %v1838_v35 = vpop.f32.mrb[4].mxu0  ;;  %v1890_v36 = vpop.f32.mrb[4].mxu1 }
 0x175   : > { %v21579_v37 = vpop.f32.mrb[5].mxu0  ;;  %v21587_v38 = vpop.f32.mrb[5].mxu1  ;;  %v1839_v20 = vadd.f32 %v18628_v8, %v1838_v35  ;;  %v1891_v21 = vadd.f32 %v18629_v9, %v1890_v36 }
 0x176   : > { %v1841_v39 = vpop.f32.mrb[6].mxu0  ;;  %v1893_v40 = vpop.f32.mrb[6].mxu1 }
 0x177   : > { %v21580_v41 = vpop.f32.mrb[7].mxu0  ;;  %v21588_v42 = vpop.f32.mrb[7].mxu1  ;;  %v2362_v22 = vpack.c.bf16 %v1839_v20, %v1839_v20  ;;  %v2363_v23 = vpack.c.bf16 %v1891_v21, %v1891_v21 }
 0x17c   : > { %v1966_v45 = vpop.f32.mrb[8].mxu0  ;;  %v2018_v46 = vpop.f32.mrb[8].mxu1 }
 0x17d   : > { %v1967_v47 = vadd.f32 %v18642_v43, %v1966_v45  ;;  %v2019_v48 = vadd.f32 %v18643_v44, %v2018_v46  ;;  %v21595_v49 = vpop.f32.mrb[9].mxu0  ;;  %v21603_v50 = vpop.f32.mrb[9].mxu1 }
 0x17e   : > { %v1969_v53 = vpop.f32.mrb[10].mxu0  ;;  %v2021_v54 = vpop.f32.mrb[10].mxu1  ;;  %v18678_v50 = vld [vmem:[%s23912_s7] ss:$0 sm:$0xff] }
 0x17f   : > { %v2364_v55 = vpack.c.bf16 %v1967_v47, %v1967_v47  ;;  %v2365_v56 = vpack.c.bf16 %v2019_v48, %v2019_v48  ;;  %v21596_v57 = vpop.f32.mrb[11].mxu0  ;;  %v21604_v58 = vpop.f32.mrb[11].mxu1 }
 0x181   : > { %v2373_v61 = vsel %vm2368_vm2, %v2364_v55, 0  ;;  %v2419_v62 = vsel %vm2368_vm2, %v2365_v56, 0 }
 0x182   : > { %21654 = vmatpush3.bf16.xpose.msra.mxu0 %v2373_v61  ;;  %21660 = vmatpush3.bf16.xpose.msra.mxu1 %v2419_v62 }
 0x183   : > { %21665 = vmatprep.subr.bf16.mxu0 %v23477_v1  ;;  %21671 = vmatprep.subr.bf16.mxu1 %v23477_v1 }
 0x184   : > { %v2070_v2 = vpop.f32.mrb[12].mxu0  ;;  %v2122_v3 = vpop.f32.mrb[12].mxu1 }
 0x185   : > { %v2071_v4 = vadd.f32 %v18644_v59, %v2070_v2  ;;  %v2123_v5 = vadd.f32 %v18645_v60, %v2122_v3  ;;  %v21611_v6 = vpop.f32.mrb[13].mxu0  ;;  %v21619_v7 = vpop.f32.mrb[13].mxu1 }
 0x186   : > { %v2073_v10 = vpop.f32.mrb[14].mxu0  ;;  %v2125_v11 = vpop.f32.mrb[14].mxu1 }
 0x187   : > { %v2366_v14 = vpack.c.bf16 %v2071_v4, %v2071_v4  ;;  %v2367_v15 = vpack.c.bf16 %v2123_v5, %v2123_v5  ;;  %v21612_v16 = vpop.f32.mrb[15].mxu0  ;;  %v21620_v17 = vpop.f32.mrb[15].mxu1 }
 0x189   : > { %21656 = vmatmul.mubr.msk.bf16.vlgmr.msra.gmra.mrb[24].mxu0 %vm2368_vm2, %v2360_v12  ;;  %21662 = vmatmul.mubr.msk.bf16.vlgmr.msra.gmra.mrb[24].mxu1 %vm2368_vm2, %v2361_v13  ;;  %v2465_v18 = vsel %vm2368_vm2, %v2366_v14, 0  ;;  %v2511_v19 = vsel %vm2368_vm2, %v2367_v15, 0 }
 0x18a   : > { %21666 = vmatpush3.bf16.xpose.msra.mxu0 %v2465_v18  ;;  %21672 = vmatpush3.bf16.xpose.msra.mxu1 %v2511_v19 }
 0x18b   : > { %21667 = vmatprep.mubr.msk.bf16.mxu0 %vm23478_vm0, %v23477_v1  ;;  %21673 = vmatprep.mubr.msk.bf16.mxu1 %vm23478_vm0, %v23477_v1 }
 0x18c   : > { %21677 = vmatprep.subr.bf16.mxu0 %v23477_v1  ;;  %21683 = vmatprep.subr.bf16.mxu1 %v23477_v1  ;;  %v2198_v26 = vpop.f32.mrb[16].mxu0 }
 0x18d   : > { %v2199_v27 = vadd.f32 %v18658_v24, %v2198_v26  ;;  %v21627_v28 = vpop.f32.mrb[17].mxu0 }
 0x18e   : > { %v2201_v29 = vpop.f32.mrb[18].mxu0  ;;  %v2250_v30 = vpop.f32.mrb[16].mxu1 }
 0x18f   : > { %v2615_v31 = vpack.c.bf16 %v2199_v27, %v2199_v27  ;;  %v21628_v32 = vpop.f32.mrb[19].mxu0  ;;  %v2251_v33 = vadd.f32 %v18659_v25, %v2250_v30  ;;  %v21635_v34 = vpop.f32.mrb[17].mxu1 }
 0x190   : > { %v2253_v35 = vpop.f32.mrb[18].mxu1 }
 0x191   : > { %21668 = vmatmul.mubr.msk.bf16.vlgmr.msra.gmra.mrb[28].mxu0 %vm2368_vm2, %v2362_v22  ;;  %21674 = vmatmul.mubr.msk.bf16.vlgmr.msra.gmra.mrb[28].mxu1 %vm2368_vm2, %v2363_v23  ;;  %v2616_v36 = vpack.c.bf16 %v2251_v33, %v2251_v33  ;;  %v21636_v37 = vpop.f32.mrb[19].mxu1  ;;  %v2624_v38 = vsel %vm2622_vm3, %v2615_v31, 0 }
 0x192   : > { %21679 = vmatprep.mubr.msk.bf16.mxu0 %vm23478_vm0, %v23477_v1  ;;  %21685 = vmatprep.mubr.msk.bf16.mxu1 %vm23478_vm0, %v23477_v1 }
 0x193   : > { %21678 = vmatpush3.bf16.msra.mxu0 %v2624_v38  ;;  %v2670_v39 = vsel %vm2622_vm3, %v2616_v36, 0  ;;  %v18660_v36 = vld [vmem:[%s26117_s14 + $0x2] ss:$0 sm:$0xff] }
 0x194   : > { %21689 = vmatprep.subr.bf16.mxu0 %v23477_v1  ;;  %21684 = vmatpush3.bf16.msra.mxu1 %v2670_v39  ;;  %v23906_v40 = vpop.f32.mrb[20].mxu0  ;;  %v18661_v39 = vld [vmem:[%s26117_s14 + $0x3] ss:$0 sm:$0xff] }
 0x195   : > { %21695 = vmatprep.subr.bf16.mxu1 %v23477_v1  ;;  %v21643_v42 = vpop.f32.mrb[21].mxu0  ;;  %v2303_v37 = vadd.f32 %v18660_v36, %v23906_v40 }
 0x196   : > { %v23908_v41 = vpop.f32.mrb[20].mxu1  ;;  %v2305_v44 = vpop.f32.mrb[22].mxu0 }
 0x197   : > { %v21651_v43 = vpop.f32.mrb[21].mxu1  ;;  %v21644_v46 = vpop.f32.mrb[23].mxu0  ;;  %v2355_v44 = vadd.f32 %v18661_v39, %v23908_v41  ;;  %v1654_v41 = vld [vmem:[%s26116_s19] sm:$0xf] }
 0x198   : > { %v2357_v45 = vpop.f32.mrb[22].mxu1  ;;  %v2617_v43 = vpack.c.bf16 %v2303_v37, %v2303_v37 }
 0x199   : > { %v21652_v47 = vpop.f32.mrb[23].mxu1 }
 0x25c   : > { %v2409_v48 = vpop.f32.mrb[24].mxu0  ;;  %v2455_v49 = vpop.f32.mrb[24].mxu1 }
 0x25d   : > { %v2553_v51 = vmul.f32 0.35355338, %v2409_v48  ;;  %v2554_v52 = vmul.f32 0.35355338, %v2455_v49  ;;  %v21657_v53 = vpop.f32.mrb[25].mxu0  ;;  %v21663_v54 = vpop.f32.mrb[25].mxu1  ;;  %v2618_v49 = vpack.c.bf16 %v2355_v44, %v2355_v44 }
 0x25e   : > { %v2412_v55 = vpop.f32.mrb[26].mxu0  ;;  %v2458_v56 = vpop.f32.mrb[26].mxu1 }
 0x25f   : > { %v21658_v57 = vpop.f32.mrb[27].mxu0  ;;  %v21664_v58 = vpop.f32.mrb[27].mxu1  ;;  %v2563_v59 = vadd.f32 %v18678_v50, %v2553_v51  ;;  %v2564_v60 = vadd.f32 %v18678_v50, %v2554_v52  ;;  %v2716_v51 = vsel %vm2622_vm3, %v2617_v43, 0  ;;  %v2762_v54 = vsel %vm2622_vm3, %v2618_v49, 0 }
 0x260   : > { %v2812_v56 = vsel %vm2622_vm3, %v1654_v41, 0 }
 0x261   : > { %v2567_v61 = vsel %vm2368_vm2, %v2563_v59, -inf  ;;  %v2570_v0 = vsel %vm2368_vm2, %v2564_v60, -inf }
 0x262   : > { %2568 = vmax.xlane.f32.xlu0 %v2567_v61 }
 0x264   : > { %v2501_v62 = vpop.f32.mrb[28].mxu0  ;;  %v2547_v63 = vpop.f32.mrb[28].mxu1 }
 0x265   : > { %v2555_v2 = vmul.f32 0.35355338, %v2501_v62  ;;  %v2556_v3 = vmul.f32 0.35355338, %v2547_v63  ;;  %v21669_v4 = vpop.f32.mrb[29].mxu0  ;;  %v21675_v5 = vpop.f32.mrb[29].mxu1 }
 0x266   : > { %v2550_v6 = vpop.f32.mrb[30].mxu1  ;;  %2571 = vmax.xlane.f32.xlu0 %v2570_v0  ;;  %v2504_v7 = vpop.f32.mrb[30].mxu0  ;;  %v1656_v62 = vld [vmem:[%s26116_s19 + $0x8] sm:$0xf]  ;;  %v1657_v5 = vld [vmem:[%s26116_s19 + $0xc] sm:$0xf] }
 0x267   : > { %v21670_v8 = vpop.f32.mrb[31].mxu0  ;;  %v21676_v9 = vpop.f32.mrb[31].mxu1  ;;  %v2565_v10 = vadd.f32 %v18678_v50, %v2555_v2  ;;  %v2566_v12 = vadd.f32 %v18678_v50, %v2556_v3  ;;  %v2904_v3 = vsel %vm2622_vm3, %v1656_v62, 0 }
 0x269   : > { %v2573_v11 = vsel %vm2368_vm2, %v2565_v10, -inf  ;;  %v2576_v13 = vsel %vm2368_vm2, %v2566_v12, -inf }
 0x26a   : > { %2574 = vmax.xlane.f32.xlu1 %v2573_v11 }
 0x26e   : > { %2577 = vmax.xlane.f32.xlu1 %v2576_v13 }
 0x2ef   : > { %v2569_v14 = vpop.xlane.xlu0 %2568 }
 0x2f0   : > { %v2579_v15 = vsub.f32 %v2563_v59, %v2569_v14 }
 0x2f2   : > { %v2583_v16 = vmul.f32 1.442695, %v2579_v15 }
 0x2f3   : > { %v2572_v17 = vpop.xlane.xlu0 %2571 }
 0x2f4   : > { %23294 = vpow2.f32 %v2583_v16  ;;  %v2580_v18 = vsub.f32 %v2564_v60, %v2572_v17  ;;  %v1655_v60 = vld [vmem:[%s26116_s19 + $0x4] sm:$0xf] }
 0x2f5   : > { %v2858_v61 = vsel %vm2622_vm3, %v1655_v60, 0  ;;  %v3041_v60 = vld [vmem:[%s26118_s12 + $0x48] sm:$0xff] }
 0x2f6   : > { %v2585_v19 = vmul.f32 1.442695, %v2580_v18 }
 0x2f7   : > { %v2575_v20 = vpop.xlane.xlu1 %2574 }
 0x2f8   : > { %23296 = vpow2.f32 %v2585_v19  ;;  %v2581_v21 = vsub.f32 %v2565_v10, %v2575_v20  ;;  %v2950_v10 = vsel %vm2622_vm3, %v1657_v5, 0  ;;  %v3045_v5 = vld [vmem:[%s26118_s12 + $0xc8] sm:$0xff] }
 0x2fa   : > { %v2587_v22 = vmul.f32 1.442695, %v2581_v21 }
 0x2fb   : > { %v2578_v23 = vpop.xlane.xlu1 %2577 }
 0x2fc   : > { %23298 = vpow2.f32 %v2587_v22  ;;  %v2582_v24 = vsub.f32 %v2566_v12, %v2578_v23 }
 0x2fe   : > { %v23295_v25 = vpop.eup %23294  ;;  %v2589_v26 = vmul.f32 1.442695, %v2582_v24 }
 0x2ff   : > { %v2591_v27 = vsel %vm2368_vm2, %v23295_v25, 0.0 }
 0x300   : > { %23300 = vpow2.f32 %v2589_v26  ;;  %2592 = vadd.xlane.f32.xlu0 %v2591_v27 }
 0x302   : > { %v23297_v28 = vpop.eup %23296 }
 0x303   : > { %v2594_v29 = vsel %vm2368_vm2, %v23297_v28, 0.0 }
 0x304   : > { %2595 = vadd.xlane.f32.xlu1 %v2594_v29 }
 0x306   : > { %v23299_v30 = vpop.eup %23298 }
 0x307   : > { %v2597_v31 = vsel %vm2368_vm2, %v23299_v30, 0.0 }
 0x308   : > { %2598 = vadd.xlane.f32.xlu0 %v2597_v31 }
 0x30a   : > { %v23301_v32 = vpop.eup %23300 }
 0x30b   : > { %v2600_v33 = vsel %vm2368_vm2, %v23301_v32, 0.0 }
 0x30c   : > { %2601 = vadd.xlane.f32.xlu1 %v2600_v33 }
 0x38d   : > { %v2593_v34 = vpop.xlane.xlu0 %2592 }
 0x38e   : > { %23302 = vrcp.f32 %v2593_v34 }
 0x391   : > { %v2596_v35 = vpop.xlane.xlu1 %2595 }
 0x392   : > { %23304 = vrcp.f32 %v2596_v35 }
 0x395   : > { %v2599_v38 = vpop.xlane.xlu0 %2598 }
 0x396   : > { %23306 = vrcp.f32 %v2599_v38 }
 0x398   : > { %v23303_v42 = vpop.eup %23302 }
 0x399   : > { %v2604_v45 = vmul.f32 %v23303_v42, %v23295_v25  ;;  %v2602_v46 = vpop.xlane.xlu1 %2601 }
 0x39a   : > { %23308 = vrcp.f32 %v2602_v46 }
 0x39b   : > { %v2611_v47 = vpack.c.bf16 %v2604_v45, %v2604_v45  ;;  %v18687_v45 = vld [vmem:[%s26114_s24] ss:$0 sm:$0xff] }
 0x39c   : > { %v23305_v48 = vpop.eup %23304 }
 0x39d   : > { %v2606_v50 = vmul.f32 %v23305_v48, %v23297_v28  ;;  %21680 = vmatmul.mubr.msk.bf16.vlgmr.msra.gmra.mrb[32].mxu0 %vm2368_vm2, %v2611_v47 }
 0x39e   : > { %21690 = vmatpush3.bf16.msra.mxu0 %v2716_v51  ;;  %21691 = vmatprep.mubr.msk.bf16.mxu0 %vm23478_vm0, %v23477_v1 }
 0x39f   : > { %v2612_v40 = vpack.c.bf16 %v2606_v50, %v2606_v50  ;;  %21701 = vmatprep.subr.bf16.mxu0 %v23477_v1  ;;  %v23414_v50 = vld [vmem:[%s23778_s2] sm:$0xff]  ;;  %s26134_s2 = sld [smem:[#allocation28_spill]] }
 0x3a0   : > { %v23307_v52 = vpop.eup %23306 }
 0x3a1   : > { %v2608_v53 = vmul.f32 %v23307_v52, %v23299_v30  ;;  %21686 = vmatmul.mubr.msk.bf16.vlgmr.msra.gmra.mrb[32].mxu1 %vm2368_vm2, %v2612_v40 }
 0x3a2   : > { %21696 = vmatpush3.bf16.msra.mxu1 %v2762_v54  ;;  %21697 = vmatprep.mubr.msk.bf16.mxu1 %vm23478_vm0, %v23477_v1 }
 0x3a3   : > { %v2613_v55 = vpack.c.bf16 %v2608_v53, %v2608_v53  ;;  %21707 = vmatprep.subr.bf16.mxu1 %v23477_v1 }
 0x3a4   : > { %v23309_v57 = vpop.eup %23308 }
 0x3a5   : > { %v2610_v58 = vmul.f32 %v23309_v57, %v23301_v32  ;;  %21692 = vmatmul.mubr.msk.bf16.vlgmr.msra.gmra.mrb[36].mxu0 %vm2368_vm2, %v2613_v55  ;;  %v3040_v57 = vld [vmem:[%s26118_s12 + $0x40] sm:$0xff] }
 0x3a6   : > { %21702 = vmatpush3.bf16.msra.mxu0 %v2812_v56  ;;  %21703 = vmatprep.mubr.msk.bf16.mxu0 %vm23478_vm0, %v23477_v1  ;;  %v3038_v56 = vld [vmem:[%s26118_s12] sm:$0xff] }
 0x3a7   : > { %v2614_v59 = vpack.c.bf16 %v2610_v58, %v2610_v58  ;;  %21713 = vmatprep.subr.bf16.mxu0 %v23477_v1  ;;  %v3039_v58 = vld [vmem:[%s26118_s12 + $0x8] sm:$0xff] }
 0x3a8   : > { %v18692_v62 = vcombine.low %v3039_v58, %v3041_v60 }
 0x3a9   : > { %21698 = vmatmul.mubr.msk.bf16.vlgmr.msra.gmra.mrb[36].mxu1 %vm2368_vm2, %v2614_v59  ;;  %v18691_v59 = vcombine.high %v3038_v56, %v3040_v57 }
 0x3aa   : > { %21709 = vmatprep.mubr.msk.bf16.mxu1 %vm23478_vm0, %v23477_v1  ;;  %21708 = vmatpush3.bf16.msra.mxu1 %v2858_v61  ;;  %v18690_v61 = vcombine.low %v3038_v56, %v3040_v57  ;;  %v22680_v56 = vld [vmem:[%s26112_s27 + $0x168] sm:$0xff]  }
 0x3ab   : > { %21719 = vmatprep.subr.bf16.mxu1 %v23477_v1  ;;  %v22681_v57 = vld [vmem:[%s26112_s27 + $0x1e8] sm:$0xff]  }
 0x470   : > { %v2660_v63 = vpop.f32.mrb[32].mxu0 }
 0x471   : > { %v2804_v0 = vpack.c.bf16 %v2660_v63, %v2660_v63  ;;  %v21681_v2 = vpop.f32.mrb[33].mxu0  ;;  %v18693_v63 = vcombine.high %v3039_v58, %v3041_v60  ;;  %v22682_v58 = vld [vmem:[%s26112_s27 + $0x128] sm:$0xff]   ;;  %v22684_v60 = vld [vmem:[%s26112_s27 + $0x170] sm:$0xff]  }
 0x472   : > { %v2663_v4 = vpop.f32.mrb[34].mxu0  ;;  %v3044_v2 = vld [vmem:[%s26118_s12 + $0xc0] sm:$0xff] }
 0x473   : > { %v21682_v6 = vpop.f32.mrb[35].mxu0  ;;  %21704 = vmatmul.mubr.msk.bf16.vlgmr.msra.gmra.mrb[40].mxu0 %vm2368_vm2, %v2804_v0  ;;  %v3042_v0 = vld [vmem:[%s26118_s12 + $0x80] sm:$0xff] }
 0x474   : > { %v2706_v7 = vpop.f32.mrb[32].mxu1  ;;  %21714 = vmatpush3.bf16.msra.mxu0 %v2904_v3  ;;  %21715 = vmatprep.mubr.msk.bf16.mxu0 %vm23478_vm0, %v23477_v1  ;;  %v3043_v3 = vld [vmem:[%s26118_s12 + $0x88] sm:$0xff]  ;;  %v18695_v4 = vcombine.high %v3042_v0, %v3044_v2  ;;  %v18694_v6 = vcombine.low %v3042_v0, %v3044_v2  ;;  %v22688_v0 = vld [vmem:[%s26112_s27 + $0x178] sm:$0xff]  }
 0x475   : > { %v2805_v8 = vpack.c.bf16 %v2706_v7, %v2706_v7  ;;  %v21687_v9 = vpop.f32.mrb[33].mxu1  ;;  %3111 = vmatprep.subr.bf16.mxu0 %v18691_v59  ;;  %v18696_v7 = vcombine.low %v3043_v3, %v3045_v5  ;;  %v22683_v59 = vld [vmem:[%s26112_s27 + $0x1a8] sm:$0xff]   ;;  %v22689_v2 = vld [vmem:[%s26112_s27 + $0x1f8] sm:$0xff]  }
 0x476   : > { %v2709_v11 = vpop.f32.mrb[34].mxu1  ;;  %v3265_v9 = vld [vmem:[%s26118_s12 + $0x10] sm:$0xff] }
 0x477   : > { %v21688_v12 = vpop.f32.mrb[35].mxu1  ;;  %21710 = vmatmul.mubr.msk.bf16.vlgmr.msra.gmra.mrb[40].mxu1 %vm2368_vm2, %v2805_v8  ;;  %v18697_v8 = vcombine.high %v3043_v3, %v3045_v5  ;;  %v3266_v11 = vld [vmem:[%s26118_s12 + $0x18] sm:$0xff]  ;;  %v22692_v5 = vld [vmem:[%s26112_s27 + $0x40] sm:$0xff]  }
 0x478   : > { %v2752_v13 = vpop.f32.mrb[36].mxu0  ;;  %21720 = vmatpush3.bf16.msra.mxu1 %v2950_v10  ;;  %21721 = vmatprep.mubr.msk.bf16.mxu1 %vm23478_vm0, %v23477_v1  ;;  %v3267_v10 = vld [vmem:[%s26118_s12 + $0x50] sm:$0xff]  ;;  %v23479_v12 = vmov 0   ;;  %v22690_v3 = vld [vmem:[%s26112_s27 + $0x138] sm:$0xff]  }
 0x479   : > { %v2806_v14 = vpack.c.bf16 %v2752_v13, %v2752_v13  ;;  %v21693_v15 = vpop.f32.mrb[37].mxu0  ;;  %3152 = vmatprep.subr.bf16.mxu1 %v18693_v63  ;;  %v18701_v13 = vcombine.high %v3265_v9, %v3267_v10  ;;  %v22687_v63 = vld [vmem:[%s26112_s27 + $0x1b0] sm:$0xff]  }
 0x47a   : > { %v2755_v16 = vpop.f32.mrb[38].mxu0  ;;  %v18700_v15 = vcombine.low %v3265_v9, %v3267_v10 }
 0x47b   : > { %v21694_v17 = vpop.f32.mrb[39].mxu0  ;;  %21716 = vmatmul.mubr.msk.bf16.vlgmr.msra.gmra.mrb[44].mxu0 %vm2368_vm2, %v2806_v14  ;;  %v3268_v14 = vld [vmem:[%s26118_s12 + $0x58] sm:$0xff] }
 0x47c   : > { %v2798_v18 = vpop.f32.mrb[36].mxu1  ;;  %3112 = vmatpush1.bf16.msra.mxu0 %v18690_v61  ;;  %3143 = vmatprep.mubr.bf16.mxu0 %v23479_v12  ;;  %v18702_v16 = vcombine.low %v3266_v11, %v3268_v14  ;;  %v18703_v17 = vcombine.high %v3266_v11, %v3268_v14  ;;  %v22685_v61 = vld [vmem:[%s26112_s27 + $0x1f0] sm:$0xff]  }
 0x47d   : > { %v2807_v19 = vpack.c.bf16 %v2798_v18, %v2798_v18  ;;  %v21699_v20 = vpop.f32.mrb[37].mxu1  ;;  %3113 = vmatprep.subr.bf16.mxu0 %v18695_v4  ;;  %v22691_v4 = vld [vmem:[%s26112_s27 + $0x1b8] sm:$0xff]  }
 0x47e   : > { %v2801_v21 = vpop.f32.mrb[38].mxu1 }
 0x47f   : > { %v21700_v22 = vpop.f32.mrb[39].mxu1  ;;  %21722 = vmatmul.mubr.msk.bf16.vlgmr.msra.gmra.mrb[44].mxu1 %vm2368_vm2, %v2807_v19 }
 0x480   : > { %3153 = vmatpush1.bf16.msra.mxu1 %v18692_v62  ;;  %3114 = vmatpush1.bf16.msra.mxu0 %v18694_v6  ;;  %v18688_v22 = vld [vmem:[%s26110_s30] ss:$0 sm:$0xff]  ;;  %v22686_v62 = vld [vmem:[%s26112_s27 + $0x130] sm:$0xff]  }
 0x481   : > { %3154 = vmatprep.subr.bf16.mxu1 %v18697_v8  ;;  %3184 = vmatprep.mubr.bf16.mxu1 %v23479_v12  ;;  %v22693_v6 = vld [vmem:[%s26112_s27 + $0xc0] sm:$0xff]  }
 0x482   : > { %3335 = vmatprep.subr.bf16.mxu0 %v18701_v13 }
 0x484   : > { %3155 = vmatpush1.bf16.msra.mxu1 %v18696_v7  ;;  %v3048_v7 = vlaneseq }
 0x485   : > { %3376 = vmatprep.subr.bf16.mxu1 %v18703_v17 }
 0x486   : > { %v3049_v8 = vshrl.u32 %v3048_v7, 7  ;;  %v22706_v7 = vld [vmem:[%s26112_s27 + $0x18] sm:$0xff]  }
 0x488   : > { %v24043_v11 = vsub.s32 1, %v3049_v8  ;;  %v24045_v14 = vsub.s32 3, %v3049_v8 }
 0x546   : > { %v2848_v23 = vpop.f32.mrb[40].mxu0 }
 0x547   : > { %v21705_v24 = vpop.f32.mrb[41].mxu0  ;;  %v2992_v28 = vsel %vm1696_vm1, %v2848_v23, 0.0 }
 0x548   : > { %v2851_v25 = vpop.f32.mrb[42].mxu0  ;;  %v18689_v24 = vld [vmem:[%s26120_s6] ss:$0 sm:$0xff] }
 0x549   : > { %v21706_v26 = vpop.f32.mrb[43].mxu0 }
 0x54a   : > { %v2894_v27 = vpop.f32.mrb[40].mxu1  ;;  %v3269_v26 = vld [vmem:[%s26118_s12 + $0x90] sm:$0xff] }
 0x54b   : > { %v2993_v29 = vsel %vm1696_vm1, %v2894_v27, 0.0  ;;  %v21711_v30 = vpop.f32.mrb[41].mxu1  ;;  %v3271_v27 = vld [vmem:[%s26118_s12 + $0xd0] sm:$0xff] }
 0x54c   : > { %v2994_v31 = vadd.f32 %v2993_v29, %v2992_v28  ;;  %v2897_v32 = vpop.f32.mrb[42].mxu1  ;;  %v3270_v28 = vld [vmem:[%s26118_s12 + $0x98] sm:$0xff] }
 0x54d   : > { %v21712_v33 = vpop.f32.mrb[43].mxu1  ;;  %v3272_v29 = vld [vmem:[%s26118_s12 + $0xd8] sm:$0xff]  ;;  %v18705_v32 = vcombine.high %v3269_v26, %v3271_v27 }
 0x54e   : > { %v2940_v34 = vpop.f32.mrb[44].mxu0  ;;  %v18707_v33 = vcombine.high %v3270_v28, %v3272_v29 }
 0x54f   : > { %v2995_v35 = vsel %vm1696_vm1, %v2940_v34, 0.0  ;;  %v21717_v36 = vpop.f32.mrb[45].mxu0  ;;  %v18704_v34 = vcombine.low %v3269_v26, %v3271_v27 }
 0x550   : > { %v2996_v37 = vadd.f32 %v2995_v35, %v2994_v31  ;;  %v2943_v38 = vpop.f32.mrb[46].mxu0  ;;  %v18706_v35 = vcombine.low %v3270_v28, %v3272_v29  ;;  %v22660_v36 = vld [vmem:[%s26112_s27 + $0x140] sm:$0xff]  }
 0x551   : > { %v21718_v39 = vpop.f32.mrb[47].mxu0  ;;  %v22662_v38 = vld [vmem:[%s26112_s27 + $0x100] sm:$0xff]  }
 0x552   : > { %v2986_v42 = vpop.f32.mrb[44].mxu1  ;;  %v22663_v39 = vld [vmem:[%s26112_s27 + $0x180] sm:$0xff]  }
 0x553   : > { %v2997_v43 = vsel %vm1696_vm1, %v2986_v42, 0.0  ;;  %v21723_v44 = vpop.f32.mrb[45].mxu1  ;;  %v22664_v42 = vld [vmem:[%s26112_s27 + $0x148] sm:$0xff]  }
 0x554   : > { %v2998_v46 = vadd.f32 %v2997_v43, %v2996_v37  ;;  %v2989_v47 = vpop.f32.mrb[46].mxu1  ;;  %v22661_v37 = vld [vmem:[%s26112_s27 + $0x1c0] sm:$0xff]   ;;  %v22665_v43 = vld [vmem:[%s26112_s27 + $0x1c8] sm:$0xff]  }
 0x555   : > { %v21724_v48 = vpop.f32.mrb[47].mxu1  ;;  %v22666_v44 = vld [vmem:[%s26112_s27 + $0x108] sm:$0xff]   ;;  %v22669_v47 = vld [vmem:[%s26112_s27 + $0x1d0] sm:$0xff]  }
 0x556   : > { %v3005_v49 = vadd.f32 %v18687_v45, %v2998_v46  ;;  %v22667_v45 = vld [vmem:[%s26112_s27 + $0x188] sm:$0xff]   ;;  %v22668_v46 = vld [vmem:[%s26112_s27 + $0x150] sm:$0xff]  }
 0x557   : > { %v22670_v48 = vld [vmem:[%s26112_s27 + $0x110] sm:$0xff]  }
 0x558   : > { %v3006_v51 = vadd.f32 %v23414_v50, %v3005_v49  ;;  %v22671_v49 = vld [vmem:[%s26112_s27 + $0x190] sm:$0xff]   ;;  %v22672_v50 = vld [vmem:[%s26112_s27 + $0x158] sm:$0xff]  }
 0x55a   : > { %v3009_v40 = vsel %vm1696_vm1, %v3006_v51, 0.0 }
 0x55b   : > { %3010 = vadd.xlane.f32.xlu0 %v3009_v40  ;;  %v22674_v40 = vld [vmem:[%s26112_s27 + $0x118] sm:$0xff]  }
 0x5e8   : > { %v3011_v52 = vpop.xlane.xlu0 %3010 }
 0x5e9   : > { %v3013_v41 = vmul.f32 0.03125, %v3011_v52  ;;  %v22675_v52 = vld [vmem:[%s26112_s27 + $0x198] sm:$0xff]  }
 0x5eb   : > { %v3014_v53 = vsub.f32 %v3006_v51, %v3013_v41  ;;  %v22673_v51 = vld [vmem:[%s26112_s27 + $0x1d8] sm:$0xff]   ;;  %v22676_v41 = vld [vmem:[%s26112_s27 + $0x160] sm:$0xff]  }
 0x5ed   : > { %v3015_v54 = vmul.f32 %v3014_v53, %v3014_v53 }
 0x5ef   : > { %v3016_v55 = vsel %vm1696_vm1, %v3015_v54, 0.0  ;;  %v22678_v54 = vld [vmem:[%s26112_s27 + $0x120] sm:$0xff]  }
 0x5f0   : > { %3017 = vadd.xlane.f32.xlu1 %v3016_v55  ;;  %v22679_v55 = vld [vmem:[%s26112_s27 + $0x1a0] sm:$0xff]  }
 0x67d   : > { %v3018_v18 = vpop.xlane.xlu1 %3017 }
 0x67e   : > { %v3019_v19 = vmul.f32 0.03125, %v3018_v18 }
 0x680   : > { %v3020_v20 = vadd.f32 1e-05, %v3019_v19  ;;  %v3273_v19 = vld [vmem:[%s26126_s10 + $0x4] sm:$0xf] }
 0x681   : > { %v3282_v28 = vrot.slane %v3273_v19, %v24043_v11  ;;  %v3290_v29 = vrot.slane %v3273_v19, %v24045_v14 }
 0x682   : > { %23310 = vrsqrt.f32 %v3020_v20  ;;  %v24051_v20 = vsub.s32 0, %v3049_v8 }
 0x684   : > { %v3278_v26 = vrot.slane %v3273_v19, %v24051_v20 }
 0x68c   : > { %v23311_v21 = vpop.eup %23310 }
 0x68d   : > { %v3022_v23 = vmul.f32 %v23311_v21, %v3014_v53  ;;  %v22677_v53 = vld [vmem:[%s26112_s27 + $0x1e0] sm:$0xff]   ;;  %v24053_v21 = vsub.s32 2, %v3049_v8  ;;  %v22707_v8 = vld [vmem:[%s26112_s27 + $0x98] sm:$0xff]  }
 0x68f   : > { %v3029_v25 = vmul.f32 %v18688_v22, %v3022_v23  ;;  %v3286_v27 = vrot.slane %v3273_v19, %v24053_v21  ;;  %v22712_v19 = vld [vmem:[%s26112_s27 + $0x68] sm:$0xff]  }
 0x691   : > { %v23989_v30 = vadd.f32 %v18689_v24, %v3029_v25 }
 0x693   : > { %v23993_v31 = vpack.c.bf16 %v23989_v30, %v23989_v30 }
 0x695   : > { %18698 = vmatmul.mubr.msk.bf16.vlgmr.msra.gmra.mrb[48].mxu0 %vm1696_vm1, %v23993_v31  ;;  %18699 = vmatmul.mubr.msk.bf16.vlgmr.msra.gmra.mrb[48].mxu1 %vm1696_vm1, %v23993_v31 }
 0x696   : > { %3336 = vmatpush1.bf16.msra.mxu0 %v18700_v15  ;;  %3377 = vmatpush1.bf16.msra.mxu1 %v18702_v16  ;;  %v24048_v16 = vld [vmem:[%s26126_s10] sm:$0xf] }
 0x697   : > { %3337 = vmatprep.subr.bf16.mxu0 %v18705_v32  ;;  %3378 = vmatprep.subr.bf16.mxu1 %v18707_v33  ;;  %v3055_v24 = vrot.slane %v24048_v16, %v24043_v11  ;;  %v3063_v25 = vrot.slane %v24048_v16, %v24045_v14 }
 0x698   : > { %3367 = vmatprep.mubr.bf16.mxu0 %v23479_v12  ;;  %3408 = vmatprep.mubr.bf16.mxu1 %v23479_v12 }
 0x69a   : > { %3338 = vmatpush1.bf16.msra.mxu0 %v18704_v34  ;;  %3379 = vmatpush1.bf16.msra.mxu1 %v18706_v35 }
 0x69b   : > { %20550 = vmatprep.subr.bf16.mxu0 %v22660_v36  ;;  %20572 = vmatprep.subr.bf16.mxu1 %v22661_v37 }
 0x69d   : > { %18708 = vmatmul.mubr.msk.bf16.vlgmr.msra.gmra.mrb[52].mxu0 %vm1696_vm1, %v23993_v31  ;;  %18709 = vmatmul.mubr.msk.bf16.vlgmr.msra.gmra.mrb[52].mxu1 %vm1696_vm1, %v23993_v31 }
 0x69e   : > { %20551 = vmatpush3.bf16.msra.mxu0 %v22662_v38  ;;  %20573 = vmatpush3.bf16.msra.mxu1 %v22663_v39 }
 0x69f   : > { %20552 = vmatprep.subr.bf16.mxu0 %v22664_v42  ;;  %20574 = vmatprep.subr.bf16.mxu1 %v22665_v43 }
 0x6a2   : > { %20553 = vmatpush3.bf16.msra.mxu0 %v22666_v44  ;;  %20575 = vmatpush3.bf16.msra.mxu1 %v22667_v45 }
 0x6a3   : > { %20554 = vmatprep.subr.bf16.mxu0 %v22668_v46  ;;  %20576 = vmatprep.subr.bf16.mxu1 %v22669_v47 }
 0x6a6   : > { %20555 = vmatpush3.bf16.msra.mxu0 %v22670_v48  ;;  %20577 = vmatpush3.bf16.msra.mxu1 %v22671_v49 }
 0x6a7   : > { %20556 = vmatprep.subr.bf16.mxu0 %v22672_v50  ;;  %20578 = vmatprep.subr.bf16.mxu1 %v22673_v51 }
 0x6aa   : > { %20557 = vmatpush3.bf16.msra.mxu0 %v22674_v40  ;;  %20579 = vmatpush3.bf16.msra.mxu1 %v22675_v52 }
 0x6ab   : > { %20558 = vmatprep.subr.bf16.mxu0 %v22676_v41  ;;  %20580 = vmatprep.subr.bf16.mxu1 %v22677_v53 }
 0x6ae   : > { %20559 = vmatpush3.bf16.msra.mxu0 %v22678_v54  ;;  %20581 = vmatpush3.bf16.msra.mxu1 %v22679_v55  ;;  %v22694_v54 = vld [vmem:[%s26112_s27] sm:$0xff]  }
 0x6af   : > { %20560 = vmatprep.subr.bf16.mxu0 %v22680_v56  ;;  %20582 = vmatprep.subr.bf16.mxu1 %v22681_v57  ;;  %v22695_v55 = vld [vmem:[%s26112_s27 + $0x80] sm:$0xff]  }
 0x6b2   : > { %20561 = vmatpush3.bf16.msra.mxu0 %v22682_v58  ;;  %20583 = vmatpush3.bf16.msra.mxu1 %v22683_v59  ;;  %v22696_v58 = vld [vmem:[%s26112_s27 + $0x48] sm:$0xff]  }
 0x6b3   : > { %20562 = vmatprep.subr.bf16.mxu0 %v22684_v60  ;;  %20584 = vmatprep.subr.bf16.mxu1 %v22685_v61  ;;  %v22697_v59 = vld [vmem:[%s26112_s27 + $0xc8] sm:$0xff]  }
 0x6b6   : > { %20563 = vmatpush3.bf16.msra.mxu0 %v22686_v62  ;;  %20585 = vmatpush3.bf16.msra.mxu1 %v22687_v63  ;;  %v22698_v62 = vld [vmem:[%s26112_s27 + $0x8] sm:$0xff]  }
 0x6b7   : > { %20564 = vmatprep.subr.bf16.mxu0 %v22688_v0  ;;  %20586 = vmatprep.subr.bf16.mxu1 %v22689_v2  ;;  %v22699_v63 = vld [vmem:[%s26112_s27 + $0x88] sm:$0xff]   ;;  %v22700_v0 = vld [vmem:[%s26112_s27 + $0x50] sm:$0xff]  }
 0x6b8   : > { %v22701_v2 = vld [vmem:[%s26112_s27 + $0xd0] sm:$0xff]  }
 0x6ba   : > { %20565 = vmatpush3.bf16.msra.mxu0 %v22690_v3  ;;  %20587 = vmatpush3.bf16.msra.mxu1 %v22691_v4  ;;  %v22702_v3 = vld [vmem:[%s26112_s27 + $0x10] sm:$0xff]  }
 0x6bb   : > { %20594 = vmatprep.subr.bf16.mxu0 %v22692_v5  ;;  %20616 = vmatprep.subr.bf16.mxu1 %v22693_v6  ;;  %v22703_v4 = vld [vmem:[%s26112_s27 + $0x90] sm:$0xff]   ;;  %v22704_v5 = vld [vmem:[%s26112_s27 + $0x58] sm:$0xff]  }
 0x6bc   : > { %v22705_v6 = vld [vmem:[%s26112_s27 + $0xd8] sm:$0xff]  }
 0x768   : > { %v24039_v9 = vpop.f32.mrb[48].mxu0  ;;  %v24041_v10 = vpop.f32.mrb[48].mxu1 }
 0x769   : > { %v3147_v13 = vpop.f32.mrb[49].mxu0  ;;  %v3188_v15 = vpop.f32.mrb[49].mxu1 }
 0x76a   : > { %v3149_v17 = vpop.f32.mrb[50].mxu0  ;;  %v3190_v18 = vpop.f32.mrb[50].mxu1  ;;  %v3148_v34 = vadd.f32 %v3147_v13, %v3055_v24  ;;  %v3189_v35 = vadd.f32 %v3188_v15, %v3063_v25  ;;  %v22708_v13 = vld [vmem:[%s26112_s27 + $0x60] sm:$0xff]   ;;  %v22715_v24 = vld [vmem:[%s26112_s27 + $0xa8] sm:$0xff]   ;;  %v3051_v25 = vrot.slane %v24048_v16, %v24051_v20 }
 0x76b   : > { %v3150_v22 = vpop.f32.mrb[51].mxu0  ;;  %v3191_v23 = vpop.f32.mrb[51].mxu1  ;;  %v22709_v15 = vld [vmem:[%s26112_s27 + $0xe0] sm:$0xff]  }
 0x76c   : > { %v3194_v40 = vmax.f32 %v3148_v34, 0.0  ;;  %v3196_v52 = vmax.f32 %v3189_v35, 0.0  ;;  %v22710_v17 = vld [vmem:[%s26112_s27 + $0x20] sm:$0xff]   ;;  %v22713_v22 = vld [vmem:[%s26112_s27 + $0xe8] sm:$0xff]   ;;  %v22721_v35 = vld [vmem:[%s26112_s27 + $0xf8] sm:$0xff]  }
 0x76d   : > { %v22711_v18 = vld [vmem:[%s26112_s27 + $0xa0] sm:$0xff]   ;;  %v22714_v23 = vld [vmem:[%s26112_s27 + $0x28] sm:$0xff]  }
 0x76e   : > { %v3198_v60 = vpack.c.bf16 %v3194_v40, %v3194_v40  ;;  %v3200_v61 = vpack.c.bf16 %v3196_v52, %v3196_v52 }
 0x770   : > { %v3369_v32 = vpop.f32.mrb[52].mxu0  ;;  %v3410_v33 = vpop.f32.mrb[52].mxu1 }
 0x771   : > { %v3370_v36 = vadd.f32 %v3369_v32, %v3278_v26  ;;  %v3411_v37 = vadd.f32 %v3410_v33, %v3286_v27  ;;  %v3371_v38 = vpop.f32.mrb[53].mxu0  ;;  %v3412_v39 = vpop.f32.mrb[53].mxu1  ;;  %v3059_v26 = vrot.slane %v24048_v16, %v24053_v21  ;;  %v22716_v27 = vld [vmem:[%s26112_s27 + $0x70] sm:$0xff]   ;;  %v3146_v33 = vadd.f32 %v24039_v9, %v3051_v25  ;;  %v22720_v16 = vld [vmem:[%s26112_s27 + $0x78] sm:$0xff]  }
 0x772   : > { %v3372_v42 = vadd.f32 %v3371_v38, %v3282_v28  ;;  %v3413_v43 = vadd.f32 %v3412_v39, %v3290_v29  ;;  %v3373_v44 = vpop.f32.mrb[54].mxu0  ;;  %v3414_v45 = vpop.f32.mrb[54].mxu1  ;;  %v22717_v28 = vld [vmem:[%s26112_s27 + $0xf0] sm:$0xff]   ;;  %v4034_v38 = vld [vmem:[%s26118_s12 + $0x28] sm:$0xff] }
 0x773   : > { %v3417_v46 = vmax.f32 %v3370_v36, 0.0  ;;  %v3419_v47 = vmax.f32 %v3411_v37, 0.0  ;;  %v3374_v48 = vpop.f32.mrb[55].mxu0  ;;  %v3415_v49 = vpop.f32.mrb[55].mxu1  ;;  %v22718_v29 = vld [vmem:[%s26112_s27 + $0x30] sm:$0xff]   ;;  %v3187_v34 = vadd.f32 %v24041_v10, %v3059_v26  ;;  %v4033_v36 = vld [vmem:[%s26118_s12 + $0x20] sm:$0xff] }
 0x774   : > { %v3418_v50 = vmax.f32 %v3372_v42, 0.0  ;;  %v3420_v51 = vmax.f32 %v3413_v43, 0.0  ;;  %v22719_v32 = vld [vmem:[%s26112_s27 + $0xb0] sm:$0xff]   ;;  %v4035_v37 = vld [vmem:[%s26118_s12 + $0x60] sm:$0xff]  ;;  %v4036_v39 = vld [vmem:[%s26118_s12 + $0x68] sm:$0xff]  ;;  %v3193_v44 = vmax.f32 %v3146_v33, 0.0 }
 0x775   : > { %v3421_v56 = vpack.c.bf16 %v3417_v46, %v3417_v46  ;;  %v3423_v57 = vpack.c.bf16 %v3419_v47, %v3419_v47  ;;  %v22722_v42 = vld [vmem:[%s26112_s27 + $0x38] sm:$0xff]   ;;  %v3195_v9 = vmax.f32 %v3187_v34, 0.0  ;;  %v18775_v10 = vcombine.high %v4033_v36, %v4035_v37  ;;  %v4037_v46 = vld [vmem:[%s26118_s12 + $0xa0] sm:$0xff]  ;;  %v4038_v48 = vld [vmem:[%s26118_s12 + $0xa8] sm:$0xff] }
 0x776   : > { %v3422_v41 = vpack.c.bf16 %v3418_v50, %v3418_v50  ;;  %v3424_v53 = vpack.c.bf16 %v3420_v51, %v3420_v51  ;;  %v22723_v43 = vld [vmem:[%s26112_s27 + $0xb8] sm:$0xff]   ;;  %v18777_v45 = vcombine.high %v4034_v38, %v4036_v39  ;;  %v4039_v47 = vld [vmem:[%s26118_s12 + $0xe0] sm:$0xff]  ;;  %v4040_v49 = vld [vmem:[%s26118_s12 + $0xe8] sm:$0xff]  ;;  %v18774_v50 = vcombine.low %v4033_v36, %v4035_v37 }
 0x777   : > { %v18776_v51 = vcombine.low %v4034_v38, %v4036_v39  ;;  %v18779_v40 = vcombine.high %v4037_v46, %v4039_v47  ;;  %v3197_v52 = vpack.c.bf16 %v3193_v44, %v3193_v44  ;;  %v22748_v25 = vld [vmem:[%s26112_s27 + $0x270] sm:$0xff]   ;;  %v22754_v33 = vld [vmem:[%s26112_s27 + $0x238] sm:$0xff]  }
 0x778   : > { %3713 = vmatprep.mubr.bf16.mxu0 %v3422_v41  ;;  %3753 = vmatprep.mubr.bf16.mxu1 %v3424_v53  ;;  %v3199_v41 = vpack.c.bf16 %v3195_v9, %v3195_v9  ;;  %v18781_v53 = vcombine.high %v4038_v48, %v4040_v49  ;;  %v22749_v26 = vld [vmem:[%s26112_s27 + $0x2f0] sm:$0xff]   ;;  %v22755_v34 = vld [vmem:[%s26112_s27 + $0x2b8] sm:$0xff]  }
 0x779   : > { %3714 = vmatmul.mubr.bf16.vlgmr.msra.gmra.mrb[56].mxu0 %v3421_v56  ;;  %3754 = vmatmul.mubr.bf16.vlgmr.msra.gmra.mrb[56].mxu1 %v3423_v57  ;;  %v22724_v56 = vld [vmem:[%s26112_s27 + $0x240] sm:$0xff]   ;;  %v24152_v36 = vld [vmem:[%s26118_s12 + $0x38] sm:$0xff] }
 0x77a   : > { %20595 = vmatpush3.bf16.msra.mxu0 %v22694_v54  ;;  %20617 = vmatpush3.bf16.msra.mxu1 %v22695_v55  ;;  %v18778_v54 = vcombine.low %v4037_v46, %v4039_v47  ;;  %v18780_v55 = vcombine.low %v4038_v48, %v4040_v49  ;;  %v22725_v57 = vld [vmem:[%s26112_s27 + $0x2c0] sm:$0xff]   ;;  %v24157_v38 = vld [vmem:[%s26118_s12 + $0x78] sm:$0xff] }
 0x77b   : > { %3985 = vmatprep.mubr.bf16.mxu0 %v3198_v60  ;;  %4025 = vmatprep.mubr.bf16.mxu1 %v3200_v61  ;;  %v22728_v60 = vld [vmem:[%s26112_s27 + $0x248] sm:$0xff]  }
 0x77c   : > { %20596 = vmatprep.subr.bf16.mxu0 %v22696_v58  ;;  %20618 = vmatprep.subr.bf16.mxu1 %v22697_v59  ;;  %v22726_v58 = vld [vmem:[%s26112_s27 + $0x200] sm:$0xff]   ;;  %v22729_v61 = vld [vmem:[%s26112_s27 + $0x2c8] sm:$0xff]  }
 0x77d   : > { %v22727_v59 = vld [vmem:[%s26112_s27 + $0x280] sm:$0xff]  }
 0x77e   : > { %20597 = vmatpush3.bf16.msra.mxu0 %v22698_v62  ;;  %20619 = vmatpush3.bf16.msra.mxu1 %v22699_v63  ;;  %v22730_v62 = vld [vmem:[%s26112_s27 + $0x208] sm:$0xff]  }
 0x77f   : > { %20598 = vmatprep.subr.bf16.mxu0 %v22700_v0  ;;  %20620 = vmatprep.subr.bf16.mxu1 %v22701_v2  ;;  %v22731_v63 = vld [vmem:[%s26112_s27 + $0x288] sm:$0xff]   ;;  %v22732_v0 = vld [vmem:[%s26112_s27 + $0x250] sm:$0xff]  }
 0x780   : > { %v22733_v2 = vld [vmem:[%s26112_s27 + $0x2d0] sm:$0xff]  }
 0x782   : > { %20599 = vmatpush3.bf16.msra.mxu0 %v22702_v3  ;;  %20621 = vmatpush3.bf16.msra.mxu1 %v22703_v4  ;;  %v22734_v3 = vld [vmem:[%s26112_s27 + $0x210] sm:$0xff]  }
 0x783   : > { %20600 = vmatprep.subr.bf16.mxu0 %v22704_v5  ;;  %20622 = vmatprep.subr.bf16.mxu1 %v22705_v6  ;;  %v22735_v4 = vld [vmem:[%s26112_s27 + $0x290] sm:$0xff]   ;;  %v22736_v5 = vld [vmem:[%s26112_s27 + $0x258] sm:$0xff]  }
 0x784   : > { %v22737_v6 = vld [vmem:[%s26112_s27 + $0x2d8] sm:$0xff]  }
 0x786   : > { %20601 = vmatpush3.bf16.msra.mxu0 %v22706_v7  ;;  %20623 = vmatpush3.bf16.msra.mxu1 %v22707_v8  ;;  %v22738_v7 = vld [vmem:[%s26112_s27 + $0x218] sm:$0xff]  }
 0x787   : > { %20602 = vmatprep.subr.bf16.mxu0 %v22708_v13  ;;  %20624 = vmatprep.subr.bf16.mxu1 %v22709_v15  ;;  %v22739_v8 = vld [vmem:[%s26112_s27 + $0x298] sm:$0xff]   ;;  %v22740_v13 = vld [vmem:[%s26112_s27 + $0x260] sm:$0xff]  }
 0x788   : > { %v22741_v15 = vld [vmem:[%s26112_s27 + $0x2e0] sm:$0xff]  }
 0x78a   : > { %20603 = vmatpush3.bf16.msra.mxu0 %v22710_v17  ;;  %20625 = vmatpush3.bf16.msra.mxu1 %v22711_v18  ;;  %v22742_v17 = vld [vmem:[%s26112_s27 + $0x220] sm:$0xff]  }
 0x78b   : > { %20604 = vmatprep.subr.bf16.mxu0 %v22712_v19  ;;  %20626 = vmatprep.subr.bf16.mxu1 %v22713_v22  ;;  %v22743_v18 = vld [vmem:[%s26112_s27 + $0x2a0] sm:$0xff]   ;;  %v22744_v19 = vld [vmem:[%s26112_s27 + $0x268] sm:$0xff]  }
 0x78c   : > { %v22745_v22 = vld [vmem:[%s26112_s27 + $0x2e8] sm:$0xff]  }
 0x78e   : > { %20605 = vmatpush3.bf16.msra.mxu0 %v22714_v23  ;;  %20627 = vmatpush3.bf16.msra.mxu1 %v22715_v24  ;;  %v22746_v23 = vld [vmem:[%s26112_s27 + $0x228] sm:$0xff]  }
 0x78f   : > { %20606 = vmatprep.subr.bf16.mxu0 %v22716_v27  ;;  %20628 = vmatprep.subr.bf16.mxu1 %v22717_v28  ;;  %v22747_v24 = vld [vmem:[%s26112_s27 + $0x2a8] sm:$0xff]   ;;  %v22750_v27 = vld [vmem:[%s26112_s27 + $0x230] sm:$0xff]  }
 0x790   : > { %v22751_v28 = vld [vmem:[%s26112_s27 + $0x2b0] sm:$0xff]  }
 0x792   : > { %20607 = vmatpush3.bf16.msra.mxu0 %v22718_v29  ;;  %20629 = vmatpush3.bf16.msra.mxu1 %v22719_v32  ;;  %v22752_v29 = vld [vmem:[%s26112_s27 + $0x278] sm:$0xff]  }
 0x793   : > { %20608 = vmatprep.subr.bf16.mxu0 %v22720_v16  ;;  %20630 = vmatprep.subr.bf16.mxu1 %v22721_v35  ;;  %v22753_v32 = vld [vmem:[%s26112_s27 + $0x2f8] sm:$0xff]   ;;  %v24146_v16 = vld [vmem:[%s26118_s12 + $0x30] sm:$0xff] }
 0x794   : > { %v24149_v35 = vld [vmem:[%s26118_s12 + $0x70] sm:$0xff] }
 0x795   : > { %v18817_v37 = vcombine.high %v24146_v16, %v24149_v35  ;;  %v18816_v39 = vcombine.low %v24146_v16, %v24149_v35 }
 0x796   : > { %20609 = vmatpush3.bf16.msra.mxu0 %v22722_v42  ;;  %20631 = vmatpush3.bf16.msra.mxu1 %v22723_v43  ;;  %v18818_v42 = vcombine.low %v24152_v36, %v24157_v38  ;;  %v18819_v43 = vcombine.high %v24152_v36, %v24157_v38 }
 0x797   : > { %4103 = vmatprep.subr.bf16.mxu0 %v18775_v10  ;;  %4144 = vmatprep.subr.bf16.mxu1 %v18777_v45 }
 0x799   : > { %3986 = vmatmul.mubr.bf16.vlgmr.msra.gmra.mrb[60].mxu0 %v3197_v52  ;;  %4026 = vmatmul.mubr.bf16.vlgmr.msra.gmra.mrb[60].mxu1 %v3199_v41 }
 0x79a   : > { %4104 = vmatpush1.bf16.msra.mxu0 %v18774_v50  ;;  %4145 = vmatpush1.bf16.msra.mxu1 %v18776_v51 }
 0x79b   : > { %4105 = vmatprep.subr.bf16.mxu0 %v18779_v40  ;;  %4146 = vmatprep.subr.bf16.mxu1 %v18781_v53 }
 0x79c   : > { %4135 = vmatprep.mubr.bf16.mxu0 %v23479_v12  ;;  %4176 = vmatprep.mubr.bf16.mxu1 %v23479_v12 }
 0x79e   : > { %4106 = vmatpush1.bf16.msra.mxu0 %v18778_v54  ;;  %4147 = vmatpush1.bf16.msra.mxu1 %v18780_v55 }
 0x79f   : > { %20638 = vmatprep.subr.bf16.mxu0 %v22724_v56  ;;  %20660 = vmatprep.subr.bf16.mxu1 %v22725_v57 }
 0x7a1   : > { %18782 = vmatmul.mubr.msk.bf16.vlgmr.msra.gmra.mrb[64].mxu0 %vm1696_vm1, %v23993_v31  ;;  %18783 = vmatmul.mubr.msk.bf16.vlgmr.msra.gmra.mrb[64].mxu1 %vm1696_vm1, %v23993_v31 }
 0x7a2   : > { %20639 = vmatpush3.bf16.msra.mxu0 %v22726_v58  ;;  %20661 = vmatpush3.bf16.msra.mxu1 %v22727_v59  ;;  %v4041_v59 = vld [vmem:[%s26126_s10 + $0x8] sm:$0xf] }
 0x7a3   : > { %20640 = vmatprep.subr.bf16.mxu0 %v22728_v60  ;;  %20662 = vmatprep.subr.bf16.mxu1 %v22729_v61 }
 0x7a6   : > { %20641 = vmatpush3.bf16.msra.mxu0 %v22730_v62  ;;  %20663 = vmatpush3.bf16.msra.mxu1 %v22731_v63  ;;  %v4046_v63 = vrot.slane %v4041_v59, %v24051_v20 }
 0x7a7   : > { %20642 = vmatprep.subr.bf16.mxu0 %v22732_v0  ;;  %20664 = vmatprep.subr.bf16.mxu1 %v22733_v2  ;;  %v4054_v0 = vrot.slane %v4041_v59, %v24053_v21 }
 0x7aa   : > { %20643 = vmatpush3.bf16.msra.mxu0 %v22734_v3  ;;  %20665 = vmatpush3.bf16.msra.mxu1 %v22735_v4  ;;  %v4050_v3 = vrot.slane %v4041_v59, %v24043_v11  ;;  %v4058_v4 = vrot.slane %v4041_v59, %v24045_v14  ;;  %v22776_v59 = vld [vmem:[%s26112_s27 + $0x368] sm:$0xff]  }
 0x7ab   : > { %20644 = vmatprep.subr.bf16.mxu0 %v22736_v5  ;;  %20666 = vmatprep.subr.bf16.mxu1 %v22737_v6 }
 0x7ae   : > { %20645 = vmatpush3.bf16.msra.mxu0 %v22738_v7  ;;  %20667 = vmatpush3.bf16.msra.mxu1 %v22739_v8 }
 0x7af   : > { %20646 = vmatprep.subr.bf16.mxu0 %v22740_v13  ;;  %20668 = vmatprep.subr.bf16.mxu1 %v22741_v15 }
 0x7b2   : > { %20647 = vmatpush3.bf16.msra.mxu0 %v22742_v17  ;;  %20669 = vmatpush3.bf16.msra.mxu1 %v22743_v18 }
 0x7b3   : > { %20648 = vmatprep.subr.bf16.mxu0 %v22744_v19  ;;  %20670 = vmatprep.subr.bf16.mxu1 %v22745_v22 }
 0x7b6   : > { %20649 = vmatpush3.bf16.msra.mxu0 %v22746_v23  ;;  %20671 = vmatpush3.bf16.msra.mxu1 %v22747_v24 }
 0x7b7   : > { %20650 = vmatprep.subr.bf16.mxu0 %v22748_v25  ;;  %20672 = vmatprep.subr.bf16.mxu1 %v22749_v26 }
 0x7ba   : > { %20651 = vmatpush3.bf16.msra.mxu0 %v22750_v27  ;;  %20673 = vmatpush3.bf16.msra.mxu1 %v22751_v28  ;;  %v4534_v27 = vld [vmem:[%s26118_s12 + $0xb0] sm:$0xff] }
 0x7bb   : > { %20652 = vmatprep.subr.bf16.mxu0 %v22752_v29  ;;  %20674 = vmatprep.subr.bf16.mxu1 %v22753_v32  ;;  %v4536_v32 = vld [vmem:[%s26118_s12 + $0xf0] sm:$0xff] }
 0x7bc   : > { %v18821_v38 = vcombine.high %v4534_v27, %v4536_v32 }
 0x7be   : > { %20653 = vmatpush3.bf16.msra.mxu0 %v22754_v33  ;;  %20675 = vmatpush3.bf16.msra.mxu1 %v22755_v34  ;;  %v4535_v33 = vld [vmem:[%s26118_s12 + $0xb8] sm:$0xff] }
 0x7bf   : > { %4600 = vmatprep.subr.bf16.mxu0 %v18817_v37  ;;  %4641 = vmatprep.subr.bf16.mxu1 %v18819_v43  ;;  %v4537_v34 = vld [vmem:[%s26118_s12 + $0xf8] sm:$0xff] }
 0x7c0   : > { %v18823_v43 = vcombine.high %v4535_v33, %v4537_v34 }
 0x84c   : > { %v20566_v44 = vpop.f32.mrb[56].mxu0  ;;  %v20588_v9 = vpop.f32.mrb[56].mxu1 }
 0x84d   : > { %v20567_v10 = vpop.f32.mrb[57].mxu0  ;;  %v20589_v45 = vpop.f32.mrb[57].mxu1 }
 0x84e   : > { %v20568_v46 = vadd.f32 %v20567_v10, %v20566_v44  ;;  %v20590_v47 = vadd.f32 %v20589_v45, %v20588_v9  ;;  %v20569_v48 = vpop.f32.mrb[58].mxu0  ;;  %v20591_v49 = vpop.f32.mrb[58].mxu1  ;;  %v18820_v44 = vcombine.low %v4534_v27, %v4536_v32  ;;  %v18822_v9 = vcombine.low %v4535_v33, %v4537_v34  ;;  %v22756_v10 = vld [vmem:[%s26112_s27 + $0x340] sm:$0xff]  }
 0x84f   : > { %v20570_v50 = vpop.f32.mrb[59].mxu0  ;;  %v20592_v51 = vpop.f32.mrb[59].mxu1  ;;  %v22757_v45 = vld [vmem:[%s26112_s27 + $0x3c0] sm:$0xff]   ;;  %v22762_v48 = vld [vmem:[%s26112_s27 + $0x308] sm:$0xff]  }
 0x850   : > { %v3756_v40 = vadd.f32 %v20590_v47, %v20568_v46  ;;  %v22759_v46 = vld [vmem:[%s26112_s27 + $0x380] sm:$0xff]   ;;  %v22761_v47 = vld [vmem:[%s26112_s27 + $0x3c8] sm:$0xff]   ;;  %v22764_v50 = vld [vmem:[%s26112_s27 + $0x350] sm:$0xff]  }
 0x851   : > { %v22763_v49 = vld [vmem:[%s26112_s27 + $0x388] sm:$0xff]   ;;  %v22765_v51 = vld [vmem:[%s26112_s27 + $0x3d0] sm:$0xff]  }
 0x86c   : > { %v20610_v52 = vpop.f32.mrb[60].mxu0  ;;  %v20632_v41 = vpop.f32.mrb[60].mxu1 }
 0x86d   : > { %v20611_v53 = vpop.f32.mrb[61].mxu0  ;;  %v20633_v54 = vpop.f32.mrb[61].mxu1 }
 0x86e   : > { %v20612_v55 = vadd.f32 %v20611_v53, %v20610_v52  ;;  %v20634_v56 = vadd.f32 %v20633_v54, %v20632_v41  ;;  %v20613_v57 = vpop.f32.mrb[62].mxu0  ;;  %v20635_v58 = vpop.f32.mrb[62].mxu1  ;;  %v22767_v52 = vld [vmem:[%s26112_s27 + $0x390] sm:$0xff]   ;;  %v22769_v41 = vld [vmem:[%s26112_s27 + $0x3d8] sm:$0xff]  }
 0x86f   : > { %v20614_v60 = vpop.f32.mrb[63].mxu0  ;;  %v20636_v61 = vpop.f32.mrb[63].mxu1  ;;  %v22770_v53 = vld [vmem:[%s26112_s27 + $0x318] sm:$0xff]   ;;  %v22774_v57 = vld [vmem:[%s26112_s27 + $0x320] sm:$0xff]  }
 0x870   : > { %v3988_v62 = vadd.f32 %v20612_v55, %v3756_v40  ;;  %v22766_v40 = vld [vmem:[%s26112_s27 + $0x310] sm:$0xff]   ;;  %v22771_v54 = vld [vmem:[%s26112_s27 + $0x398] sm:$0xff]   ;;  %v22772_v55 = vld [vmem:[%s26112_s27 + $0x360] sm:$0xff]  }
 0x871   : > { %v22775_v58 = vld [vmem:[%s26112_s27 + $0x3a0] sm:$0xff]   ;;  %v22777_v60 = vld [vmem:[%s26112_s27 + $0x3e8] sm:$0xff]  }
 0x872   : > { %v24168_v2 = vadd.f32 %v20634_v56, %v3988_v62  ;;  %v22773_v56 = vld [vmem:[%s26112_s27 + $0x3e0] sm:$0xff]   ;;  %v22778_v61 = vld [vmem:[%s26112_s27 + $0x328] sm:$0xff]  }
 0x873   : > { %v22779_v62 = vld [vmem:[%s26112_s27 + $0x3a8] sm:$0xff]  }
 0x874   : > { %v4137_v5 = vpop.f32.mrb[64].mxu0  ;;  %v4178_v6 = vpop.f32.mrb[64].mxu1 }
 0x875   : > { %v4138_v7 = vadd.f32 %v4137_v5, %v4046_v63  ;;  %v4179_v8 = vadd.f32 %v4178_v6, %v4054_v0  ;;  %v4139_v13 = vpop.f32.mrb[65].mxu0  ;;  %v4180_v15 = vpop.f32.mrb[65].mxu1  ;;  %v22780_v63 = vld [vmem:[%s26112_s27 + $0x370] sm:$0xff]   ;;  %v22784_v5 = vld [vmem:[%s26112_s27 + $0x378] sm:$0xff]  }
 0x876   : > { %v4140_v17 = vadd.f32 %v4139_v13, %v4050_v3  ;;  %v4181_v18 = vadd.f32 %v4180_v15, %v4058_v4  ;;  %v4141_v19 = vpop.f32.mrb[66].mxu0  ;;  %v4182_v22 = vpop.f32.mrb[66].mxu1  ;;  %v22781_v0 = vld [vmem:[%s26112_s27 + $0x3f0] sm:$0xff]   ;;  %v22785_v6 = vld [vmem:[%s26112_s27 + $0x3f8] sm:$0xff]  }
 0x877   : > { %v4185_v23 = vmax.f32 %v4138_v7, 0.0  ;;  %v4187_v24 = vmax.f32 %v4179_v8, 0.0  ;;  %v4142_v25 = vpop.f32.mrb[67].mxu0  ;;  %v4183_v26 = vpop.f32.mrb[67].mxu1  ;;  %v22782_v3 = vld [vmem:[%s26112_s27 + $0x330] sm:$0xff]   ;;  %v22786_v7 = vld [vmem:[%s26112_s27 + $0x338] sm:$0xff]  }
 0x878   : > { %v4186_v28 = vmax.f32 %v4140_v17, 0.0  ;;  %v4188_v29 = vmax.f32 %v4181_v18, 0.0  ;;  %v22783_v4 = vld [vmem:[%s26112_s27 + $0x3b0] sm:$0xff]   ;;  %v22787_v8 = vld [vmem:[%s26112_s27 + $0x3b8] sm:$0xff]   ;;  %v4538_v25 = vld [vmem:[%s26126_s10 + $0xc] sm:$0xf] }
 0x879   : > { %v4189_v36 = vpack.c.bf16 %v4185_v23, %v4185_v23  ;;  %v4191_v37 = vpack.c.bf16 %v4187_v24, %v4187_v24  ;;  %v4551_v32 = vrot.slane %v4538_v25, %v24053_v21  ;;  %v4547_v34 = vrot.slane %v4538_v25, %v24043_v11 }
 0x87a   : > { %v4190_v16 = vpack.c.bf16 %v4186_v28, %v4186_v28  ;;  %v4192_v35 = vpack.c.bf16 %v4188_v29, %v4188_v29  ;;  %v4543_v29 = vrot.slane %v4538_v25, %v24051_v20 }
 0x87c   : > { %4481 = vmatprep.mubr.bf16.mxu0 %v4190_v16  ;;  %4521 = vmatprep.mubr.bf16.mxu1 %v4192_v35  ;;  %v4555_v16 = vrot.slane %v4538_v25, %v24045_v14  ;;  %v18859_v25 = vld [vmem:[%s26128_s15] ss:$0 sm:$0xff] }
 0x87d   : > { %4482 = vmatmul.mubr.bf16.vlgmr.msra.gmra.mrb[68].mxu0 %v4189_v36  ;;  %4522 = vmatmul.mubr.bf16.vlgmr.msra.gmra.mrb[68].mxu1 %v4191_v37 }
 0x87e   : > { %4601 = vmatpush1.bf16.msra.mxu0 %v18816_v39  ;;  %4642 = vmatpush1.bf16.msra.mxu1 %v18818_v42  ;;  %v22758_v39 = vld [vmem:[%s26112_s27 + $0x300] sm:$0xff]   ;;  %v22760_v42 = vld [vmem:[%s26112_s27 + $0x348] sm:$0xff]  }
 0x87f   : > { %4602 = vmatprep.subr.bf16.mxu0 %v18821_v38  ;;  %4643 = vmatprep.subr.bf16.mxu1 %v18823_v43 }
 0x880   : > { %4632 = vmatprep.mubr.bf16.mxu0 %v23479_v12  ;;  %4673 = vmatprep.mubr.bf16.mxu1 %v23479_v12 }
 0x882   : > { %4603 = vmatpush1.bf16.msra.mxu0 %v18820_v44  ;;  %4644 = vmatpush1.bf16.msra.mxu1 %v18822_v9 }
 0x883   : > { %20682 = vmatprep.subr.bf16.mxu0 %v22756_v10  ;;  %20704 = vmatprep.subr.bf16.mxu1 %v22757_v45 }
 0x885   : > { %18824 = vmatmul.mubr.msk.bf16.vlgmr.msra.gmra.mrb[72].mxu0 %vm1696_vm1, %v23993_v31  ;;  %18825 = vmatmul.mubr.msk.bf16.vlgmr.msra.gmra.mrb[72].mxu1 %vm1696_vm1, %v23993_v31  ;;  %v22768_v31 = vld [vmem:[%s26112_s27 + $0x358] sm:$0xff]  }
 0x886   : > { %20683 = vmatpush3.bf16.msra.mxu0 %v22758_v39  ;;  %20705 = vmatpush3.bf16.msra.mxu1 %v22759_v46 }
 0x887   : > { %20684 = vmatprep.subr.bf16.mxu0 %v22760_v42  ;;  %20706 = vmatprep.subr.bf16.mxu1 %v22761_v47 }
 0x88a   : > { %20685 = vmatpush3.bf16.msra.mxu0 %v22762_v48  ;;  %20707 = vmatpush3.bf16.msra.mxu1 %v22763_v49 }
 0x88b   : > { %20686 = vmatprep.subr.bf16.mxu0 %v22764_v50  ;;  %20708 = vmatprep.subr.bf16.mxu1 %v22765_v51 }
 0x88e   : > { %20687 = vmatpush3.bf16.msra.mxu0 %v22766_v40  ;;  %20709 = vmatpush3.bf16.msra.mxu1 %v22767_v52 }
 0x88f   : > { %20688 = vmatprep.subr.bf16.mxu0 %v22768_v31  ;;  %20710 = vmatprep.subr.bf16.mxu1 %v22769_v41 }
 0x892   : > { %20689 = vmatpush3.bf16.msra.mxu0 %v22770_v53  ;;  %20711 = vmatpush3.bf16.msra.mxu1 %v22771_v54 }
 0x893   : > { %20690 = vmatprep.subr.bf16.mxu0 %v22772_v55  ;;  %20712 = vmatprep.subr.bf16.mxu1 %v22773_v56 }
 0x896   : > { %20691 = vmatpush3.bf16.msra.mxu0 %v22774_v57  ;;  %20713 = vmatpush3.bf16.msra.mxu1 %v22775_v58 }
 0x897   : > { %20692 = vmatprep.subr.bf16.mxu0 %v22776_v59  ;;  %20714 = vmatprep.subr.bf16.mxu1 %v22777_v60 }
 0x89a   : > { %20693 = vmatpush3.bf16.msra.mxu0 %v22778_v61  ;;  %20715 = vmatpush3.bf16.msra.mxu1 %v22779_v62 }
 0x89b   : > { %20694 = vmatprep.subr.bf16.mxu0 %v22780_v63  ;;  %20716 = vmatprep.subr.bf16.mxu1 %v22781_v0  ;;  %v18858_v63 = vld [vmem:[%s26127_s11] ss:$0 sm:$0xff] }
 0x89e   : > { %20695 = vmatpush3.bf16.msra.mxu0 %v22782_v3  ;;  %20717 = vmatpush3.bf16.msra.mxu1 %v22783_v4 }
 0x89f   : > { %20696 = vmatprep.subr.bf16.mxu0 %v22784_v5  ;;  %20718 = vmatprep.subr.bf16.mxu1 %v22785_v6 }
 0x8a2   : > { %20697 = vmatpush3.bf16.msra.mxu0 %v22786_v7  ;;  %20719 = vmatpush3.bf16.msra.mxu1 %v22787_v8 }
 0x8a3   : > { %21725 = vmatprep.subr.bf16.mxu0 %v23477_v1  ;;  %21733 = vmatprep.subr.bf16.mxu1 %v23477_v1 }
 0x950   : > { %v20654_v13 = vpop.f32.mrb[68].mxu0  ;;  %v20676_v15 = vpop.f32.mrb[68].mxu1 }
 0x951   : > { %v20655_v17 = vpop.f32.mrb[69].mxu0  ;;  %v20677_v18 = vpop.f32.mrb[69].mxu1 }
 0x952   : > { %v20656_v19 = vadd.f32 %v20655_v17, %v20654_v13  ;;  %v20678_v22 = vadd.f32 %v20677_v18, %v20676_v15  ;;  %v20657_v23 = vpop.f32.mrb[70].mxu0  ;;  %v20679_v24 = vpop.f32.mrb[70].mxu1  ;;  %v22788_v15 = vld [vmem:[%s26115_s21 + $0x40] sm:$0xff]   ;;  %v22789_v17 = vld [vmem:[%s26115_s21 + $0x50] sm:$0xff]   ;;  %v22791_v18 = vld [vmem:[%s26115_s21 + $0x58] sm:$0xff]  }
 0x953   : > { %v20658_v26 = vpop.f32.mrb[71].mxu0  ;;  %v20680_v27 = vpop.f32.mrb[71].mxu1 }
 0x954   : > { %v4524_v28 = vadd.f32 %v20678_v22, %v20656_v19  ;;  %v18860_v27 = vld [vmem:[%s26129_s16] ss:$0 sm:$0xff] }
 0x956   : > { %v4529_v33 = vadd.f32 %v4524_v28, %v24168_v2 }
 0x958   : > { %v4634_v35 = vpop.f32.mrb[72].mxu0  ;;  %v4675_v36 = vpop.f32.mrb[72].mxu1 }
 0x959   : > { %v4635_v37 = vadd.f32 %v4634_v35, %v4543_v29  ;;  %v4676_v38 = vadd.f32 %v4675_v36, %v4551_v32  ;;  %v4636_v43 = vpop.f32.mrb[73].mxu0  ;;  %v4677_v44 = vpop.f32.mrb[73].mxu1  ;;  %v22792_v32 = vld [vmem:[%s26115_s21 + $0x60] sm:$0xff]   ;;  %v22795_v35 = vld [vmem:[%s26115_s21 + $0x78] sm:$0xff]  }
 0x95a   : > { %v4637_v9 = vadd.f32 %v4636_v43, %v4547_v34  ;;  %v4678_v10 = vadd.f32 %v4677_v44, %v4555_v16  ;;  %v4638_v45 = vpop.f32.mrb[74].mxu0  ;;  %v4679_v39 = vpop.f32.mrb[74].mxu1  ;;  %v22794_v16 = vld [vmem:[%s26115_s21 + $0x68] sm:$0xff]   ;;  %v22796_v36 = vld [vmem:[%s26113_s25 + $0x40] sm:$0xff]   ;;  %v22799_v43 = vld [vmem:[%s26113_s25 + $0x58] sm:$0xff]  }
 0x95b   : > { %v4682_v46 = vmax.f32 %v4635_v37, 0.0  ;;  %v4684_v42 = vmax.f32 %v4676_v38, 0.0  ;;  %v4639_v47 = vpop.f32.mrb[75].mxu0  ;;  %v4680_v48 = vpop.f32.mrb[75].mxu1  ;;  %v22797_v37 = vld [vmem:[%s26113_s25 + $0x50] sm:$0xff]   ;;  %v22798_v38 = vld [vmem:[%s26113_s25 + $0x48] sm:$0xff]  }
 0x95c   : > { %v4683_v49 = vmax.f32 %v4637_v9, 0.0  ;;  %v4685_v2 = vmax.f32 %v4678_v10, 0.0  ;;  %v22800_v44 = vld [vmem:[%s26113_s25 + $0x60] sm:$0xff]   ;;  %v22801_v9 = vld [vmem:[%s26113_s25 + $0x70] sm:$0xff]   ;;  %v22802_v10 = vld [vmem:[%s26113_s25 + $0x68] sm:$0xff]  }
 0x95d   : > { %v4686_v40 = vpack.c.bf16 %v4682_v46, %v4682_v46  ;;  %v4688_v52 = vpack.c.bf16 %v4684_v42, %v4684_v42  ;;  %v22803_v45 = vld [vmem:[%s26113_s25 + $0x78] sm:$0xff]   ;;  %v22804_v39 = vld [vmem:[%s26111_s29 + $0x40] sm:$0xff]   ;;  %v22805_v46 = vld [vmem:[%s26111_s29 + $0x50] sm:$0xff]   ;;  %s26154_s25 = sld [smem:[#allocation43_spill]] }
 0x95e   : > { %v4687_v50 = vpack.c.bf16 %v4683_v49, %v4683_v49  ;;  %v4689_v51 = vpack.c.bf16 %v4685_v2, %v4685_v2  ;;  %v22806_v42 = vld [vmem:[%s26111_s29 + $0x48] sm:$0xff]   ;;  %v22807_v47 = vld [vmem:[%s26111_s29 + $0x58] sm:$0xff]   ;;  %v22808_v48 = vld [vmem:[%s26111_s29 + $0x60] sm:$0xff]  }
 0x95f   : > { %v22809_v49 = vld [vmem:[%s26111_s29 + $0x70] sm:$0xff]   ;;  %v22810_v2 = vld [vmem:[%s26111_s29 + $0x68] sm:$0xff]  }
 0x960   : > { %4978 = vmatprep.mubr.bf16.mxu0 %v4687_v50  ;;  %5018 = vmatprep.mubr.bf16.mxu1 %v4689_v51  ;;  %v22811_v50 = vld [vmem:[%s26111_s29 + $0x78] sm:$0xff]   ;;  %s26156_s29 = sld [smem:[#allocation45_spill]] }
 0x961   : > { %4979 = vmatmul.mubr.bf16.vlgmr.msra.gmra.mrb[76].mxu0 %v4686_v40  ;;  %5019 = vmatmul.mubr.bf16.vlgmr.msra.gmra.mrb[76].mxu1 %v4688_v52 }
 0x962   : > { %21729 = vmatprep.mubr.msk.bf16.mxu0 %vm23478_vm0, %v23477_v1  ;;  %21737 = vmatprep.mubr.msk.bf16.mxu1 %vm23478_vm0, %v23477_v1 }
 0x963   : > { %21726 = vmatpush3.bf16.msra.mxu0 %v22788_v15  ;;  %21734 = vmatpush3.bf16.msra.mxu1 %v22789_v17 }
 0x964   : > { %21727 = vmatprep.subr.bf16.mxu0 %v23477_v1  ;;  %21735 = vmatprep.subr.bf16.mxu1 %v23477_v1 }
 0x967   : > { %21736 = vmatpush3.bf16.msra.mxu1 %v22791_v18 }
 0x968   : > { %21749 = vmatprep.subr.bf16.mxu1 %v23477_v1 }
 0xa34   : > { %v20698_v31 = vpop.f32.mrb[76].mxu0  ;;  %v20720_v41 = vpop.f32.mrb[76].mxu1 }
 0xa35   : > { %v20699_v53 = vpop.f32.mrb[77].mxu0  ;;  %v20721_v54 = vpop.f32.mrb[77].mxu1 }
 0xa36   : > { %v20700_v55 = vadd.f32 %v20699_v53, %v20698_v31  ;;  %v20722_v56 = vadd.f32 %v20721_v54, %v20720_v41  ;;  %v20701_v57 = vpop.f32.mrb[78].mxu0  ;;  %v20723_v58 = vpop.f32.mrb[78].mxu1 }
 0xa37   : > { %v20702_v59 = vpop.f32.mrb[79].mxu0  ;;  %v20724_v60 = vpop.f32.mrb[79].mxu1 }
 0xa38   : > { %v5021_v61 = vadd.f32 %v20722_v56, %v20700_v55 }
 0xa3a   : > { %v5026_v62 = vadd.f32 %v5021_v61, %v4529_v33  ;;  %v22793_v33 = vld [vmem:[%s26115_s21 + $0x70] sm:$0xff]  }
 0xa3c   : > { %v5027_v0 = vadd.f32 %v5026_v62, %v23989_v30  ;;  %v22790_v30 = vld [vmem:[%s26115_s21 + $0x48] sm:$0xff]   ;;  %s26152_s21 = sld [smem:[#allocation44_spill]] }
 0xa3d   : > { %21728 = vmatpush3.bf16.msra.mxu0 %v22790_v30 }
 0xa3e   : > { %v5035_v3 = vadd.f32 %v18858_v63, %v5027_v0  ;;  %21741 = vmatprep.subr.bf16.mxu0 %v23477_v1  ;;  %v18942_v0 = vld [vmem:[%s26119_s8 + $0x4] ss:$0 sm:$0xff] }
 0xa40   : > { %v5038_v4 = vsel %vm1696_vm1, %v5035_v3, 0.0 }
 0xa41   : > { %5039 = vadd.xlane.f32.xlu0 %v5038_v4 }
 0xace   : > { %v5040_v5 = vpop.xlane.xlu0 %5039 }
 0xacf   : > { %v5041_v6 = vmul.f32 0.03125, %v5040_v5 }
 0xad1   : > { %v5042_v7 = vsub.f32 %v5035_v3, %v5041_v6  ;;  %v18943_v3 = vld [vmem:[%s26119_s8 + $0x5] ss:$0 sm:$0xff] }
 0xad3   : > { %v5043_v8 = vmul.f32 %v5042_v7, %v5042_v7 }
 0xad5   : > { %v5044_v13 = vsel %vm1696_vm1, %v5043_v8, 0.0 }
 0xad6   : > { %5045 = vadd.xlane.f32.xlu1 %v5044_v13 }
 0xb63   : > { %v5046_v19 = vpop.xlane.xlu1 %5045 }
 0xb64   : > { %v5047_v22 = vmul.f32 0.03125, %v5046_v19 }
 0xb66   : > { %v5048_v23 = vadd.f32 1e-05, %v5047_v22 }
 0xb68   : > { %23312 = vrsqrt.f32 %v5048_v23  ;;  %v18926_v23 = vld [vmem:[%s26121_s3 + $0x4] ss:$0 sm:$0xff] }
 0xb72   : > { %v23313_v24 = vpop.eup %23312 }
 0xb73   : > { %v5050_v26 = vmul.f32 %v23313_v24, %v5042_v7  ;;  %v18927_v24 = vld [vmem:[%s26121_s3 + $0x5] ss:$0 sm:$0xff] }
 0xb75   : > { %v5057_v28 = vmul.f32 %v18859_v25, %v5050_v26 }
 0xb77   : > { %v24240_v29 = vadd.f32 %v18860_v27, %v5057_v28  ;;  %v18944_v27 = vld [vmem:[%s26119_s8 + $0x6] ss:$0 sm:$0xff]  ;;  %v18945_v28 = vld [vmem:[%s26119_s8 + $0x7] ss:$0 sm:$0xff]  ;;  %s26141_s8 = sld [smem:[#allocation32_spill]] }
 0xb79   : > { %v24246_v34 = vpack.c.bf16 %v24240_v29, %v24240_v29 }
 0xb7b   : > { %21730 = vmatmul.mubr.msk.bf16.vlgmr.msra.gmra.mrb[80].mxu0 %vm1696_vm1, %v24246_v34  ;;  %21738 = vmatmul.mubr.msk.bf16.vlgmr.msra.gmra.mrb[80].mxu1 %vm1696_vm1, %v24246_v34 }
 0xb7c   : > { %21742 = vmatpush3.bf16.msra.mxu0 %v22792_v32  ;;  %21750 = vmatpush3.bf16.msra.mxu1 %v22793_v33 }
 0xb7d   : > { %21743 = vmatprep.subr.bf16.mxu0 %v23477_v1  ;;  %21751 = vmatprep.subr.bf16.mxu1 %v23477_v1 }
 0xb7e   : > { %21745 = vmatprep.mubr.msk.bf16.mxu0 %vm23478_vm0, %v23477_v1  ;;  %21753 = vmatprep.mubr.msk.bf16.mxu1 %vm23478_vm0, %v23477_v1 }
 0xb80   : > { %21744 = vmatpush3.bf16.msra.mxu0 %v22794_v16  ;;  %21752 = vmatpush3.bf16.msra.mxu1 %v22795_v35 }
 0xb81   : > { %21757 = vmatprep.subr.bf16.mxu0 %v23477_v1  ;;  %21765 = vmatprep.subr.bf16.mxu1 %v23477_v1 }
 0xb83   : > { %21746 = vmatmul.mubr.msk.bf16.vlgmr.msra.gmra.mrb[84].mxu0 %vm1696_vm1, %v24246_v34  ;;  %21754 = vmatmul.mubr.msk.bf16.vlgmr.msra.gmra.mrb[84].mxu1 %vm1696_vm1, %v24246_v34 }
 0xb84   : > { %21758 = vmatpush3.bf16.msra.mxu0 %v22796_v36  ;;  %21766 = vmatpush3.bf16.msra.mxu1 %v22797_v37 }
 0xb85   : > { %21759 = vmatprep.subr.bf16.mxu0 %v23477_v1  ;;  %21767 = vmatprep.subr.bf16.mxu1 %v23477_v1 }
 0xb86   : > { %21761 = vmatprep.mubr.msk.bf16.mxu0 %vm23478_vm0, %v23477_v1  ;;  %21769 = vmatprep.mubr.msk.bf16.mxu1 %vm23478_vm0, %v23477_v1 }
 0xb88   : > { %21760 = vmatpush3.bf16.msra.mxu0 %v22798_v38  ;;  %21768 = vmatpush3.bf16.msra.mxu1 %v22799_v43 }
 0xb89   : > { %21773 = vmatprep.subr.bf16.mxu0 %v23477_v1  ;;  %21781 = vmatprep.subr.bf16.mxu1 %v23477_v1 }
 0xb8b   : > { %21762 = vmatmul.mubr.msk.bf16.vlgmr.msra.gmra.mrb[88].mxu0 %vm1696_vm1, %v24246_v34  ;;  %21770 = vmatmul.mubr.msk.bf16.vlgmr.msra.gmra.mrb[88].mxu1 %vm1696_vm1, %v24246_v34 }
 0xb8c   : > { %21774 = vmatpush3.bf16.msra.mxu0 %v22800_v44  ;;  %21782 = vmatpush3.bf16.msra.mxu1 %v22801_v9 }
 0xb8d   : > { %21775 = vmatprep.subr.bf16.mxu0 %v23477_v1  ;;  %21783 = vmatprep.subr.bf16.mxu1 %v23477_v1 }
 0xb8e   : > { %21777 = vmatprep.mubr.msk.bf16.mxu0 %vm23478_vm0, %v23477_v1  ;;  %21785 = vmatprep.mubr.msk.bf16.mxu1 %vm23478_vm0, %v23477_v1 }
 0xb90   : > { %21776 = vmatpush3.bf16.msra.mxu0 %v22802_v10  ;;  %21784 = vmatpush3.bf16.msra.mxu1 %v22803_v45 }
 0xb91   : > { %21789 = vmatprep.subr.bf16.mxu0 %v23477_v1  ;;  %21797 = vmatprep.subr.bf16.mxu1 %v23477_v1 }
 0xb93   : > { %21778 = vmatmul.mubr.msk.bf16.vlgmr.msra.gmra.mrb[92].mxu0 %vm1696_vm1, %v24246_v34  ;;  %21786 = vmatmul.mubr.msk.bf16.vlgmr.msra.gmra.mrb[92].mxu1 %vm1696_vm1, %v24246_v34 }
 0xb94   : > { %21790 = vmatpush3.bf16.msra.mxu0 %v22804_v39  ;;  %21798 = vmatpush3.bf16.msra.mxu1 %v22805_v46 }
 0xb95   : > { %21791 = vmatprep.subr.bf16.mxu0 %v23477_v1  ;;  %21799 = vmatprep.subr.bf16.mxu1 %v23477_v1 }
 0xb96   : > { %21793 = vmatprep.mubr.msk.bf16.mxu0 %vm23478_vm0, %v23477_v1  ;;  %21801 = vmatprep.mubr.msk.bf16.mxu1 %vm23478_vm0, %v23477_v1 }
 0xb98   : > { %21792 = vmatpush3.bf16.msra.mxu0 %v22806_v42  ;;  %21800 = vmatpush3.bf16.msra.mxu1 %v22807_v47  ;;  %v18928_v47 = vld [vmem:[%s26121_s3 + $0x6] ss:$0 sm:$0xff] }
 0xb99   : > { %21805 = vmatprep.subr.bf16.mxu0 %v23477_v1  ;;  %21813 = vmatprep.subr.bf16.mxu1 %v23477_v1 }
 0xb9b   : > { %21794 = vmatmul.mubr.msk.bf16.vlgmr.msra.gmra.mrb[96].mxu0 %vm1696_vm1, %v24246_v34  ;;  %21802 = vmatmul.mubr.msk.bf16.vlgmr.msra.gmra.mrb[96].mxu1 %vm1696_vm1, %v24246_v34 }
 0xb9c   : > { %21806 = vmatpush3.bf16.msra.mxu0 %v22808_v48  ;;  %21814 = vmatpush3.bf16.msra.mxu1 %v22809_v49  ;;  %v18929_v48 = vld [vmem:[%s26121_s3 + $0x7] ss:$0 sm:$0xff] }
 0xb9d   : > { %21807 = vmatprep.subr.bf16.mxu0 %v23477_v1  ;;  %21815 = vmatprep.subr.bf16.mxu1 %v23477_v1 }
 0xb9e   : > { %21809 = vmatprep.mubr.msk.bf16.mxu0 %vm23478_vm0, %v23477_v1  ;;  %21817 = vmatprep.mubr.msk.bf16.mxu1 %vm23478_vm0, %v23477_v1 }
 0xba0   : > { %21808 = vmatpush3.bf16.msra.mxu0 %v22810_v2  ;;  %21816 = vmatpush3.bf16.msra.mxu1 %v22811_v50  ;;  %v18958_v50 = vld [vmem:[%s26117_s14 + $0x4] ss:$0 sm:$0xff] }
 0xba1   : > { %21821 = vmatprep.subr.bf16.mxu0 %v23477_v1  ;;  %21827 = vmatprep.subr.bf16.mxu1 %v23477_v1 }
 0xba3   : > { %21810 = vmatmul.mubr.msk.bf16.vlgmr.msra.gmra.mrb[100].mxu0 %vm1696_vm1, %v24246_v34  ;;  %21818 = vmatmul.mubr.msk.bf16.vlgmr.msra.gmra.mrb[100].mxu1 %vm1696_vm1, %v24246_v34 }
 0xba4   : > { %21823 = vmatprep.mubr.msk.bf16.mxu0 %vm23478_vm0, %v23477_v1  ;;  %21829 = vmatprep.mubr.msk.bf16.mxu1 %vm23478_vm0, %v23477_v1 }
 0xc4e   : > { %v5212_v51 = vpop.f32.mrb[80].mxu0  ;;  %v5264_v40 = vpop.f32.mrb[80].mxu1 }
 0xc4f   : > { %v21731_v52 = vpop.f32.mrb[81].mxu0  ;;  %v21739_v31 = vpop.f32.mrb[81].mxu1  ;;  %v5213_v32 = vadd.f32 %v18926_v23, %v5212_v51  ;;  %v5265_v33 = vadd.f32 %v18927_v24, %v5264_v40  ;;  %v18959_v51 = vld [vmem:[%s26117_s14 + $0x5] ss:$0 sm:$0xff] }
 0xc50   : > { %v5215_v41 = vpop.f32.mrb[82].mxu0  ;;  %v5267_v53 = vpop.f32.mrb[82].mxu1 }
 0xc51   : > { %v21732_v54 = vpop.f32.mrb[83].mxu0  ;;  %v21740_v55 = vpop.f32.mrb[83].mxu1  ;;  %v5838_v9 = vpack.c.bf16 %v5213_v32, %v5213_v32  ;;  %v5839_v10 = vpack.c.bf16 %v5265_v33, %v5265_v33  ;;  %v23415_v33 = vld [vmem:[%s23912_s7] ss:$0 sm:$0xff]  ;;  %s26135_s7 = sld [smem:[#allocation27_spill]] }
 0xc56   : > { %v5316_v56 = vpop.f32.mrb[84].mxu0  ;;  %v5368_v57 = vpop.f32.mrb[84].mxu1 }
 0xc57   : > { %v21747_v58 = vpop.f32.mrb[85].mxu0  ;;  %v21755_v59 = vpop.f32.mrb[85].mxu1  ;;  %v5317_v40 = vadd.f32 %v18928_v47, %v5316_v56  ;;  %v5369_v52 = vadd.f32 %v18929_v48, %v5368_v57 }
 0xc58   : > { %v5319_v60 = vpop.f32.mrb[86].mxu0  ;;  %v5371_v61 = vpop.f32.mrb[86].mxu1 }
 0xc59   : > { %v21748_v62 = vpop.f32.mrb[87].mxu0  ;;  %v21756_v63 = vpop.f32.mrb[87].mxu1  ;;  %v5840_v56 = vpack.c.bf16 %v5317_v40, %v5317_v40  ;;  %v5841_v57 = vpack.c.bf16 %v5369_v52, %v5369_v52 }
 0xc5e   : > { %v5444_v4 = vpop.f32.mrb[88].mxu0  ;;  %v5496_v5 = vpop.f32.mrb[88].mxu1 }
 0xc5f   : > { %v5445_v6 = vadd.f32 %v18942_v0, %v5444_v4  ;;  %v5497_v7 = vadd.f32 %v18943_v3, %v5496_v5  ;;  %v21763_v8 = vpop.f32.mrb[89].mxu0  ;;  %v21771_v13 = vpop.f32.mrb[89].mxu1 }
 0xc60   : > { %v5447_v15 = vpop.f32.mrb[90].mxu0  ;;  %v5499_v17 = vpop.f32.mrb[90].mxu1 }
 0xc61   : > { %v5842_v30 = vpack.c.bf16 %v5445_v6, %v5445_v6  ;;  %v5843_v18 = vpack.c.bf16 %v5497_v7, %v5497_v7  ;;  %v21764_v19 = vpop.f32.mrb[91].mxu0  ;;  %v21772_v22 = vpop.f32.mrb[91].mxu1 }
 0xc63   : > { %v5850_v25 = vsel %vm2368_vm2, %v5842_v30, 0  ;;  %v5896_v26 = vsel %vm2368_vm2, %v5843_v18, 0 }
 0xc64   : > { %21822 = vmatpush3.bf16.xpose.msra.mxu0 %v5850_v25  ;;  %21828 = vmatpush3.bf16.xpose.msra.mxu1 %v5896_v26 }
 0xc65   : > { %21833 = vmatprep.subr.bf16.mxu0 %v23477_v1  ;;  %21839 = vmatprep.subr.bf16.mxu1 %v23477_v1 }
 0xc66   : > { %v5548_v34 = vpop.f32.mrb[92].mxu0  ;;  %v5600_v16 = vpop.f32.mrb[92].mxu1 }
 0xc67   : > { %v5549_v35 = vadd.f32 %v18944_v27, %v5548_v34  ;;  %v5601_v36 = vadd.f32 %v18945_v28, %v5600_v16  ;;  %v21779_v37 = vpop.f32.mrb[93].mxu0  ;;  %v21787_v38 = vpop.f32.mrb[93].mxu1 }
 0xc68   : > { %v5551_v43 = vpop.f32.mrb[94].mxu0  ;;  %v5603_v44 = vpop.f32.mrb[94].mxu1 }
 0xc69   : > { %v5844_v45 = vpack.c.bf16 %v5549_v35, %v5549_v35  ;;  %v5845_v39 = vpack.c.bf16 %v5601_v36, %v5601_v36  ;;  %v21780_v46 = vpop.f32.mrb[95].mxu0  ;;  %v21788_v42 = vpop.f32.mrb[95].mxu1 }
 0xc6b   : > { %21824 = vmatmul.mubr.msk.bf16.vlgmr.msra.gmra.mrb[104].mxu0 %vm2368_vm2, %v5838_v9  ;;  %21830 = vmatmul.mubr.msk.bf16.vlgmr.msra.gmra.mrb[104].mxu1 %vm2368_vm2, %v5839_v10  ;;  %v5942_v49 = vsel %vm2368_vm2, %v5844_v45, 0  ;;  %v5988_v2 = vsel %vm2368_vm2, %v5845_v39, 0 }
 0xc6c   : > { %21834 = vmatpush3.bf16.xpose.msra.mxu0 %v5942_v49  ;;  %21840 = vmatpush3.bf16.xpose.msra.mxu1 %v5988_v2 }
 0xc6d   : > { %21835 = vmatprep.mubr.msk.bf16.mxu0 %vm23478_vm0, %v23477_v1  ;;  %21841 = vmatprep.mubr.msk.bf16.mxu1 %vm23478_vm0, %v23477_v1 }
 0xc6e   : > { %v5676_v31 = vpop.f32.mrb[96].mxu0  ;;  %v5728_v41 = vpop.f32.mrb[96].mxu1  ;;  %21845 = vmatprep.subr.bf16.mxu0 %v23477_v1  ;;  %21851 = vmatprep.subr.bf16.mxu1 %v23477_v1 }
 0xc6f   : > { %v5677_v53 = vadd.f32 %v18958_v50, %v5676_v31  ;;  %v5729_v54 = vadd.f32 %v18959_v51, %v5728_v41  ;;  %v21795_v55 = vpop.f32.mrb[97].mxu0  ;;  %v21803_v58 = vpop.f32.mrb[97].mxu1 }
 0xc70   : > { %v5679_v59 = vpop.f32.mrb[98].mxu0  ;;  %v5731_v60 = vpop.f32.mrb[98].mxu1 }
 0xc71   : > { %v6086_v61 = vpack.c.bf16 %v5677_v53, %v5677_v53  ;;  %v6087_v62 = vpack.c.bf16 %v5729_v54, %v5729_v54  ;;  %v21796_v63 = vpop.f32.mrb[99].mxu0  ;;  %v21804_v0 = vpop.f32.mrb[99].mxu1 }
 0xc73   : > { %21836 = vmatmul.mubr.msk.bf16.vlgmr.msra.gmra.mrb[108].mxu0 %vm2368_vm2, %v5840_v56  ;;  %21842 = vmatmul.mubr.msk.bf16.vlgmr.msra.gmra.mrb[108].mxu1 %vm2368_vm2, %v5841_v57  ;;  %v6094_v3 = vsel %vm2622_vm3, %v6086_v61, 0  ;;  %v6140_v4 = vsel %vm2622_vm3, %v6087_v62, 0 }
 0xc74   : > { %21846 = vmatpush3.bf16.msra.mxu0 %v6094_v3  ;;  %21852 = vmatpush3.bf16.msra.mxu1 %v6140_v4 }
 0xc75   : > { %21847 = vmatprep.mubr.msk.bf16.mxu0 %vm23478_vm0, %v23477_v1  ;;  %21853 = vmatprep.mubr.msk.bf16.mxu1 %vm23478_vm0, %v23477_v1 }
 0xc76   : > { %v24366_v5 = vpop.f32.mrb[100].mxu0  ;;  %v24368_v6 = vpop.f32.mrb[100].mxu1  ;;  %21857 = vmatprep.subr.bf16.mxu0 %v23477_v1  ;;  %21863 = vmatprep.subr.bf16.mxu1 %v23477_v1 }
 0xc77   : > { %v21811_v7 = vpop.f32.mrb[101].mxu0  ;;  %v21819_v8 = vpop.f32.mrb[101].mxu1 }
 0xc78   : > { %v5783_v13 = vpop.f32.mrb[102].mxu0  ;;  %v5835_v15 = vpop.f32.mrb[102].mxu1 }
 0xc79   : > { %v21812_v17 = vpop.f32.mrb[103].mxu0  ;;  %v21820_v30 = vpop.f32.mrb[103].mxu1  ;;  %v18961_v13 = vld [vmem:[%s26117_s14 + $0x7] ss:$0 sm:$0xff]  ;;  %v18960_v15 = vld [vmem:[%s26117_s14 + $0x6] ss:$0 sm:$0xff] }
 0xc7a   : > { %v5833_v17 = vadd.f32 %v18961_v13, %v24368_v6  ;;  %s26148_s14 = sld [smem:[#allocation37_spill]] }
 0xd3e   : > { %v5886_v18 = vpop.f32.mrb[104].mxu0  ;;  %v5932_v19 = vpop.f32.mrb[104].mxu1 }
 0xd3f   : > { %v6030_v22 = vmul.f32 0.35355338, %v5886_v18  ;;  %v6031_v23 = vmul.f32 0.35355338, %v5932_v19  ;;  %v21825_v24 = vpop.f32.mrb[105].mxu0  ;;  %v21831_v25 = vpop.f32.mrb[105].mxu1  ;;  %v5781_v18 = vadd.f32 %v18960_v15, %v24366_v5 }
 0xd40   : > { %v5889_v26 = vpop.f32.mrb[106].mxu0  ;;  %v5935_v27 = vpop.f32.mrb[106].mxu1  ;;  %v6089_v24 = vpack.c.bf16 %v5833_v17, %v5833_v17 }
 0xd41   : > { %v21826_v28 = vpop.f32.mrb[107].mxu0  ;;  %v21832_v32 = vpop.f32.mrb[107].mxu1  ;;  %v6035_v34 = vadd.f32 %v23415_v33, %v6031_v23  ;;  %v6034_v16 = vadd.f32 %v23415_v33, %v6030_v22  ;;  %v6088_v26 = vpack.c.bf16 %v5781_v18, %v5781_v18 }
 0xd42   : > { %v6232_v6 = vsel %vm2622_vm3, %v6089_v24, 0 }
 0xd43   : > { %v6041_v35 = vsel %vm2368_vm2, %v6035_v34, -inf  ;;  %v6038_v36 = vsel %vm2368_vm2, %v6034_v16, -inf  ;;  %v6186_v5 = vsel %vm2622_vm3, %v6088_v26, 0 }
 0xd44   : > { %6042 = vmax.xlane.f32.xlu1 %v6041_v35  ;;  %6039 = vmax.xlane.f32.xlu0 %v6038_v36  ;;  %v18921_v36 = vld [vmem:[%s26116_s19 + $0x10] sm:$0xf] }
 0xd46   : > { %v5978_v37 = vpop.f32.mrb[108].mxu0  ;;  %v6024_v38 = vpop.f32.mrb[108].mxu1 }
 0xd47   : > { %v6032_v43 = vmul.f32 0.35355338, %v5978_v37  ;;  %v6033_v44 = vmul.f32 0.35355338, %v6024_v38  ;;  %v21837_v9 = vpop.f32.mrb[109].mxu0  ;;  %v21843_v10 = vpop.f32.mrb[109].mxu1 }
 0xd48   : > { %v5981_v45 = vpop.f32.mrb[110].mxu0  ;;  %v6027_v39 = vpop.f32.mrb[110].mxu1  ;;  %v6282_v9 = vsel %vm2622_vm3, %v18921_v36, 0  ;;  %v18924_v10 = vld [vmem:[%s26116_s19 + $0x1c] sm:$0xf] }
 0xd49   : > { %v21838_v46 = vpop.f32.mrb[111].mxu0  ;;  %v21844_v42 = vpop.f32.mrb[111].mxu1  ;;  %v6037_v47 = vadd.f32 %v23415_v33, %v6033_v44  ;;  %v6036_v48 = vadd.f32 %v23415_v33, %v6032_v43  ;;  %v18923_v45 = vld [vmem:[%s26116_s19 + $0x18] sm:$0xf] }
 0xd4b   : > { %v6047_v49 = vsel %vm2368_vm2, %v6037_v47, -inf  ;;  %v6044_v2 = vsel %vm2368_vm2, %v6036_v48, -inf }
 0xd4c   : > { %6048 = vmax.xlane.f32.xlu1 %v6047_v49  ;;  %6045 = vmax.xlane.f32.xlu0 %v6044_v2 }
 0xdd1   : > { %v6043_v50 = vpop.xlane.xlu1 %6042  ;;  %v6040_v51 = vpop.xlane.xlu0 %6039 }
 0xdd2   : > { %v6051_v40 = vsub.f32 %v6035_v34, %v6043_v50  ;;  %v6050_v52 = vsub.f32 %v6034_v16, %v6040_v51  ;;  %v18922_v34 = vld [vmem:[%s26116_s19 + $0x14] sm:$0xf]  ;;  %v6374_v51 = vsel %vm2622_vm3, %v18923_v45, 0  ;;  %v18992_v45 = vld [vmem:[%s26118_s12 + $0x108] sm:$0xff]  ;;  %s26151_s19 = sld [smem:[#allocation41_spill]] }
 0xdd3   : > { %v6328_v43 = vsel %vm2622_vm3, %v18922_v34, 0 }
 0xdd4   : > { %v6056_v31 = vmul.f32 1.442695, %v6051_v40  ;;  %v6054_v41 = vmul.f32 1.442695, %v6050_v52 }
 0xdd6   : > { %23314 = vpow2.f32 %v6056_v31 }
 0xdd7   : > { %23316 = vpow2.f32 %v6054_v41 }
 0xdd9   : > { %v6049_v53 = vpop.xlane.xlu1 %6048  ;;  %v6046_v54 = vpop.xlane.xlu0 %6045 }
 0xdda   : > { %v6053_v55 = vsub.f32 %v6037_v47, %v6049_v53  ;;  %v6052_v58 = vsub.f32 %v6036_v48, %v6046_v54  ;;  %v6420_v48 = vsel %vm2622_vm3, %v18924_v10, 0  ;;  %v18993_v10 = vld [vmem:[%s26118_s12 + $0x140] sm:$0xff] }
 0xddc   : > { %v6060_v59 = vmul.f32 1.442695, %v6053_v55  ;;  %v6058_v60 = vmul.f32 1.442695, %v6052_v58 }
 0xdde   : > { %23318 = vpow2.f32 %v6060_v59 }
 0xddf   : > { %23320 = vpow2.f32 %v6058_v60 }
 0xde0   : > { %v23315_v56 = vpop.eup %23314 }
 0xde1   : > { %v23317_v57 = vpop.eup %23316  ;;  %v6065_v61 = vsel %vm2368_vm2, %v23315_v56, 0.0 }
 0xde2   : > { %6066 = vadd.xlane.f32.xlu1 %v6065_v61  ;;  %v6062_v62 = vsel %vm2368_vm2, %v23317_v57, 0.0 }
 0xde3   : > { %6063 = vadd.xlane.f32.xlu0 %v6062_v62 }
 0xde8   : > { %v23319_v63 = vpop.eup %23318 }
 0xde9   : > { %v23321_v0 = vpop.eup %23320  ;;  %v6071_v3 = vsel %vm2368_vm2, %v23319_v63, 0.0 }
 0xdea   : > { %6072 = vadd.xlane.f32.xlu1 %v6071_v3  ;;  %v6068_v4 = vsel %vm2368_vm2, %v23321_v0, 0.0 }
 0xdeb   : > { %6069 = vadd.xlane.f32.xlu0 %v6068_v4 }
 0xe6f   : > { %v6067_v7 = vpop.xlane.xlu1 %6066 }
 0xe70   : > { %23322 = vrcp.f32 %v6067_v7  ;;  %v6064_v8 = vpop.xlane.xlu0 %6063 }
 0xe71   : > { %23324 = vrcp.f32 %v6064_v8 }
 0xe77   : > { %v6073_v30 = vpop.xlane.xlu1 %6072 }
 0xe78   : > { %23326 = vrcp.f32 %v6073_v30  ;;  %v6070_v19 = vpop.xlane.xlu0 %6069 }
 0xe79   : > { %23328 = vrcp.f32 %v6070_v19 }
 0xe7a   : > { %v23323_v22 = vpop.eup %23322 }
 0xe7b   : > { %v23325_v23 = vpop.eup %23324  ;;  %v6077_v25 = vmul.f32 %v23323_v22, %v23315_v56 }
 0xe7c   : > { %v6075_v27 = vmul.f32 %v23325_v23, %v23317_v57 }
 0xe7d   : > { %v6083_v28 = vpack.c.bf16 %v6077_v25, %v6077_v25 }
 0xe7e   : > { %v6082_v32 = vpack.c.bf16 %v6075_v27, %v6075_v27 }
 0xe7f   : > { %21854 = vmatmul.mubr.msk.bf16.vlgmr.msra.gmra.mrb[112].mxu1 %vm2368_vm2, %v6083_v28 }
 0xe80   : > { %21848 = vmatmul.mubr.msk.bf16.vlgmr.msra.gmra.mrb[112].mxu0 %vm2368_vm2, %v6082_v32  ;;  %21864 = vmatpush3.bf16.msra.mxu1 %v6232_v6 }
 0xe81   : > { %21858 = vmatpush3.bf16.msra.mxu0 %v6186_v5  ;;  %21859 = vmatprep.mubr.msk.bf16.mxu0 %vm23478_vm0, %v23477_v1  ;;  %v18986_v5 = vld [vmem:[%s26114_s24 + $0x1] ss:$0 sm:$0xff]  ;;  %s26153_s24 = sld [smem:[#allocation42_spill]] }
 0xe82   : > { %v23327_v33 = vpop.eup %23326  ;;  %21865 = vmatprep.mubr.msk.bf16.mxu1 %vm23478_vm0, %v23477_v1  ;;  %21869 = vmatprep.subr.bf16.mxu0 %v23477_v1 }
 0xe83   : > { %v23329_v16 = vpop.eup %23328  ;;  %v6081_v35 = vmul.f32 %v23327_v33, %v23319_v63  ;;  %21875 = vmatprep.subr.bf16.mxu1 %v23477_v1 }
 0xe84   : > { %v6079_v37 = vmul.f32 %v23329_v16, %v23321_v0 }
 0xe85   : > { %v6085_v38 = vpack.c.bf16 %v6081_v35, %v6081_v35 }
 0xe86   : > { %v6084_v44 = vpack.c.bf16 %v6079_v37, %v6079_v37 }
 0xe87   : > { %21866 = vmatmul.mubr.msk.bf16.vlgmr.msra.gmra.mrb[116].mxu1 %vm2368_vm2, %v6085_v38 }
 0xe88   : > { %21860 = vmatmul.mubr.msk.bf16.vlgmr.msra.gmra.mrb[116].mxu0 %vm2368_vm2, %v6084_v44  ;;  %21876 = vmatpush3.bf16.msra.mxu1 %v6328_v43 }
 0xe89   : > { %21870 = vmatpush3.bf16.msra.mxu0 %v6282_v9  ;;  %21871 = vmatprep.mubr.msk.bf16.mxu0 %vm23478_vm0, %v23477_v1  ;;  %v18991_v9 = vld [vmem:[%s26118_s12 + $0x100] sm:$0xff] }
 0xe8a   : > { %21877 = vmatprep.mubr.msk.bf16.mxu1 %vm23478_vm0, %v23477_v1  ;;  %21881 = vmatprep.subr.bf16.mxu0 %v23477_v1 }
 0xe8b   : > { %21887 = vmatprep.subr.bf16.mxu1 %v23477_v1 }
 0xf52   : > { %v6176_v39 = vpop.f32.mrb[112].mxu1 }
 0xf53   : > { %v6130_v46 = vpop.f32.mrb[112].mxu0  ;;  %v6275_v42 = vpack.c.bf16 %v6176_v39, %v6176_v39  ;;  %v21855_v47 = vpop.f32.mrb[113].mxu1  ;;  %v19001_v39 = vcombine.high %v18991_v9, %v18993_v10 }
 0xf54   : > { %v6274_v49 = vpack.c.bf16 %v6130_v46, %v6130_v46  ;;  %v21849_v2 = vpop.f32.mrb[113].mxu0  ;;  %v6179_v50 = vpop.f32.mrb[114].mxu1  ;;  %v18994_v46 = vld [vmem:[%s26118_s12 + $0x148] sm:$0xff] }
 0xf55   : > { %v6133_v40 = vpop.f32.mrb[114].mxu0  ;;  %v21856_v52 = vpop.f32.mrb[115].mxu1  ;;  %21878 = vmatmul.mubr.msk.bf16.vlgmr.msra.gmra.mrb[120].mxu1 %vm2368_vm2, %v6275_v42  ;;  %v19002_v42 = vcombine.low %v18992_v45, %v18994_v46  ;;  %v19003_v47 = vcombine.high %v18992_v45, %v18994_v46  ;;  %v18996_v2 = vld [vmem:[%s26118_s12 + $0x188] sm:$0xff]  ;;  %v22830_v45 = vld [vmem:[%s26112_s27 + $0x520] sm:$0xff]  }
 0xf56   : > { %v21850_v31 = vpop.f32.mrb[115].mxu0  ;;  %21872 = vmatmul.mubr.msk.bf16.vlgmr.msra.gmra.mrb[120].mxu0 %vm2368_vm2, %v6274_v49  ;;  %21888 = vmatpush3.bf16.msra.mxu1 %v6420_v48  ;;  %v18995_v48 = vld [vmem:[%s26118_s12 + $0x180] sm:$0xff]  ;;  %v22832_v46 = vld [vmem:[%s26112_s27 + $0x568] sm:$0xff]  }
 0xf57   : > { %21882 = vmatpush3.bf16.msra.mxu0 %v6374_v51  ;;  %21883 = vmatprep.mubr.msk.bf16.mxu0 %vm23478_vm0, %v23477_v1  ;;  %v18997_v49 = vld [vmem:[%s26118_s12 + $0x1c0] sm:$0xff]  ;;  %v18998_v51 = vld [vmem:[%s26118_s12 + $0x1c8] sm:$0xff] }
 0xf58   : > { %21889 = vmatprep.mubr.msk.bf16.mxu1 %vm23478_vm0, %v23477_v1  ;;  %6584 = vmatprep.subr.bf16.mxu0 %v19001_v39  ;;  %v19005_v50 = vcombine.high %v18995_v48, %v18997_v49  ;;  %v19004_v40 = vcombine.low %v18995_v48, %v18997_v49  ;;  %v19006_v52 = vcombine.low %v18996_v2, %v18998_v51  ;;  %v22831_v39 = vld [vmem:[%s26112_s27 + $0x5a0] sm:$0xff]   ;;  %v22836_v48 = vld [vmem:[%s26112_s27 + $0x570] sm:$0xff]  }
 0xf59   : > { %6625 = vmatprep.subr.bf16.mxu1 %v19003_v47  ;;  %v19007_v31 = vcombine.high %v18996_v2, %v18998_v51  ;;  %v22835_v47 = vld [vmem:[%s26112_s27 + $0x5a8] sm:$0xff]   ;;  %v22837_v49 = vld [vmem:[%s26112_s27 + $0x5f0] sm:$0xff]   ;;  %v22840_v51 = vld [vmem:[%s26112_s27 + $0x578] sm:$0xff]  }
 0xf5a   : > { %v6268_v41 = vpop.f32.mrb[116].mxu1  ;;  %v22838_v2 = vld [vmem:[%s26112_s27 + $0x530] sm:$0xff]  }
 0xf5b   : > { %v6222_v53 = vpop.f32.mrb[116].mxu0  ;;  %v6277_v54 = vpack.c.bf16 %v6268_v41, %v6268_v41  ;;  %v21867_v55 = vpop.f32.mrb[117].mxu1  ;;  %v19074_v41 = vld [vmem:[%s26118_s12 + $0x110] sm:$0xff] }
 0xf5c   : > { %v6276_v58 = vpack.c.bf16 %v6222_v53, %v6222_v53  ;;  %v21861_v59 = vpop.f32.mrb[117].mxu0  ;;  %v6271_v60 = vpop.f32.mrb[118].mxu1  ;;  %v19076_v53 = vld [vmem:[%s26118_s12 + $0x150] sm:$0xff] }
 0xf5d   : > { %v6225_v56 = vpop.f32.mrb[118].mxu0  ;;  %v21868_v57 = vpop.f32.mrb[119].mxu1  ;;  %21890 = vmatmul.mubr.msk.bf16.vlgmr.msra.gmra.mrb[124].mxu1 %vm2368_vm2, %v6277_v54  ;;  %v19075_v54 = vld [vmem:[%s26118_s12 + $0x118] sm:$0xff]  ;;  %v19084_v55 = vcombine.high %v19074_v41, %v19076_v53  ;;  %v19083_v59 = vcombine.low %v19074_v41, %v19076_v53  ;;  %v22844_v41 = vld [vmem:[%s26112_s27 + $0x440] sm:$0xff]  }
 0xf5e   : > { %v21862_v61 = vpop.f32.mrb[119].mxu0  ;;  %21884 = vmatmul.mubr.msk.bf16.vlgmr.msra.gmra.mrb[124].mxu0 %vm2368_vm2, %v6276_v58  ;;  %6657 = vmatprep.mubr.bf16.mxu1 %v23479_v12  ;;  %v19077_v58 = vld [vmem:[%s26118_s12 + $0x158] sm:$0xff]  ;;  %v22845_v53 = vld [vmem:[%s26112_s27 + $0x4c0] sm:$0xff]  }
 0xf5f   : > { %6616 = vmatprep.mubr.bf16.mxu0 %v23479_v12  ;;  %6626 = vmatpush1.bf16.msra.mxu1 %v19002_v42  ;;  %v19085_v60 = vcombine.low %v19075_v54, %v19077_v58  ;;  %v19086_v56 = vcombine.high %v19075_v54, %v19077_v58  ;;  %v22834_v42 = vld [vmem:[%s26112_s27 + $0x528] sm:$0xff]  }
 0xf60   : > { %6627 = vmatprep.subr.bf16.mxu1 %v19007_v31  ;;  %v22843_v31 = vld [vmem:[%s26112_s27 + $0x5b8] sm:$0xff]  }
 0xf63   : > { %6628 = vmatpush1.bf16.msra.mxu1 %v19006_v52  ;;  %v22842_v52 = vld [vmem:[%s26112_s27 + $0x538] sm:$0xff]  }
 0xf64   : > { %6850 = vmatprep.subr.bf16.mxu1 %v19086_v56 }
0x1028   : > { %v6364_v62 = vpop.f32.mrb[120].mxu1 }
0x1029   : > { %v6318_v63 = vpop.f32.mrb[120].mxu0  ;;  %v6463_v0 = vsel %vm1696_vm1, %v6364_v62, 0.0  ;;  %v21879_v3 = vpop.f32.mrb[121].mxu1 }
0x102a   : > { %v6462_v4 = vsel %vm1696_vm1, %v6318_v63, 0.0  ;;  %v21873_v7 = vpop.f32.mrb[121].mxu0  ;;  %v6367_v8 = vpop.f32.mrb[122].mxu1 }
0x102b   : > { %v6464_v13 = vadd.f32 %v6463_v0, %v6462_v4  ;;  %v6321_v15 = vpop.f32.mrb[122].mxu0  ;;  %v21880_v17 = vpop.f32.mrb[123].mxu1  ;;  %v18989_v0 = vld [vmem:[%s26110_s30 + $0x1] ss:$0 sm:$0xff]  ;;  %v19078_v8 = vld [vmem:[%s26118_s12 + $0x190] sm:$0xff]  ;;  %s26157_s30 = sld [smem:[#allocation47_spill]] }
0x102c   : > { %v21874_v30 = vpop.f32.mrb[123].mxu0  ;;  %v18990_v4 = vld [vmem:[%s26120_s6 + $0x1] ss:$0 sm:$0xff]  ;;  %v19079_v15 = vld [vmem:[%s26118_s12 + $0x198] sm:$0xff]  ;;  %s26140_s6 = sld [smem:[#allocation34_spill]] }
0x102d   : > { %v19081_v17 = vld [vmem:[%s26118_s12 + $0x1d8] sm:$0xff] }
0x1030   : > { %v6456_v18 = vpop.f32.mrb[124].mxu1 }
0x1031   : > { %v6410_v19 = vpop.f32.mrb[124].mxu0  ;;  %v21891_v22 = vpop.f32.mrb[125].mxu1  ;;  %v6467_v32 = vsel %vm1696_vm1, %v6456_v18, 0.0 }
0x1032   : > { %v6465_v23 = vsel %vm1696_vm1, %v6410_v19, 0.0  ;;  %v21885_v24 = vpop.f32.mrb[125].mxu0  ;;  %v6459_v25 = vpop.f32.mrb[126].mxu1  ;;  %v19090_v22 = vcombine.high %v19079_v15, %v19081_v17 }
0x1033   : > { %v6466_v26 = vadd.f32 %v6465_v23, %v6464_v13  ;;  %v6413_v27 = vpop.f32.mrb[126].mxu0  ;;  %v21892_v28 = vpop.f32.mrb[127].mxu1  ;;  %v19080_v13 = vld [vmem:[%s26118_s12 + $0x1d0] sm:$0xff]  ;;  %v19089_v24 = vcombine.low %v19079_v15, %v19081_v17  ;;  %v22812_v25 = vld [vmem:[%s26112_s27 + $0x540] sm:$0xff]  }
0x1034   : > { %v21886_v6 = vpop.f32.mrb[127].mxu0  ;;  %v19088_v19 = vcombine.high %v19078_v8, %v19080_v13  ;;  %v19087_v23 = vcombine.low %v19078_v8, %v19080_v13  ;;  %v22814_v27 = vld [vmem:[%s26112_s27 + $0x500] sm:$0xff]  }
0x1035   : > { %v6468_v33 = vadd.f32 %v6467_v32, %v6466_v26  ;;  %v22813_v26 = vld [vmem:[%s26112_s27 + $0x5c0] sm:$0xff]   ;;  %v22816_v32 = vld [vmem:[%s26112_s27 + $0x548] sm:$0xff]  }
0x1036   : > { %v22815_v28 = vld [vmem:[%s26112_s27 + $0x580] sm:$0xff]   ;;  %v22817_v6 = vld [vmem:[%s26112_s27 + $0x5c8] sm:$0xff]  }
0x1037   : > { %v6475_v34 = vadd.f32 %v18986_v5, %v6468_v33  ;;  %v22818_v5 = vld [vmem:[%s26112_s27 + $0x508] sm:$0xff]  }
0x1038   : > { %v22819_v33 = vld [vmem:[%s26112_s27 + $0x588] sm:$0xff]  }
0x1039   : > { %v6476_v16 = vadd.f32 %v6475_v34, %v24240_v29  ;;  %v19000_v29 = vcombine.low %v18991_v9, %v18993_v10  ;;  %v22820_v34 = vld [vmem:[%s26112_s27 + $0x550] sm:$0xff]   ;;  %v22828_v9 = vld [vmem:[%s26112_s27 + $0x560] sm:$0xff]  }
0x103a   : > { %v22829_v10 = vld [vmem:[%s26112_s27 + $0x5e0] sm:$0xff]  }
0x103b   : > { %v6481_v35 = vsel %vm1696_vm1, %v6476_v16, 0.0  ;;  %6585 = vmatpush1.bf16.msra.mxu0 %v19000_v29  ;;  %v22833_v29 = vld [vmem:[%s26112_s27 + $0x5e8] sm:$0xff]  }
0x103c   : > { %6482 = vadd.xlane.f32.xlu0 %v6481_v35  ;;  %6586 = vmatprep.subr.bf16.mxu0 %v19005_v50  ;;  %v22822_v35 = vld [vmem:[%s26112_s27 + $0x510] sm:$0xff]  }
0x103d   : > { %v22839_v50 = vld [vmem:[%s26112_s27 + $0x5b0] sm:$0xff]  }
0x103f   : > { %6587 = vmatpush1.bf16.msra.mxu0 %v19004_v40  ;;  %v22841_v40 = vld [vmem:[%s26112_s27 + $0x5f8] sm:$0xff]  }
0x1040   : > { %6809 = vmatprep.subr.bf16.mxu0 %v19084_v55 }
0x10c9   : > { %v6483_v36 = vpop.xlane.xlu0 %6482 }
0x10ca   : > { %v6484_v37 = vmul.f32 0.03125, %v6483_v36  ;;  %v22823_v36 = vld [vmem:[%s26112_s27 + $0x590] sm:$0xff]  }
0x10cc   : > { %v6485_v38 = vsub.f32 %v6476_v16, %v6484_v37  ;;  %v22821_v16 = vld [vmem:[%s26112_s27 + $0x5d0] sm:$0xff]   ;;  %v22824_v37 = vld [vmem:[%s26112_s27 + $0x558] sm:$0xff]  }
0x10ce   : > { %v6486_v43 = vmul.f32 %v6485_v38, %v6485_v38 }
0x10d0   : > { %v6487_v44 = vsel %vm1696_vm1, %v6486_v43, 0.0  ;;  %v22826_v43 = vld [vmem:[%s26112_s27 + $0x518] sm:$0xff]  }
0x10d1   : > { %6488 = vadd.xlane.f32.xlu1 %v6487_v44  ;;  %v22827_v44 = vld [vmem:[%s26112_s27 + $0x598] sm:$0xff]  }
0x115e   : > { %v6489_v57 = vpop.xlane.xlu1 %6488 }
0x115f   : > { %v6490_v61 = vmul.f32 0.03125, %v6489_v57 }
0x1161   : > { %v6491_v62 = vadd.f32 1e-05, %v6490_v61  ;;  %v19082_v61 = vld [vmem:[%s26126_s10 + $0x14] sm:$0xf] }
0x1162   : > { %v6756_v8 = vrot.slane %v19082_v61, %v24043_v11  ;;  %v6764_v13 = vrot.slane %v19082_v61, %v24045_v14 }
0x1163   : > { %23330 = vrsqrt.f32 %v6491_v62 }
0x116d   : > { %v23331_v63 = vpop.eup %23330 }
0x116e   : > { %v6493_v3 = vmul.f32 %v23331_v63, %v6485_v38  ;;  %v22825_v38 = vld [vmem:[%s26112_s27 + $0x5d8] sm:$0xff]  }
0x1170   : > { %v6500_v7 = vmul.f32 %v18989_v0, %v6493_v3 }
0x1172   : > { %v24447_v30 = vadd.f32 %v18990_v4, %v6500_v7  ;;  %v6752_v4 = vrot.slane %v19082_v61, %v24051_v20  ;;  %v6760_v7 = vrot.slane %v19082_v61, %v24053_v21  ;;  %v22864_v61 = vld [vmem:[%s26112_s27 + $0x468] sm:$0xff]  }
0x1174   : > { %v24451_v18 = vpack.c.bf16 %v24447_v30, %v24447_v30 }
0x1176   : > { %19008 = vmatmul.mubr.msk.bf16.vlgmr.msra.gmra.mrb[128].mxu0 %vm1696_vm1, %v24451_v18  ;;  %19009 = vmatmul.mubr.msk.bf16.vlgmr.msra.gmra.mrb[128].mxu1 %vm1696_vm1, %v24451_v18 }
0x1177   : > { %6810 = vmatpush1.bf16.msra.mxu0 %v19083_v59  ;;  %6851 = vmatpush1.bf16.msra.mxu1 %v19085_v60  ;;  %v24502_v60 = vld [vmem:[%s26126_s10 + $0x10] sm:$0xf] }
0x1178   : > { %6811 = vmatprep.subr.bf16.mxu0 %v19088_v19  ;;  %6852 = vmatprep.subr.bf16.mxu1 %v19090_v22  ;;  %v6528_v0 = vrot.slane %v24502_v60, %v24043_v11  ;;  %v6536_v3 = vrot.slane %v24502_v60, %v24045_v14 }
0x1179   : > { %6841 = vmatprep.mubr.bf16.mxu0 %v23479_v12  ;;  %6882 = vmatprep.mubr.bf16.mxu1 %v23479_v12 }
0x117b   : > { %6812 = vmatpush1.bf16.msra.mxu0 %v19087_v23  ;;  %6853 = vmatpush1.bf16.msra.mxu1 %v19089_v24 }
0x117c   : > { %20786 = vmatprep.subr.bf16.mxu0 %v22812_v25  ;;  %20808 = vmatprep.subr.bf16.mxu1 %v22813_v26 }
0x117e   : > { %19091 = vmatmul.mubr.msk.bf16.vlgmr.msra.gmra.mrb[132].mxu0 %vm1696_vm1, %v24451_v18  ;;  %19092 = vmatmul.mubr.msk.bf16.vlgmr.msra.gmra.mrb[132].mxu1 %vm1696_vm1, %v24451_v18 }
0x117f   : > { %20787 = vmatpush3.bf16.msra.mxu0 %v22814_v27  ;;  %20809 = vmatpush3.bf16.msra.mxu1 %v22815_v28 }
0x1180   : > { %20788 = vmatprep.subr.bf16.mxu0 %v22816_v32  ;;  %20810 = vmatprep.subr.bf16.mxu1 %v22817_v6 }
0x1183   : > { %20789 = vmatpush3.bf16.msra.mxu0 %v22818_v5  ;;  %20811 = vmatpush3.bf16.msra.mxu1 %v22819_v33 }
0x1184   : > { %20790 = vmatprep.subr.bf16.mxu0 %v22820_v34  ;;  %20812 = vmatprep.subr.bf16.mxu1 %v22821_v16 }
0x1187   : > { %20791 = vmatpush3.bf16.msra.mxu0 %v22822_v35  ;;  %20813 = vmatpush3.bf16.msra.mxu1 %v22823_v36 }
0x1188   : > { %20792 = vmatprep.subr.bf16.mxu0 %v22824_v37  ;;  %20814 = vmatprep.subr.bf16.mxu1 %v22825_v38 }
0x118b   : > { %20793 = vmatpush3.bf16.msra.mxu0 %v22826_v43  ;;  %20815 = vmatpush3.bf16.msra.mxu1 %v22827_v44 }
0x118c   : > { %20794 = vmatprep.subr.bf16.mxu0 %v22828_v9  ;;  %20816 = vmatprep.subr.bf16.mxu1 %v22829_v10  ;;  %v22846_v9 = vld [vmem:[%s26112_s27 + $0x400] sm:$0xff]  }
0x118d   : > { %v22847_v10 = vld [vmem:[%s26112_s27 + $0x480] sm:$0xff]  }
0x118f   : > { %20795 = vmatpush3.bf16.msra.mxu0 %v22830_v45  ;;  %20817 = vmatpush3.bf16.msra.mxu1 %v22831_v39 }
0x1190   : > { %20796 = vmatprep.subr.bf16.mxu0 %v22832_v46  ;;  %20818 = vmatprep.subr.bf16.mxu1 %v22833_v29  ;;  %v22848_v46 = vld [vmem:[%s26112_s27 + $0x448] sm:$0xff]  }
0x1191   : > { %v22849_v29 = vld [vmem:[%s26112_s27 + $0x4c8] sm:$0xff]  }
0x1193   : > { %20797 = vmatpush3.bf16.msra.mxu0 %v22834_v42  ;;  %20819 = vmatpush3.bf16.msra.mxu1 %v22835_v47 }
0x1194   : > { %20798 = vmatprep.subr.bf16.mxu0 %v22836_v48  ;;  %20820 = vmatprep.subr.bf16.mxu1 %v22837_v49  ;;  %v22850_v48 = vld [vmem:[%s26112_s27 + $0x408] sm:$0xff]  }
0x1195   : > { %v22851_v49 = vld [vmem:[%s26112_s27 + $0x488] sm:$0xff]  }
0x1197   : > { %20799 = vmatpush3.bf16.msra.mxu0 %v22838_v2  ;;  %20821 = vmatpush3.bf16.msra.mxu1 %v22839_v50  ;;  %v22852_v2 = vld [vmem:[%s26112_s27 + $0x450] sm:$0xff]  }
0x1198   : > { %20800 = vmatprep.subr.bf16.mxu0 %v22840_v51  ;;  %20822 = vmatprep.subr.bf16.mxu1 %v22841_v40  ;;  %v22853_v50 = vld [vmem:[%s26112_s27 + $0x4d0] sm:$0xff]  }
0x1199   : > { %v22854_v51 = vld [vmem:[%s26112_s27 + $0x410] sm:$0xff]  }
0x119a   : > { %v22855_v40 = vld [vmem:[%s26112_s27 + $0x490] sm:$0xff]  }
0x119b   : > { %20801 = vmatpush3.bf16.msra.mxu0 %v22842_v52  ;;  %20823 = vmatpush3.bf16.msra.mxu1 %v22843_v31  ;;  %v22856_v52 = vld [vmem:[%s26112_s27 + $0x458] sm:$0xff]  }
0x119c   : > { %20830 = vmatprep.subr.bf16.mxu0 %v22844_v41  ;;  %20852 = vmatprep.subr.bf16.mxu1 %v22845_v53  ;;  %v22857_v31 = vld [vmem:[%s26112_s27 + $0x4d8] sm:$0xff]  }
0x119d   : > { %v22858_v41 = vld [vmem:[%s26112_s27 + $0x418] sm:$0xff]  }
0x119e   : > { %v22859_v53 = vld [vmem:[%s26112_s27 + $0x498] sm:$0xff]  }
0x1249   : > { %v24497_v54 = vpop.f32.mrb[128].mxu0  ;;  %v24499_v55 = vpop.f32.mrb[128].mxu1 }
0x124a   : > { %v6620_v58 = vpop.f32.mrb[129].mxu0  ;;  %v6661_v59 = vpop.f32.mrb[129].mxu1 }
0x124b   : > { %v6622_v56 = vpop.f32.mrb[130].mxu0  ;;  %v6663_v57 = vpop.f32.mrb[130].mxu1  ;;  %v6621_v19 = vadd.f32 %v6620_v58, %v6528_v0  ;;  %v6662_v22 = vadd.f32 %v6661_v59, %v6536_v3  ;;  %v22860_v58 = vld [vmem:[%s26112_s27 + $0x460] sm:$0xff]   ;;  %v22867_v0 = vld [vmem:[%s26112_s27 + $0x4a8] sm:$0xff]   ;;  %v6524_v3 = vrot.slane %v24502_v60, %v24051_v20 }
0x124c   : > { %v6623_v62 = vpop.f32.mrb[131].mxu0  ;;  %v6664_v63 = vpop.f32.mrb[131].mxu1  ;;  %v22861_v59 = vld [vmem:[%s26112_s27 + $0x4e0] sm:$0xff]  }
0x124d   : > { %v6667_v37 = vmax.f32 %v6621_v19, 0.0  ;;  %v6669_v38 = vmax.f32 %v6662_v22, 0.0  ;;  %v22862_v56 = vld [vmem:[%s26112_s27 + $0x420] sm:$0xff]   ;;  %v22865_v62 = vld [vmem:[%s26112_s27 + $0x4e8] sm:$0xff]   ;;  %v22873_v22 = vld [vmem:[%s26112_s27 + $0x4f8] sm:$0xff]  }
0x124e   : > { %v22863_v57 = vld [vmem:[%s26112_s27 + $0x4a0] sm:$0xff]   ;;  %v22866_v63 = vld [vmem:[%s26112_s27 + $0x428] sm:$0xff]  }
0x124f   : > { %v6671_v42 = vpack.c.bf16 %v6667_v37, %v6667_v37  ;;  %v6673_v47 = vpack.c.bf16 %v6669_v38, %v6669_v38 }
0x1251   : > { %v6843_v15 = vpop.f32.mrb[132].mxu0  ;;  %v6884_v17 = vpop.f32.mrb[132].mxu1 }
0x1252   : > { %v6844_v23 = vadd.f32 %v6843_v15, %v6752_v4  ;;  %v6885_v24 = vadd.f32 %v6884_v17, %v6760_v7  ;;  %v6845_v25 = vpop.f32.mrb[133].mxu0  ;;  %v6886_v26 = vpop.f32.mrb[133].mxu1  ;;  %v6532_v4 = vrot.slane %v24502_v60, %v24053_v21  ;;  %v22868_v7 = vld [vmem:[%s26112_s27 + $0x470] sm:$0xff]   ;;  %v6619_v17 = vadd.f32 %v24497_v54, %v6524_v3  ;;  %v22872_v60 = vld [vmem:[%s26112_s27 + $0x478] sm:$0xff]  }
0x1253   : > { %v6846_v27 = vadd.f32 %v6845_v25, %v6756_v8  ;;  %v6887_v28 = vadd.f32 %v6886_v26, %v6764_v13  ;;  %v6847_v32 = vpop.f32.mrb[134].mxu0  ;;  %v6888_v6 = vpop.f32.mrb[134].mxu1  ;;  %v22869_v8 = vld [vmem:[%s26112_s27 + $0x4f0] sm:$0xff]   ;;  %v19222_v25 = vld [vmem:[%s26118_s12 + $0x128] sm:$0xff] }
0x1254   : > { %v6891_v5 = vmax.f32 %v6844_v23, 0.0  ;;  %v6893_v33 = vmax.f32 %v6885_v24, 0.0  ;;  %v6848_v34 = vpop.f32.mrb[135].mxu0  ;;  %v6889_v16 = vpop.f32.mrb[135].mxu1  ;;  %v22870_v13 = vld [vmem:[%s26112_s27 + $0x430] sm:$0xff]   ;;  %v6660_v19 = vadd.f32 %v24499_v55, %v6532_v4  ;;  %v19221_v23 = vld [vmem:[%s26118_s12 + $0x120] sm:$0xff] }
0x1255   : > { %v6892_v35 = vmax.f32 %v6846_v27, 0.0  ;;  %v6894_v36 = vmax.f32 %v6887_v28, 0.0  ;;  %v22871_v15 = vld [vmem:[%s26112_s27 + $0x4b0] sm:$0xff]   ;;  %v19223_v24 = vld [vmem:[%s26118_s12 + $0x160] sm:$0xff]  ;;  %v19224_v26 = vld [vmem:[%s26118_s12 + $0x168] sm:$0xff]  ;;  %v6666_v32 = vmax.f32 %v6619_v17, 0.0 }
0x1256   : > { %v6895_v45 = vpack.c.bf16 %v6891_v5, %v6891_v5  ;;  %v6897_v39 = vpack.c.bf16 %v6893_v33, %v6893_v33  ;;  %v22874_v27 = vld [vmem:[%s26112_s27 + $0x438] sm:$0xff]   ;;  %v6668_v54 = vmax.f32 %v6660_v19, 0.0  ;;  %v19231_v55 = vcombine.high %v19221_v23, %v19223_v24  ;;  %v19225_v5 = vld [vmem:[%s26118_s12 + $0x1a0] sm:$0xff]  ;;  %v19226_v34 = vld [vmem:[%s26118_s12 + $0x1a8] sm:$0xff] }
0x1257   : > { %v6896_v43 = vpack.c.bf16 %v6892_v35, %v6892_v35  ;;  %v6898_v44 = vpack.c.bf16 %v6894_v36, %v6894_v36  ;;  %v22875_v28 = vld [vmem:[%s26112_s27 + $0x4b8] sm:$0xff]   ;;  %v19233_v6 = vcombine.high %v19222_v25, %v19224_v26  ;;  %v19227_v33 = vld [vmem:[%s26118_s12 + $0x1e0] sm:$0xff]  ;;  %v19228_v16 = vld [vmem:[%s26118_s12 + $0x1e8] sm:$0xff]  ;;  %v19230_v35 = vcombine.low %v19221_v23, %v19223_v24 }
0x1258   : > { %v19232_v36 = vcombine.low %v19222_v25, %v19224_v26  ;;  %v19235_v37 = vcombine.high %v19225_v5, %v19227_v33  ;;  %v6670_v38 = vpack.c.bf16 %v6666_v32, %v6666_v32  ;;  %v22900_v3 = vld [vmem:[%s26112_s27 + $0x670] sm:$0xff]   ;;  %v22906_v17 = vld [vmem:[%s26112_s27 + $0x638] sm:$0xff]  }
0x1259   : > { %7187 = vmatprep.mubr.bf16.mxu0 %v6896_v43  ;;  %7227 = vmatprep.mubr.bf16.mxu1 %v6898_v44  ;;  %v6672_v43 = vpack.c.bf16 %v6668_v54, %v6668_v54  ;;  %v19237_v44 = vcombine.high %v19226_v34, %v19228_v16  ;;  %v22901_v4 = vld [vmem:[%s26112_s27 + $0x6f0] sm:$0xff]   ;;  %v22907_v19 = vld [vmem:[%s26112_s27 + $0x6b8] sm:$0xff]  }
0x125a   : > { %7188 = vmatmul.mubr.bf16.vlgmr.msra.gmra.mrb[136].mxu0 %v6895_v45  ;;  %7228 = vmatmul.mubr.bf16.vlgmr.msra.gmra.mrb[136].mxu1 %v6897_v39  ;;  %v22876_v45 = vld [vmem:[%s26112_s27 + $0x640] sm:$0xff]   ;;  %v24602_v23 = vld [vmem:[%s26118_s12 + $0x138] sm:$0xff] }
0x125b   : > { %20831 = vmatpush3.bf16.msra.mxu0 %v22846_v9  ;;  %20853 = vmatpush3.bf16.msra.mxu1 %v22847_v10  ;;  %v19234_v9 = vcombine.low %v19225_v5, %v19227_v33  ;;  %v19236_v10 = vcombine.low %v19226_v34, %v19228_v16  ;;  %v22877_v39 = vld [vmem:[%s26112_s27 + $0x6c0] sm:$0xff]   ;;  %v24607_v25 = vld [vmem:[%s26118_s12 + $0x178] sm:$0xff] }
0x125c   : > { %7459 = vmatprep.mubr.bf16.mxu0 %v6671_v42  ;;  %7499 = vmatprep.mubr.bf16.mxu1 %v6673_v47  ;;  %v22880_v42 = vld [vmem:[%s26112_s27 + $0x648] sm:$0xff]  }
0x125d   : > { %20832 = vmatprep.subr.bf16.mxu0 %v22848_v46  ;;  %20854 = vmatprep.subr.bf16.mxu1 %v22849_v29  ;;  %v22878_v46 = vld [vmem:[%s26112_s27 + $0x600] sm:$0xff]   ;;  %v22881_v47 = vld [vmem:[%s26112_s27 + $0x6c8] sm:$0xff]  }
0x125e   : > { %v22879_v29 = vld [vmem:[%s26112_s27 + $0x680] sm:$0xff]  }
0x125f   : > { %20833 = vmatpush3.bf16.msra.mxu0 %v22850_v48  ;;  %20855 = vmatpush3.bf16.msra.mxu1 %v22851_v49  ;;  %v22882_v48 = vld [vmem:[%s26112_s27 + $0x608] sm:$0xff]  }
0x1260   : > { %20834 = vmatprep.subr.bf16.mxu0 %v22852_v2  ;;  %20856 = vmatprep.subr.bf16.mxu1 %v22853_v50  ;;  %v22883_v49 = vld [vmem:[%s26112_s27 + $0x688] sm:$0xff]   ;;  %v22884_v2 = vld [vmem:[%s26112_s27 + $0x650] sm:$0xff]  }
0x1261   : > { %v22885_v50 = vld [vmem:[%s26112_s27 + $0x6d0] sm:$0xff]  }
0x1263   : > { %20835 = vmatpush3.bf16.msra.mxu0 %v22854_v51  ;;  %20857 = vmatpush3.bf16.msra.mxu1 %v22855_v40  ;;  %v22886_v51 = vld [vmem:[%s26112_s27 + $0x610] sm:$0xff]  }
0x1264   : > { %20836 = vmatprep.subr.bf16.mxu0 %v22856_v52  ;;  %20858 = vmatprep.subr.bf16.mxu1 %v22857_v31  ;;  %v22887_v40 = vld [vmem:[%s26112_s27 + $0x690] sm:$0xff]   ;;  %v22888_v52 = vld [vmem:[%s26112_s27 + $0x658] sm:$0xff]  }
0x1265   : > { %v22889_v31 = vld [vmem:[%s26112_s27 + $0x6d8] sm:$0xff]  }
0x1267   : > { %20837 = vmatpush3.bf16.msra.mxu0 %v22858_v41  ;;  %20859 = vmatpush3.bf16.msra.mxu1 %v22859_v53  ;;  %v22890_v41 = vld [vmem:[%s26112_s27 + $0x618] sm:$0xff]  }
0x1268   : > { %20838 = vmatprep.subr.bf16.mxu0 %v22860_v58  ;;  %20860 = vmatprep.subr.bf16.mxu1 %v22861_v59  ;;  %v22891_v53 = vld [vmem:[%s26112_s27 + $0x698] sm:$0xff]   ;;  %v22892_v58 = vld [vmem:[%s26112_s27 + $0x660] sm:$0xff]  }
0x1269   : > { %v22893_v59 = vld [vmem:[%s26112_s27 + $0x6e0] sm:$0xff]  }
0x126b   : > { %20839 = vmatpush3.bf16.msra.mxu0 %v22862_v56  ;;  %20861 = vmatpush3.bf16.msra.mxu1 %v22863_v57  ;;  %v22894_v56 = vld [vmem:[%s26112_s27 + $0x620] sm:$0xff]  }
0x126c   : > { %20840 = vmatprep.subr.bf16.mxu0 %v22864_v61  ;;  %20862 = vmatprep.subr.bf16.mxu1 %v22865_v62  ;;  %v22895_v57 = vld [vmem:[%s26112_s27 + $0x6a0] sm:$0xff]   ;;  %v22896_v61 = vld [vmem:[%s26112_s27 + $0x668] sm:$0xff]  }
0x126d   : > { %v22897_v62 = vld [vmem:[%s26112_s27 + $0x6e8] sm:$0xff]  }
0x126f   : > { %20841 = vmatpush3.bf16.msra.mxu0 %v22866_v63  ;;  %20863 = vmatpush3.bf16.msra.mxu1 %v22867_v0  ;;  %v22898_v63 = vld [vmem:[%s26112_s27 + $0x628] sm:$0xff]  }
0x1270   : > { %20842 = vmatprep.subr.bf16.mxu0 %v22868_v7  ;;  %20864 = vmatprep.subr.bf16.mxu1 %v22869_v8  ;;  %v22899_v0 = vld [vmem:[%s26112_s27 + $0x6a8] sm:$0xff]   ;;  %v22902_v7 = vld [vmem:[%s26112_s27 + $0x630] sm:$0xff]  }
0x1271   : > { %v22903_v8 = vld [vmem:[%s26112_s27 + $0x6b0] sm:$0xff]  }
0x1273   : > { %20843 = vmatpush3.bf16.msra.mxu0 %v22870_v13  ;;  %20865 = vmatpush3.bf16.msra.mxu1 %v22871_v15  ;;  %v22904_v13 = vld [vmem:[%s26112_s27 + $0x678] sm:$0xff]  }
0x1274   : > { %20844 = vmatprep.subr.bf16.mxu0 %v22872_v60  ;;  %20866 = vmatprep.subr.bf16.mxu1 %v22873_v22  ;;  %v22905_v15 = vld [vmem:[%s26112_s27 + $0x6f8] sm:$0xff]   ;;  %v24596_v60 = vld [vmem:[%s26118_s12 + $0x130] sm:$0xff] }
0x1275   : > { %v24599_v22 = vld [vmem:[%s26118_s12 + $0x170] sm:$0xff] }
0x1276   : > { %v19346_v24 = vcombine.high %v24596_v60, %v24599_v22  ;;  %v19345_v26 = vcombine.low %v24596_v60, %v24599_v22 }
0x1277   : > { %20845 = vmatpush3.bf16.msra.mxu0 %v22874_v27  ;;  %20867 = vmatpush3.bf16.msra.mxu1 %v22875_v28  ;;  %v19347_v27 = vcombine.low %v24602_v23, %v24607_v25  ;;  %v19348_v28 = vcombine.high %v24602_v23, %v24607_v25 }
0x1278   : > { %7577 = vmatprep.subr.bf16.mxu0 %v19231_v55  ;;  %7618 = vmatprep.subr.bf16.mxu1 %v19233_v6 }
0x127a   : > { %7460 = vmatmul.mubr.bf16.vlgmr.msra.gmra.mrb[140].mxu0 %v6670_v38  ;;  %7500 = vmatmul.mubr.bf16.vlgmr.msra.gmra.mrb[140].mxu1 %v6672_v43 }
0x127b   : > { %7578 = vmatpush1.bf16.msra.mxu0 %v19230_v35  ;;  %7619 = vmatpush1.bf16.msra.mxu1 %v19232_v36 }
0x127c   : > { %7579 = vmatprep.subr.bf16.mxu0 %v19235_v37  ;;  %7620 = vmatprep.subr.bf16.mxu1 %v19237_v44 }
0x127d   : > { %7609 = vmatprep.mubr.bf16.mxu0 %v23479_v12  ;;  %7650 = vmatprep.mubr.bf16.mxu1 %v23479_v12 }
0x127f   : > { %7580 = vmatpush1.bf16.msra.mxu0 %v19234_v9  ;;  %7621 = vmatpush1.bf16.msra.mxu1 %v19236_v10 }
0x1280   : > { %20874 = vmatprep.subr.bf16.mxu0 %v22876_v45  ;;  %20896 = vmatprep.subr.bf16.mxu1 %v22877_v39 }
0x1282   : > { %19238 = vmatmul.mubr.msk.bf16.vlgmr.msra.gmra.mrb[144].mxu0 %vm1696_vm1, %v24451_v18  ;;  %19239 = vmatmul.mubr.msk.bf16.vlgmr.msra.gmra.mrb[144].mxu1 %vm1696_vm1, %v24451_v18 }
0x1283   : > { %20875 = vmatpush3.bf16.msra.mxu0 %v22878_v46  ;;  %20897 = vmatpush3.bf16.msra.mxu1 %v22879_v29  ;;  %v19229_v29 = vld [vmem:[%s26126_s10 + $0x18] sm:$0xf] }
0x1284   : > { %20876 = vmatprep.subr.bf16.mxu0 %v22880_v42  ;;  %20898 = vmatprep.subr.bf16.mxu1 %v22881_v47 }
0x1287   : > { %20877 = vmatpush3.bf16.msra.mxu0 %v22882_v48  ;;  %20899 = vmatpush3.bf16.msra.mxu1 %v22883_v49  ;;  %v7520_v49 = vrot.slane %v19229_v29, %v24051_v20 }
0x1288   : > { %20878 = vmatprep.subr.bf16.mxu0 %v22884_v2  ;;  %20900 = vmatprep.subr.bf16.mxu1 %v22885_v50  ;;  %v7528_v2 = vrot.slane %v19229_v29, %v24053_v21 }
0x128b   : > { %20879 = vmatpush3.bf16.msra.mxu0 %v22886_v51  ;;  %20901 = vmatpush3.bf16.msra.mxu1 %v22887_v40  ;;  %v7524_v51 = vrot.slane %v19229_v29, %v24043_v11  ;;  %v7532_v40 = vrot.slane %v19229_v29, %v24045_v14  ;;  %v22928_v29 = vld [vmem:[%s26112_s27 + $0x768] sm:$0xff]  }
0x128c   : > { %20880 = vmatprep.subr.bf16.mxu0 %v22888_v52  ;;  %20902 = vmatprep.subr.bf16.mxu1 %v22889_v31 }
0x128f   : > { %20881 = vmatpush3.bf16.msra.mxu0 %v22890_v41  ;;  %20903 = vmatpush3.bf16.msra.mxu1 %v22891_v53 }
0x1290   : > { %20882 = vmatprep.subr.bf16.mxu0 %v22892_v58  ;;  %20904 = vmatprep.subr.bf16.mxu1 %v22893_v59 }
0x1293   : > { %20883 = vmatpush3.bf16.msra.mxu0 %v22894_v56  ;;  %20905 = vmatpush3.bf16.msra.mxu1 %v22895_v57 }
0x1294   : > { %20884 = vmatprep.subr.bf16.mxu0 %v22896_v61  ;;  %20906 = vmatprep.subr.bf16.mxu1 %v22897_v62 }
0x1297   : > { %20885 = vmatpush3.bf16.msra.mxu0 %v22898_v63  ;;  %20907 = vmatpush3.bf16.msra.mxu1 %v22899_v0 }
0x1298   : > { %20886 = vmatprep.subr.bf16.mxu0 %v22900_v3  ;;  %20908 = vmatprep.subr.bf16.mxu1 %v22901_v4 }
0x129b   : > { %20887 = vmatpush3.bf16.msra.mxu0 %v22902_v7  ;;  %20909 = vmatpush3.bf16.msra.mxu1 %v22903_v8  ;;  %v19340_v7 = vld [vmem:[%s26118_s12 + $0x1b0] sm:$0xff] }
0x129c   : > { %20888 = vmatprep.subr.bf16.mxu0 %v22904_v13  ;;  %20910 = vmatprep.subr.bf16.mxu1 %v22905_v15  ;;  %v19342_v15 = vld [vmem:[%s26118_s12 + $0x1f0] sm:$0xff] }
0x129d   : > { %v19350_v25 = vcombine.high %v19340_v7, %v19342_v15 }
0x129f   : > { %20889 = vmatpush3.bf16.msra.mxu0 %v22906_v17  ;;  %20911 = vmatpush3.bf16.msra.mxu1 %v22907_v19  ;;  %v19341_v17 = vld [vmem:[%s26118_s12 + $0x1b8] sm:$0xff] }
0x12a0   : > { %8074 = vmatprep.subr.bf16.mxu0 %v19346_v24  ;;  %8115 = vmatprep.subr.bf16.mxu1 %v19348_v28  ;;  %v19343_v19 = vld [vmem:[%s26118_s12 + $0x1f8] sm:$0xff]  ;;  %s26144_s12 = sld [smem:[#allocation35_spill]] }
0x12a1   : > { %v19352_v28 = vcombine.high %v19341_v17, %v19343_v19 }
0x132d   : > { %v20802_v32 = vpop.f32.mrb[136].mxu0  ;;  %v20824_v54 = vpop.f32.mrb[136].mxu1 }
0x132e   : > { %v20803_v55 = vpop.f32.mrb[137].mxu0  ;;  %v20825_v6 = vpop.f32.mrb[137].mxu1 }
0x132f   : > { %v20804_v5 = vadd.f32 %v20803_v55, %v20802_v32  ;;  %v20826_v33 = vadd.f32 %v20825_v6, %v20824_v54  ;;  %v20805_v34 = vpop.f32.mrb[138].mxu0  ;;  %v20827_v16 = vpop.f32.mrb[138].mxu1  ;;  %v19349_v32 = vcombine.low %v19340_v7, %v19342_v15  ;;  %v19351_v54 = vcombine.low %v19341_v17, %v19343_v19  ;;  %v22908_v55 = vld [vmem:[%s26112_s27 + $0x740] sm:$0xff]  }
0x1330   : > { %v20806_v35 = vpop.f32.mrb[139].mxu0  ;;  %v20828_v36 = vpop.f32.mrb[139].mxu1  ;;  %v22909_v6 = vld [vmem:[%s26112_s27 + $0x7c0] sm:$0xff]   ;;  %v22914_v34 = vld [vmem:[%s26112_s27 + $0x708] sm:$0xff]  }
0x1331   : > { %v7230_v37 = vadd.f32 %v20826_v33, %v20804_v5  ;;  %v22911_v5 = vld [vmem:[%s26112_s27 + $0x780] sm:$0xff]   ;;  %v22913_v33 = vld [vmem:[%s26112_s27 + $0x7c8] sm:$0xff]   ;;  %v22916_v35 = vld [vmem:[%s26112_s27 + $0x750] sm:$0xff]  }
0x1332   : > { %v22915_v16 = vld [vmem:[%s26112_s27 + $0x788] sm:$0xff]   ;;  %v22917_v36 = vld [vmem:[%s26112_s27 + $0x7d0] sm:$0xff]  }
0x134d   : > { %v20846_v38 = vpop.f32.mrb[140].mxu0  ;;  %v20868_v43 = vpop.f32.mrb[140].mxu1 }
0x134e   : > { %v20847_v44 = vpop.f32.mrb[141].mxu0  ;;  %v20869_v9 = vpop.f32.mrb[141].mxu1 }
0x134f   : > { %v20848_v10 = vadd.f32 %v20847_v44, %v20846_v38  ;;  %v20870_v45 = vadd.f32 %v20869_v9, %v20868_v43  ;;  %v20849_v39 = vpop.f32.mrb[142].mxu0  ;;  %v20871_v46 = vpop.f32.mrb[142].mxu1  ;;  %v22919_v38 = vld [vmem:[%s26112_s27 + $0x790] sm:$0xff]   ;;  %v22921_v43 = vld [vmem:[%s26112_s27 + $0x7d8] sm:$0xff]  }
0x1350   : > { %v20850_v42 = vpop.f32.mrb[143].mxu0  ;;  %v20872_v47 = vpop.f32.mrb[143].mxu1  ;;  %v22922_v44 = vld [vmem:[%s26112_s27 + $0x718] sm:$0xff]   ;;  %v22926_v39 = vld [vmem:[%s26112_s27 + $0x720] sm:$0xff]  }
0x1351   : > { %v7462_v48 = vadd.f32 %v20848_v10, %v7230_v37  ;;  %v22918_v37 = vld [vmem:[%s26112_s27 + $0x710] sm:$0xff]   ;;  %v22923_v9 = vld [vmem:[%s26112_s27 + $0x798] sm:$0xff]   ;;  %v22924_v10 = vld [vmem:[%s26112_s27 + $0x760] sm:$0xff]  }
0x1352   : > { %v22927_v46 = vld [vmem:[%s26112_s27 + $0x7a0] sm:$0xff]   ;;  %v22929_v42 = vld [vmem:[%s26112_s27 + $0x7e8] sm:$0xff]  }
0x1353   : > { %v24618_v50 = vadd.f32 %v20870_v45, %v7462_v48  ;;  %v22925_v45 = vld [vmem:[%s26112_s27 + $0x7e0] sm:$0xff]   ;;  %v22930_v47 = vld [vmem:[%s26112_s27 + $0x728] sm:$0xff]  }
0x1354   : > { %v22931_v48 = vld [vmem:[%s26112_s27 + $0x7a8] sm:$0xff]  }
0x1355   : > { %v7611_v52 = vpop.f32.mrb[144].mxu0  ;;  %v7652_v31 = vpop.f32.mrb[144].mxu1 }
0x1356   : > { %v7612_v41 = vadd.f32 %v7611_v52, %v7520_v49  ;;  %v7653_v53 = vadd.f32 %v7652_v31, %v7528_v2  ;;  %v7613_v58 = vpop.f32.mrb[145].mxu0  ;;  %v7654_v59 = vpop.f32.mrb[145].mxu1  ;;  %v22932_v49 = vld [vmem:[%s26112_s27 + $0x770] sm:$0xff]   ;;  %v22936_v52 = vld [vmem:[%s26112_s27 + $0x778] sm:$0xff]  }
0x1357   : > { %v7614_v56 = vadd.f32 %v7613_v58, %v7524_v51  ;;  %v7655_v57 = vadd.f32 %v7654_v59, %v7532_v40  ;;  %v7615_v61 = vpop.f32.mrb[146].mxu0  ;;  %v7656_v62 = vpop.f32.mrb[146].mxu1  ;;  %v22933_v2 = vld [vmem:[%s26112_s27 + $0x7f0] sm:$0xff]   ;;  %v22937_v31 = vld [vmem:[%s26112_s27 + $0x7f8] sm:$0xff]  }
0x1358   : > { %v7659_v63 = vmax.f32 %v7612_v41, 0.0  ;;  %v7661_v0 = vmax.f32 %v7653_v53, 0.0  ;;  %v7616_v3 = vpop.f32.mrb[147].mxu0  ;;  %v7657_v4 = vpop.f32.mrb[147].mxu1  ;;  %v22934_v51 = vld [vmem:[%s26112_s27 + $0x730] sm:$0xff]   ;;  %v22938_v41 = vld [vmem:[%s26112_s27 + $0x738] sm:$0xff]  }
0x1359   : > { %v7660_v8 = vmax.f32 %v7614_v56, 0.0  ;;  %v7662_v13 = vmax.f32 %v7655_v57, 0.0  ;;  %v22935_v40 = vld [vmem:[%s26112_s27 + $0x7b0] sm:$0xff]   ;;  %v22939_v53 = vld [vmem:[%s26112_s27 + $0x7b8] sm:$0xff]  }
0x135a   : > { %v7663_v23 = vpack.c.bf16 %v7659_v63, %v7659_v63  ;;  %v7665_v24 = vpack.c.bf16 %v7661_v0, %v7661_v0  ;;  %v19344_v3 = vld [vmem:[%s26126_s10 + $0x1c] sm:$0xf]  ;;  %s26142_s10 = sld [smem:[#allocation33_spill]] }
0x135b   : > { %v7664_v60 = vpack.c.bf16 %v7660_v8, %v7660_v8  ;;  %v7666_v22 = vpack.c.bf16 %v7662_v13, %v7662_v13  ;;  %v8017_v13 = vrot.slane %v19344_v3, %v24051_v20  ;;  %v8025_v15 = vrot.slane %v19344_v3, %v24053_v21 }
0x135c   : > { %v8021_v19 = vrot.slane %v19344_v3, %v24043_v11 }
0x135d   : > { %7955 = vmatprep.mubr.bf16.mxu0 %v7664_v60  ;;  %7995 = vmatprep.mubr.bf16.mxu1 %v7666_v22  ;;  %v8029_v60 = vrot.slane %v19344_v3, %v24045_v14 }
0x135e   : > { %7956 = vmatmul.mubr.bf16.vlgmr.msra.gmra.mrb[148].mxu0 %v7663_v23  ;;  %7996 = vmatmul.mubr.bf16.vlgmr.msra.gmra.mrb[148].mxu1 %v7665_v24 }
0x135f   : > { %8075 = vmatpush1.bf16.msra.mxu0 %v19345_v26  ;;  %8116 = vmatpush1.bf16.msra.mxu1 %v19347_v27  ;;  %v22910_v26 = vld [vmem:[%s26112_s27 + $0x700] sm:$0xff]   ;;  %v22912_v27 = vld [vmem:[%s26112_s27 + $0x748] sm:$0xff]  }
0x1360   : > { %8076 = vmatprep.subr.bf16.mxu0 %v19350_v25  ;;  %8117 = vmatprep.subr.bf16.mxu1 %v19352_v28 }
0x1361   : > { %8106 = vmatprep.mubr.bf16.mxu0 %v23479_v12  ;;  %8147 = vmatprep.mubr.bf16.mxu1 %v23479_v12 }
0x1363   : > { %8077 = vmatpush1.bf16.msra.mxu0 %v19349_v32  ;;  %8118 = vmatpush1.bf16.msra.mxu1 %v19351_v54 }
0x1364   : > { %20918 = vmatprep.subr.bf16.mxu0 %v22908_v55  ;;  %20940 = vmatprep.subr.bf16.mxu1 %v22909_v6 }
0x1366   : > { %19353 = vmatmul.mubr.msk.bf16.vlgmr.msra.gmra.mrb[152].mxu0 %vm1696_vm1, %v24451_v18  ;;  %19354 = vmatmul.mubr.msk.bf16.vlgmr.msra.gmra.mrb[152].mxu1 %vm1696_vm1, %v24451_v18  ;;  %v22920_v18 = vld [vmem:[%s26112_s27 + $0x758] sm:$0xff]   ;;  %s26155_s27 = sld [smem:[#allocation46_spill]] }
0x1367   : > { %20919 = vmatpush3.bf16.msra.mxu0 %v22910_v26  ;;  %20941 = vmatpush3.bf16.msra.mxu1 %v22911_v5 }
0x1368   : > { %20920 = vmatprep.subr.bf16.mxu0 %v22912_v27  ;;  %20942 = vmatprep.subr.bf16.mxu1 %v22913_v33 }
0x136b   : > { %20921 = vmatpush3.bf16.msra.mxu0 %v22914_v34  ;;  %20943 = vmatpush3.bf16.msra.mxu1 %v22915_v16 }
0x136c   : > { %20922 = vmatprep.subr.bf16.mxu0 %v22916_v35  ;;  %20944 = vmatprep.subr.bf16.mxu1 %v22917_v36 }
0x136f   : > { %20923 = vmatpush3.bf16.msra.mxu0 %v22918_v37  ;;  %20945 = vmatpush3.bf16.msra.mxu1 %v22919_v38  ;;  %v22940_v37 = vld [vmem:[%s26130_s18] sm:$0xff]   ;;  %v22941_v38 = vld [vmem:[%s26130_s18 + $0x10] sm:$0xff]  }
0x1370   : > { %20924 = vmatprep.subr.bf16.mxu0 %v22920_v18  ;;  %20946 = vmatprep.subr.bf16.mxu1 %v22921_v43 }
0x1373   : > { %20925 = vmatpush3.bf16.msra.mxu0 %v22922_v44  ;;  %20947 = vmatpush3.bf16.msra.mxu1 %v22923_v9  ;;  %v22942_v44 = vld [vmem:[%s26130_s18 + $0x8] sm:$0xff]   ;;  %v22943_v9 = vld [vmem:[%s26130_s18 + $0x18] sm:$0xff]  }
0x1374   : > { %20926 = vmatprep.subr.bf16.mxu0 %v22924_v10  ;;  %20948 = vmatprep.subr.bf16.mxu1 %v22925_v45  ;;  %v24680_v10 = vld [vmem:[%s1578_s23] sm:$0xff]  ;;  %s26137_s23 = sld [smem:[#allocation5_spill]] }
0x1375   : > { %v24690_v45 = vpack.c.bf16 %v24680_v10, %v24680_v10 }
0x1377   : > { %20927 = vmatpush3.bf16.msra.mxu0 %v22926_v39  ;;  %20949 = vmatpush3.bf16.msra.mxu1 %v22927_v46  ;;  %v22944_v39 = vld [vmem:[%s26130_s18 + $0x20] sm:$0xff]   ;;  %v22945_v46 = vld [vmem:[%s26130_s18 + $0x30] sm:$0xff]  }
0x1378   : > { %20928 = vmatprep.subr.bf16.mxu0 %v22928_v29  ;;  %20950 = vmatprep.subr.bf16.mxu1 %v22929_v42  ;;  %v22946_v29 = vld [vmem:[%s26130_s18 + $0x28] sm:$0xff]   ;;  %v22947_v42 = vld [vmem:[%s26130_s18 + $0x38] sm:$0xff]  }
0x137a   : > { %s24825_s3 = scalar_lea.vmem %s26137_s23, %s23773_s0  ;;  %s26138_s23 = sld [smem:[#allocation30_spill]] }
0x137b   : > { %20929 = vmatpush3.bf16.msra.mxu0 %v22930_v47  ;;  %20951 = vmatpush3.bf16.msra.mxu1 %v22931_v48  ;;  %v22948_v47 = vld [vmem:[%s26132_s26] sm:$0xff]   ;;  %v22949_v48 = vld [vmem:[%s26132_s26 + $0x10] sm:$0xff]   ;;  %s26160_s0 = sld [smem:[#allocation49_spill]] }
0x137c   : > { %20930 = vmatprep.subr.bf16.mxu0 %v22932_v49  ;;  %20952 = vmatprep.subr.bf16.mxu1 %v22933_v2  ;;  %v22950_v49 = vld [vmem:[%s26132_s26 + $0x8] sm:$0xff]   ;;  %v22951_v2 = vld [vmem:[%s26132_s26 + $0x18] sm:$0xff]  }
0x137f   : > { %20931 = vmatpush3.bf16.msra.mxu0 %v22934_v51  ;;  %20953 = vmatpush3.bf16.msra.mxu1 %v22935_v40  ;;  %v22952_v51 = vld [vmem:[%s26132_s26 + $0x20] sm:$0xff]   ;;  %v22953_v40 = vld [vmem:[%s26132_s26 + $0x30] sm:$0xff]  }
0x1380   : > { %20932 = vmatprep.subr.bf16.mxu0 %v22936_v52  ;;  %20954 = vmatprep.subr.bf16.mxu1 %v22937_v31  ;;  %v22954_v52 = vld [vmem:[%s26132_s26 + $0x28] sm:$0xff]   ;;  %v22955_v31 = vld [vmem:[%s26132_s26 + $0x38] sm:$0xff]  }
0x1383   : > { %20933 = vmatpush3.bf16.msra.mxu0 %v22938_v41  ;;  %20955 = vmatpush3.bf16.msra.mxu1 %v22939_v53  ;;  %v22956_v41 = vld [vmem:[%s26133_s1] sm:$0xff]   ;;  %v22957_v53 = vld [vmem:[%s26133_s1 + $0x10] sm:$0xff]  }
0x1384   : > { %21893 = vmatprep.subr.bf16.mxu0 %v23477_v1  ;;  %21901 = vmatprep.subr.bf16.mxu1 %v23477_v1 }
0x1431   : > { %v20890_v58 = vpop.f32.mrb[148].mxu0  ;;  %v20912_v59 = vpop.f32.mrb[148].mxu1 }
0x1432   : > { %v20891_v56 = vpop.f32.mrb[149].mxu0  ;;  %v20913_v57 = vpop.f32.mrb[149].mxu1 }
0x1433   : > { %v20892_v61 = vadd.f32 %v20891_v56, %v20890_v58  ;;  %v20914_v62 = vadd.f32 %v20913_v57, %v20912_v59  ;;  %v20893_v63 = vpop.f32.mrb[150].mxu0  ;;  %v20915_v0 = vpop.f32.mrb[150].mxu1  ;;  %v22958_v58 = vld [vmem:[%s26133_s1 + $0x8] sm:$0xff]   ;;  %v22959_v59 = vld [vmem:[%s26133_s1 + $0x18] sm:$0xff]   ;;  %v22960_v56 = vld [vmem:[%s26133_s1 + $0x20] sm:$0xff]  }
0x1434   : > { %v20894_v4 = vpop.f32.mrb[151].mxu0  ;;  %v20916_v7 = vpop.f32.mrb[151].mxu1  ;;  %v22961_v57 = vld [vmem:[%s26133_s1 + $0x30] sm:$0xff]  }
0x1435   : > { %v7998_v8 = vadd.f32 %v20914_v62, %v20892_v61  ;;  %v22962_v61 = vld [vmem:[%s26133_s1 + $0x28] sm:$0xff]   ;;  %v22963_v62 = vld [vmem:[%s26133_s1 + $0x38] sm:$0xff]  }
0x1437   : > { %v24670_v17 = vadd.f32 %v7998_v8, %v24618_v50 }
0x1439   : > { %v8108_v22 = vpop.f32.mrb[152].mxu0  ;;  %v8149_v23 = vpop.f32.mrb[152].mxu1 }
0x143a   : > { %v8109_v24 = vadd.f32 %v8108_v22, %v8017_v13  ;;  %v8150_v25 = vadd.f32 %v8149_v23, %v8025_v15  ;;  %v8110_v28 = vpop.f32.mrb[153].mxu0  ;;  %v8151_v32 = vpop.f32.mrb[153].mxu1 }
0x143b   : > { %v8111_v54 = vadd.f32 %v8110_v28, %v8021_v19  ;;  %v8152_v55 = vadd.f32 %v8151_v32, %v8029_v60  ;;  %v8112_v6 = vpop.f32.mrb[154].mxu0  ;;  %v8153_v26 = vpop.f32.mrb[154].mxu1 }
0x143c   : > { %v8156_v50 = vmax.f32 %v8109_v24, 0.0  ;;  %v8158_v5 = vmax.f32 %v8150_v25, 0.0  ;;  %v8113_v27 = vpop.f32.mrb[155].mxu0  ;;  %v8154_v33 = vpop.f32.mrb[155].mxu1 }
0x143d   : > { %v8157_v34 = vmax.f32 %v8111_v54, 0.0  ;;  %v8159_v16 = vmax.f32 %v8152_v55, 0.0 }
0x143e   : > { %v8160_v18 = vpack.c.bf16 %v8156_v50, %v8156_v50  ;;  %v8162_v43 = vpack.c.bf16 %v8158_v5, %v8158_v5 }
0x143f   : > { %v8161_v35 = vpack.c.bf16 %v8157_v34, %v8157_v34  ;;  %v8163_v36 = vpack.c.bf16 %v8159_v16, %v8159_v16 }
0x1441   : > { %8452 = vmatprep.mubr.bf16.mxu0 %v8161_v35  ;;  %8492 = vmatprep.mubr.bf16.mxu1 %v8163_v36  ;;  %v19475_v36 = vld [vmem:[%s26134_s2] ss:$0 sm:$0xff] }
0x1442   : > { %8453 = vmatmul.mubr.bf16.vlgmr.msra.gmra.mrb[156].mxu0 %v8160_v18  ;;  %8493 = vmatmul.mubr.bf16.vlgmr.msra.gmra.mrb[156].mxu1 %v8162_v43 }
0x1443   : > { %21894 = vmatpush3.bf16.msra.mxu0 %v22940_v37  ;;  %21902 = vmatpush3.bf16.msra.mxu1 %v22941_v38  ;;  %v19476_v37 = vld [vmem:[%s26134_s2 + $0x1] ss:$0 sm:$0xff] }
0x1444   : > { %21895 = vmatprep.subr.bf16.mxu0 %v23477_v1  ;;  %21903 = vmatprep.subr.bf16.mxu1 %v23477_v1 }
0x1445   : > { %21897 = vmatprep.mubr.msk.bf16.mxu0 %vm23478_vm0, %v23477_v1  ;;  %21905 = vmatprep.mubr.msk.bf16.mxu1 %vm23478_vm0, %v23477_v1 }
0x1447   : > { %21896 = vmatpush3.bf16.msra.mxu0 %v22942_v44  ;;  %21904 = vmatpush3.bf16.msra.mxu1 %v22943_v9 }
0x1448   : > { %21909 = vmatprep.subr.bf16.mxu0 %v23477_v1  ;;  %21917 = vmatprep.subr.bf16.mxu1 %v23477_v1 }
0x144a   : > { %21898 = vmatmul.mubr.msk.bf16.vlgmr.msra.gmra.mrb[160].mxu0 %vm1696_vm1, %v24690_v45  ;;  %21906 = vmatmul.mubr.msk.bf16.vlgmr.msra.gmra.mrb[160].mxu1 %vm1696_vm1, %v24690_v45 }
0x144b   : > { %21910 = vmatpush3.bf16.msra.mxu0 %v22944_v39  ;;  %21918 = vmatpush3.bf16.msra.mxu1 %v22945_v46 }
0x144c   : > { %21911 = vmatprep.subr.bf16.mxu0 %v23477_v1  ;;  %21919 = vmatprep.subr.bf16.mxu1 %v23477_v1 }
0x144d   : > { %21913 = vmatprep.mubr.msk.bf16.mxu0 %vm23478_vm0, %v23477_v1  ;;  %21921 = vmatprep.mubr.msk.bf16.mxu1 %vm23478_vm0, %v23477_v1 }
0x144f   : > { %21912 = vmatpush3.bf16.msra.mxu0 %v22946_v29  ;;  %21920 = vmatpush3.bf16.msra.mxu1 %v22947_v42 }
0x1450   : > { %21925 = vmatprep.subr.bf16.mxu0 %v23477_v1  ;;  %21933 = vmatprep.subr.bf16.mxu1 %v23477_v1 }
0x1452   : > { %21914 = vmatmul.mubr.msk.bf16.vlgmr.msra.gmra.mrb[164].mxu0 %vm1696_vm1, %v24690_v45  ;;  %21922 = vmatmul.mubr.msk.bf16.vlgmr.msra.gmra.mrb[164].mxu1 %vm1696_vm1, %v24690_v45 }
0x1453   : > { %21926 = vmatpush3.bf16.msra.mxu0 %v22948_v47  ;;  %21934 = vmatpush3.bf16.msra.mxu1 %v22949_v48 }
0x1454   : > { %21927 = vmatprep.subr.bf16.mxu0 %v23477_v1  ;;  %21935 = vmatprep.subr.bf16.mxu1 %v23477_v1 }
0x1455   : > { %21929 = vmatprep.mubr.msk.bf16.mxu0 %vm23478_vm0, %v23477_v1  ;;  %21937 = vmatprep.mubr.msk.bf16.mxu1 %vm23478_vm0, %v23477_v1 }
0x1457   : > { %21928 = vmatpush3.bf16.msra.mxu0 %v22950_v49  ;;  %21936 = vmatpush3.bf16.msra.mxu1 %v22951_v2  ;;  %v19459_v49 = vld [vmem:[%s26135_s7] ss:$0 sm:$0xff]  ;;  %v19460_v2 = vld [vmem:[%s26135_s7 + $0x1] ss:$0 sm:$0xff] }
0x1458   : > { %21941 = vmatprep.subr.bf16.mxu0 %v23477_v1  ;;  %21949 = vmatprep.subr.bf16.mxu1 %v23477_v1 }
0x145a   : > { %21930 = vmatmul.mubr.msk.bf16.vlgmr.msra.gmra.mrb[168].mxu0 %vm1696_vm1, %v24690_v45  ;;  %21938 = vmatmul.mubr.msk.bf16.vlgmr.msra.gmra.mrb[168].mxu1 %vm1696_vm1, %v24690_v45 }
0x145b   : > { %21942 = vmatpush3.bf16.msra.mxu0 %v22952_v51  ;;  %21950 = vmatpush3.bf16.msra.mxu1 %v22953_v40 }
0x145c   : > { %21943 = vmatprep.subr.bf16.mxu0 %v23477_v1  ;;  %21951 = vmatprep.subr.bf16.mxu1 %v23477_v1 }
0x145d   : > { %21945 = vmatprep.mubr.msk.bf16.mxu0 %vm23478_vm0, %v23477_v1  ;;  %21953 = vmatprep.mubr.msk.bf16.mxu1 %vm23478_vm0, %v23477_v1 }
0x145f   : > { %21944 = vmatpush3.bf16.msra.mxu0 %v22954_v52  ;;  %21952 = vmatpush3.bf16.msra.mxu1 %v22955_v31  ;;  %v19477_v52 = vld [vmem:[%s26134_s2 + $0x2] ss:$0 sm:$0xff]  ;;  %v19478_v31 = vld [vmem:[%s26134_s2 + $0x3] ss:$0 sm:$0xff] }
0x1460   : > { %21957 = vmatprep.subr.bf16.mxu0 %v23477_v1  ;;  %21965 = vmatprep.subr.bf16.mxu1 %v23477_v1 }
0x1462   : > { %21946 = vmatmul.mubr.msk.bf16.vlgmr.msra.gmra.mrb[172].mxu0 %vm1696_vm1, %v24690_v45  ;;  %21954 = vmatmul.mubr.msk.bf16.vlgmr.msra.gmra.mrb[172].mxu1 %vm1696_vm1, %v24690_v45 }
0x1463   : > { %21961 = vmatprep.mubr.msk.bf16.mxu0 %vm23478_vm0, %v23477_v1  ;;  %21969 = vmatprep.mubr.msk.bf16.mxu1 %vm23478_vm0, %v23477_v1 }
0x1464   : > { %21958 = vmatpush3.bf16.msra.mxu0 %v22956_v41  ;;  %21966 = vmatpush3.bf16.msra.mxu1 %v22957_v53 }
0x1465   : > { %21959 = vmatprep.subr.bf16.mxu0 %v23477_v1  ;;  %21967 = vmatprep.subr.bf16.mxu1 %v23477_v1 }
0x1468   : > { %21960 = vmatpush3.bf16.msra.mxu0 %v22958_v58  ;;  %21968 = vmatpush3.bf16.msra.mxu1 %v22959_v59 }
0x1469   : > { %21973 = vmatprep.subr.bf16.mxu0 %v23477_v1  ;;  %21981 = vmatprep.subr.bf16.mxu1 %v23477_v1 }
0x146b   : > { %21962 = vmatmul.mubr.msk.bf16.vlgmr.msra.gmra.mrb[176].mxu0 %vm1696_vm1, %v24690_v45  ;;  %21970 = vmatmul.mubr.msk.bf16.vlgmr.msra.gmra.mrb[176].mxu1 %vm1696_vm1, %v24690_v45 }
0x146c   : > { %21977 = vmatprep.mubr.msk.bf16.mxu0 %vm23478_vm0, %v23477_v1  ;;  %21974 = vmatpush3.bf16.msra.mxu0 %v22960_v56 }
0x146d   : > { %21982 = vmatpush3.bf16.msra.mxu1 %v22961_v57  ;;  %21975 = vmatprep.subr.bf16.mxu0 %v23477_v1 }
0x146e   : > { %21983 = vmatprep.subr.bf16.mxu1 %v23477_v1  ;;  %21985 = vmatprep.mubr.msk.bf16.mxu1 %vm23478_vm0, %v23477_v1 }
0x1470   : > { %21976 = vmatpush3.bf16.msra.mxu0 %v22962_v61 }
0x1471   : > { %21984 = vmatpush3.bf16.msra.mxu1 %v22963_v62  ;;  %21989 = vmatprep.subr.bf16.mxu0 %v23477_v1 }
0x1472   : > { %21995 = vmatprep.subr.bf16.mxu1 %v23477_v1 }
0x1473   : > { %21978 = vmatmul.mubr.msk.bf16.vlgmr.msra.gmra.mrb[180].mxu0 %vm1696_vm1, %v24690_v45 }
0x1474   : > { %21986 = vmatmul.mubr.msk.bf16.vlgmr.msra.gmra.mrb[180].mxu1 %vm1696_vm1, %v24690_v45  ;;  %21991 = vmatprep.mubr.msk.bf16.mxu0 %vm23478_vm0, %v23477_v1 }
0x1475   : > { %21997 = vmatprep.mubr.msk.bf16.mxu1 %vm23478_vm0, %v23477_v1 }
0x1515   : > { %v20934_v63 = vpop.f32.mrb[156].mxu0  ;;  %v20956_v0 = vpop.f32.mrb[156].mxu1 }
0x1516   : > { %v20935_v3 = vpop.f32.mrb[157].mxu0  ;;  %v20957_v4 = vpop.f32.mrb[157].mxu1 }
0x1517   : > { %v20936_v7 = vadd.f32 %v20935_v3, %v20934_v63  ;;  %v20958_v8 = vadd.f32 %v20957_v4, %v20956_v0  ;;  %v20937_v13 = vpop.f32.mrb[158].mxu0  ;;  %v20959_v15 = vpop.f32.mrb[158].mxu1 }
0x1518   : > { %v20938_v19 = vpop.f32.mrb[159].mxu0  ;;  %v20960_v60 = vpop.f32.mrb[159].mxu1 }
0x1519   : > { %v8495_v22 = vadd.f32 %v20958_v8, %v20936_v7  ;;  %v19461_v19 = vld [vmem:[%s26135_s7 + $0x2] ss:$0 sm:$0xff]  ;;  %v19462_v60 = vld [vmem:[%s26135_s7 + $0x3] ss:$0 sm:$0xff] }
0x151b   : > { %v24783_v23 = vadd.f32 %v8495_v22, %v24670_v17 }
0x151d   : > { %v8711_v24 = vpop.f32.mrb[160].mxu0  ;;  %v8763_v25 = vpop.f32.mrb[160].mxu1 }
0x151e   : > { %v21899_v28 = vpop.f32.mrb[161].mxu0  ;;  %v21907_v32 = vpop.f32.mrb[161].mxu1  ;;  %v8712_v41 = vadd.f32 %v19459_v49, %v8711_v24  ;;  %v8764_v53 = vadd.f32 %v19460_v2, %v8763_v25  ;;  %v1592_v2 = vld [vmem:[%s24825_s3] sm:$0xff] }
0x151f   : > { %v8714_v54 = vpop.f32.mrb[162].mxu0  ;;  %v8766_v55 = vpop.f32.mrb[162].mxu1 }
0x1520   : > { %v21900_v6 = vpop.f32.mrb[163].mxu0  ;;  %v21908_v26 = vpop.f32.mrb[163].mxu1  ;;  %v9337_v3 = vpack.c.bf16 %v8712_v41, %v8712_v41  ;;  %v9338_v4 = vpack.c.bf16 %v8764_v53, %v8764_v53  ;;  %v19491_v55 = vld [vmem:[%s26136_s22] ss:$0 sm:$0xff] }
0x1521   : > { %v19492_v26 = vld [vmem:[%s26136_s22 + $0x1] ss:$0 sm:$0xff] }
0x1525   : > { %v8815_v50 = vpop.f32.mrb[164].mxu0  ;;  %v8867_v5 = vpop.f32.mrb[164].mxu1 }
0x1526   : > { %v21915_v27 = vpop.f32.mrb[165].mxu0  ;;  %v21923_v33 = vpop.f32.mrb[165].mxu1  ;;  %v8816_v25 = vadd.f32 %v19461_v19, %v8815_v50  ;;  %v8868_v28 = vadd.f32 %v19462_v60, %v8867_v5 }
0x1527   : > { %v8818_v34 = vpop.f32.mrb[166].mxu0  ;;  %v8870_v16 = vpop.f32.mrb[166].mxu1 }
0x1528   : > { %v21916_v35 = vpop.f32.mrb[167].mxu0  ;;  %v21924_v17 = vpop.f32.mrb[167].mxu1  ;;  %v9339_v32 = vpack.c.bf16 %v8816_v25, %v8816_v25  ;;  %v9340_v54 = vpack.c.bf16 %v8868_v28, %v8868_v28 }
0x152d   : > { %v8943_v38 = vpop.f32.mrb[168].mxu0  ;;  %v8995_v18 = vpop.f32.mrb[168].mxu1 }
0x152e   : > { %v8944_v43 = vadd.f32 %v19475_v36, %v8943_v38  ;;  %v8996_v44 = vadd.f32 %v19476_v37, %v8995_v18  ;;  %v21931_v9 = vpop.f32.mrb[169].mxu0  ;;  %v21939_v45 = vpop.f32.mrb[169].mxu1 }
0x152f   : > { %v8946_v39 = vpop.f32.mrb[170].mxu0  ;;  %v8998_v46 = vpop.f32.mrb[170].mxu1 }
0x1530   : > { %v9341_v29 = vpack.c.bf16 %v8944_v43, %v8944_v43  ;;  %v9342_v42 = vpack.c.bf16 %v8996_v44, %v8996_v44  ;;  %v21932_v47 = vpop.f32.mrb[171].mxu0  ;;  %v21940_v48 = vpop.f32.mrb[171].mxu1 }
0x1532   : > { %v9349_v51 = vsel %vm2368_vm2, %v9341_v29, 0  ;;  %v9395_v40 = vsel %vm2368_vm2, %v9342_v42, 0 }
0x1533   : > { %21990 = vmatpush3.bf16.xpose.msra.mxu0 %v9349_v51  ;;  %21996 = vmatpush3.bf16.xpose.msra.mxu1 %v9395_v40 }
0x1534   : > { %22001 = vmatprep.subr.bf16.mxu0 %v23477_v1  ;;  %22007 = vmatprep.subr.bf16.mxu1 %v23477_v1 }
0x1535   : > { %v9047_v58 = vpop.f32.mrb[172].mxu0  ;;  %v9099_v59 = vpop.f32.mrb[172].mxu1 }
0x1536   : > { %v9048_v56 = vadd.f32 %v19477_v52, %v9047_v58  ;;  %v9100_v57 = vadd.f32 %v19478_v31, %v9099_v59  ;;  %v21947_v61 = vpop.f32.mrb[173].mxu0  ;;  %v21955_v62 = vpop.f32.mrb[173].mxu1 }
0x1537   : > { %v9050_v63 = vpop.f32.mrb[174].mxu0  ;;  %v9102_v0 = vpop.f32.mrb[174].mxu1 }
0x1538   : > { %v9343_v7 = vpack.c.bf16 %v9048_v56, %v9048_v56  ;;  %v9344_v8 = vpack.c.bf16 %v9100_v57, %v9100_v57  ;;  %v21948_v13 = vpop.f32.mrb[175].mxu0  ;;  %v21956_v15 = vpop.f32.mrb[175].mxu1 }
0x153a   : > { %v9441_v22 = vsel %vm2368_vm2, %v9343_v7, 0  ;;  %v9487_v24 = vsel %vm2368_vm2, %v9344_v8, 0  ;;  %21992 = vmatmul.mubr.msk.bf16.vlgmr.msra.gmra.mrb[184].mxu0 %vm2368_vm2, %v9337_v3  ;;  %21998 = vmatmul.mubr.msk.bf16.vlgmr.msra.gmra.mrb[184].mxu1 %vm2368_vm2, %v9338_v4 }
0x153b   : > { %22002 = vmatpush3.bf16.xpose.msra.mxu0 %v9441_v22  ;;  %22008 = vmatpush3.bf16.xpose.msra.mxu1 %v9487_v24 }
0x153c   : > { %22003 = vmatprep.mubr.msk.bf16.mxu0 %vm23478_vm0, %v23477_v1  ;;  %22009 = vmatprep.mubr.msk.bf16.mxu1 %vm23478_vm0, %v23477_v1 }
0x153d   : > { %22013 = vmatprep.subr.bf16.mxu0 %v23477_v1  ;;  %22019 = vmatprep.subr.bf16.mxu1 %v23477_v1 }
0x153e   : > { %v9175_v6 = vpop.f32.mrb[176].mxu0  ;;  %v9227_v33 = vpop.f32.mrb[176].mxu1 }
0x153f   : > { %v9176_v50 = vadd.f32 %v19491_v55, %v9175_v6  ;;  %v21963_v5 = vpop.f32.mrb[177].mxu0  ;;  %v9228_v16 = vadd.f32 %v19492_v26, %v9227_v33  ;;  %v21971_v17 = vpop.f32.mrb[177].mxu1 }
0x1540   : > { %v9178_v27 = vpop.f32.mrb[178].mxu0  ;;  %v9230_v36 = vpop.f32.mrb[178].mxu1 }
0x1541   : > { %v9585_v34 = vpack.c.bf16 %v9176_v50, %v9176_v50  ;;  %v21964_v35 = vpop.f32.mrb[179].mxu0  ;;  %v9586_v38 = vpack.c.bf16 %v9228_v16, %v9228_v16  ;;  %v21972_v18 = vpop.f32.mrb[179].mxu1 }
0x1542   : > { %22004 = vmatmul.mubr.msk.bf16.vlgmr.msra.gmra.mrb[188].mxu0 %vm2368_vm2, %v9339_v32  ;;  %22010 = vmatmul.mubr.msk.bf16.vlgmr.msra.gmra.mrb[188].mxu1 %vm2368_vm2, %v9340_v54  ;;  %v8501_v18 = vadd.f32 %v24783_v23, %v24447_v30  ;;  %v19493_v30 = vld [vmem:[%s26136_s22 + $0x2] ss:$0 sm:$0xff] }
0x1543   : > { %22015 = vmatprep.mubr.msk.bf16.mxu0 %vm23478_vm0, %v23477_v1  ;;  %22021 = vmatprep.mubr.msk.bf16.mxu1 %vm23478_vm0, %v23477_v1  ;;  %v9593_v37 = vsel %vm2622_vm3, %v9585_v34, 0  ;;  %v9639_v43 = vsel %vm2622_vm3, %v9586_v38, 0 }
0x1544   : > { %22014 = vmatpush3.bf16.msra.mxu0 %v9593_v37  ;;  %22020 = vmatpush3.bf16.msra.mxu1 %v9639_v43  ;;  %v19452_v43 = vld [vmem:[%s26127_s11 + $0x1] ss:$0 sm:$0xff]  ;;  %s26143_s11 = sld [smem:[#allocation22_spill]] }
0x1545   : > { %22025 = vmatprep.subr.bf16.mxu0 %v23477_v1  ;;  %22031 = vmatprep.subr.bf16.mxu1 %v23477_v1 }
0x1546   : > { %v24819_v44 = vpop.f32.mrb[180].mxu0 }
0x1547   : > { %v24821_v9 = vpop.f32.mrb[180].mxu1  ;;  %v21979_v45 = vpop.f32.mrb[181].mxu0 }
0x1548   : > { %v21987_v39 = vpop.f32.mrb[181].mxu1  ;;  %v9282_v46 = vpop.f32.mrb[182].mxu0 }
0x1549   : > { %v9334_v29 = vpop.f32.mrb[182].mxu1  ;;  %v21980_v42 = vpop.f32.mrb[183].mxu0 }
0x154a   : > { %v21988_v47 = vpop.f32.mrb[183].mxu1  ;;  %v8510_v42 = vadd.f32 %v19452_v43, %v8501_v18 }
0x154c   : > { %v8515_v47 = vsel %vm1696_vm1, %v8510_v42, 0.0 }
0x160d   : > { %v9385_v48 = vpop.f32.mrb[184].mxu0  ;;  %v9431_v49 = vpop.f32.mrb[184].mxu1 }
0x160e   : > { %v9529_v51 = vmul.f32 0.35355338, %v9385_v48  ;;  %v9530_v40 = vmul.f32 0.35355338, %v9431_v49  ;;  %v21993_v52 = vpop.f32.mrb[185].mxu0  ;;  %v21999_v31 = vpop.f32.mrb[185].mxu1 }
0x160f   : > { %v9388_v41 = vpop.f32.mrb[186].mxu0  ;;  %v9434_v53 = vpop.f32.mrb[186].mxu1 }
0x1610   : > { %v21994_v58 = vpop.f32.mrb[187].mxu0  ;;  %v22000_v59 = vpop.f32.mrb[187].mxu1  ;;  %v9534_v56 = vadd.f32 %v9530_v40, %v1592_v2  ;;  %v9533_v57 = vadd.f32 %v9529_v51, %v1592_v2  ;;  %v9280_v40 = vadd.f32 %v19493_v30, %v24819_v44 }
0x1612   : > { %v9540_v61 = vsel %vm2368_vm2, %v9534_v56, -inf  ;;  %v9537_v62 = vsel %vm2368_vm2, %v9533_v57, -inf  ;;  %v9587_v59 = vpack.c.bf16 %v9280_v40, %v9280_v40 }
0x1613   : > { %9541 = vmax.xlane.f32.xlu1 %v9540_v61  ;;  %9538 = vmax.xlane.f32.xlu0 %v9537_v62 }
0x1614   : > { %v9685_v44 = vsel %vm2622_vm3, %v9587_v59, 0 }
0x1615   : > { %v9477_v63 = vpop.f32.mrb[188].mxu0  ;;  %v9523_v0 = vpop.f32.mrb[188].mxu1 }
0x1616   : > { %v9531_v3 = vmul.f32 0.35355338, %v9477_v63  ;;  %v9532_v4 = vmul.f32 0.35355338, %v9523_v0  ;;  %v22005_v7 = vpop.f32.mrb[189].mxu0  ;;  %v22011_v8 = vpop.f32.mrb[189].mxu1 }
0x1617   : > { %v9480_v13 = vpop.f32.mrb[190].mxu0  ;;  %v9526_v15 = vpop.f32.mrb[190].mxu1 }
0x1618   : > { %v22006_v19 = vpop.f32.mrb[191].mxu0  ;;  %v22012_v60 = vpop.f32.mrb[191].mxu1  ;;  %v9536_v22 = vadd.f32 %v9532_v4, %v1592_v2  ;;  %v9535_v24 = vadd.f32 %v9531_v3, %v1592_v2  ;;  %v19494_v2 = vld [vmem:[%s26136_s22 + $0x3] ss:$0 sm:$0xff] }
0x1619   : > { %v9332_v23 = vadd.f32 %v19494_v2, %v24821_v9 }
0x161a   : > { %v9546_v25 = vsel %vm2368_vm2, %v9536_v22, -inf  ;;  %v9543_v28 = vsel %vm2368_vm2, %v9535_v24, -inf }
0x161b   : > { %9547 = vmax.xlane.f32.xlu1 %v9546_v25  ;;  %9544 = vmax.xlane.f32.xlu0 %v9543_v28  ;;  %v9588_v53 = vpack.c.bf16 %v9332_v23, %v9332_v23 }
0x161d   : > { %v9731_v0 = vsel %vm2622_vm3, %v9588_v53, 0 }
0x16a0   : > { %v9542_v32 = vpop.xlane.xlu1 %9541  ;;  %v9539_v54 = vpop.xlane.xlu0 %9538 }
0x16a1   : > { %v9550_v55 = vsub.f32 %v9534_v56, %v9542_v32  ;;  %v9549_v6 = vsub.f32 %v9533_v57, %v9539_v54 }
0x16a3   : > { %v9555_v26 = vmul.f32 1.442695, %v9550_v55  ;;  %v9553_v50 = vmul.f32 1.442695, %v9549_v6 }
0x16a5   : > { %23332 = vpow2.f32 %v9555_v26  ;;  %v19455_v26 = vld [vmem:[%s26128_s15 + $0x1] ss:$0 sm:$0xff]  ;;  %s26149_s15 = sld [smem:[#allocation39_spill]] }
0x16a6   : > { %23334 = vpow2.f32 %v9553_v50 }
0x16a8   : > { %v9548_v5 = vpop.xlane.xlu1 %9547  ;;  %v9545_v27 = vpop.xlane.xlu0 %9544 }
0x16a9   : > { %v9552_v33 = vsub.f32 %v9536_v22, %v9548_v5  ;;  %v9551_v34 = vsub.f32 %v9535_v24, %v9545_v27  ;;  %v8632_v22 = vld [vmem:[%s26138_s23] sm:$0xf]  ;;  %v8633_v24 = vld [vmem:[%s26138_s23 + $0x4] sm:$0xf] }
0x16aa   : > { %v9781_v25 = vsel %vm2622_vm3, %v8632_v22, 0  ;;  %v9827_v28 = vsel %vm2622_vm3, %v8633_v24, 0  ;;  %v19456_v5 = vld [vmem:[%s26129_s16 + $0x1] ss:$0 sm:$0xff]  ;;  %s26150_s16 = sld [smem:[#allocation40_spill]] }
0x16ab   : > { %v9559_v16 = vmul.f32 1.442695, %v9552_v33  ;;  %v9557_v35 = vmul.f32 1.442695, %v9551_v34 }
0x16ad   : > { %23336 = vpow2.f32 %v9559_v16  ;;  %v8635_v16 = vld [vmem:[%s26138_s23 + $0xc] sm:$0xf] }
0x16ae   : > { %23338 = vpow2.f32 %v9557_v35  ;;  %v8634_v35 = vld [vmem:[%s26138_s23 + $0x8] sm:$0xf]  ;;  %v9919_v18 = vsel %vm2622_vm3, %v8635_v16, 0 }
0x16af   : > { %v23333_v17 = vpop.eup %23332 }
0x16b0   : > { %v23335_v36 = vpop.eup %23334  ;;  %v9564_v37 = vsel %vm2368_vm2, %v23333_v17, 0.0 }
0x16b1   : > { %9565 = vadd.xlane.f32.xlu1 %v9564_v37  ;;  %v9561_v38 = vsel %vm2368_vm2, %v23335_v36, 0.0 }
0x16b2   : > { %9562 = vadd.xlane.f32.xlu0 %v9561_v38 }
0x16b7   : > { %v23337_v45 = vpop.eup %23336 }
0x16b8   : > { %v23339_v39 = vpop.eup %23338  ;;  %v9570_v46 = vsel %vm2368_vm2, %v23337_v45, 0.0 }
0x16b9   : > { %9571 = vadd.xlane.f32.xlu1 %v9570_v46  ;;  %v9567_v29 = vsel %vm2368_vm2, %v23339_v39, 0.0  ;;  %v9873_v46 = vsel %vm2622_vm3, %v8634_v35, 0 }
0x16ba   : > { %9568 = vadd.xlane.f32.xlu0 %v9567_v29 }
0x16be   : > { %8516 = vadd.xlane.f32.xlu0 %v8515_v47 }
0x173e   : > { %v9566_v48 = vpop.xlane.xlu1 %9565 }
0x173f   : > { %23340 = vrcp.f32 %v9566_v48  ;;  %v9563_v49 = vpop.xlane.xlu0 %9562 }
0x1740   : > { %23342 = vrcp.f32 %v9563_v49 }
0x1746   : > { %v9572_v51 = vpop.xlane.xlu1 %9571 }
0x1747   : > { %23344 = vrcp.f32 %v9572_v51  ;;  %v9569_v52 = vpop.xlane.xlu0 %9568 }
0x1748   : > { %23346 = vrcp.f32 %v9569_v52 }
0x1749   : > { %v23341_v31 = vpop.eup %23340 }
0x174a   : > { %v23343_v41 = vpop.eup %23342  ;;  %v9576_v58 = vmul.f32 %v23341_v31, %v23333_v17 }
0x174b   : > { %v9574_v56 = vmul.f32 %v23343_v41, %v23335_v36  ;;  %v8517_v57 = vpop.xlane.xlu0 %8516 }
0x174c   : > { %v8518_v61 = vmul.f32 0.03125, %v8517_v57  ;;  %v9582_v62 = vpack.c.bf16 %v9576_v58, %v9576_v58 }
0x174d   : > { %v9581_v63 = vpack.c.bf16 %v9574_v56, %v9574_v56 }
0x174e   : > { %v8519_v3 = vsub.f32 %v8510_v42, %v8518_v61  ;;  %22022 = vmatmul.mubr.msk.bf16.vlgmr.msra.gmra.mrb[192].mxu1 %vm2368_vm2, %v9582_v62 }
0x174f   : > { %22016 = vmatmul.mubr.msk.bf16.vlgmr.msra.gmra.mrb[192].mxu0 %vm2368_vm2, %v9581_v63  ;;  %22032 = vmatpush3.bf16.msra.mxu1 %v9731_v0 }
0x1750   : > { %22026 = vmatpush3.bf16.msra.mxu0 %v9685_v44  ;;  %v8520_v9 = vmul.f32 %v8519_v3, %v8519_v3  ;;  %22027 = vmatprep.mubr.msk.bf16.mxu0 %vm23478_vm0, %v23477_v1 }
0x1751   : > { %v23345_v4 = vpop.eup %23344  ;;  %22033 = vmatprep.mubr.msk.bf16.mxu1 %vm23478_vm0, %v23477_v1  ;;  %22037 = vmatprep.subr.bf16.mxu0 %v23477_v1 }
0x1752   : > { %v23347_v7 = vpop.eup %23346  ;;  %v9580_v8 = vmul.f32 %v23345_v4, %v23337_v45  ;;  %v8521_v13 = vsel %vm1696_vm1, %v8520_v9, 0.0  ;;  %22043 = vmatprep.subr.bf16.mxu1 %v23477_v1 }
0x1753   : > { %v9578_v15 = vmul.f32 %v23347_v7, %v23339_v39  ;;  %8522 = vadd.xlane.f32.xlu1 %v8521_v13 }
0x1754   : > { %v9584_v19 = vpack.c.bf16 %v9580_v8, %v9580_v8 }
0x1755   : > { %v9583_v60 = vpack.c.bf16 %v9578_v15, %v9578_v15 }
0x1756   : > { %22034 = vmatmul.mubr.msk.bf16.vlgmr.msra.gmra.mrb[196].mxu1 %vm2368_vm2, %v9584_v19 }
0x1757   : > { %22028 = vmatmul.mubr.msk.bf16.vlgmr.msra.gmra.mrb[196].mxu0 %vm2368_vm2, %v9583_v60  ;;  %22045 = vmatprep.mubr.msk.bf16.mxu1 %vm23478_vm0, %v23477_v1 }
0x1758   : > { %22039 = vmatprep.mubr.msk.bf16.mxu0 %vm23478_vm0, %v23477_v1  ;;  %22038 = vmatpush3.bf16.msra.mxu0 %v9781_v25 }
0x1759   : > { %22044 = vmatpush3.bf16.msra.mxu1 %v9827_v28  ;;  %22049 = vmatprep.subr.bf16.mxu0 %v23477_v1 }
0x175a   : > { %22055 = vmatprep.subr.bf16.mxu1 %v23477_v1 }
0x17e0   : > { %v8523_v32 = vpop.xlane.xlu1 %8522 }
0x17e1   : > { %v8524_v54 = vmul.f32 0.03125, %v8523_v32 }
0x17e3   : > { %v8525_v55 = vadd.f32 1e-05, %v8524_v54 }
0x17e5   : > { %23348 = vrsqrt.f32 %v8525_v55  ;;  %v19519_v55 = vld [vmem:[%s26139_s5] ss:$0 sm:$0xff] }
0x17ef   : > { %v23349_v6 = vpop.eup %23348 }
0x17f0   : > { %v8527_v50 = vmul.f32 %v23349_v6, %v8519_v3 }
0x17f2   : > { %v8534_v27 = vmul.f32 %v19455_v26, %v8527_v50 }
0x17f4   : > { %v8541_v33 = vadd.f32 %v19456_v5, %v8534_v27 }
0x17f6   : > { %v8544_v34 = vsel %vm1696_vm1, %v8541_v33, 0.0 }
0x17f7   : > { %8545 = vadd.xlane.f32.xlu1 %v8544_v34 }
0x1821   : > { %v9675_v17 = vpop.f32.mrb[192].mxu1 }
0x1822   : > { %v9629_v36 = vpop.f32.mrb[192].mxu0  ;;  %v9774_v37 = vpack.c.bf16 %v9675_v17, %v9675_v17  ;;  %v22023_v38 = vpop.f32.mrb[193].mxu1 }
0x1823   : > { %v9773_v43 = vpack.c.bf16 %v9629_v36, %v9629_v36  ;;  %v22017_v45 = vpop.f32.mrb[193].mxu0  ;;  %v9678_v39 = vpop.f32.mrb[194].mxu1  ;;  %v22965_v38 = vld [vmem:[%s26140_s6 + $0x10] sm:$0xff]  }
0x1824   : > { %v9632_v29 = vpop.f32.mrb[194].mxu0  ;;  %v22024_v42 = vpop.f32.mrb[195].mxu1  ;;  %22046 = vmatmul.mubr.msk.bf16.vlgmr.msra.gmra.mrb[200].mxu1 %vm2368_vm2, %v9774_v37  ;;  %v22964_v37 = vld [vmem:[%s26140_s6] sm:$0xff]  }
0x1825   : > { %v22018_v47 = vpop.f32.mrb[195].mxu0  ;;  %22040 = vmatmul.mubr.msk.bf16.vlgmr.msra.gmra.mrb[200].mxu0 %vm2368_vm2, %v9773_v43  ;;  %22056 = vmatpush3.bf16.msra.mxu1 %v9919_v18  ;;  %v22966_v18 = vld [vmem:[%s26140_s6 + $0x8] sm:$0xff]   ;;  %v22967_v43 = vld [vmem:[%s26140_s6 + $0x18] sm:$0xff]  }
0x1826   : > { %22050 = vmatpush3.bf16.msra.mxu0 %v9873_v46  ;;  %22051 = vmatprep.mubr.msk.bf16.mxu0 %vm23478_vm0, %v23477_v1 }
0x1827   : > { %22057 = vmatprep.mubr.msk.bf16.mxu1 %vm23478_vm0, %v23477_v1  ;;  %22061 = vmatprep.subr.bf16.mxu0 %v23477_v1 }
0x1828   : > { %22069 = vmatprep.subr.bf16.mxu1 %v23477_v1 }
0x1829   : > { %v9767_v48 = vpop.f32.mrb[196].mxu1 }
0x182a   : > { %v9721_v49 = vpop.f32.mrb[196].mxu0  ;;  %v9776_v2 = vpack.c.bf16 %v9767_v48, %v9767_v48  ;;  %v22035_v30 = vpop.f32.mrb[197].mxu1  ;;  %v19520_v48 = vld [vmem:[%s26141_s8] ss:$0 sm:$0xff] }
0x182b   : > { %v9775_v23 = vpack.c.bf16 %v9721_v49, %v9721_v49  ;;  %v22029_v51 = vpop.f32.mrb[197].mxu0  ;;  %v9770_v40 = vpop.f32.mrb[198].mxu1 }
0x182c   : > { %v9724_v52 = vpop.f32.mrb[198].mxu0  ;;  %v22036_v31 = vpop.f32.mrb[199].mxu1  ;;  %22058 = vmatmul.mubr.msk.bf16.vlgmr.msra.gmra.mrb[204].mxu1 %vm2368_vm2, %v9776_v2  ;;  %v19521_v2 = vld [vmem:[%s26142_s10] ss:$0 sm:$0xff]  ;;  %v22969_v40 = vld [vmem:[%s26140_s6 + $0x30] sm:$0xff]  }
0x182d   : > { %v22030_v41 = vpop.f32.mrb[199].mxu0  ;;  %22052 = vmatmul.mubr.msk.bf16.vlgmr.msra.gmra.mrb[204].mxu0 %vm2368_vm2, %v9775_v23  ;;  %22073 = vmatprep.mubr.msk.bf16.mxu1 %vm23478_vm0, %v23477_v1  ;;  %v22968_v51 = vld [vmem:[%s26140_s6 + $0x20] sm:$0xff]  }
0x182e   : > { %22065 = vmatprep.mubr.msk.bf16.mxu0 %vm23478_vm0, %v23477_v1  ;;  %22062 = vmatpush3.bf16.msra.mxu0 %v22964_v37  ;;  %v22970_v41 = vld [vmem:[%s26140_s6 + $0x28] sm:$0xff]  }
0x182f   : > { %22070 = vmatpush3.bf16.msra.mxu1 %v22965_v38  ;;  %22063 = vmatprep.subr.bf16.mxu0 %v23477_v1 }
0x1830   : > { %22071 = vmatprep.subr.bf16.mxu1 %v23477_v1 }
0x1832   : > { %22064 = vmatpush3.bf16.msra.mxu0 %v22966_v18 }
0x1833   : > { %22072 = vmatpush3.bf16.msra.mxu1 %v22967_v43  ;;  %22077 = vmatprep.subr.bf16.mxu0 %v23477_v1 }
0x1834   : > { %22085 = vmatprep.subr.bf16.mxu1 %v23477_v1 }
0x1884   : > { %v8546_v53 = vpop.xlane.xlu1 %8545 }
0x1885   : > { %v8547_v58 = vmul.f32 0.03125, %v8546_v53  ;;  %v22971_v53 = vld [vmem:[%s26140_s6 + $0x38] sm:$0xff]  }
0x1887   : > { %v24888_v59 = vsub.f32 %v8541_v33, %v8547_v58 }
0x1889   : > { %v8549_v56 = vmul.f32 %v24888_v59, %v24888_v59 }
0x188b   : > { %v8550_v57 = vsel %vm1696_vm1, %v8549_v56, 0.0  ;;  %v19457_v56 = vld [vmem:[%s26143_s11] ss:$0 sm:$0xff]  ;;  %s26147_s11 = sld [smem:[#allocation38_spill]] }
0x188c   : > { %8551 = vadd.xlane.f32.xlu1 %v8550_v57  ;;  %v22972_v57 = vld [vmem:[%s26144_s12] sm:$0xff]  }
0x1891   : > { %v19538_v18 = vld [vmem:[%s26147_s11] ss:$0 sm:$0xff]  ;;  %v19539_v43 = vld [vmem:[%s26147_s11 + $0x1] ss:$0 sm:$0xff] }
0x18f7   : > { %v9863_v61 = vpop.f32.mrb[200].mxu1 }
0x18f8   : > { %v9817_v62 = vpop.f32.mrb[200].mxu0  ;;  %v9962_v63 = vsel %vm1696_vm1, %v9863_v61, 0.0  ;;  %v22047_v0 = vpop.f32.mrb[201].mxu1  ;;  %v22973_v61 = vld [vmem:[%s26144_s12 + $0x10] sm:$0xff]  }
0x18f9   : > { %v9961_v3 = vsel %vm1696_vm1, %v9817_v62, 0.0  ;;  %v22041_v44 = vpop.f32.mrb[201].mxu0  ;;  %v9866_v9 = vpop.f32.mrb[202].mxu1  ;;  %v22975_v0 = vld [vmem:[%s26144_s12 + $0x18] sm:$0xff]  }
0x18fa   : > { %v9963_v4 = vadd.f32 %v9962_v63, %v9961_v3  ;;  %v9820_v7 = vpop.f32.mrb[202].mxu0  ;;  %v22048_v8 = vpop.f32.mrb[203].mxu1  ;;  %v22974_v63 = vld [vmem:[%s26144_s12 + $0x8] sm:$0xff]   ;;  %v22976_v44 = vld [vmem:[%s26144_s12 + $0x20] sm:$0xff]   ;;  %v22977_v9 = vld [vmem:[%s26144_s12 + $0x30] sm:$0xff]  }
0x18fb   : > { %v22042_v13 = vpop.f32.mrb[203].mxu0  ;;  %v22978_v7 = vld [vmem:[%s26144_s12 + $0x28] sm:$0xff]   ;;  %v22979_v8 = vld [vmem:[%s26144_s12 + $0x38] sm:$0xff]  }
0x18ff   : > { %v9955_v15 = vpop.f32.mrb[204].mxu1 }
0x1900   : > { %v9909_v19 = vpop.f32.mrb[204].mxu0  ;;  %v22059_v60 = vpop.f32.mrb[205].mxu1  ;;  %v9966_v6 = vsel %vm1696_vm1, %v9955_v15, 0.0 }
0x1901   : > { %v9964_v22 = vsel %vm1696_vm1, %v9909_v19, 0.0  ;;  %v22053_v24 = vpop.f32.mrb[205].mxu0  ;;  %v9958_v25 = vpop.f32.mrb[206].mxu1 }
0x1902   : > { %v9965_v28 = vadd.f32 %v9964_v22, %v9963_v4  ;;  %v9912_v32 = vpop.f32.mrb[206].mxu0  ;;  %v22060_v54 = vpop.f32.mrb[207].mxu1 }
0x1903   : > { %v22054_v26 = vpop.f32.mrb[207].mxu0 }
0x1904   : > { %v9967_v50 = vadd.f32 %v9966_v6, %v9965_v28 }
0x1906   : > { %v9974_v5 = vadd.f32 %v19519_v55, %v9967_v50 }
0x1908   : > { %v9975_v27 = vadd.f32 %v9974_v5, %v24680_v10 }
0x190a   : > { %v9978_v33 = vsel %vm1696_vm1, %v9975_v27, 0.0 }
0x190b   : > { %9979 = vadd.xlane.f32.xlu0 %v9978_v33 }
0x1919   : > { %v8552_v39 = vpop.xlane.xlu1 %8551 }
0x191a   : > { %v8553_v29 = vmul.f32 0.03125, %v8552_v39 }
0x191c   : > { %v8554_v42 = vadd.f32 1e-05, %v8553_v29 }
0x1998   : > { %v9980_v34 = vpop.xlane.xlu0 %9979 }
0x1999   : > { %v9981_v16 = vmul.f32 0.03125, %v9980_v34 }
0x199b   : > { %v9982_v35 = vsub.f32 %v9975_v27, %v9981_v16 }
0x199d   : > { %v9983_v17 = vmul.f32 %v9982_v35, %v9982_v35 }
0x199f   : > { %v9984_v36 = vsel %vm1696_vm1, %v9983_v17, 0.0 }
0x19a0   : > { %9985 = vadd.xlane.f32.xlu0 %v9984_v36 }
0x1a2d   : > { %v9986_v10 = vpop.xlane.xlu0 %9985 }
0x1a2e   : > { %v9987_v45 = vmul.f32 0.03125, %v9986_v10 }
0x1a30   : > { %v9988_v46 = vadd.f32 1e-05, %v9987_v45 }
0x1a32   : > { %23350 = vrsqrt.f32 %v9988_v46 }
0x1a33   : > { %23352 = vrsqrt.f32 %v8554_v42 }
0x1a3c   : > { %v23351_v47 = vpop.eup %23350 }
0x1a3d   : > { %v9990_v49 = vmul.f32 %v23351_v47, %v9982_v35  ;;  %v23353_v31 = vpop.eup %23352 }
0x1a3e   : > { %v8556_v58 = vmul.f32 %v23353_v31, %v24888_v59  ;;  %v19458_v59 = vld [vmem:[%s26145_s13] ss:$0 sm:$0xff]  ;;  %s26146_s13 = sld [smem:[#allocation36_spill]] }
0x1a3f   : > { %v9997_v30 = vmul.f32 %v19520_v48, %v9990_v49 }
0x1a40   : > { %v8563_v62 = vmul.f32 %v19457_v56, %v8556_v58  ;;  %v19541_v58 = vld [vmem:[%s26147_s11 + $0x3] ss:$0 sm:$0xff] }
0x1a41   : > { %v24911_v23 = vadd.f32 %v19521_v2, %v9997_v30 }
0x1a42   : > { %v8570_v3 = vadd.f32 %v19458_v59, %v8563_v62 }
0x1a43   : > { %v10070_v52 = vpack.c.bf16 %v24911_v23, %v24911_v23 }
0x1a44   : > { %v24946_v4 = vpack.c.bf16 %v8570_v3, %v8570_v3  ;;  %v22980_v13 = vld [vmem:[%s26146_s13] sm:$0xff]   ;;  %v22981_v15 = vld [vmem:[%s26146_s13 + $0x10] sm:$0xff]   ;;  %v22982_v19 = vld [vmem:[%s26146_s13 + $0x8] sm:$0xff]  }
0x1a45   : > { %22066 = vmatmul.mubr.msk.bf16.vlgmr.msra.gmra.mrb[208].mxu0 %vm1696_vm1, %v10070_v52  ;;  %22074 = vmatmul.mubr.msk.bf16.vlgmr.msra.gmra.mrb[208].mxu1 %vm1696_vm1, %v10070_v52  ;;  %v22983_v60 = vld [vmem:[%s26146_s13 + $0x18] sm:$0xff]   ;;  %v22984_v22 = vld [vmem:[%s26146_s13 + $0x20] sm:$0xff]   ;;  %v22985_v24 = vld [vmem:[%s26146_s13 + $0x30] sm:$0xff]  }
0x1a46   : > { %22078 = vmatpush3.bf16.msra.mxu0 %v22968_v51  ;;  %22086 = vmatpush3.bf16.msra.mxu1 %v22969_v40  ;;  %v22986_v25 = vld [vmem:[%s26146_s13 + $0x28] sm:$0xff]   ;;  %v22987_v28 = vld [vmem:[%s26146_s13 + $0x38] sm:$0xff]   ;;  %v19522_v40 = vld [vmem:[%s26148_s14] ss:$0 sm:$0xff] }
0x1a47   : > { %22079 = vmatprep.subr.bf16.mxu0 %v23477_v1  ;;  %22087 = vmatprep.subr.bf16.mxu1 %v23477_v1 }
0x1a48   : > { %22081 = vmatprep.mubr.msk.bf16.mxu0 %vm23478_vm0, %v23477_v1  ;;  %22089 = vmatprep.mubr.msk.bf16.mxu1 %vm23478_vm0, %v23477_v1 }
0x1a4a   : > { %22080 = vmatpush3.bf16.msra.mxu0 %v22970_v41  ;;  %22088 = vmatpush3.bf16.msra.mxu1 %v22971_v53  ;;  %v19540_v53 = vld [vmem:[%s26147_s11 + $0x2] ss:$0 sm:$0xff] }
0x1a4b   : > { %22093 = vmatprep.subr.bf16.mxu0 %v23477_v1  ;;  %22101 = vmatprep.subr.bf16.mxu1 %v23477_v1 }
0x1a4d   : > { %22082 = vmatmul.mubr.msk.bf16.vlgmr.msra.gmra.mrb[212].mxu0 %vm1696_vm1, %v10070_v52  ;;  %22090 = vmatmul.mubr.msk.bf16.vlgmr.msra.gmra.mrb[212].mxu1 %vm1696_vm1, %v10070_v52  ;;  %v19523_v52 = vld [vmem:[%s26148_s14 + $0x1] ss:$0 sm:$0xff] }
0x1a4e   : > { %22094 = vmatpush3.bf16.msra.mxu0 %v22972_v57  ;;  %22102 = vmatpush3.bf16.msra.mxu1 %v22973_v61 }
0x1a4f   : > { %22095 = vmatprep.subr.bf16.mxu0 %v23477_v1  ;;  %22103 = vmatprep.subr.bf16.mxu1 %v23477_v1 }
0x1a50   : > { %22097 = vmatprep.mubr.msk.bf16.mxu0 %vm23478_vm0, %v23477_v1  ;;  %22105 = vmatprep.mubr.msk.bf16.mxu1 %vm23478_vm0, %v23477_v1 }
0x1a52   : > { %22096 = vmatpush3.bf16.msra.mxu0 %v22974_v63  ;;  %22104 = vmatpush3.bf16.msra.mxu1 %v22975_v0 }
0x1a53   : > { %22109 = vmatprep.subr.bf16.mxu0 %v23477_v1  ;;  %22117 = vmatprep.subr.bf16.mxu1 %v23477_v1 }
0x1a55   : > { %22098 = vmatmul.mubr.msk.bf16.vlgmr.msra.gmra.mrb[216].mxu0 %vm1696_vm1, %v24946_v4  ;;  %22106 = vmatmul.mubr.msk.bf16.vlgmr.msra.gmra.mrb[216].mxu1 %vm1696_vm1, %v24946_v4 }
0x1a56   : > { %22110 = vmatpush3.bf16.msra.mxu0 %v22976_v44  ;;  %22118 = vmatpush3.bf16.msra.mxu1 %v22977_v9 }
0x1a57   : > { %22111 = vmatprep.subr.bf16.mxu0 %v23477_v1  ;;  %22119 = vmatprep.subr.bf16.mxu1 %v23477_v1 }
0x1a58   : > { %22113 = vmatprep.mubr.msk.bf16.mxu0 %vm23478_vm0, %v23477_v1  ;;  %22121 = vmatprep.mubr.msk.bf16.mxu1 %vm23478_vm0, %v23477_v1 }
0x1a5a   : > { %22112 = vmatpush3.bf16.msra.mxu0 %v22978_v7  ;;  %22120 = vmatpush3.bf16.msra.mxu1 %v22979_v8 }
0x1a5b   : > { %22125 = vmatprep.subr.bf16.mxu0 %v23477_v1  ;;  %22133 = vmatprep.subr.bf16.mxu1 %v23477_v1 }
0x1a5d   : > { %22114 = vmatmul.mubr.msk.bf16.vlgmr.msra.gmra.mrb[220].mxu0 %vm1696_vm1, %v24946_v4  ;;  %22122 = vmatmul.mubr.msk.bf16.vlgmr.msra.gmra.mrb[220].mxu1 %vm1696_vm1, %v24946_v4 }
0x1a5e   : > { %22126 = vmatpush3.bf16.msra.mxu0 %v22980_v13  ;;  %22134 = vmatpush3.bf16.msra.mxu1 %v22981_v15 }
0x1a5f   : > { %22127 = vmatprep.subr.bf16.mxu0 %v23477_v1  ;;  %22135 = vmatprep.subr.bf16.mxu1 %v23477_v1 }
0x1a60   : > { %22129 = vmatprep.mubr.msk.bf16.mxu0 %vm23478_vm0, %v23477_v1  ;;  %22137 = vmatprep.mubr.msk.bf16.mxu1 %vm23478_vm0, %v23477_v1 }
0x1a62   : > { %22128 = vmatpush3.bf16.msra.mxu0 %v22982_v19  ;;  %22136 = vmatpush3.bf16.msra.mxu1 %v22983_v60 }
0x1a63   : > { %22141 = vmatprep.subr.bf16.mxu0 %v23477_v1  ;;  %22149 = vmatprep.subr.bf16.mxu1 %v23477_v1 }
0x1a65   : > { %22130 = vmatmul.mubr.msk.bf16.vlgmr.msra.gmra.mrb[224].mxu0 %vm1696_vm1, %v24946_v4  ;;  %22138 = vmatmul.mubr.msk.bf16.vlgmr.msra.gmra.mrb[224].mxu1 %vm1696_vm1, %v24946_v4 }
0x1a66   : > { %22142 = vmatpush3.bf16.msra.mxu0 %v22984_v22  ;;  %22150 = vmatpush3.bf16.msra.mxu1 %v22985_v24  ;;  %v19524_v22 = vld [vmem:[%s26148_s14 + $0x2] ss:$0 sm:$0xff]  ;;  %v19525_v24 = vld [vmem:[%s26148_s14 + $0x3] ss:$0 sm:$0xff] }
0x1a67   : > { %22143 = vmatprep.subr.bf16.mxu0 %v23477_v1  ;;  %22151 = vmatprep.subr.bf16.mxu1 %v23477_v1 }
0x1a68   : > { %22145 = vmatprep.mubr.msk.bf16.mxu0 %vm23478_vm0, %v23477_v1  ;;  %22153 = vmatprep.mubr.msk.bf16.mxu1 %vm23478_vm0, %v23477_v1 }
0x1a6a   : > { %22144 = vmatpush3.bf16.msra.mxu0 %v22986_v25  ;;  %22152 = vmatpush3.bf16.msra.mxu1 %v22987_v28 }
0x1a6b   : > { %22157 = vmatprep.subr.bf16.mxu0 %v23477_v1  ;;  %22163 = vmatprep.subr.bf16.mxu1 %v23477_v1 }
0x1a6d   : > { %22146 = vmatmul.mubr.msk.bf16.vlgmr.msra.gmra.mrb[228].mxu0 %vm1696_vm1, %v24946_v4  ;;  %22154 = vmatmul.mubr.msk.bf16.vlgmr.msra.gmra.mrb[228].mxu1 %vm1696_vm1, %v24946_v4 }
0x1a6e   : > { %22159 = vmatprep.mubr.msk.bf16.mxu0 %vm23478_vm0, %v23477_v1  ;;  %22165 = vmatprep.mubr.msk.bf16.mxu1 %vm23478_vm0, %v23477_v1 }
0x1b18   : > { %v10145_v32 = vpop.f32.mrb[208].mxu0  ;;  %v10197_v54 = vpop.f32.mrb[208].mxu1 }
0x1b19   : > { %v22067_v55 = vpop.f32.mrb[209].mxu0  ;;  %v22075_v6 = vpop.f32.mrb[209].mxu1  ;;  %v10146_v56 = vadd.f32 %v19522_v40, %v10145_v32  ;;  %v10198_v57 = vadd.f32 %v19523_v52, %v10197_v54  ;;  %v19554_v32 = vld [vmem:[%s26149_s15] ss:$0 sm:$0xff]  ;;  %v19555_v54 = vld [vmem:[%s26149_s15 + $0x1] ss:$0 sm:$0xff] }
0x1b1a   : > { %v10148_v26 = vpop.f32.mrb[210].mxu0  ;;  %v10200_v50 = vpop.f32.mrb[210].mxu1 }
0x1b1b   : > { %v22068_v5 = vpop.f32.mrb[211].mxu0  ;;  %v22076_v27 = vpop.f32.mrb[211].mxu1  ;;  %v10774_v7 = vpack.c.bf16 %v10146_v56, %v10146_v56  ;;  %v10775_v8 = vpack.c.bf16 %v10198_v57, %v10198_v57 }
0x1b20   : > { %v10249_v33 = vpop.f32.mrb[212].mxu0  ;;  %v10301_v34 = vpop.f32.mrb[212].mxu1 }
0x1b21   : > { %v22083_v16 = vpop.f32.mrb[213].mxu0  ;;  %v22091_v35 = vpop.f32.mrb[213].mxu1  ;;  %v10250_v55 = vadd.f32 %v19524_v22, %v10249_v33  ;;  %v10302_v6 = vadd.f32 %v19525_v24, %v10301_v34 }
0x1b22   : > { %v10252_v17 = vpop.f32.mrb[214].mxu0  ;;  %v10304_v36 = vpop.f32.mrb[214].mxu1 }
0x1b23   : > { %v22084_v37 = vpop.f32.mrb[215].mxu0  ;;  %v22092_v38 = vpop.f32.mrb[215].mxu1  ;;  %v10776_v33 = vpack.c.bf16 %v10250_v55, %v10250_v55  ;;  %v10777_v34 = vpack.c.bf16 %v10302_v6, %v10302_v6 }
0x1b28   : > { %v10380_v10 = vpop.f32.mrb[216].mxu0  ;;  %v10432_v45 = vpop.f32.mrb[216].mxu1 }
0x1b29   : > { %v10381_v39 = vadd.f32 %v19538_v18, %v10380_v10  ;;  %v10433_v46 = vadd.f32 %v19539_v43, %v10432_v45  ;;  %v22099_v29 = vpop.f32.mrb[217].mxu0  ;;  %v22107_v42 = vpop.f32.mrb[217].mxu1 }
0x1b2a   : > { %v10383_v47 = vpop.f32.mrb[218].mxu0  ;;  %v10435_v48 = vpop.f32.mrb[218].mxu1 }
0x1b2b   : > { %v10778_v49 = vpack.c.bf16 %v10381_v39, %v10381_v39  ;;  %v10779_v2 = vpack.c.bf16 %v10433_v46, %v10433_v46  ;;  %v22100_v30 = vpop.f32.mrb[219].mxu0  ;;  %v22108_v51 = vpop.f32.mrb[219].mxu1 }
0x1b2d   : > { %v10786_v31 = vsel %vm2368_vm2, %v10778_v49, 0  ;;  %v10832_v41 = vsel %vm2368_vm2, %v10779_v2, 0 }
0x1b2e   : > { %22158 = vmatpush3.bf16.xpose.msra.mxu0 %v10786_v31  ;;  %22164 = vmatpush3.bf16.xpose.msra.mxu1 %v10832_v41 }
0x1b2f   : > { %22169 = vmatprep.subr.bf16.mxu0 %v23477_v1  ;;  %22175 = vmatprep.subr.bf16.mxu1 %v23477_v1 }
0x1b30   : > { %v10484_v61 = vpop.f32.mrb[220].mxu0  ;;  %v10536_v62 = vpop.f32.mrb[220].mxu1 }
0x1b31   : > { %v10485_v59 = vadd.f32 %v19540_v53, %v10484_v61  ;;  %v10537_v63 = vadd.f32 %v19541_v58, %v10536_v62  ;;  %v22115_v0 = vpop.f32.mrb[221].mxu0  ;;  %v22123_v3 = vpop.f32.mrb[221].mxu1 }
0x1b32   : > { %v10487_v44 = vpop.f32.mrb[222].mxu0  ;;  %v10539_v9 = vpop.f32.mrb[222].mxu1 }
0x1b33   : > { %v10780_v13 = vpack.c.bf16 %v10485_v59, %v10485_v59  ;;  %v10781_v15 = vpack.c.bf16 %v10537_v63, %v10537_v63  ;;  %v22116_v19 = vpop.f32.mrb[223].mxu0  ;;  %v22124_v60 = vpop.f32.mrb[223].mxu1 }
0x1b35   : > { %v10878_v25 = vsel %vm2368_vm2, %v10780_v13, 0  ;;  %v10924_v28 = vsel %vm2368_vm2, %v10781_v15, 0  ;;  %22160 = vmatmul.mubr.msk.bf16.vlgmr.msra.gmra.mrb[232].mxu0 %vm2368_vm2, %v10774_v7  ;;  %22166 = vmatmul.mubr.msk.bf16.vlgmr.msra.gmra.mrb[232].mxu1 %vm2368_vm2, %v10775_v8 }
0x1b36   : > { %22170 = vmatpush3.bf16.xpose.msra.mxu0 %v10878_v25  ;;  %22176 = vmatpush3.bf16.xpose.msra.mxu1 %v10924_v28 }
0x1b37   : > { %22171 = vmatprep.mubr.msk.bf16.mxu0 %vm23478_vm0, %v23477_v1  ;;  %22177 = vmatprep.mubr.msk.bf16.mxu1 %vm23478_vm0, %v23477_v1 }
0x1b38   : > { %v10612_v26 = vpop.f32.mrb[224].mxu0  ;;  %v10664_v50 = vpop.f32.mrb[224].mxu1  ;;  %22181 = vmatprep.subr.bf16.mxu0 %v23477_v1  ;;  %22187 = vmatprep.subr.bf16.mxu1 %v23477_v1 }
0x1b39   : > { %v10613_v5 = vadd.f32 %v19554_v32, %v10612_v26  ;;  %v10665_v27 = vadd.f32 %v19555_v54, %v10664_v50  ;;  %v22131_v16 = vpop.f32.mrb[225].mxu0  ;;  %v22139_v35 = vpop.f32.mrb[225].mxu1 }
0x1b3a   : > { %v10615_v17 = vpop.f32.mrb[226].mxu0  ;;  %v10667_v36 = vpop.f32.mrb[226].mxu1 }
0x1b3b   : > { %v11018_v37 = vpack.c.bf16 %v10613_v5, %v10613_v5  ;;  %v11019_v38 = vpack.c.bf16 %v10665_v27, %v10665_v27  ;;  %v22132_v18 = vpop.f32.mrb[227].mxu0  ;;  %v22140_v43 = vpop.f32.mrb[227].mxu1 }
0x1b3d   : > { %v11026_v10 = vsel %vm2622_vm3, %v11018_v37, 0  ;;  %v11072_v45 = vsel %vm2622_vm3, %v11019_v38, 0  ;;  %22172 = vmatmul.mubr.msk.bf16.vlgmr.msra.gmra.mrb[236].mxu0 %vm2368_vm2, %v10776_v33  ;;  %22178 = vmatmul.mubr.msk.bf16.vlgmr.msra.gmra.mrb[236].mxu1 %vm2368_vm2, %v10777_v34 }
0x1b3e   : > { %22182 = vmatpush3.bf16.msra.mxu0 %v11026_v10  ;;  %22188 = vmatpush3.bf16.msra.mxu1 %v11072_v45  ;;  %v19557_v10 = vld [vmem:[%s26149_s15 + $0x3] ss:$0 sm:$0xff]  ;;  %v19556_v45 = vld [vmem:[%s26149_s15 + $0x2] ss:$0 sm:$0xff] }
0x1b3f   : > { %22183 = vmatprep.mubr.msk.bf16.mxu0 %vm23478_vm0, %v23477_v1  ;;  %22189 = vmatprep.mubr.msk.bf16.mxu1 %vm23478_vm0, %v23477_v1 }
0x1b40   : > { %v25036_v39 = vpop.f32.mrb[228].mxu0  ;;  %v25038_v46 = vpop.f32.mrb[228].mxu1  ;;  %22193 = vmatprep.subr.bf16.mxu0 %v23477_v1  ;;  %22199 = vmatprep.subr.bf16.mxu1 %v23477_v1 }
0x1b41   : > { %v22147_v29 = vpop.f32.mrb[229].mxu0  ;;  %v22155_v42 = vpop.f32.mrb[229].mxu1 }
0x1b42   : > { %v10719_v47 = vpop.f32.mrb[230].mxu0  ;;  %v10771_v48 = vpop.f32.mrb[230].mxu1  ;;  %v10769_v29 = vadd.f32 %v19557_v10, %v25038_v46 }
0x1b43   : > { %v22148_v49 = vpop.f32.mrb[231].mxu0  ;;  %v22156_v2 = vpop.f32.mrb[231].mxu1  ;;  %v10717_v47 = vadd.f32 %v19556_v45, %v25036_v39 }
0x1c08   : > { %v10822_v30 = vpop.f32.mrb[232].mxu0  ;;  %v10868_v51 = vpop.f32.mrb[232].mxu1 }
0x1c09   : > { %v10966_v40 = vmul.f32 0.35355338, %v10822_v30  ;;  %v10967_v52 = vmul.f32 0.35355338, %v10868_v51  ;;  %v22161_v31 = vpop.f32.mrb[233].mxu0  ;;  %v22167_v41 = vpop.f32.mrb[233].mxu1  ;;  %v11021_v30 = vpack.c.bf16 %v10769_v29, %v10769_v29 }
0x1c0a   : > { %v10825_v53 = vpop.f32.mrb[234].mxu0  ;;  %v10871_v58 = vpop.f32.mrb[234].mxu1 }
0x1c0b   : > { %v22162_v56 = vpop.f32.mrb[235].mxu0  ;;  %v22168_v57 = vpop.f32.mrb[235].mxu1  ;;  %v10973_v61 = vsel %vm2368_vm2, %v10967_v52, -inf  ;;  %v10970_v62 = vsel %vm2368_vm2, %v10966_v40, -inf  ;;  %v11164_v53 = vsel %vm2622_vm3, %v11021_v30, 0 }
0x1c0c   : > { %10974 = vmax.xlane.f32.xlu1 %v10973_v61  ;;  %10971 = vmax.xlane.f32.xlu0 %v10970_v62  ;;  %v10066_v58 = vld [vmem:[%s26150_s16 + $0x4] sm:$0xf]  ;;  %v10065_v61 = vld [vmem:[%s26150_s16] sm:$0xf] }
0x1c10   : > { %v10914_v59 = vpop.f32.mrb[236].mxu0  ;;  %v10960_v63 = vpop.f32.mrb[236].mxu1 }
0x1c11   : > { %v10968_v0 = vmul.f32 0.35355338, %v10914_v59  ;;  %v10969_v3 = vmul.f32 0.35355338, %v10960_v63  ;;  %v22173_v44 = vpop.f32.mrb[237].mxu0  ;;  %v22179_v9 = vpop.f32.mrb[237].mxu1 }
0x1c12   : > { %v10917_v7 = vpop.f32.mrb[238].mxu0  ;;  %v10963_v8 = vpop.f32.mrb[238].mxu1  ;;  %v11260_v63 = vsel %vm2622_vm3, %v10066_v58, 0  ;;  %v10068_v44 = vld [vmem:[%s26150_s16 + $0xc] sm:$0xf] }
0x1c13   : > { %v22174_v13 = vpop.f32.mrb[239].mxu0  ;;  %v22180_v15 = vpop.f32.mrb[239].mxu1  ;;  %v10979_v19 = vsel %vm2368_vm2, %v10969_v3, -inf  ;;  %v10976_v60 = vsel %vm2368_vm2, %v10968_v0, -inf  ;;  %v10067_v9 = vld [vmem:[%s26150_s16 + $0x8] sm:$0xf] }
0x1c14   : > { %10980 = vmax.xlane.f32.xlu1 %v10979_v19  ;;  %10977 = vmax.xlane.f32.xlu0 %v10976_v60  ;;  %v11352_v19 = vsel %vm2622_vm3, %v10068_v44, 0  ;;  %v11439_v44 = vld [vmem:[%s26152_s21] sm:$0xff] }
0x1c99   : > { %v10975_v22 = vpop.xlane.xlu1 %10974  ;;  %v10972_v24 = vpop.xlane.xlu0 %10971 }
0x1c9a   : > { %v10983_v25 = vsub.f32 %v10967_v52, %v10975_v22  ;;  %v10982_v28 = vsub.f32 %v10966_v40, %v10972_v24  ;;  %v11020_v40 = vpack.c.bf16 %v10717_v47, %v10717_v47 }
0x1c9c   : > { %v10988_v32 = vmul.f32 1.442695, %v10983_v25  ;;  %v10986_v54 = vmul.f32 1.442695, %v10982_v28  ;;  %v11118_v46 = vsel %vm2622_vm3, %v11020_v40, 0  ;;  %v11306_v25 = vsel %vm2622_vm3, %v10067_v9, 0 }
0x1c9d   : > { %v11441_v9 = vld [vmem:[%s26152_s21 + $0x40] sm:$0xff] }
0x1c9e   : > { %23354 = vpow2.f32 %v10988_v32 }
0x1c9f   : > { %23356 = vpow2.f32 %v10986_v54 }
0x1ca1   : > { %v10981_v55 = vpop.xlane.xlu1 %10980  ;;  %v10978_v6 = vpop.xlane.xlu0 %10977 }
0x1ca2   : > { %v10985_v26 = vsub.f32 %v10969_v3, %v10981_v55  ;;  %v10984_v50 = vsub.f32 %v10968_v0, %v10978_v6  ;;  %v11214_v3 = vsel %vm2622_vm3, %v10065_v61, 0 }
0x1ca4   : > { %v10992_v5 = vmul.f32 1.442695, %v10985_v26  ;;  %v10990_v27 = vmul.f32 1.442695, %v10984_v50 }
0x1ca6   : > { %23358 = vpow2.f32 %v10992_v5 }
0x1ca7   : > { %23360 = vpow2.f32 %v10990_v27 }
0x1ca8   : > { %v23355_v16 = vpop.eup %23354 }
0x1ca9   : > { %v23357_v35 = vpop.eup %23356  ;;  %v10997_v17 = vsel %vm2368_vm2, %v23355_v16, 0.0 }
0x1caa   : > { %10998 = vadd.xlane.f32.xlu1 %v10997_v17  ;;  %v10994_v36 = vsel %vm2368_vm2, %v23357_v35, 0.0 }
0x1cab   : > { %10995 = vadd.xlane.f32.xlu0 %v10994_v36 }
0x1cb0   : > { %v23359_v33 = vpop.eup %23358 }
0x1cb1   : > { %v23361_v34 = vpop.eup %23360  ;;  %v11003_v37 = vsel %vm2368_vm2, %v23359_v33, 0.0 }
0x1cb2   : > { %11004 = vadd.xlane.f32.xlu1 %v11003_v37  ;;  %v11000_v38 = vsel %vm2368_vm2, %v23361_v34, 0.0 }
0x1cb3   : > { %11001 = vadd.xlane.f32.xlu0 %v11000_v38 }
0x1d37   : > { %v10999_v18 = vpop.xlane.xlu1 %10998 }
0x1d38   : > { %23362 = vrcp.f32 %v10999_v18  ;;  %v10996_v43 = vpop.xlane.xlu0 %10995 }
0x1d39   : > { %23364 = vrcp.f32 %v10996_v43 }
0x1d3f   : > { %v11005_v42 = vpop.xlane.xlu1 %11004 }
0x1d40   : > { %23366 = vrcp.f32 %v11005_v42  ;;  %v11002_v48 = vpop.xlane.xlu0 %11001 }
0x1d41   : > { %23368 = vrcp.f32 %v11002_v48 }
0x1d42   : > { %v23363_v49 = vpop.eup %23362 }
0x1d43   : > { %v23365_v2 = vpop.eup %23364  ;;  %v11009_v51 = vmul.f32 %v23363_v49, %v23355_v16 }
0x1d44   : > { %v11007_v52 = vmul.f32 %v23365_v2, %v23357_v35 }
0x1d45   : > { %v11015_v31 = vpack.c.bf16 %v11009_v51, %v11009_v51 }
0x1d46   : > { %v11014_v41 = vpack.c.bf16 %v11007_v52, %v11007_v52 }
0x1d47   : > { %22190 = vmatmul.mubr.msk.bf16.vlgmr.msra.gmra.mrb[240].mxu1 %vm2368_vm2, %v11015_v31 }
0x1d48   : > { %22184 = vmatmul.mubr.msk.bf16.vlgmr.msra.gmra.mrb[240].mxu0 %vm2368_vm2, %v11014_v41  ;;  %22200 = vmatpush3.bf16.msra.mxu1 %v11164_v53  ;;  %v19582_v53 = vld [vmem:[%s26151_s19] ss:$0 sm:$0xff] }
0x1d49   : > { %22194 = vmatpush3.bf16.msra.mxu0 %v11118_v46  ;;  %22195 = vmatprep.mubr.msk.bf16.mxu0 %vm23478_vm0, %v23477_v1 }
0x1d4a   : > { %v23367_v39 = vpop.eup %23366  ;;  %22201 = vmatprep.mubr.msk.bf16.mxu1 %vm23478_vm0, %v23477_v1  ;;  %22205 = vmatprep.subr.bf16.mxu0 %v23477_v1 }
0x1d4b   : > { %v23369_v56 = vpop.eup %23368  ;;  %v11013_v57 = vmul.f32 %v23367_v39, %v23359_v33  ;;  %22211 = vmatprep.subr.bf16.mxu1 %v23477_v1 }
0x1d4c   : > { %v11011_v62 = vmul.f32 %v23369_v56, %v23361_v34 }
0x1d4d   : > { %v11017_v59 = vpack.c.bf16 %v11013_v57, %v11013_v57 }
0x1d4e   : > { %v11016_v0 = vpack.c.bf16 %v11011_v62, %v11011_v62 }
0x1d4f   : > { %22202 = vmatmul.mubr.msk.bf16.vlgmr.msra.gmra.mrb[244].mxu1 %vm2368_vm2, %v11017_v59 }
0x1d50   : > { %22196 = vmatmul.mubr.msk.bf16.vlgmr.msra.gmra.mrb[244].mxu0 %vm2368_vm2, %v11016_v0  ;;  %22212 = vmatpush3.bf16.msra.mxu1 %v11260_v63 }
0x1d51   : > { %22206 = vmatpush3.bf16.msra.mxu0 %v11214_v3  ;;  %22207 = vmatprep.mubr.msk.bf16.mxu0 %vm23478_vm0, %v23477_v1 }
0x1d52   : > { %22213 = vmatprep.mubr.msk.bf16.mxu1 %vm23478_vm0, %v23477_v1  ;;  %22217 = vmatprep.subr.bf16.mxu0 %v23477_v1 }
0x1d53   : > { %22223 = vmatprep.subr.bf16.mxu1 %v23477_v1 }
0x1e1a   : > { %v11108_v7 = vpop.f32.mrb[240].mxu1 }
0x1e1b   : > { %v11062_v8 = vpop.f32.mrb[240].mxu0  ;;  %v11207_v13 = vpack.c.bf16 %v11108_v7, %v11108_v7  ;;  %v22191_v15 = vpop.f32.mrb[241].mxu1  ;;  %v11440_v7 = vld [vmem:[%s26152_s21 + $0x8] sm:$0xff] }
0x1e1c   : > { %v11206_v60 = vpack.c.bf16 %v11062_v8, %v11062_v8  ;;  %v22185_v22 = vpop.f32.mrb[241].mxu0  ;;  %v11111_v24 = vpop.f32.mrb[242].mxu1  ;;  %v19586_v8 = vcombine.high %v11439_v44, %v11441_v9 }
0x1e1d   : > { %v11065_v28 = vpop.f32.mrb[242].mxu0  ;;  %v22192_v32 = vpop.f32.mrb[243].mxu1  ;;  %22214 = vmatmul.mubr.msk.bf16.vlgmr.msra.gmra.mrb[248].mxu1 %vm2368_vm2, %v11207_v13  ;;  %v11442_v13 = vld [vmem:[%s26152_s21 + $0x48] sm:$0xff]  ;;  %v11445_v22 = vld [vmem:[%s26152_s21 + $0xc0] sm:$0xff] }
0x1e1e   : > { %v22186_v54 = vpop.f32.mrb[243].mxu0  ;;  %22208 = vmatmul.mubr.msk.bf16.vlgmr.msra.gmra.mrb[248].mxu0 %vm2368_vm2, %v11206_v60  ;;  %22224 = vmatpush3.bf16.msra.mxu1 %v11352_v19  ;;  %v19587_v15 = vcombine.low %v11440_v7, %v11442_v13  ;;  %v19588_v19 = vcombine.high %v11440_v7, %v11442_v13  ;;  %v11443_v60 = vld [vmem:[%s26152_s21 + $0x80] sm:$0xff]  ;;  %v11444_v24 = vld [vmem:[%s26152_s21 + $0x88] sm:$0xff] }
0x1e1f   : > { %22218 = vmatpush3.bf16.msra.mxu0 %v11306_v25  ;;  %22219 = vmatprep.mubr.msk.bf16.mxu0 %vm23478_vm0, %v23477_v1  ;;  %v19590_v25 = vcombine.high %v11443_v60, %v11445_v22  ;;  %v11446_v28 = vld [vmem:[%s26152_s21 + $0xc8] sm:$0xff]  ;;  %v19589_v32 = vcombine.low %v11443_v60, %v11445_v22  ;;  %v23005_v7 = vld [vmem:[%s26155_s27 + $0x1e0] sm:$0xff]   ;;  %v23012_v22 = vld [vmem:[%s26155_s27 + $0x170] sm:$0xff]  }
0x1e20   : > { %22225 = vmatprep.mubr.msk.bf16.mxu1 %vm23478_vm0, %v23477_v1  ;;  %11512 = vmatprep.subr.bf16.mxu0 %v19586_v8  ;;  %v19591_v54 = vcombine.low %v11444_v24, %v11446_v28  ;;  %v23006_v8 = vld [vmem:[%s26155_s27 + $0x120] sm:$0xff]   ;;  %v23011_v60 = vld [vmem:[%s26155_s27 + $0x1a8] sm:$0xff]  }
0x1e21   : > { %11553 = vmatprep.subr.bf16.mxu1 %v19588_v19  ;;  %v23007_v13 = vld [vmem:[%s26155_s27 + $0x1a0] sm:$0xff]   ;;  %v23010_v19 = vld [vmem:[%s26155_s27 + $0x128] sm:$0xff]  }
0x1e22   : > { %v11200_v55 = vpop.f32.mrb[244].mxu1 }
0x1e23   : > { %v11154_v6 = vpop.f32.mrb[244].mxu0  ;;  %v11209_v26 = vpack.c.bf16 %v11200_v55, %v11200_v55  ;;  %v22203_v50 = vpop.f32.mrb[245].mxu1  ;;  %v19592_v55 = vcombine.high %v11444_v24, %v11446_v28  ;;  %v23013_v24 = vld [vmem:[%s26155_s27 + $0x1f0] sm:$0xff]  }
0x1e24   : > { %v11208_v5 = vpack.c.bf16 %v11154_v6, %v11154_v6  ;;  %v22197_v27 = vpop.f32.mrb[245].mxu0  ;;  %v11203_v16 = vpop.f32.mrb[246].mxu1  ;;  %v11666_v6 = vld [vmem:[%s26152_s21 + $0x10] sm:$0xff]  ;;  %v11667_v50 = vld [vmem:[%s26152_s21 + $0x18] sm:$0xff] }
0x1e25   : > { %v11157_v35 = vpop.f32.mrb[246].mxu0  ;;  %v22204_v17 = vpop.f32.mrb[247].mxu1  ;;  %22226 = vmatmul.mubr.msk.bf16.vlgmr.msra.gmra.mrb[252].mxu1 %vm2368_vm2, %v11209_v26  ;;  %v11668_v26 = vld [vmem:[%s26152_s21 + $0x50] sm:$0xff]  ;;  %v11669_v27 = vld [vmem:[%s26152_s21 + $0x58] sm:$0xff] }
0x1e26   : > { %v22198_v36 = vpop.f32.mrb[247].mxu0  ;;  %22220 = vmatmul.mubr.msk.bf16.vlgmr.msra.gmra.mrb[252].mxu0 %vm2368_vm2, %v11208_v5  ;;  %11585 = vmatprep.mubr.bf16.mxu1 %v23479_v12  ;;  %v19596_v5 = vcombine.high %v11666_v6, %v11668_v26  ;;  %v19595_v16 = vcombine.low %v11666_v6, %v11668_v26  ;;  %v19597_v35 = vcombine.low %v11667_v50, %v11669_v27  ;;  %v23015_v28 = vld [vmem:[%s26155_s27 + $0x1b0] sm:$0xff]   ;;  %v23019_v6 = vld [vmem:[%s26155_s27 + $0x1b8] sm:$0xff]   ;;  %v23020_v26 = vld [vmem:[%s26155_s27 + $0x40] sm:$0xff]  }
0x1e27   : > { %11544 = vmatprep.mubr.bf16.mxu0 %v23479_v12  ;;  %11554 = vmatpush1.bf16.msra.mxu1 %v19587_v15  ;;  %v19598_v17 = vcombine.high %v11667_v50, %v11669_v27  ;;  %v23009_v15 = vld [vmem:[%s26155_s27 + $0x1e8] sm:$0xff]   ;;  %v23021_v50 = vld [vmem:[%s26155_s27 + $0xc0] sm:$0xff]  }
0x1e28   : > { %11555 = vmatprep.subr.bf16.mxu1 %v19592_v55  ;;  %v23018_v55 = vld [vmem:[%s26155_s27 + $0x138] sm:$0xff]  }
0x1e2b   : > { %11556 = vmatpush1.bf16.msra.mxu1 %v19591_v54  ;;  %v23017_v54 = vld [vmem:[%s26155_s27 + $0x1f8] sm:$0xff]  }
0x1e2c   : > { %11777 = vmatprep.subr.bf16.mxu1 %v19598_v17  ;;  %v25171_v17 = vld [vmem:[%s26156_s29] sm:$0xf] }
0x1ef0   : > { %v11296_v33 = vpop.f32.mrb[248].mxu1 }
0x1ef1   : > { %v11250_v34 = vpop.f32.mrb[248].mxu0  ;;  %v11395_v37 = vsel %vm1696_vm1, %v11296_v33, 0.0  ;;  %v22215_v38 = vpop.f32.mrb[249].mxu1 }
0x1ef2   : > { %v11394_v18 = vsel %vm1696_vm1, %v11250_v34, 0.0  ;;  %v22209_v43 = vpop.f32.mrb[249].mxu0  ;;  %v11299_v10 = vpop.f32.mrb[250].mxu1  ;;  %v19583_v38 = vld [vmem:[%s26153_s24] ss:$0 sm:$0xff] }
0x1ef3   : > { %v11396_v45 = vadd.f32 %v11395_v37, %v11394_v18  ;;  %v11253_v29 = vpop.f32.mrb[250].mxu0  ;;  %v22216_v42 = vpop.f32.mrb[251].mxu1  ;;  %v19584_v43 = vld [vmem:[%s26154_s25] ss:$0 sm:$0xff] }
0x1ef4   : > { %v22210_v47 = vpop.f32.mrb[251].mxu0  ;;  %v11672_v29 = vld [vmem:[%s26152_s21 + $0xd0] sm:$0xff]  ;;  %v11671_v42 = vld [vmem:[%s26152_s21 + $0x98] sm:$0xff] }
0x1ef5   : > { %v11673_v47 = vld [vmem:[%s26152_s21 + $0xd8] sm:$0xff] }
0x1ef8   : > { %v11388_v48 = vpop.f32.mrb[252].mxu1 }
0x1ef9   : > { %v11342_v49 = vpop.f32.mrb[252].mxu0  ;;  %v22227_v2 = vpop.f32.mrb[253].mxu1  ;;  %v11399_v46 = vsel %vm1696_vm1, %v11388_v48, 0.0 }
0x1efa   : > { %v11397_v30 = vsel %vm1696_vm1, %v11342_v49, 0.0  ;;  %v22221_v51 = vpop.f32.mrb[253].mxu0  ;;  %v11391_v40 = vpop.f32.mrb[254].mxu1 }
0x1efb   : > { %v11398_v52 = vadd.f32 %v11397_v30, %v11396_v45  ;;  %v11345_v31 = vpop.f32.mrb[254].mxu0  ;;  %v22228_v41 = vpop.f32.mrb[255].mxu1  ;;  %v11670_v45 = vld [vmem:[%s26152_s21 + $0x90] sm:$0xff]  ;;  %v19602_v30 = vcombine.high %v11671_v42, %v11673_v47  ;;  %v19601_v40 = vcombine.low %v11671_v42, %v11673_v47 }
0x1efc   : > { %v22222_v39 = vpop.f32.mrb[255].mxu0  ;;  %v19600_v2 = vcombine.high %v11670_v45, %v11672_v29  ;;  %v19599_v51 = vcombine.low %v11670_v45, %v11672_v29  ;;  %v22989_v31 = vld [vmem:[%s26155_s27 + $0x1c0] sm:$0xff]  }
0x1efd   : > { %v11400_v58 = vadd.f32 %v11399_v46, %v11398_v52  ;;  %v22988_v52 = vld [vmem:[%s26155_s27 + $0x140] sm:$0xff]   ;;  %v22992_v46 = vld [vmem:[%s26155_s27 + $0x148] sm:$0xff]  }
0x1efe   : > { %v22990_v41 = vld [vmem:[%s26155_s27 + $0x100] sm:$0xff]   ;;  %v22993_v39 = vld [vmem:[%s26155_s27 + $0x1c8] sm:$0xff]  }
0x1eff   : > { %v11407_v56 = vadd.f32 %v19582_v53, %v11400_v58  ;;  %v22991_v53 = vld [vmem:[%s26155_s27 + $0x180] sm:$0xff]   ;;  %v22994_v58 = vld [vmem:[%s26155_s27 + $0x108] sm:$0xff]  }
0x1f01   : > { %v11408_v57 = vadd.f32 %v11407_v56, %v24911_v23  ;;  %v19585_v23 = vcombine.low %v11439_v44, %v11441_v9  ;;  %v22995_v56 = vld [vmem:[%s26155_s27 + $0x188] sm:$0xff]   ;;  %v23003_v44 = vld [vmem:[%s26155_s27 + $0x198] sm:$0xff]   ;;  %v23004_v9 = vld [vmem:[%s26155_s27 + $0x160] sm:$0xff]  }
0x1f03   : > { %v11411_v61 = vsel %vm1696_vm1, %v11408_v57, 0.0  ;;  %11513 = vmatpush1.bf16.msra.mxu0 %v19585_v23  ;;  %v23008_v23 = vld [vmem:[%s26155_s27 + $0x168] sm:$0xff]  }
0x1f04   : > { %11412 = vadd.xlane.f32.xlu0 %v11411_v61  ;;  %11514 = vmatprep.subr.bf16.mxu0 %v19590_v25  ;;  %v22997_v61 = vld [vmem:[%s26155_s27 + $0x1d0] sm:$0xff]  }
0x1f05   : > { %v23014_v25 = vld [vmem:[%s26155_s27 + $0x130] sm:$0xff]  }
0x1f07   : > { %11515 = vmatpush1.bf16.msra.mxu0 %v19589_v32  ;;  %v23016_v32 = vld [vmem:[%s26155_s27 + $0x178] sm:$0xff]  }
0x1f08   : > { %11736 = vmatprep.subr.bf16.mxu0 %v19596_v5 }
0x1f91   : > { %v11413_v62 = vpop.xlane.xlu0 %11412 }
0x1f92   : > { %v11414_v59 = vmul.f32 0.03125, %v11413_v62  ;;  %v22998_v62 = vld [vmem:[%s26155_s27 + $0x110] sm:$0xff]  }
0x1f94   : > { %v11415_v63 = vsub.f32 %v11408_v57, %v11414_v59  ;;  %v22996_v57 = vld [vmem:[%s26155_s27 + $0x150] sm:$0xff]  }
0x1f95   : > { %v22999_v59 = vld [vmem:[%s26155_s27 + $0x190] sm:$0xff]  }
0x1f96   : > { %v11416_v0 = vmul.f32 %v11415_v63, %v11415_v63 }
0x1f98   : > { %v11417_v3 = vsel %vm1696_vm1, %v11416_v0, 0.0  ;;  %v23001_v0 = vld [vmem:[%s26155_s27 + $0x1d8] sm:$0xff]  }
0x1f99   : > { %11418 = vadd.xlane.f32.xlu1 %v11417_v3  ;;  %v23002_v3 = vld [vmem:[%s26155_s27 + $0x118] sm:$0xff]  }
0x2026   : > { %v11419_v36 = vpop.xlane.xlu1 %11418 }
0x2027   : > { %v11420_v33 = vmul.f32 0.03125, %v11419_v36 }
0x2029   : > { %v11421_v34 = vadd.f32 1e-05, %v11420_v33 }
0x202b   : > { %23370 = vrsqrt.f32 %v11421_v34  ;;  %v11674_v34 = vld [vmem:[%s26156_s29 + $0x4] sm:$0xf] }
0x202c   : > { %v11687_v45 = vrot.slane %v11674_v34, %v24053_v21  ;;  %v11683_v29 = vrot.slane %v11674_v34, %v24043_v11  ;;  %v11691_v42 = vrot.slane %v11674_v34, %v24045_v14 }
0x2035   : > { %v23371_v37 = vpop.eup %23370 }
0x2036   : > { %v11423_v18 = vmul.f32 %v23371_v37, %v11415_v63  ;;  %v23000_v63 = vld [vmem:[%s26155_s27 + $0x158] sm:$0xff]  }
0x2038   : > { %v11430_v10 = vmul.f32 %v19583_v38, %v11423_v18  ;;  %v11456_v18 = vrot.slane %v25171_v17, %v24043_v11 }
0x203a   : > { %v25116_v48 = vadd.f32 %v19584_v43, %v11430_v10  ;;  %v11464_v43 = vrot.slane %v25171_v17, %v24045_v14  ;;  %v11679_v10 = vrot.slane %v11674_v34, %v24051_v20  ;;  %v23039_v34 = vld [vmem:[%s26155_s27 + $0xa0] sm:$0xff]  }
0x203c   : > { %v25120_v49 = vpack.c.bf16 %v25116_v48, %v25116_v48 }
0x203e   : > { %19593 = vmatmul.mubr.msk.bf16.vlgmr.msra.gmra.mrb[0].mxu0 %vm1696_vm1, %v25120_v49  ;;  %19594 = vmatmul.mubr.msk.bf16.vlgmr.msra.gmra.mrb[0].mxu1 %vm1696_vm1, %v25120_v49 }
0x203f   : > { %11737 = vmatpush1.bf16.msra.mxu0 %v19595_v16  ;;  %11778 = vmatpush1.bf16.msra.mxu1 %v19597_v35 }
0x2040   : > { %11738 = vmatprep.subr.bf16.mxu0 %v19600_v2  ;;  %11779 = vmatprep.subr.bf16.mxu1 %v19602_v30 }
0x2041   : > { %11768 = vmatprep.mubr.bf16.mxu0 %v23479_v12  ;;  %11809 = vmatprep.mubr.bf16.mxu1 %v23479_v12 }
0x2043   : > { %11739 = vmatpush1.bf16.msra.mxu0 %v19599_v51  ;;  %11780 = vmatpush1.bf16.msra.mxu1 %v19601_v40 }
0x2044   : > { %21082 = vmatprep.subr.bf16.mxu0 %v22988_v52  ;;  %21104 = vmatprep.subr.bf16.mxu1 %v22989_v31 }
0x2046   : > { %19603 = vmatmul.mubr.msk.bf16.vlgmr.msra.gmra.mrb[4].mxu0 %vm1696_vm1, %v25120_v49  ;;  %19604 = vmatmul.mubr.msk.bf16.vlgmr.msra.gmra.mrb[4].mxu1 %vm1696_vm1, %v25120_v49 }
0x2047   : > { %21083 = vmatpush3.bf16.msra.mxu0 %v22990_v41  ;;  %21105 = vmatpush3.bf16.msra.mxu1 %v22991_v53 }
0x2048   : > { %21084 = vmatprep.subr.bf16.mxu0 %v22992_v46  ;;  %21106 = vmatprep.subr.bf16.mxu1 %v22993_v39 }
0x204b   : > { %21085 = vmatpush3.bf16.msra.mxu0 %v22994_v58  ;;  %21107 = vmatpush3.bf16.msra.mxu1 %v22995_v56 }
0x204c   : > { %21086 = vmatprep.subr.bf16.mxu0 %v22996_v57  ;;  %21108 = vmatprep.subr.bf16.mxu1 %v22997_v61 }
0x204f   : > { %21087 = vmatpush3.bf16.msra.mxu0 %v22998_v62  ;;  %21109 = vmatpush3.bf16.msra.mxu1 %v22999_v59 }
0x2050   : > { %21088 = vmatprep.subr.bf16.mxu0 %v23000_v63  ;;  %21110 = vmatprep.subr.bf16.mxu1 %v23001_v0 }
0x2053   : > { %21089 = vmatpush3.bf16.msra.mxu0 %v23002_v3  ;;  %21111 = vmatpush3.bf16.msra.mxu1 %v23003_v44 }
0x2054   : > { %21090 = vmatprep.subr.bf16.mxu0 %v23004_v9  ;;  %21112 = vmatprep.subr.bf16.mxu1 %v23005_v7  ;;  %v23022_v7 = vld [vmem:[%s26155_s27] sm:$0xff]  }
0x2057   : > { %21091 = vmatpush3.bf16.msra.mxu0 %v23006_v8  ;;  %21113 = vmatpush3.bf16.msra.mxu1 %v23007_v13  ;;  %v23023_v8 = vld [vmem:[%s26155_s27 + $0x80] sm:$0xff]  }
0x2058   : > { %21092 = vmatprep.subr.bf16.mxu0 %v23008_v23  ;;  %21114 = vmatprep.subr.bf16.mxu1 %v23009_v15  ;;  %v23024_v15 = vld [vmem:[%s26155_s27 + $0x48] sm:$0xff]  }
0x205b   : > { %21093 = vmatpush3.bf16.msra.mxu0 %v23010_v19  ;;  %21115 = vmatpush3.bf16.msra.mxu1 %v23011_v60  ;;  %v23025_v19 = vld [vmem:[%s26155_s27 + $0xc8] sm:$0xff]  }
0x205c   : > { %21094 = vmatprep.subr.bf16.mxu0 %v23012_v22  ;;  %21116 = vmatprep.subr.bf16.mxu1 %v23013_v24  ;;  %v23026_v24 = vld [vmem:[%s26155_s27 + $0x8] sm:$0xff]  }
0x205f   : > { %21095 = vmatpush3.bf16.msra.mxu0 %v23014_v25  ;;  %21117 = vmatpush3.bf16.msra.mxu1 %v23015_v28  ;;  %v23027_v25 = vld [vmem:[%s26155_s27 + $0x88] sm:$0xff]   ;;  %v23028_v28 = vld [vmem:[%s26155_s27 + $0x50] sm:$0xff]  }
0x2060   : > { %21096 = vmatprep.subr.bf16.mxu0 %v23016_v32  ;;  %21118 = vmatprep.subr.bf16.mxu1 %v23017_v54  ;;  %v23029_v32 = vld [vmem:[%s26155_s27 + $0xd0] sm:$0xff]  }
0x2061   : > { %v23030_v54 = vld [vmem:[%s26155_s27 + $0x10] sm:$0xff]  }
0x2063   : > { %21097 = vmatpush3.bf16.msra.mxu0 %v23018_v55  ;;  %21119 = vmatpush3.bf16.msra.mxu1 %v23019_v6  ;;  %v23031_v55 = vld [vmem:[%s26155_s27 + $0x90] sm:$0xff]   ;;  %v23032_v6 = vld [vmem:[%s26155_s27 + $0x58] sm:$0xff]  }
0x2064   : > { %21126 = vmatprep.subr.bf16.mxu0 %v23020_v26  ;;  %21148 = vmatprep.subr.bf16.mxu1 %v23021_v50  ;;  %v23033_v26 = vld [vmem:[%s26155_s27 + $0xd8] sm:$0xff]  }
0x2065   : > { %v23034_v50 = vld [vmem:[%s26155_s27 + $0x18] sm:$0xff]  }
0x2111   : > { %v25166_v5 = vpop.f32.mrb[0].mxu0  ;;  %v25168_v27 = vpop.f32.mrb[0].mxu1 }
0x2112   : > { %v11548_v16 = vpop.f32.mrb[1].mxu0  ;;  %v11589_v35 = vpop.f32.mrb[1].mxu1 }
0x2113   : > { %v11550_v36 = vpop.f32.mrb[2].mxu0  ;;  %v11591_v33 = vpop.f32.mrb[2].mxu1  ;;  %v11549_v30 = vadd.f32 %v11548_v16, %v11456_v18  ;;  %v11590_v51 = vadd.f32 %v11589_v35, %v11464_v43  ;;  %v23035_v16 = vld [vmem:[%s26155_s27 + $0x98] sm:$0xff]   ;;  %v23036_v35 = vld [vmem:[%s26155_s27 + $0x60] sm:$0xff]   ;;  %v23042_v18 = vld [vmem:[%s26155_s27 + $0x28] sm:$0xff]  }
0x2114   : > { %v11551_v37 = vpop.f32.mrb[3].mxu0  ;;  %v11592_v38 = vpop.f32.mrb[3].mxu1  ;;  %v23037_v36 = vld [vmem:[%s26155_s27 + $0xe0] sm:$0xff]   ;;  %v23043_v43 = vld [vmem:[%s26155_s27 + $0xa8] sm:$0xff]  }
0x2115   : > { %v11595_v0 = vmax.f32 %v11549_v30, 0.0  ;;  %v11597_v3 = vmax.f32 %v11590_v51, 0.0  ;;  %v23038_v33 = vld [vmem:[%s26155_s27 + $0x20] sm:$0xff]   ;;  %v23040_v37 = vld [vmem:[%s26155_s27 + $0x68] sm:$0xff]  }
0x2116   : > { %v23041_v38 = vld [vmem:[%s26155_s27 + $0xe8] sm:$0xff]  }
0x2117   : > { %v11599_v60 = vpack.c.bf16 %v11595_v0, %v11595_v0  ;;  %v11601_v22 = vpack.c.bf16 %v11597_v3, %v11597_v3 }
0x2119   : > { %v11770_v47 = vpop.f32.mrb[4].mxu0  ;;  %v11811_v2 = vpop.f32.mrb[4].mxu1 }
0x211a   : > { %v11771_v40 = vadd.f32 %v11770_v47, %v11679_v10  ;;  %v11812_v52 = vadd.f32 %v11811_v2, %v11687_v45  ;;  %v11772_v31 = vpop.f32.mrb[5].mxu0  ;;  %v11813_v41 = vpop.f32.mrb[5].mxu1  ;;  %v11452_v10 = vrot.slane %v25171_v17, %v24051_v20  ;;  %v11460_v45 = vrot.slane %v25171_v17, %v24053_v21  ;;  %v23046_v47 = vld [vmem:[%s26155_s27 + $0x30] sm:$0xff]   ;;  %v23048_v17 = vld [vmem:[%s26155_s27 + $0x78] sm:$0xff]  }
0x211b   : > { %v11773_v53 = vadd.f32 %v11772_v31, %v11683_v29  ;;  %v11814_v46 = vadd.f32 %v11813_v41, %v11691_v42  ;;  %v11774_v39 = vpop.f32.mrb[6].mxu0  ;;  %v11815_v58 = vpop.f32.mrb[6].mxu1  ;;  %v23044_v29 = vld [vmem:[%s26155_s27 + $0x70] sm:$0xff]   ;;  %v12436_v31 = vld [vmem:[%s26152_s21 + $0x60] sm:$0xff]  ;;  %v12435_v41 = vld [vmem:[%s26152_s21 + $0x28] sm:$0xff] }
0x211c   : > { %v11818_v56 = vmax.f32 %v11771_v40, 0.0  ;;  %v11820_v57 = vmax.f32 %v11812_v52, 0.0  ;;  %v11775_v61 = vpop.f32.mrb[7].mxu0  ;;  %v11816_v62 = vpop.f32.mrb[7].mxu1  ;;  %v23045_v42 = vld [vmem:[%s26155_s27 + $0xf0] sm:$0xff]   ;;  %v11547_v30 = vadd.f32 %v25166_v5, %v11452_v10  ;;  %v11588_v51 = vadd.f32 %v25168_v27, %v11460_v45  ;;  %v23049_v40 = vld [vmem:[%s26155_s27 + $0xf8] sm:$0xff]  }
0x211d   : > { %v11819_v59 = vmax.f32 %v11773_v53, 0.0  ;;  %v11821_v63 = vmax.f32 %v11814_v46, 0.0  ;;  %v23047_v2 = vld [vmem:[%s26155_s27 + $0xb0] sm:$0xff]   ;;  %v12434_v52 = vld [vmem:[%s26152_s21 + $0x20] sm:$0xff]  ;;  %v12437_v53 = vld [vmem:[%s26152_s21 + $0x68] sm:$0xff] }
0x211e   : > { %v11822_v13 = vpack.c.bf16 %v11818_v56, %v11818_v56  ;;  %v11824_v23 = vpack.c.bf16 %v11820_v57, %v11820_v57  ;;  %v23050_v46 = vld [vmem:[%s26155_s27 + $0x38] sm:$0xff]   ;;  %v11594_v58 = vmax.f32 %v11547_v30, 0.0  ;;  %v11596_v5 = vmax.f32 %v11588_v51, 0.0  ;;  %v12438_v57 = vld [vmem:[%s26152_s21 + $0xa0] sm:$0xff]  ;;  %v12439_v62 = vld [vmem:[%s26152_s21 + $0xa8] sm:$0xff] }
0x211f   : > { %v11823_v44 = vpack.c.bf16 %v11819_v59, %v11819_v59  ;;  %v11825_v9 = vpack.c.bf16 %v11821_v63, %v11821_v63  ;;  %v23051_v39 = vld [vmem:[%s26155_s27 + $0xb8] sm:$0xff]   ;;  %v19670_v27 = vcombine.high %v12434_v52, %v12436_v31  ;;  %v19672_v56 = vcombine.high %v12435_v41, %v12437_v53  ;;  %v12440_v61 = vld [vmem:[%s26152_s21 + $0xe0] sm:$0xff]  ;;  %v12441_v59 = vld [vmem:[%s26152_s21 + $0xe8] sm:$0xff] }
0x2120   : > { %v19669_v63 = vcombine.low %v12434_v52, %v12436_v31  ;;  %v19671_v0 = vcombine.low %v12435_v41, %v12437_v53  ;;  %v19674_v3 = vcombine.high %v12438_v57, %v12440_v61  ;;  %v23075_v10 = vld [vmem:[%s26155_s27 + $0x2a8] sm:$0xff]   ;;  %v23076_v45 = vld [vmem:[%s26155_s27 + $0x270] sm:$0xff]   ;;  %v23081_v30 = vld [vmem:[%s26155_s27 + $0x2f8] sm:$0xff]  }
0x2121   : > { %12114 = vmatprep.mubr.bf16.mxu0 %v11823_v44  ;;  %12154 = vmatprep.mubr.bf16.mxu1 %v11825_v9  ;;  %v11598_v44 = vpack.c.bf16 %v11594_v58, %v11594_v58  ;;  %v11600_v9 = vpack.c.bf16 %v11596_v5, %v11596_v5  ;;  %v23082_v51 = vld [vmem:[%s26155_s27 + $0x238] sm:$0xff]   ;;  %v25268_v52 = vld [vmem:[%s26152_s21 + $0x70] sm:$0xff] }
0x2122   : > { %12115 = vmatmul.mubr.bf16.vlgmr.msra.gmra.mrb[8].mxu0 %v11822_v13  ;;  %12155 = vmatmul.mubr.bf16.vlgmr.msra.gmra.mrb[8].mxu1 %v11824_v23  ;;  %v19675_v13 = vcombine.low %v12439_v62, %v12441_v59  ;;  %v23052_v23 = vld [vmem:[%s26155_s27 + $0x240] sm:$0xff]   ;;  %v25271_v31 = vld [vmem:[%s26152_s21 + $0x38] sm:$0xff] }
0x2123   : > { %21127 = vmatpush3.bf16.msra.mxu0 %v23022_v7  ;;  %21149 = vmatpush3.bf16.msra.mxu1 %v23023_v8  ;;  %v19676_v7 = vcombine.high %v12439_v62, %v12441_v59  ;;  %v19673_v8 = vcombine.low %v12438_v57, %v12440_v61  ;;  %v25276_v53 = vld [vmem:[%s26152_s21 + $0x78] sm:$0xff] }
0x2124   : > { %12386 = vmatprep.mubr.bf16.mxu0 %v11599_v60  ;;  %12426 = vmatprep.mubr.bf16.mxu1 %v11601_v22  ;;  %v23055_v60 = vld [vmem:[%s26155_s27 + $0x280] sm:$0xff]   ;;  %v23056_v22 = vld [vmem:[%s26155_s27 + $0x248] sm:$0xff]   ;;  %v19714_v58 = vcombine.high %v25271_v31, %v25276_v53 }
0x2125   : > { %21128 = vmatprep.subr.bf16.mxu0 %v23024_v15  ;;  %21150 = vmatprep.subr.bf16.mxu1 %v23025_v19  ;;  %v23053_v15 = vld [vmem:[%s26155_s27 + $0x2c0] sm:$0xff]  }
0x2126   : > { %v23054_v19 = vld [vmem:[%s26155_s27 + $0x200] sm:$0xff]  }
0x2127   : > { %21129 = vmatpush3.bf16.msra.mxu0 %v23026_v24  ;;  %21151 = vmatpush3.bf16.msra.mxu1 %v23027_v25  ;;  %v23057_v24 = vld [vmem:[%s26155_s27 + $0x2c8] sm:$0xff]  }
0x2128   : > { %21130 = vmatprep.subr.bf16.mxu0 %v23028_v28  ;;  %21152 = vmatprep.subr.bf16.mxu1 %v23029_v32  ;;  %v23058_v25 = vld [vmem:[%s26155_s27 + $0x208] sm:$0xff]   ;;  %v23060_v32 = vld [vmem:[%s26155_s27 + $0x250] sm:$0xff]  }
0x2129   : > { %v23059_v28 = vld [vmem:[%s26155_s27 + $0x288] sm:$0xff]  }
0x212b   : > { %21131 = vmatpush3.bf16.msra.mxu0 %v23030_v54  ;;  %21153 = vmatpush3.bf16.msra.mxu1 %v23031_v55  ;;  %v23061_v54 = vld [vmem:[%s26155_s27 + $0x2d0] sm:$0xff]  }
0x212c   : > { %21132 = vmatprep.subr.bf16.mxu0 %v23032_v6  ;;  %21154 = vmatprep.subr.bf16.mxu1 %v23033_v26  ;;  %v23062_v55 = vld [vmem:[%s26155_s27 + $0x210] sm:$0xff]   ;;  %v23064_v26 = vld [vmem:[%s26155_s27 + $0x258] sm:$0xff]  }
0x212d   : > { %v23063_v6 = vld [vmem:[%s26155_s27 + $0x290] sm:$0xff]  }
0x212f   : > { %21133 = vmatpush3.bf16.msra.mxu0 %v23034_v50  ;;  %21155 = vmatpush3.bf16.msra.mxu1 %v23035_v16  ;;  %v23065_v50 = vld [vmem:[%s26155_s27 + $0x2d8] sm:$0xff]  }
0x2130   : > { %21134 = vmatprep.subr.bf16.mxu0 %v23036_v35  ;;  %21156 = vmatprep.subr.bf16.mxu1 %v23037_v36  ;;  %v23066_v16 = vld [vmem:[%s26155_s27 + $0x218] sm:$0xff]   ;;  %v23068_v36 = vld [vmem:[%s26155_s27 + $0x260] sm:$0xff]  }
0x2131   : > { %v23067_v35 = vld [vmem:[%s26155_s27 + $0x298] sm:$0xff]  }
0x2133   : > { %21135 = vmatpush3.bf16.msra.mxu0 %v23038_v33  ;;  %21157 = vmatpush3.bf16.msra.mxu1 %v23039_v34  ;;  %v23069_v33 = vld [vmem:[%s26155_s27 + $0x2e0] sm:$0xff]  }
0x2134   : > { %21136 = vmatprep.subr.bf16.mxu0 %v23040_v37  ;;  %21158 = vmatprep.subr.bf16.mxu1 %v23041_v38  ;;  %v23070_v34 = vld [vmem:[%s26155_s27 + $0x220] sm:$0xff]   ;;  %v23072_v38 = vld [vmem:[%s26155_s27 + $0x268] sm:$0xff]  }
0x2135   : > { %v23071_v37 = vld [vmem:[%s26155_s27 + $0x2a0] sm:$0xff]  }
0x2137   : > { %21137 = vmatpush3.bf16.msra.mxu0 %v23042_v18  ;;  %21159 = vmatpush3.bf16.msra.mxu1 %v23043_v43  ;;  %v23073_v18 = vld [vmem:[%s26155_s27 + $0x2e8] sm:$0xff]  }
0x2138   : > { %21138 = vmatprep.subr.bf16.mxu0 %v23044_v29  ;;  %21160 = vmatprep.subr.bf16.mxu1 %v23045_v42  ;;  %v23074_v43 = vld [vmem:[%s26155_s27 + $0x228] sm:$0xff]   ;;  %v23077_v29 = vld [vmem:[%s26155_s27 + $0x2f0] sm:$0xff]  }
0x2139   : > { %v23078_v42 = vld [vmem:[%s26155_s27 + $0x230] sm:$0xff]  }
0x213b   : > { %21139 = vmatpush3.bf16.msra.mxu0 %v23046_v47  ;;  %21161 = vmatpush3.bf16.msra.mxu1 %v23047_v2  ;;  %v23079_v47 = vld [vmem:[%s26155_s27 + $0x2b0] sm:$0xff]   ;;  %v23080_v2 = vld [vmem:[%s26155_s27 + $0x278] sm:$0xff]  }
0x213c   : > { %21140 = vmatprep.subr.bf16.mxu0 %v23048_v17  ;;  %21162 = vmatprep.subr.bf16.mxu1 %v23049_v40  ;;  %v23083_v17 = vld [vmem:[%s26155_s27 + $0x2b8] sm:$0xff]   ;;  %v25265_v40 = vld [vmem:[%s26152_s21 + $0x30] sm:$0xff] }
0x213d   : > { %v19712_v41 = vcombine.high %v25265_v40, %v25268_v52 }
0x213f   : > { %21141 = vmatpush3.bf16.msra.mxu0 %v23050_v46  ;;  %21163 = vmatpush3.bf16.msra.mxu1 %v23051_v39  ;;  %v19711_v46 = vcombine.low %v25265_v40, %v25268_v52  ;;  %v19713_v39 = vcombine.low %v25271_v31, %v25276_v53  ;;  %v12938_v40 = vld [vmem:[%s26152_s21 + $0xf8] sm:$0xff] }
0x2140   : > { %12504 = vmatprep.subr.bf16.mxu0 %v19670_v27  ;;  %12545 = vmatprep.subr.bf16.mxu1 %v19672_v56 }
0x2142   : > { %12387 = vmatmul.mubr.bf16.vlgmr.msra.gmra.mrb[12].mxu0 %v11598_v44  ;;  %12427 = vmatmul.mubr.bf16.vlgmr.msra.gmra.mrb[12].mxu1 %v11600_v9 }
0x2143   : > { %12505 = vmatpush1.bf16.msra.mxu0 %v19669_v63  ;;  %12546 = vmatpush1.bf16.msra.mxu1 %v19671_v0 }
0x2144   : > { %12506 = vmatprep.subr.bf16.mxu0 %v19674_v3  ;;  %12547 = vmatprep.subr.bf16.mxu1 %v19676_v7 }
0x2145   : > { %12536 = vmatprep.mubr.bf16.mxu0 %v23479_v12  ;;  %12577 = vmatprep.mubr.bf16.mxu1 %v23479_v12 }
0x2147   : > { %12507 = vmatpush1.bf16.msra.mxu0 %v19673_v8  ;;  %12548 = vmatpush1.bf16.msra.mxu1 %v19675_v13 }
0x2148   : > { %21170 = vmatprep.subr.bf16.mxu0 %v23052_v23  ;;  %21192 = vmatprep.subr.bf16.mxu1 %v23053_v15 }
0x214a   : > { %19677 = vmatmul.mubr.msk.bf16.vlgmr.msra.gmra.mrb[16].mxu0 %vm1696_vm1, %v25120_v49  ;;  %19678 = vmatmul.mubr.msk.bf16.vlgmr.msra.gmra.mrb[16].mxu1 %vm1696_vm1, %v25120_v49 }
0x214b   : > { %21171 = vmatpush3.bf16.msra.mxu0 %v23054_v19  ;;  %21193 = vmatpush3.bf16.msra.mxu1 %v23055_v60 }
0x214c   : > { %21172 = vmatprep.subr.bf16.mxu0 %v23056_v22  ;;  %21194 = vmatprep.subr.bf16.mxu1 %v23057_v24  ;;  %v12442_v22 = vld [vmem:[%s26156_s29 + $0x8] sm:$0xf] }
0x214f   : > { %21173 = vmatpush3.bf16.msra.mxu0 %v23058_v25  ;;  %21195 = vmatpush3.bf16.msra.mxu1 %v23059_v28 }
0x2150   : > { %21174 = vmatprep.subr.bf16.mxu0 %v23060_v32  ;;  %21196 = vmatprep.subr.bf16.mxu1 %v23061_v54  ;;  %v12447_v32 = vrot.slane %v12442_v22, %v24051_v20  ;;  %v12455_v54 = vrot.slane %v12442_v22, %v24053_v21 }
0x2153   : > { %21175 = vmatpush3.bf16.msra.mxu0 %v23062_v55  ;;  %21197 = vmatpush3.bf16.msra.mxu1 %v23063_v6  ;;  %v12451_v6 = vrot.slane %v12442_v22, %v24043_v11 }
0x2154   : > { %21176 = vmatprep.subr.bf16.mxu0 %v23064_v26  ;;  %21198 = vmatprep.subr.bf16.mxu1 %v23065_v50  ;;  %v12459_v26 = vrot.slane %v12442_v22, %v24045_v14  ;;  %v23103_v22 = vld [vmem:[%s26155_s27 + $0x3a0] sm:$0xff]  }
0x2157   : > { %21177 = vmatpush3.bf16.msra.mxu0 %v23066_v16  ;;  %21199 = vmatpush3.bf16.msra.mxu1 %v23067_v35 }
0x2158   : > { %21178 = vmatprep.subr.bf16.mxu0 %v23068_v36  ;;  %21200 = vmatprep.subr.bf16.mxu1 %v23069_v33 }
0x215b   : > { %21179 = vmatpush3.bf16.msra.mxu0 %v23070_v34  ;;  %21201 = vmatpush3.bf16.msra.mxu1 %v23071_v37 }
0x215c   : > { %21180 = vmatprep.subr.bf16.mxu0 %v23072_v38  ;;  %21202 = vmatprep.subr.bf16.mxu1 %v23073_v18 }
0x215f   : > { %21181 = vmatpush3.bf16.msra.mxu0 %v23074_v43  ;;  %21203 = vmatpush3.bf16.msra.mxu1 %v23075_v10 }
0x2160   : > { %21182 = vmatprep.subr.bf16.mxu0 %v23076_v45  ;;  %21204 = vmatprep.subr.bf16.mxu1 %v23077_v29 }
0x2163   : > { %21183 = vmatpush3.bf16.msra.mxu0 %v23078_v42  ;;  %21205 = vmatpush3.bf16.msra.mxu1 %v23079_v47  ;;  %v12935_v47 = vld [vmem:[%s26152_s21 + $0xb0] sm:$0xff] }
0x2164   : > { %21184 = vmatprep.subr.bf16.mxu0 %v23080_v2  ;;  %21206 = vmatprep.subr.bf16.mxu1 %v23081_v30 }
0x2167   : > { %21185 = vmatpush3.bf16.msra.mxu0 %v23082_v51  ;;  %21207 = vmatpush3.bf16.msra.mxu1 %v23083_v17  ;;  %v12937_v51 = vld [vmem:[%s26152_s21 + $0xf0] sm:$0xff]  ;;  %v12936_v17 = vld [vmem:[%s26152_s21 + $0xb8] sm:$0xff] }
0x2168   : > { %13001 = vmatprep.subr.bf16.mxu0 %v19712_v41  ;;  %13042 = vmatprep.subr.bf16.mxu1 %v19714_v58  ;;  %v19716_v58 = vcombine.high %v12935_v47, %v12937_v51 }
0x21f5   : > { %v21098_v5 = vpop.f32.mrb[8].mxu0  ;;  %v21120_v27 = vpop.f32.mrb[8].mxu1 }
0x21f6   : > { %v21099_v56 = vpop.f32.mrb[9].mxu0  ;;  %v21121_v57 = vpop.f32.mrb[9].mxu1 }
0x21f7   : > { %v21100_v61 = vadd.f32 %v21099_v56, %v21098_v5  ;;  %v21122_v62 = vadd.f32 %v21121_v57, %v21120_v27  ;;  %v21101_v59 = vpop.f32.mrb[10].mxu0  ;;  %v21123_v63 = vpop.f32.mrb[10].mxu1  ;;  %v19718_v5 = vcombine.high %v12936_v17, %v12938_v40  ;;  %v19715_v27 = vcombine.low %v12935_v47, %v12937_v51  ;;  %v23084_v57 = vld [vmem:[%s26155_s27 + $0x340] sm:$0xff]  }
0x21f8   : > { %v21102_v0 = vpop.f32.mrb[11].mxu0  ;;  %v21124_v3 = vpop.f32.mrb[11].mxu1  ;;  %v19717_v56 = vcombine.low %v12936_v17, %v12938_v40  ;;  %v23089_v59 = vld [vmem:[%s26155_s27 + $0x3c8] sm:$0xff]  }
0x21f9   : > { %v12157_v44 = vadd.f32 %v21122_v62, %v21100_v61  ;;  %v23085_v61 = vld [vmem:[%s26155_s27 + $0x3c0] sm:$0xff]   ;;  %v23090_v63 = vld [vmem:[%s26155_s27 + $0x308] sm:$0xff]   ;;  %v23092_v3 = vld [vmem:[%s26155_s27 + $0x350] sm:$0xff]  }
0x21fa   : > { %v23087_v62 = vld [vmem:[%s26155_s27 + $0x380] sm:$0xff]   ;;  %v23091_v0 = vld [vmem:[%s26155_s27 + $0x388] sm:$0xff]  }
0x2215   : > { %v21142_v9 = vpop.f32.mrb[12].mxu0  ;;  %v21164_v7 = vpop.f32.mrb[12].mxu1 }
0x2216   : > { %v21143_v8 = vpop.f32.mrb[13].mxu0  ;;  %v21165_v13 = vpop.f32.mrb[13].mxu1 }
0x2217   : > { %v21144_v23 = vadd.f32 %v21143_v8, %v21142_v9  ;;  %v21166_v15 = vadd.f32 %v21165_v13, %v21164_v7  ;;  %v21145_v19 = vpop.f32.mrb[14].mxu0  ;;  %v21167_v60 = vpop.f32.mrb[14].mxu1  ;;  %v23094_v9 = vld [vmem:[%s26155_s27 + $0x310] sm:$0xff]   ;;  %v23097_v8 = vld [vmem:[%s26155_s27 + $0x3d8] sm:$0xff]  }
0x2218   : > { %v21146_v24 = vpop.f32.mrb[15].mxu0  ;;  %v21168_v25 = vpop.f32.mrb[15].mxu1  ;;  %v23095_v7 = vld [vmem:[%s26155_s27 + $0x390] sm:$0xff]   ;;  %v23098_v13 = vld [vmem:[%s26155_s27 + $0x318] sm:$0xff]   ;;  %v23101_v19 = vld [vmem:[%s26155_s27 + $0x3e0] sm:$0xff]  }
0x2219   : > { %v12389_v28 = vadd.f32 %v21144_v23, %v12157_v44  ;;  %v23093_v44 = vld [vmem:[%s26155_s27 + $0x3d0] sm:$0xff]   ;;  %v23099_v23 = vld [vmem:[%s26155_s27 + $0x398] sm:$0xff]   ;;  %v23102_v60 = vld [vmem:[%s26155_s27 + $0x320] sm:$0xff]  }
0x221a   : > { %v23104_v24 = vld [vmem:[%s26155_s27 + $0x368] sm:$0xff]  }
0x221b   : > { %v25287_v55 = vadd.f32 %v21166_v15, %v12389_v28  ;;  %v23100_v15 = vld [vmem:[%s26155_s27 + $0x360] sm:$0xff]   ;;  %v23105_v25 = vld [vmem:[%s26155_s27 + $0x3e8] sm:$0xff]  }
0x221c   : > { %v23106_v28 = vld [vmem:[%s26155_s27 + $0x328] sm:$0xff]  }
0x221d   : > { %v12538_v50 = vpop.f32.mrb[16].mxu0  ;;  %v12579_v16 = vpop.f32.mrb[16].mxu1 }
0x221e   : > { %v12539_v35 = vadd.f32 %v12538_v50, %v12447_v32  ;;  %v12580_v36 = vadd.f32 %v12579_v16, %v12455_v54  ;;  %v12540_v33 = vpop.f32.mrb[17].mxu0  ;;  %v12581_v34 = vpop.f32.mrb[17].mxu1  ;;  %v23107_v32 = vld [vmem:[%s26155_s27 + $0x3a8] sm:$0xff]   ;;  %v23108_v54 = vld [vmem:[%s26155_s27 + $0x370] sm:$0xff]   ;;  %v23112_v16 = vld [vmem:[%s26155_s27 + $0x378] sm:$0xff]  }
0x221f   : > { %v12541_v37 = vadd.f32 %v12540_v33, %v12451_v6  ;;  %v12582_v38 = vadd.f32 %v12581_v34, %v12459_v26  ;;  %v12542_v18 = vpop.f32.mrb[18].mxu0  ;;  %v12583_v43 = vpop.f32.mrb[18].mxu1  ;;  %v23109_v6 = vld [vmem:[%s26155_s27 + $0x3f0] sm:$0xff]   ;;  %v23115_v33 = vld [vmem:[%s26155_s27 + $0x3b8] sm:$0xff]  }
0x2220   : > { %v12586_v10 = vmax.f32 %v12539_v35, 0.0  ;;  %v12588_v45 = vmax.f32 %v12580_v36, 0.0  ;;  %v12543_v29 = vpop.f32.mrb[19].mxu0  ;;  %v12584_v42 = vpop.f32.mrb[19].mxu1  ;;  %v23110_v26 = vld [vmem:[%s26155_s27 + $0x330] sm:$0xff]   ;;  %v23113_v35 = vld [vmem:[%s26155_s27 + $0x3f8] sm:$0xff]  }
0x2221   : > { %v12587_v2 = vmax.f32 %v12541_v37, 0.0  ;;  %v12589_v30 = vmax.f32 %v12582_v38, 0.0  ;;  %v23111_v50 = vld [vmem:[%s26155_s27 + $0x3b0] sm:$0xff]   ;;  %v23114_v36 = vld [vmem:[%s26155_s27 + $0x338] sm:$0xff]   ;;  %v12939_v42 = vld [vmem:[%s26156_s29 + $0xc] sm:$0xf] }
0x2222   : > { %v12590_v41 = vpack.c.bf16 %v12586_v10, %v12586_v10  ;;  %v12592_v53 = vpack.c.bf16 %v12588_v45, %v12588_v45  ;;  %v12944_v51 = vrot.slane %v12939_v42, %v24051_v20  ;;  %v12952_v17 = vrot.slane %v12939_v42, %v24053_v21 }
0x2223   : > { %v12591_v52 = vpack.c.bf16 %v12587_v2, %v12587_v2  ;;  %v12593_v31 = vpack.c.bf16 %v12589_v30, %v12589_v30 }
0x2225   : > { %12882 = vmatprep.mubr.bf16.mxu0 %v12591_v52  ;;  %12922 = vmatprep.mubr.bf16.mxu1 %v12593_v31  ;;  %v12948_v52 = vrot.slane %v12939_v42, %v24043_v11  ;;  %v12956_v31 = vrot.slane %v12939_v42, %v24045_v14 }
0x2226   : > { %12883 = vmatmul.mubr.bf16.vlgmr.msra.gmra.mrb[20].mxu0 %v12590_v41  ;;  %12923 = vmatmul.mubr.bf16.vlgmr.msra.gmra.mrb[20].mxu1 %v12592_v53 }
0x2227   : > { %13002 = vmatpush1.bf16.msra.mxu0 %v19711_v46  ;;  %13043 = vmatpush1.bf16.msra.mxu1 %v19713_v39  ;;  %v23086_v46 = vld [vmem:[%s26155_s27 + $0x300] sm:$0xff]   ;;  %v23088_v39 = vld [vmem:[%s26155_s27 + $0x348] sm:$0xff]  }
0x2228   : > { %13003 = vmatprep.subr.bf16.mxu0 %v19716_v58  ;;  %13044 = vmatprep.subr.bf16.mxu1 %v19718_v5 }
0x2229   : > { %13033 = vmatprep.mubr.bf16.mxu0 %v23479_v12  ;;  %13074 = vmatprep.mubr.bf16.mxu1 %v23479_v12 }
0x222b   : > { %13004 = vmatpush1.bf16.msra.mxu0 %v19715_v27  ;;  %13045 = vmatpush1.bf16.msra.mxu1 %v19717_v56 }
0x222c   : > { %21214 = vmatprep.subr.bf16.mxu0 %v23084_v57  ;;  %21236 = vmatprep.subr.bf16.mxu1 %v23085_v61 }
0x222e   : > { %19719 = vmatmul.mubr.msk.bf16.vlgmr.msra.gmra.mrb[24].mxu0 %vm1696_vm1, %v25120_v49  ;;  %19720 = vmatmul.mubr.msk.bf16.vlgmr.msra.gmra.mrb[24].mxu1 %vm1696_vm1, %v25120_v49  ;;  %v23096_v49 = vld [vmem:[%s26155_s27 + $0x358] sm:$0xff]  }
0x222f   : > { %21215 = vmatpush3.bf16.msra.mxu0 %v23086_v46  ;;  %21237 = vmatpush3.bf16.msra.mxu1 %v23087_v62 }
0x2230   : > { %21216 = vmatprep.subr.bf16.mxu0 %v23088_v39  ;;  %21238 = vmatprep.subr.bf16.mxu1 %v23089_v59 }
0x2233   : > { %21217 = vmatpush3.bf16.msra.mxu0 %v23090_v63  ;;  %21239 = vmatpush3.bf16.msra.mxu1 %v23091_v0 }
0x2234   : > { %21218 = vmatprep.subr.bf16.mxu0 %v23092_v3  ;;  %21240 = vmatprep.subr.bf16.mxu1 %v23093_v44 }
0x2237   : > { %21219 = vmatpush3.bf16.msra.mxu0 %v23094_v9  ;;  %21241 = vmatpush3.bf16.msra.mxu1 %v23095_v7 }
0x2238   : > { %21220 = vmatprep.subr.bf16.mxu0 %v23096_v49  ;;  %21242 = vmatprep.subr.bf16.mxu1 %v23097_v8 }
0x223b   : > { %21221 = vmatpush3.bf16.msra.mxu0 %v23098_v13  ;;  %21243 = vmatpush3.bf16.msra.mxu1 %v23099_v23 }
0x223c   : > { %21222 = vmatprep.subr.bf16.mxu0 %v23100_v15  ;;  %21244 = vmatprep.subr.bf16.mxu1 %v23101_v19 }
0x223f   : > { %21223 = vmatpush3.bf16.msra.mxu0 %v23102_v60  ;;  %21245 = vmatpush3.bf16.msra.mxu1 %v23103_v22 }
0x2240   : > { %21224 = vmatprep.subr.bf16.mxu0 %v23104_v24  ;;  %21246 = vmatprep.subr.bf16.mxu1 %v23105_v25 }
0x2243   : > { %21225 = vmatpush3.bf16.msra.mxu0 %v23106_v28  ;;  %21247 = vmatpush3.bf16.msra.mxu1 %v23107_v32 }
0x2244   : > { %21226 = vmatprep.subr.bf16.mxu0 %v23108_v54  ;;  %21248 = vmatprep.subr.bf16.mxu1 %v23109_v6  ;;  %v19753_v6 = vld [vmem:[%s26157_s30] ss:$0 sm:$0xff] }
0x2247   : > { %21227 = vmatpush3.bf16.msra.mxu0 %v23110_v26  ;;  %21249 = vmatpush3.bf16.msra.mxu1 %v23111_v50 }
0x2248   : > { %21228 = vmatprep.subr.bf16.mxu0 %v23112_v16  ;;  %21250 = vmatprep.subr.bf16.mxu1 %v23113_v35 }
0x224b   : > { %21229 = vmatpush3.bf16.msra.mxu0 %v23114_v36  ;;  %21251 = vmatpush3.bf16.msra.mxu1 %v23115_v33 }
0x224c   : > { %22229 = vmatprep.subr.bf16.mxu0 %v23477_v1  ;;  %22237 = vmatprep.subr.bf16.mxu1 %v23477_v1 }
0x22f9   : > { %v21186_v34 = vpop.f32.mrb[20].mxu0  ;;  %v21208_v37 = vpop.f32.mrb[20].mxu1 }
0x22fa   : > { %v21187_v38 = vpop.f32.mrb[21].mxu0  ;;  %v21209_v18 = vpop.f32.mrb[21].mxu1 }
0x22fb   : > { %v21188_v43 = vadd.f32 %v21187_v38, %v21186_v34  ;;  %v21210_v10 = vadd.f32 %v21209_v18, %v21208_v37  ;;  %v21189_v45 = vpop.f32.mrb[22].mxu0  ;;  %v21211_v29 = vpop.f32.mrb[22].mxu1  ;;  %v23116_v38 = vld [vmem:[%s26130_s18 + $0x40] sm:$0xff]   ;;  %v23117_v18 = vld [vmem:[%s26130_s18 + $0x50] sm:$0xff]  }
0x22fc   : > { %v21190_v47 = vpop.f32.mrb[23].mxu0  ;;  %v21212_v2 = vpop.f32.mrb[23].mxu1 }
0x22fd   : > { %v12925_v30 = vadd.f32 %v21210_v10, %v21188_v43  ;;  %v23119_v43 = vld [vmem:[%s26130_s18 + $0x58] sm:$0xff]   ;;  %v19754_v47 = vld [vmem:[%s26158_s28] ss:$0 sm:$0xff]  ;;  %s26162_s28 = sld [smem:[#allocation53_spill]] }
0x22ff   : > { %v12930_v40 = vadd.f32 %v12925_v30, %v25287_v55  ;;  %v19755_v30 = vld [vmem:[%s26160_s0] ss:$0 sm:$0xff] }
0x2301   : > { %v13035_v41 = vpop.f32.mrb[24].mxu0  ;;  %v13076_v53 = vpop.f32.mrb[24].mxu1 }
0x2302   : > { %v13036_v58 = vadd.f32 %v13035_v41, %v12944_v51  ;;  %v13077_v5 = vadd.f32 %v13076_v53, %v12952_v17  ;;  %v13037_v27 = vpop.f32.mrb[25].mxu0  ;;  %v13078_v56 = vpop.f32.mrb[25].mxu1  ;;  %v23122_v41 = vld [vmem:[%s26130_s18 + $0x68] sm:$0xff]   ;;  %v23123_v53 = vld [vmem:[%s26130_s18 + $0x78] sm:$0xff]  }
0x2303   : > { %v13038_v57 = vadd.f32 %v13037_v27, %v12948_v52  ;;  %v13079_v61 = vadd.f32 %v13078_v56, %v12956_v31  ;;  %v13039_v46 = vpop.f32.mrb[26].mxu0  ;;  %v13080_v62 = vpop.f32.mrb[26].mxu1  ;;  %v23121_v52 = vld [vmem:[%s26130_s18 + $0x70] sm:$0xff]   ;;  %v23126_v27 = vld [vmem:[%s26132_s26 + $0x48] sm:$0xff]   ;;  %v23127_v56 = vld [vmem:[%s26132_s26 + $0x58] sm:$0xff]  }
0x2304   : > { %v13083_v39 = vmax.f32 %v13036_v58, 0.0  ;;  %v13085_v59 = vmax.f32 %v13077_v5, 0.0  ;;  %v13040_v63 = vpop.f32.mrb[27].mxu0  ;;  %v13081_v0 = vpop.f32.mrb[27].mxu1  ;;  %v23124_v58 = vld [vmem:[%s26132_s26 + $0x40] sm:$0xff]   ;;  %v23125_v5 = vld [vmem:[%s26132_s26 + $0x50] sm:$0xff]  }
0x2305   : > { %v13084_v3 = vmax.f32 %v13038_v57, 0.0  ;;  %v13086_v55 = vmax.f32 %v13079_v61, 0.0  ;;  %v23128_v57 = vld [vmem:[%s26132_s26 + $0x60] sm:$0xff]   ;;  %v23129_v61 = vld [vmem:[%s26132_s26 + $0x70] sm:$0xff]   ;;  %v23130_v46 = vld [vmem:[%s26132_s26 + $0x68] sm:$0xff]  }
0x2306   : > { %v13087_v7 = vpack.c.bf16 %v13083_v39, %v13083_v39  ;;  %v13089_v49 = vpack.c.bf16 %v13085_v59, %v13085_v59  ;;  %v23131_v62 = vld [vmem:[%s26132_s26 + $0x78] sm:$0xff]   ;;  %v23132_v39 = vld [vmem:[%s26133_s1 + $0x40] sm:$0xff]   ;;  %v23133_v59 = vld [vmem:[%s26133_s1 + $0x50] sm:$0xff]  }
0x2307   : > { %v13088_v44 = vpack.c.bf16 %v13084_v3, %v13084_v3  ;;  %v13090_v9 = vpack.c.bf16 %v13086_v55, %v13086_v55  ;;  %v23134_v63 = vld [vmem:[%s26133_s1 + $0x48] sm:$0xff]   ;;  %v23135_v0 = vld [vmem:[%s26133_s1 + $0x58] sm:$0xff]   ;;  %v23136_v3 = vld [vmem:[%s26133_s1 + $0x60] sm:$0xff]  }
0x2308   : > { %v23137_v55 = vld [vmem:[%s26133_s1 + $0x70] sm:$0xff]  }
0x2309   : > { %13379 = vmatprep.mubr.bf16.mxu0 %v13088_v44  ;;  %13419 = vmatprep.mubr.bf16.mxu1 %v13090_v9  ;;  %v23138_v44 = vld [vmem:[%s26133_s1 + $0x68] sm:$0xff]   ;;  %v23139_v9 = vld [vmem:[%s26133_s1 + $0x78] sm:$0xff]  }
0x230a   : > { %13380 = vmatmul.mubr.bf16.vlgmr.msra.gmra.mrb[28].mxu0 %v13087_v7  ;;  %13420 = vmatmul.mubr.bf16.vlgmr.msra.gmra.mrb[28].mxu1 %v13089_v49 }
0x230b   : > { %22233 = vmatprep.mubr.msk.bf16.mxu0 %vm23478_vm0, %v23477_v1  ;;  %22241 = vmatprep.mubr.msk.bf16.mxu1 %vm23478_vm0, %v23477_v1 }
0x230c   : > { %22230 = vmatpush3.bf16.msra.mxu0 %v23116_v38  ;;  %22238 = vmatpush3.bf16.msra.mxu1 %v23117_v18 }
0x230d   : > { %22231 = vmatprep.subr.bf16.mxu0 %v23477_v1  ;;  %22239 = vmatprep.subr.bf16.mxu1 %v23477_v1 }
0x2310   : > { %22240 = vmatpush3.bf16.msra.mxu1 %v23119_v43 }
0x2311   : > { %22253 = vmatprep.subr.bf16.mxu1 %v23477_v1 }
0x23dd   : > { %v21230_v8 = vpop.f32.mrb[28].mxu0  ;;  %v21252_v13 = vpop.f32.mrb[28].mxu1 }
0x23de   : > { %v21231_v23 = vpop.f32.mrb[29].mxu0  ;;  %v21253_v15 = vpop.f32.mrb[29].mxu1 }
0x23df   : > { %v21232_v19 = vadd.f32 %v21231_v23, %v21230_v8  ;;  %v21254_v60 = vadd.f32 %v21253_v15, %v21252_v13  ;;  %v21233_v22 = vpop.f32.mrb[30].mxu0  ;;  %v21255_v24 = vpop.f32.mrb[30].mxu1 }
0x23e0   : > { %v21234_v25 = vpop.f32.mrb[31].mxu0  ;;  %v21256_v28 = vpop.f32.mrb[31].mxu1 }
0x23e1   : > { %v13422_v32 = vadd.f32 %v21254_v60, %v21232_v19 }
0x23e3   : > { %v13427_v54 = vadd.f32 %v13422_v32, %v12930_v40  ;;  %v23120_v40 = vld [vmem:[%s26130_s18 + $0x60] sm:$0xff]  }
0x23e5   : > { %v13428_v26 = vadd.f32 %v13427_v54, %v25116_v48  ;;  %v23118_v48 = vld [vmem:[%s26130_s18 + $0x48] sm:$0xff]  }
0x23e6   : > { %22232 = vmatpush3.bf16.msra.mxu0 %v23118_v48 }
0x23e7   : > { %v13436_v50 = vadd.f32 %v19753_v6, %v13428_v26  ;;  %22245 = vmatprep.subr.bf16.mxu0 %v23477_v1 }
0x23e9   : > { %v13439_v16 = vsel %vm1696_vm1, %v13436_v50, 0.0 }
0x23ea   : > { %13440 = vadd.xlane.f32.xlu0 %v13439_v16  ;;  %v19838_v16 = vld [vmem:[%s26134_s2 + $0x5] ss:$0 sm:$0xff] }
0x2477   : > { %v13441_v35 = vpop.xlane.xlu0 %13440 }
0x2478   : > { %v13442_v36 = vmul.f32 0.03125, %v13441_v35 }
0x247a   : > { %v13443_v33 = vsub.f32 %v13436_v50, %v13442_v36  ;;  %v19837_v50 = vld [vmem:[%s26134_s2 + $0x4] ss:$0 sm:$0xff] }
0x247c   : > { %v13444_v34 = vmul.f32 %v13443_v33, %v13443_v33 }
0x247e   : > { %v13445_v37 = vsel %vm1696_vm1, %v13444_v34, 0.0 }
0x247f   : > { %13446 = vadd.xlane.f32.xlu1 %v13445_v37 }
0x250c   : > { %v13447_v10 = vpop.xlane.xlu1 %13446 }
0x250d   : > { %v13448_v45 = vmul.f32 0.03125, %v13447_v10 }
0x250f   : > { %v13449_v29 = vadd.f32 1e-05, %v13448_v45 }
0x2511   : > { %23372 = vrsqrt.f32 %v13449_v29 }
0x251b   : > { %v23373_v42 = vpop.eup %23372 }
0x251c   : > { %v13451_v2 = vmul.f32 %v23373_v42, %v13443_v33  ;;  %v19821_v42 = vld [vmem:[%s26135_s7 + $0x4] ss:$0 sm:$0xff] }
0x251e   : > { %v13458_v51 = vmul.f32 %v19754_v47, %v13451_v2  ;;  %v19822_v47 = vld [vmem:[%s26135_s7 + $0x5] ss:$0 sm:$0xff] }
0x2520   : > { %v25359_v17 = vadd.f32 %v19755_v30, %v13458_v51  ;;  %v19839_v51 = vld [vmem:[%s26134_s2 + $0x6] ss:$0 sm:$0xff] }
0x2522   : > { %v25365_v31 = vpack.c.bf16 %v25359_v17, %v25359_v17 }
0x2524   : > { %22234 = vmatmul.mubr.msk.bf16.vlgmr.msra.gmra.mrb[32].mxu0 %vm1696_vm1, %v25365_v31  ;;  %22242 = vmatmul.mubr.msk.bf16.vlgmr.msra.gmra.mrb[32].mxu1 %vm1696_vm1, %v25365_v31 }
0x2525   : > { %22246 = vmatpush3.bf16.msra.mxu0 %v23120_v40  ;;  %22254 = vmatpush3.bf16.msra.mxu1 %v23121_v52  ;;  %v19840_v40 = vld [vmem:[%s26134_s2 + $0x7] ss:$0 sm:$0xff] }
0x2526   : > { %22247 = vmatprep.subr.bf16.mxu0 %v23477_v1  ;;  %22255 = vmatprep.subr.bf16.mxu1 %v23477_v1 }
0x2527   : > { %22249 = vmatprep.mubr.msk.bf16.mxu0 %vm23478_vm0, %v23477_v1  ;;  %22257 = vmatprep.mubr.msk.bf16.mxu1 %vm23478_vm0, %v23477_v1 }
0x2529   : > { %22248 = vmatpush3.bf16.msra.mxu0 %v23122_v41  ;;  %22256 = vmatpush3.bf16.msra.mxu1 %v23123_v53 }
0x252a   : > { %22261 = vmatprep.subr.bf16.mxu0 %v23477_v1  ;;  %22269 = vmatprep.subr.bf16.mxu1 %v23477_v1 }
0x252c   : > { %22250 = vmatmul.mubr.msk.bf16.vlgmr.msra.gmra.mrb[36].mxu0 %vm1696_vm1, %v25365_v31  ;;  %22258 = vmatmul.mubr.msk.bf16.vlgmr.msra.gmra.mrb[36].mxu1 %vm1696_vm1, %v25365_v31 }
0x252d   : > { %22262 = vmatpush3.bf16.msra.mxu0 %v23124_v58  ;;  %22270 = vmatpush3.bf16.msra.mxu1 %v23125_v5 }
0x252e   : > { %22263 = vmatprep.subr.bf16.mxu0 %v23477_v1  ;;  %22271 = vmatprep.subr.bf16.mxu1 %v23477_v1 }
0x252f   : > { %22265 = vmatprep.mubr.msk.bf16.mxu0 %vm23478_vm0, %v23477_v1  ;;  %22273 = vmatprep.mubr.msk.bf16.mxu1 %vm23478_vm0, %v23477_v1 }
0x2531   : > { %22264 = vmatpush3.bf16.msra.mxu0 %v23126_v27  ;;  %22272 = vmatpush3.bf16.msra.mxu1 %v23127_v56 }
0x2532   : > { %22277 = vmatprep.subr.bf16.mxu0 %v23477_v1  ;;  %22285 = vmatprep.subr.bf16.mxu1 %v23477_v1 }
0x2534   : > { %22266 = vmatmul.mubr.msk.bf16.vlgmr.msra.gmra.mrb[40].mxu0 %vm1696_vm1, %v25365_v31  ;;  %22274 = vmatmul.mubr.msk.bf16.vlgmr.msra.gmra.mrb[40].mxu1 %vm1696_vm1, %v25365_v31 }
0x2535   : > { %22278 = vmatpush3.bf16.msra.mxu0 %v23128_v57  ;;  %22286 = vmatpush3.bf16.msra.mxu1 %v23129_v61 }
0x2536   : > { %22279 = vmatprep.subr.bf16.mxu0 %v23477_v1  ;;  %22287 = vmatprep.subr.bf16.mxu1 %v23477_v1 }
0x2537   : > { %22281 = vmatprep.mubr.msk.bf16.mxu0 %vm23478_vm0, %v23477_v1  ;;  %22289 = vmatprep.mubr.msk.bf16.mxu1 %vm23478_vm0, %v23477_v1 }
0x2539   : > { %22280 = vmatpush3.bf16.msra.mxu0 %v23130_v46  ;;  %22288 = vmatpush3.bf16.msra.mxu1 %v23131_v62 }
0x253a   : > { %22293 = vmatprep.subr.bf16.mxu0 %v23477_v1  ;;  %22301 = vmatprep.subr.bf16.mxu1 %v23477_v1 }
0x253c   : > { %22282 = vmatmul.mubr.msk.bf16.vlgmr.msra.gmra.mrb[44].mxu0 %vm1696_vm1, %v25365_v31  ;;  %22290 = vmatmul.mubr.msk.bf16.vlgmr.msra.gmra.mrb[44].mxu1 %vm1696_vm1, %v25365_v31 }
0x253d   : > { %22294 = vmatpush3.bf16.msra.mxu0 %v23132_v39  ;;  %22302 = vmatpush3.bf16.msra.mxu1 %v23133_v59 }
0x253e   : > { %22295 = vmatprep.subr.bf16.mxu0 %v23477_v1  ;;  %22303 = vmatprep.subr.bf16.mxu1 %v23477_v1 }
0x253f   : > { %22297 = vmatprep.mubr.msk.bf16.mxu0 %vm23478_vm0, %v23477_v1  ;;  %22305 = vmatprep.mubr.msk.bf16.mxu1 %vm23478_vm0, %v23477_v1 }
0x2541   : > { %22296 = vmatpush3.bf16.msra.mxu0 %v23134_v63  ;;  %22304 = vmatpush3.bf16.msra.mxu1 %v23135_v0 }
0x2542   : > { %22309 = vmatprep.subr.bf16.mxu0 %v23477_v1  ;;  %22317 = vmatprep.subr.bf16.mxu1 %v23477_v1 }
0x2544   : > { %22298 = vmatmul.mubr.msk.bf16.vlgmr.msra.gmra.mrb[48].mxu0 %vm1696_vm1, %v25365_v31  ;;  %22306 = vmatmul.mubr.msk.bf16.vlgmr.msra.gmra.mrb[48].mxu1 %vm1696_vm1, %v25365_v31 }
0x2545   : > { %22310 = vmatpush3.bf16.msra.mxu0 %v23136_v3  ;;  %22318 = vmatpush3.bf16.msra.mxu1 %v23137_v55  ;;  %v19823_v3 = vld [vmem:[%s26135_s7 + $0x6] ss:$0 sm:$0xff]  ;;  %v19824_v55 = vld [vmem:[%s26135_s7 + $0x7] ss:$0 sm:$0xff] }
0x2546   : > { %22311 = vmatprep.subr.bf16.mxu0 %v23477_v1  ;;  %22319 = vmatprep.subr.bf16.mxu1 %v23477_v1 }
0x2547   : > { %22313 = vmatprep.mubr.msk.bf16.mxu0 %vm23478_vm0, %v23477_v1  ;;  %22321 = vmatprep.mubr.msk.bf16.mxu1 %vm23478_vm0, %v23477_v1 }
0x2549   : > { %22312 = vmatpush3.bf16.msra.mxu0 %v23138_v44  ;;  %22320 = vmatpush3.bf16.msra.mxu1 %v23139_v9 }
0x254a   : > { %22325 = vmatprep.subr.bf16.mxu0 %v23477_v1  ;;  %22331 = vmatprep.subr.bf16.mxu1 %v23477_v1 }
0x254c   : > { %22314 = vmatmul.mubr.msk.bf16.vlgmr.msra.gmra.mrb[52].mxu0 %vm1696_vm1, %v25365_v31  ;;  %22322 = vmatmul.mubr.msk.bf16.vlgmr.msra.gmra.mrb[52].mxu1 %vm1696_vm1, %v25365_v31 }
0x254d   : > { %22327 = vmatprep.mubr.msk.bf16.mxu0 %vm23478_vm0, %v23477_v1  ;;  %22333 = vmatprep.mubr.msk.bf16.mxu1 %vm23478_vm0, %v23477_v1 }
0x25f7   : > { %v13613_v7 = vpop.f32.mrb[32].mxu0  ;;  %v13665_v49 = vpop.f32.mrb[32].mxu1 }
0x25f8   : > { %v22235_v8 = vpop.f32.mrb[33].mxu0  ;;  %v22243_v13 = vpop.f32.mrb[33].mxu1  ;;  %v13614_v52 = vadd.f32 %v19821_v42, %v13613_v7  ;;  %v13666_v31 = vadd.f32 %v19822_v47, %v13665_v49  ;;  %v19853_v7 = vld [vmem:[%s26136_s22 + $0x4] ss:$0 sm:$0xff]  ;;  %v19854_v49 = vld [vmem:[%s26136_s22 + $0x5] ss:$0 sm:$0xff] }
0x25f9   : > { %v13616_v23 = vpop.f32.mrb[34].mxu0  ;;  %v13668_v15 = vpop.f32.mrb[34].mxu1 }
0x25fa   : > { %v22236_v19 = vpop.f32.mrb[35].mxu0  ;;  %v22244_v60 = vpop.f32.mrb[35].mxu1  ;;  %v14239_v46 = vpack.c.bf16 %v13614_v52, %v13614_v52  ;;  %v14240_v62 = vpack.c.bf16 %v13666_v31, %v13666_v31 }
0x25ff   : > { %v13717_v22 = vpop.f32.mrb[36].mxu0  ;;  %v13769_v24 = vpop.f32.mrb[36].mxu1 }
0x2600   : > { %v22251_v25 = vpop.f32.mrb[37].mxu0  ;;  %v22259_v28 = vpop.f32.mrb[37].mxu1  ;;  %v13718_v8 = vadd.f32 %v19823_v3, %v13717_v22  ;;  %v13770_v13 = vadd.f32 %v19824_v55, %v13769_v24 }
0x2601   : > { %v13720_v32 = vpop.f32.mrb[38].mxu0  ;;  %v13772_v54 = vpop.f32.mrb[38].mxu1 }
0x2602   : > { %v22252_v6 = vpop.f32.mrb[39].mxu0  ;;  %v22260_v26 = vpop.f32.mrb[39].mxu1  ;;  %v14241_v22 = vpack.c.bf16 %v13718_v8, %v13718_v8  ;;  %v14242_v24 = vpack.c.bf16 %v13770_v13, %v13770_v13 }
0x2607   : > { %v13845_v35 = vpop.f32.mrb[40].mxu0  ;;  %v13897_v36 = vpop.f32.mrb[40].mxu1 }
0x2608   : > { %v13846_v33 = vadd.f32 %v19837_v50, %v13845_v35  ;;  %v13898_v34 = vadd.f32 %v19838_v16, %v13897_v36  ;;  %v22267_v37 = vpop.f32.mrb[41].mxu0  ;;  %v22275_v38 = vpop.f32.mrb[41].mxu1 }
0x2609   : > { %v13848_v18 = vpop.f32.mrb[42].mxu0  ;;  %v13900_v48 = vpop.f32.mrb[42].mxu1 }
0x260a   : > { %v14243_v43 = vpack.c.bf16 %v13846_v33, %v13846_v33  ;;  %v14244_v10 = vpack.c.bf16 %v13898_v34, %v13898_v34  ;;  %v22268_v45 = vpop.f32.mrb[43].mxu0  ;;  %v22276_v29 = vpop.f32.mrb[43].mxu1 }
0x260c   : > { %v14251_v2 = vsel %vm2368_vm2, %v14243_v43, 0  ;;  %v14297_v30 = vsel %vm2368_vm2, %v14244_v10, 0 }
0x260d   : > { %22326 = vmatpush3.bf16.xpose.msra.mxu0 %v14251_v2  ;;  %22332 = vmatpush3.bf16.xpose.msra.mxu1 %v14297_v30 }
0x260e   : > { %22337 = vmatprep.subr.bf16.mxu0 %v23477_v1  ;;  %22343 = vmatprep.subr.bf16.mxu1 %v23477_v1 }
0x260f   : > { %v13949_v41 = vpop.f32.mrb[44].mxu0  ;;  %v14001_v53 = vpop.f32.mrb[44].mxu1 }
0x2610   : > { %v13950_v58 = vadd.f32 %v19839_v51, %v13949_v41  ;;  %v14002_v5 = vadd.f32 %v19840_v40, %v14001_v53  ;;  %v22283_v27 = vpop.f32.mrb[45].mxu0  ;;  %v22291_v56 = vpop.f32.mrb[45].mxu1  ;;  %v23416_v41 = vld [vmem:[%s24825_s3] sm:$0xff]  ;;  %s26161_s3 = sld [smem:[#allocation50_spill]] }
0x2611   : > { %v13952_v57 = vpop.f32.mrb[46].mxu0  ;;  %v14004_v61 = vpop.f32.mrb[46].mxu1 }
0x2612   : > { %v14245_v39 = vpack.c.bf16 %v13950_v58, %v13950_v58  ;;  %v14246_v59 = vpack.c.bf16 %v14002_v5, %v14002_v5  ;;  %v22284_v63 = vpop.f32.mrb[47].mxu0  ;;  %v22292_v0 = vpop.f32.mrb[47].mxu1 }
0x2614   : > { %v14343_v44 = vsel %vm2368_vm2, %v14245_v39, 0  ;;  %v14389_v9 = vsel %vm2368_vm2, %v14246_v59, 0  ;;  %22328 = vmatmul.mubr.msk.bf16.vlgmr.msra.gmra.mrb[56].mxu0 %vm2368_vm2, %v14239_v46  ;;  %22334 = vmatmul.mubr.msk.bf16.vlgmr.msra.gmra.mrb[56].mxu1 %vm2368_vm2, %v14240_v62 }
0x2615   : > { %22338 = vmatpush3.bf16.xpose.msra.mxu0 %v14343_v44  ;;  %22344 = vmatpush3.bf16.xpose.msra.mxu1 %v14389_v9 }
0x2616   : > { %22339 = vmatprep.mubr.msk.bf16.mxu0 %vm23478_vm0, %v23477_v1  ;;  %22345 = vmatprep.mubr.msk.bf16.mxu1 %vm23478_vm0, %v23477_v1 }
0x2617   : > { %v14077_v23 = vpop.f32.mrb[48].mxu0  ;;  %v14129_v15 = vpop.f32.mrb[48].mxu1  ;;  %22349 = vmatprep.subr.bf16.mxu0 %v23477_v1  ;;  %22355 = vmatprep.subr.bf16.mxu1 %v23477_v1 }
0x2618   : > { %v14078_v19 = vadd.f32 %v19853_v7, %v14077_v23  ;;  %v14130_v60 = vadd.f32 %v19854_v49, %v14129_v15  ;;  %v22299_v25 = vpop.f32.mrb[49].mxu0  ;;  %v22307_v28 = vpop.f32.mrb[49].mxu1 }
0x2619   : > { %v14080_v32 = vpop.f32.mrb[50].mxu0  ;;  %v14132_v54 = vpop.f32.mrb[50].mxu1 }
0x261a   : > { %v14487_v6 = vpack.c.bf16 %v14078_v19, %v14078_v19  ;;  %v14488_v26 = vpack.c.bf16 %v14130_v60, %v14130_v60  ;;  %v22300_v50 = vpop.f32.mrb[51].mxu0  ;;  %v22308_v16 = vpop.f32.mrb[51].mxu1 }
0x261c   : > { %v14495_v35 = vsel %vm2622_vm3, %v14487_v6, 0  ;;  %v14541_v36 = vsel %vm2622_vm3, %v14488_v26, 0  ;;  %22340 = vmatmul.mubr.msk.bf16.vlgmr.msra.gmra.mrb[60].mxu0 %vm2368_vm2, %v14241_v22  ;;  %22346 = vmatmul.mubr.msk.bf16.vlgmr.msra.gmra.mrb[60].mxu1 %vm2368_vm2, %v14242_v24 }
0x261d   : > { %22350 = vmatpush3.bf16.msra.mxu0 %v14495_v35  ;;  %22356 = vmatpush3.bf16.msra.mxu1 %v14541_v36 }
0x261e   : > { %22351 = vmatprep.mubr.msk.bf16.mxu0 %vm23478_vm0, %v23477_v1  ;;  %22357 = vmatprep.mubr.msk.bf16.mxu1 %vm23478_vm0, %v23477_v1 }
0x261f   : > { %v25485_v33 = vpop.f32.mrb[52].mxu0  ;;  %v25487_v34 = vpop.f32.mrb[52].mxu1  ;;  %22361 = vmatprep.subr.bf16.mxu0 %v23477_v1  ;;  %22367 = vmatprep.subr.bf16.mxu1 %v23477_v1 }
0x2620   : > { %v22315_v37 = vpop.f32.mrb[53].mxu0  ;;  %v22323_v38 = vpop.f32.mrb[53].mxu1 }
0x2621   : > { %v14184_v18 = vpop.f32.mrb[54].mxu0  ;;  %v14236_v48 = vpop.f32.mrb[54].mxu1 }
0x2622   : > { %v22316_v43 = vpop.f32.mrb[55].mxu0  ;;  %v22324_v10 = vpop.f32.mrb[55].mxu1  ;;  %v19856_v48 = vld [vmem:[%s26136_s22 + $0x7] ss:$0 sm:$0xff] }
0x2623   : > { %v19855_v43 = vld [vmem:[%s26136_s22 + $0x6] ss:$0 sm:$0xff]  ;;  %v14234_v10 = vadd.f32 %v19856_v48, %v25487_v34 }
0x26e7   : > { %v14287_v45 = vpop.f32.mrb[56].mxu0  ;;  %v14333_v29 = vpop.f32.mrb[56].mxu1 }
0x26e8   : > { %v14431_v42 = vmul.f32 0.35355338, %v14287_v45  ;;  %v14432_v47 = vmul.f32 0.35355338, %v14333_v29  ;;  %v22329_v2 = vpop.f32.mrb[57].mxu0  ;;  %v22335_v30 = vpop.f32.mrb[57].mxu1  ;;  %v14182_v29 = vadd.f32 %v19855_v43, %v25485_v33 }
0x26e9   : > { %v14290_v51 = vpop.f32.mrb[58].mxu0  ;;  %v14336_v40 = vpop.f32.mrb[58].mxu1  ;;  %v14490_v30 = vpack.c.bf16 %v14234_v10, %v14234_v10 }
0x26ea   : > { %v22330_v52 = vpop.f32.mrb[59].mxu0  ;;  %v22336_v31 = vpop.f32.mrb[59].mxu1  ;;  %v14436_v53 = vadd.f32 %v23416_v41, %v14432_v47  ;;  %v14435_v58 = vadd.f32 %v23416_v41, %v14431_v42  ;;  %v14489_v40 = vpack.c.bf16 %v14182_v29, %v14182_v29 }
0x26ec   : > { %v14442_v5 = vsel %vm2368_vm2, %v14436_v53, -inf  ;;  %v14439_v27 = vsel %vm2368_vm2, %v14435_v58, -inf  ;;  %v14587_v34 = vsel %vm2622_vm3, %v14489_v40, 0 }
0x26ed   : > { %14443 = vmax.xlane.f32.xlu1 %v14442_v5  ;;  %14440 = vmax.xlane.f32.xlu0 %v14439_v27 }
0x26ef   : > { %v14379_v56 = vpop.f32.mrb[60].mxu0  ;;  %v14425_v57 = vpop.f32.mrb[60].mxu1 }
0x26f0   : > { %v14433_v61 = vmul.f32 0.35355338, %v14379_v56  ;;  %v14434_v46 = vmul.f32 0.35355338, %v14425_v57  ;;  %v22341_v62 = vpop.f32.mrb[61].mxu0  ;;  %v22347_v39 = vpop.f32.mrb[61].mxu1 }
0x26f1   : > { %v14382_v59 = vpop.f32.mrb[62].mxu0  ;;  %v14428_v63 = vpop.f32.mrb[62].mxu1  ;;  %v19816_v56 = vld [vmem:[%s26138_s23 + $0x10] sm:$0xf] }
0x26f2   : > { %v22342_v0 = vpop.f32.mrb[63].mxu0  ;;  %v22348_v3 = vpop.f32.mrb[63].mxu1  ;;  %v14438_v55 = vadd.f32 %v23416_v41, %v14434_v46  ;;  %v14437_v44 = vadd.f32 %v23416_v41, %v14433_v61  ;;  %v14683_v39 = vsel %vm2622_vm3, %v19816_v56, 0  ;;  %v19819_v59 = vld [vmem:[%s26138_s23 + $0x1c] sm:$0xf] }
0x26f3   : > { %v19818_v63 = vld [vmem:[%s26138_s23 + $0x18] sm:$0xf] }
0x26f4   : > { %v14448_v9 = vsel %vm2368_vm2, %v14438_v55, -inf  ;;  %v14445_v7 = vsel %vm2368_vm2, %v14437_v44, -inf }
0x26f5   : > { %14449 = vmax.xlane.f32.xlu1 %v14448_v9  ;;  %14446 = vmax.xlane.f32.xlu0 %v14445_v7  ;;  %v14821_v9 = vsel %vm2622_vm3, %v19819_v59, 0  ;;  %v23140_v59 = vld [vmem:[%s26140_s6 + $0x40] sm:$0xff]  }
0x277a   : > { %v14444_v49 = vpop.xlane.xlu1 %14443  ;;  %v14441_v8 = vpop.xlane.xlu0 %14440 }
0x277b   : > { %v14452_v13 = vsub.f32 %v14436_v53, %v14444_v49  ;;  %v14451_v23 = vsub.f32 %v14435_v58, %v14441_v8  ;;  %v14633_v53 = vsel %vm2622_vm3, %v14490_v30, 0  ;;  %v19817_v58 = vld [vmem:[%s26138_s23 + $0x14] sm:$0xf] }
0x277c   : > { %v14729_v46 = vsel %vm2622_vm3, %v19817_v58, 0 }
0x277d   : > { %v14457_v15 = vmul.f32 1.442695, %v14452_v13  ;;  %v14455_v19 = vmul.f32 1.442695, %v14451_v23  ;;  %v14775_v13 = vsel %vm2622_vm3, %v19818_v63, 0  ;;  %v23141_v63 = vld [vmem:[%s26140_s6 + $0x50] sm:$0xff]  }
0x277f   : > { %23374 = vpow2.f32 %v14457_v15 }
0x2780   : > { %23376 = vpow2.f32 %v14455_v19 }
0x2782   : > { %v14450_v60 = vpop.xlane.xlu1 %14449  ;;  %v14447_v25 = vpop.xlane.xlu0 %14446 }
0x2783   : > { %v14454_v28 = vsub.f32 %v14438_v55, %v14450_v60  ;;  %v14453_v32 = vsub.f32 %v14437_v44, %v14447_v25 }
0x2785   : > { %v14461_v54 = vmul.f32 1.442695, %v14454_v28  ;;  %v14459_v22 = vmul.f32 1.442695, %v14453_v32 }
0x2787   : > { %23378 = vpow2.f32 %v14461_v54 }
0x2788   : > { %23380 = vpow2.f32 %v14459_v22 }
0x2789   : > { %v23375_v24 = vpop.eup %23374 }
0x278a   : > { %v23377_v6 = vpop.eup %23376  ;;  %v14466_v26 = vsel %vm2368_vm2, %v23375_v24, 0.0 }
0x278b   : > { %14467 = vadd.xlane.f32.xlu1 %v14466_v26  ;;  %v14463_v50 = vsel %vm2368_vm2, %v23377_v6, 0.0 }
0x278c   : > { %14464 = vadd.xlane.f32.xlu0 %v14463_v50 }
0x2791   : > { %v23379_v16 = vpop.eup %23378 }
0x2792   : > { %v23381_v35 = vpop.eup %23380  ;;  %v14472_v36 = vsel %vm2368_vm2, %v23379_v16, 0.0 }
0x2793   : > { %14473 = vadd.xlane.f32.xlu1 %v14472_v36  ;;  %v14469_v37 = vsel %vm2368_vm2, %v23381_v35, 0.0 }
0x2794   : > { %14470 = vadd.xlane.f32.xlu0 %v14469_v37 }
0x2818   : > { %v14468_v38 = vpop.xlane.xlu1 %14467 }
0x2819   : > { %23382 = vrcp.f32 %v14468_v38  ;;  %v14465_v18 = vpop.xlane.xlu0 %14464 }
0x281a   : > { %23384 = vrcp.f32 %v14465_v18 }
0x2820   : > { %v14474_v45 = vpop.xlane.xlu1 %14473 }
0x2821   : > { %23386 = vrcp.f32 %v14474_v45  ;;  %v14471_v42 = vpop.xlane.xlu0 %14470 }
0x2822   : > { %23388 = vrcp.f32 %v14471_v42 }
0x2823   : > { %v23383_v47 = vpop.eup %23382 }
0x2824   : > { %v23385_v2 = vpop.eup %23384  ;;  %v14478_v51 = vmul.f32 %v23383_v47, %v23375_v24 }
0x2825   : > { %v14476_v52 = vmul.f32 %v23385_v2, %v23377_v6 }
0x2826   : > { %v14484_v31 = vpack.c.bf16 %v14478_v51, %v14478_v51 }
0x2827   : > { %v14483_v41 = vpack.c.bf16 %v14476_v52, %v14476_v52 }
0x2828   : > { %22358 = vmatmul.mubr.msk.bf16.vlgmr.msra.gmra.mrb[64].mxu1 %vm2368_vm2, %v14484_v31 }
0x2829   : > { %22352 = vmatmul.mubr.msk.bf16.vlgmr.msra.gmra.mrb[64].mxu0 %vm2368_vm2, %v14483_v41  ;;  %22368 = vmatpush3.bf16.msra.mxu1 %v14633_v53  ;;  %v19881_v53 = vld [vmem:[%s26139_s5 + $0x1] ss:$0 sm:$0xff] }
0x282a   : > { %22362 = vmatpush3.bf16.msra.mxu0 %v14587_v34  ;;  %22363 = vmatprep.mubr.msk.bf16.mxu0 %vm23478_vm0, %v23477_v1 }
0x282b   : > { %v23387_v33 = vpop.eup %23386  ;;  %22369 = vmatprep.mubr.msk.bf16.mxu1 %vm23478_vm0, %v23477_v1  ;;  %22373 = vmatprep.subr.bf16.mxu0 %v23477_v1 }
0x282c   : > { %v23389_v5 = vpop.eup %23388  ;;  %v14482_v27 = vmul.f32 %v23387_v33, %v23379_v16  ;;  %22379 = vmatprep.subr.bf16.mxu1 %v23477_v1 }
0x282d   : > { %v14480_v57 = vmul.f32 %v23389_v5, %v23381_v35 }
0x282e   : > { %v14486_v61 = vpack.c.bf16 %v14482_v27, %v14482_v27 }
0x282f   : > { %v14485_v62 = vpack.c.bf16 %v14480_v57, %v14480_v57 }
0x2830   : > { %22370 = vmatmul.mubr.msk.bf16.vlgmr.msra.gmra.mrb[68].mxu1 %vm2368_vm2, %v14486_v61 }
0x2831   : > { %22364 = vmatmul.mubr.msk.bf16.vlgmr.msra.gmra.mrb[68].mxu0 %vm2368_vm2, %v14485_v62  ;;  %22380 = vmatpush3.bf16.msra.mxu1 %v14729_v46 }
0x2832   : > { %22374 = vmatpush3.bf16.msra.mxu0 %v14683_v39  ;;  %22375 = vmatprep.mubr.msk.bf16.mxu0 %vm23478_vm0, %v23477_v1 }
0x2833   : > { %22381 = vmatprep.mubr.msk.bf16.mxu1 %vm23478_vm0, %v23477_v1  ;;  %22385 = vmatprep.subr.bf16.mxu0 %v23477_v1 }
0x2834   : > { %22391 = vmatprep.subr.bf16.mxu1 %v23477_v1 }
0x28fb   : > { %v14577_v0 = vpop.f32.mrb[64].mxu1 }
0x28fc   : > { %v14531_v3 = vpop.f32.mrb[64].mxu0  ;;  %v14676_v55 = vpack.c.bf16 %v14577_v0, %v14577_v0  ;;  %v22359_v44 = vpop.f32.mrb[65].mxu1  ;;  %v23143_v0 = vld [vmem:[%s26140_s6 + $0x58] sm:$0xff]  }
0x28fd   : > { %v14675_v7 = vpack.c.bf16 %v14531_v3, %v14531_v3  ;;  %v22353_v49 = vpop.f32.mrb[65].mxu0  ;;  %v14580_v8 = vpop.f32.mrb[66].mxu1 }
0x28fe   : > { %v14534_v23 = vpop.f32.mrb[66].mxu0  ;;  %v22360_v15 = vpop.f32.mrb[67].mxu1  ;;  %22382 = vmatmul.mubr.msk.bf16.vlgmr.msra.gmra.mrb[72].mxu1 %vm2368_vm2, %v14676_v55  ;;  %v19885_v8 = vld [vmem:[%s26142_s10 + $0x1] ss:$0 sm:$0xff] }
0x28ff   : > { %v22354_v19 = vpop.f32.mrb[67].mxu0  ;;  %22376 = vmatmul.mubr.msk.bf16.vlgmr.msra.gmra.mrb[72].mxu0 %vm2368_vm2, %v14675_v7  ;;  %22392 = vmatpush3.bf16.msra.mxu1 %v14821_v9  ;;  %v19884_v7 = vld [vmem:[%s26141_s8 + $0x1] ss:$0 sm:$0xff] }
0x2900   : > { %22386 = vmatpush3.bf16.msra.mxu0 %v14775_v13  ;;  %22387 = vmatprep.mubr.msk.bf16.mxu0 %vm23478_vm0, %v23477_v1  ;;  %v23144_v15 = vld [vmem:[%s26140_s6 + $0x60] sm:$0xff]   ;;  %v23145_v19 = vld [vmem:[%s26140_s6 + $0x70] sm:$0xff]  }
0x2901   : > { %22393 = vmatprep.mubr.msk.bf16.mxu1 %vm23478_vm0, %v23477_v1  ;;  %22397 = vmatprep.subr.bf16.mxu0 %v23477_v1 }
0x2902   : > { %22405 = vmatprep.subr.bf16.mxu1 %v23477_v1 }
0x2903   : > { %v14669_v60 = vpop.f32.mrb[68].mxu1 }
0x2904   : > { %v14623_v25 = vpop.f32.mrb[68].mxu0  ;;  %v14678_v28 = vpack.c.bf16 %v14669_v60, %v14669_v60  ;;  %v22371_v32 = vpop.f32.mrb[69].mxu1 }
0x2905   : > { %v14677_v54 = vpack.c.bf16 %v14623_v25, %v14623_v25  ;;  %v22365_v22 = vpop.f32.mrb[69].mxu0  ;;  %v14672_v24 = vpop.f32.mrb[70].mxu1  ;;  %v23146_v25 = vld [vmem:[%s26140_s6 + $0x68] sm:$0xff]   ;;  %v23148_v32 = vld [vmem:[%s26144_s12 + $0x40] sm:$0xff]  }
0x2906   : > { %v14626_v6 = vpop.f32.mrb[70].mxu0  ;;  %v22372_v26 = vpop.f32.mrb[71].mxu1  ;;  %22394 = vmatmul.mubr.msk.bf16.vlgmr.msra.gmra.mrb[76].mxu1 %vm2368_vm2, %v14678_v28  ;;  %v23147_v28 = vld [vmem:[%s26140_s6 + $0x78] sm:$0xff]   ;;  %v23150_v22 = vld [vmem:[%s26144_s12 + $0x48] sm:$0xff]  }
0x2907   : > { %v22366_v50 = vpop.f32.mrb[71].mxu0  ;;  %22388 = vmatmul.mubr.msk.bf16.vlgmr.msra.gmra.mrb[76].mxu0 %vm2368_vm2, %v14677_v54  ;;  %22409 = vmatprep.mubr.msk.bf16.mxu1 %vm23478_vm0, %v23477_v1  ;;  %v23149_v54 = vld [vmem:[%s26144_s12 + $0x50] sm:$0xff]   ;;  %v23151_v24 = vld [vmem:[%s26144_s12 + $0x58] sm:$0xff]   ;;  %v23152_v6 = vld [vmem:[%s26144_s12 + $0x60] sm:$0xff]  }
0x2908   : > { %22401 = vmatprep.mubr.msk.bf16.mxu0 %vm23478_vm0, %v23477_v1  ;;  %22398 = vmatpush3.bf16.msra.mxu0 %v23140_v59  ;;  %v23153_v26 = vld [vmem:[%s26144_s12 + $0x70] sm:$0xff]   ;;  %v23154_v50 = vld [vmem:[%s26144_s12 + $0x68] sm:$0xff]  }
0x2909   : > { %22406 = vmatpush3.bf16.msra.mxu1 %v23141_v63  ;;  %22399 = vmatprep.subr.bf16.mxu0 %v23477_v1 }
0x290a   : > { %22407 = vmatprep.subr.bf16.mxu1 %v23477_v1 }
0x290d   : > { %22408 = vmatpush3.bf16.msra.mxu1 %v23143_v0 }
0x290e   : > { %22421 = vmatprep.subr.bf16.mxu1 %v23477_v1 }
0x29d1   : > { %v14765_v16 = vpop.f32.mrb[72].mxu1 }
0x29d2   : > { %v14719_v35 = vpop.f32.mrb[72].mxu0  ;;  %v14864_v36 = vsel %vm1696_vm1, %v14765_v16, 0.0  ;;  %v22383_v37 = vpop.f32.mrb[73].mxu1  ;;  %v23155_v16 = vld [vmem:[%s26144_s12 + $0x78] sm:$0xff]  }
0x29d3   : > { %v14863_v38 = vsel %vm1696_vm1, %v14719_v35, 0.0  ;;  %v22377_v18 = vpop.f32.mrb[73].mxu0  ;;  %v14768_v48 = vpop.f32.mrb[74].mxu1  ;;  %v23156_v35 = vld [vmem:[%s26146_s13 + $0x40] sm:$0xff]   ;;  %v23158_v37 = vld [vmem:[%s26146_s13 + $0x48] sm:$0xff]  }
0x29d4   : > { %v14865_v43 = vadd.f32 %v14864_v36, %v14863_v38  ;;  %v14722_v10 = vpop.f32.mrb[74].mxu0  ;;  %v22384_v45 = vpop.f32.mrb[75].mxu1  ;;  %v23157_v36 = vld [vmem:[%s26146_s13 + $0x50] sm:$0xff]   ;;  %v23159_v38 = vld [vmem:[%s26146_s13 + $0x58] sm:$0xff]   ;;  %v23160_v18 = vld [vmem:[%s26146_s13 + $0x60] sm:$0xff]  }
0x29d5   : > { %v22378_v29 = vpop.f32.mrb[75].mxu0  ;;  %v23161_v48 = vld [vmem:[%s26146_s13 + $0x70] sm:$0xff]   ;;  %v23163_v10 = vld [vmem:[%s26146_s13 + $0x78] sm:$0xff]  }
0x29d9   : > { %v14857_v42 = vpop.f32.mrb[76].mxu1 }
0x29da   : > { %v14811_v47 = vpop.f32.mrb[76].mxu0  ;;  %v22395_v2 = vpop.f32.mrb[77].mxu1  ;;  %v14868_v34 = vsel %vm1696_vm1, %v14857_v42, 0.0 }
0x29db   : > { %v14866_v30 = vsel %vm1696_vm1, %v14811_v47, 0.0  ;;  %v22389_v51 = vpop.f32.mrb[77].mxu0  ;;  %v14860_v40 = vpop.f32.mrb[78].mxu1 }
0x29dc   : > { %v14867_v52 = vadd.f32 %v14866_v30, %v14865_v43  ;;  %v14814_v31 = vpop.f32.mrb[78].mxu0  ;;  %v22396_v41 = vpop.f32.mrb[79].mxu1  ;;  %v23162_v43 = vld [vmem:[%s26146_s13 + $0x68] sm:$0xff]  }
0x29dd   : > { %v22390_v33 = vpop.f32.mrb[79].mxu0 }
0x29de   : > { %v14869_v58 = vadd.f32 %v14868_v34, %v14867_v52 }
0x29e0   : > { %v14876_v5 = vadd.f32 %v19881_v53, %v14869_v58 }
0x29e2   : > { %v14877_v27 = vadd.f32 %v14876_v5, %v25359_v17  ;;  %v23142_v17 = vld [vmem:[%s26140_s6 + $0x48] sm:$0xff]   ;;  %v19967_v5 = vld [vmem:[%s26147_s11 + $0x4] ss:$0 sm:$0xff] }
0x29e3   : > { %22400 = vmatpush3.bf16.msra.mxu0 %v23142_v17 }
0x29e4   : > { %v14882_v56 = vsel %vm1696_vm1, %v14877_v27, 0.0  ;;  %22413 = vmatprep.subr.bf16.mxu0 %v23477_v1 }
0x29e5   : > { %14883 = vadd.xlane.f32.xlu0 %v14882_v56 }
0x2a72   : > { %v14884_v57 = vpop.xlane.xlu0 %14883 }
0x2a73   : > { %v14885_v61 = vmul.f32 0.03125, %v14884_v57 }
0x2a75   : > { %v14886_v46 = vsub.f32 %v14877_v27, %v14885_v61  ;;  %v19968_v27 = vld [vmem:[%s26147_s11 + $0x5] ss:$0 sm:$0xff] }
0x2a77   : > { %v14887_v62 = vmul.f32 %v14886_v46, %v14886_v46 }
0x2a79   : > { %v14888_v39 = vsel %vm1696_vm1, %v14887_v62, 0.0 }
0x2a7a   : > { %14889 = vadd.xlane.f32.xlu1 %v14888_v39 }
0x2b07   : > { %v14890_v3 = vpop.xlane.xlu1 %14889 }
0x2b08   : > { %v14891_v55 = vmul.f32 0.03125, %v14890_v3 }
0x2b0a   : > { %v14892_v44 = vadd.f32 1e-05, %v14891_v55 }
0x2b0c   : > { %23390 = vrsqrt.f32 %v14892_v44  ;;  %v19951_v44 = vld [vmem:[%s26148_s14 + $0x4] ss:$0 sm:$0xff] }
0x2b16   : > { %v23391_v9 = vpop.eup %23390 }
0x2b17   : > { %v14894_v49 = vmul.f32 %v23391_v9, %v14886_v46  ;;  %v19952_v9 = vld [vmem:[%s26148_s14 + $0x5] ss:$0 sm:$0xff] }
0x2b19   : > { %v14901_v13 = vmul.f32 %v19884_v7, %v14894_v49 }
0x2b1b   : > { %v25562_v23 = vadd.f32 %v19885_v8, %v14901_v13  ;;  %v19969_v8 = vld [vmem:[%s26147_s11 + $0x6] ss:$0 sm:$0xff]  ;;  %v19970_v13 = vld [vmem:[%s26147_s11 + $0x7] ss:$0 sm:$0xff] }
0x2b1d   : > { %v14982_v60 = vpack.c.bf16 %v25562_v23, %v25562_v23 }
0x2b1f   : > { %22402 = vmatmul.mubr.msk.bf16.vlgmr.msra.gmra.mrb[80].mxu0 %vm1696_vm1, %v14982_v60  ;;  %22410 = vmatmul.mubr.msk.bf16.vlgmr.msra.gmra.mrb[80].mxu1 %vm1696_vm1, %v14982_v60 }
0x2b20   : > { %22414 = vmatpush3.bf16.msra.mxu0 %v23144_v15  ;;  %22422 = vmatpush3.bf16.msra.mxu1 %v23145_v19 }
0x2b21   : > { %22415 = vmatprep.subr.bf16.mxu0 %v23477_v1  ;;  %22423 = vmatprep.subr.bf16.mxu1 %v23477_v1 }
0x2b22   : > { %22417 = vmatprep.mubr.msk.bf16.mxu0 %vm23478_vm0, %v23477_v1  ;;  %22425 = vmatprep.mubr.msk.bf16.mxu1 %vm23478_vm0, %v23477_v1 }
0x2b24   : > { %22416 = vmatpush3.bf16.msra.mxu0 %v23146_v25  ;;  %22424 = vmatpush3.bf16.msra.mxu1 %v23147_v28 }
0x2b25   : > { %22429 = vmatprep.subr.bf16.mxu0 %v23477_v1  ;;  %22437 = vmatprep.subr.bf16.mxu1 %v23477_v1 }
0x2b27   : > { %22418 = vmatmul.mubr.msk.bf16.vlgmr.msra.gmra.mrb[84].mxu0 %vm1696_vm1, %v14982_v60  ;;  %22426 = vmatmul.mubr.msk.bf16.vlgmr.msra.gmra.mrb[84].mxu1 %vm1696_vm1, %v14982_v60 }
0x2b28   : > { %22430 = vmatpush3.bf16.msra.mxu0 %v23148_v32  ;;  %22438 = vmatpush3.bf16.msra.mxu1 %v23149_v54 }
0x2b29   : > { %22431 = vmatprep.subr.bf16.mxu0 %v23477_v1  ;;  %22439 = vmatprep.subr.bf16.mxu1 %v23477_v1 }
0x2b2a   : > { %22433 = vmatprep.mubr.msk.bf16.mxu0 %vm23478_vm0, %v23477_v1  ;;  %22441 = vmatprep.mubr.msk.bf16.mxu1 %vm23478_vm0, %v23477_v1 }
0x2b2c   : > { %22432 = vmatpush3.bf16.msra.mxu0 %v23150_v22  ;;  %22440 = vmatpush3.bf16.msra.mxu1 %v23151_v24 }
0x2b2d   : > { %22445 = vmatprep.subr.bf16.mxu0 %v23477_v1  ;;  %22453 = vmatprep.subr.bf16.mxu1 %v23477_v1 }
0x2b2f   : > { %22434 = vmatmul.mubr.msk.bf16.vlgmr.msra.gmra.mrb[88].mxu0 %vm1696_vm1, %v24946_v4  ;;  %22442 = vmatmul.mubr.msk.bf16.vlgmr.msra.gmra.mrb[88].mxu1 %vm1696_vm1, %v24946_v4 }
0x2b30   : > { %22446 = vmatpush3.bf16.msra.mxu0 %v23152_v6  ;;  %22454 = vmatpush3.bf16.msra.mxu1 %v23153_v26 }
0x2b31   : > { %22447 = vmatprep.subr.bf16.mxu0 %v23477_v1  ;;  %22455 = vmatprep.subr.bf16.mxu1 %v23477_v1 }
0x2b32   : > { %22449 = vmatprep.mubr.msk.bf16.mxu0 %vm23478_vm0, %v23477_v1  ;;  %22457 = vmatprep.mubr.msk.bf16.mxu1 %vm23478_vm0, %v23477_v1 }
0x2b34   : > { %22448 = vmatpush3.bf16.msra.mxu0 %v23154_v50  ;;  %22456 = vmatpush3.bf16.msra.mxu1 %v23155_v16 }
0x2b35   : > { %22461 = vmatprep.subr.bf16.mxu0 %v23477_v1  ;;  %22469 = vmatprep.subr.bf16.mxu1 %v23477_v1 }
0x2b37   : > { %22450 = vmatmul.mubr.msk.bf16.vlgmr.msra.gmra.mrb[92].mxu0 %vm1696_vm1, %v24946_v4  ;;  %22458 = vmatmul.mubr.msk.bf16.vlgmr.msra.gmra.mrb[92].mxu1 %vm1696_vm1, %v24946_v4 }
0x2b38   : > { %22462 = vmatpush3.bf16.msra.mxu0 %v23156_v35  ;;  %22470 = vmatpush3.bf16.msra.mxu1 %v23157_v36 }
0x2b39   : > { %22463 = vmatprep.subr.bf16.mxu0 %v23477_v1  ;;  %22471 = vmatprep.subr.bf16.mxu1 %v23477_v1 }
0x2b3a   : > { %22465 = vmatprep.mubr.msk.bf16.mxu0 %vm23478_vm0, %v23477_v1  ;;  %22473 = vmatprep.mubr.msk.bf16.mxu1 %vm23478_vm0, %v23477_v1 }
0x2b3c   : > { %22464 = vmatpush3.bf16.msra.mxu0 %v23158_v37  ;;  %22472 = vmatpush3.bf16.msra.mxu1 %v23159_v38  ;;  %v19953_v38 = vld [vmem:[%s26148_s14 + $0x6] ss:$0 sm:$0xff] }
0x2b3d   : > { %22477 = vmatprep.subr.bf16.mxu0 %v23477_v1  ;;  %22485 = vmatprep.subr.bf16.mxu1 %v23477_v1 }
0x2b3f   : > { %22466 = vmatmul.mubr.msk.bf16.vlgmr.msra.gmra.mrb[96].mxu0 %vm1696_vm1, %v24946_v4  ;;  %22474 = vmatmul.mubr.msk.bf16.vlgmr.msra.gmra.mrb[96].mxu1 %vm1696_vm1, %v24946_v4 }
0x2b40   : > { %22478 = vmatpush3.bf16.msra.mxu0 %v23160_v18  ;;  %22486 = vmatpush3.bf16.msra.mxu1 %v23161_v48  ;;  %v19954_v18 = vld [vmem:[%s26148_s14 + $0x7] ss:$0 sm:$0xff] }
0x2b41   : > { %22479 = vmatprep.subr.bf16.mxu0 %v23477_v1  ;;  %22487 = vmatprep.subr.bf16.mxu1 %v23477_v1 }
0x2b42   : > { %22481 = vmatprep.mubr.msk.bf16.mxu0 %vm23478_vm0, %v23477_v1  ;;  %22489 = vmatprep.mubr.msk.bf16.mxu1 %vm23478_vm0, %v23477_v1 }
0x2b44   : > { %22480 = vmatpush3.bf16.msra.mxu0 %v23162_v43  ;;  %22488 = vmatpush3.bf16.msra.mxu1 %v23163_v10  ;;  %v19983_v10 = vld [vmem:[%s26149_s15 + $0x4] ss:$0 sm:$0xff] }
0x2b45   : > { %22493 = vmatprep.subr.bf16.mxu0 %v23477_v1  ;;  %22499 = vmatprep.subr.bf16.mxu1 %v23477_v1 }
0x2b47   : > { %22482 = vmatmul.mubr.msk.bf16.vlgmr.msra.gmra.mrb[100].mxu0 %vm1696_vm1, %v24946_v4  ;;  %22490 = vmatmul.mubr.msk.bf16.vlgmr.msra.gmra.mrb[100].mxu1 %vm1696_vm1, %v24946_v4 }
0x2b48   : > { %22495 = vmatprep.mubr.msk.bf16.mxu0 %vm23478_vm0, %v23477_v1  ;;  %22501 = vmatprep.mubr.msk.bf16.mxu1 %vm23478_vm0, %v23477_v1 }
0x2bf2   : > { %v15056_v45 = vpop.f32.mrb[80].mxu0  ;;  %v15108_v29 = vpop.f32.mrb[80].mxu1 }
0x2bf3   : > { %v22403_v42 = vpop.f32.mrb[81].mxu0  ;;  %v22411_v47 = vpop.f32.mrb[81].mxu1  ;;  %v15057_v15 = vadd.f32 %v19951_v44, %v15056_v45  ;;  %v15109_v19 = vadd.f32 %v19952_v9, %v15108_v29  ;;  %v19984_v45 = vld [vmem:[%s26149_s15 + $0x5] ss:$0 sm:$0xff] }
0x2bf4   : > { %v15059_v2 = vpop.f32.mrb[82].mxu0  ;;  %v15111_v30 = vpop.f32.mrb[82].mxu1 }
0x2bf5   : > { %v22404_v51 = vpop.f32.mrb[83].mxu0  ;;  %v22412_v40 = vpop.f32.mrb[83].mxu1  ;;  %v15682_v26 = vpack.c.bf16 %v15057_v15, %v15057_v15  ;;  %v15683_v50 = vpack.c.bf16 %v15109_v19, %v15109_v19 }
0x2bfa   : > { %v15160_v52 = vpop.f32.mrb[84].mxu0  ;;  %v15212_v31 = vpop.f32.mrb[84].mxu1 }
0x2bfb   : > { %v22419_v41 = vpop.f32.mrb[85].mxu0  ;;  %v22427_v4 = vpop.f32.mrb[85].mxu1  ;;  %v15161_v29 = vadd.f32 %v19953_v38, %v15160_v52  ;;  %v15213_v42 = vadd.f32 %v19954_v18, %v15212_v31 }
0x2bfc   : > { %v15163_v53 = vpop.f32.mrb[86].mxu0  ;;  %v15215_v34 = vpop.f32.mrb[86].mxu1 }
0x2bfd   : > { %v22420_v33 = vpop.f32.mrb[87].mxu0  ;;  %v22428_v58 = vpop.f32.mrb[87].mxu1  ;;  %v15684_v52 = vpack.c.bf16 %v15161_v29, %v15161_v29  ;;  %v15685_v31 = vpack.c.bf16 %v15213_v42, %v15213_v42 }
0x2c02   : > { %v15288_v56 = vpop.f32.mrb[88].mxu0  ;;  %v15340_v57 = vpop.f32.mrb[88].mxu1 }
0x2c03   : > { %v15289_v61 = vadd.f32 %v19967_v5, %v15288_v56  ;;  %v15341_v46 = vadd.f32 %v19968_v27, %v15340_v57  ;;  %v22435_v62 = vpop.f32.mrb[89].mxu0  ;;  %v22443_v39 = vpop.f32.mrb[89].mxu1 }
0x2c04   : > { %v15291_v59 = vpop.f32.mrb[90].mxu0  ;;  %v15343_v63 = vpop.f32.mrb[90].mxu1 }
0x2c05   : > { %v15686_v17 = vpack.c.bf16 %v15289_v61, %v15289_v61  ;;  %v15687_v0 = vpack.c.bf16 %v15341_v46, %v15341_v46  ;;  %v22436_v3 = vpop.f32.mrb[91].mxu0  ;;  %v22444_v55 = vpop.f32.mrb[91].mxu1 }
0x2c07   : > { %v15694_v7 = vsel %vm2368_vm2, %v15686_v17, 0  ;;  %v15740_v49 = vsel %vm2368_vm2, %v15687_v0, 0 }
0x2c08   : > { %22494 = vmatpush3.bf16.xpose.msra.mxu0 %v15694_v7  ;;  %22500 = vmatpush3.bf16.xpose.msra.mxu1 %v15740_v49 }
0x2c09   : > { %22505 = vmatprep.subr.bf16.mxu0 %v23477_v1  ;;  %22511 = vmatprep.subr.bf16.mxu1 %v23477_v1 }
0x2c0a   : > { %v15392_v60 = vpop.f32.mrb[92].mxu0  ;;  %v15444_v25 = vpop.f32.mrb[92].mxu1 }
0x2c0b   : > { %v15393_v28 = vadd.f32 %v19969_v8, %v15392_v60  ;;  %v15445_v32 = vadd.f32 %v19970_v13, %v15444_v25  ;;  %v22451_v54 = vpop.f32.mrb[93].mxu0  ;;  %v22459_v22 = vpop.f32.mrb[93].mxu1 }
0x2c0c   : > { %v15395_v24 = vpop.f32.mrb[94].mxu0  ;;  %v15447_v6 = vpop.f32.mrb[94].mxu1 }
0x2c0d   : > { %v15688_v16 = vpack.c.bf16 %v15393_v28, %v15393_v28  ;;  %v15689_v35 = vpack.c.bf16 %v15445_v32, %v15445_v32  ;;  %v22452_v36 = vpop.f32.mrb[95].mxu0  ;;  %v22460_v37 = vpop.f32.mrb[95].mxu1 }
0x2c0f   : > { %v15786_v48 = vsel %vm2368_vm2, %v15688_v16, 0  ;;  %v15832_v43 = vsel %vm2368_vm2, %v15689_v35, 0  ;;  %22496 = vmatmul.mubr.msk.bf16.vlgmr.msra.gmra.mrb[104].mxu0 %vm2368_vm2, %v15682_v26  ;;  %22502 = vmatmul.mubr.msk.bf16.vlgmr.msra.gmra.mrb[104].mxu1 %vm2368_vm2, %v15683_v50 }
0x2c10   : > { %22506 = vmatpush3.bf16.xpose.msra.mxu0 %v15786_v48  ;;  %22512 = vmatpush3.bf16.xpose.msra.mxu1 %v15832_v43 }
0x2c11   : > { %22507 = vmatprep.mubr.msk.bf16.mxu0 %vm23478_vm0, %v23477_v1  ;;  %22513 = vmatprep.mubr.msk.bf16.mxu1 %vm23478_vm0, %v23477_v1 }
0x2c12   : > { %v15520_v47 = vpop.f32.mrb[96].mxu0  ;;  %v15572_v2 = vpop.f32.mrb[96].mxu1  ;;  %22517 = vmatprep.subr.bf16.mxu0 %v23477_v1  ;;  %22523 = vmatprep.subr.bf16.mxu1 %v23477_v1 }
0x2c13   : > { %v15521_v30 = vadd.f32 %v19983_v10, %v15520_v47  ;;  %v15573_v51 = vadd.f32 %v19984_v45, %v15572_v2  ;;  %v22467_v40 = vpop.f32.mrb[97].mxu0  ;;  %v22475_v41 = vpop.f32.mrb[97].mxu1 }
0x2c14   : > { %v15523_v4 = vpop.f32.mrb[98].mxu0  ;;  %v15575_v53 = vpop.f32.mrb[98].mxu1 }
0x2c15   : > { %v15926_v34 = vpack.c.bf16 %v15521_v30, %v15521_v30  ;;  %v15927_v33 = vpack.c.bf16 %v15573_v51, %v15573_v51  ;;  %v22468_v58 = vpop.f32.mrb[99].mxu0  ;;  %v22476_v5 = vpop.f32.mrb[99].mxu1 }
0x2c16   : > { %v19986_v5 = vld [vmem:[%s26149_s15 + $0x7] ss:$0 sm:$0xff] }
0x2c17   : > { %v15934_v27 = vsel %vm2622_vm3, %v15926_v34, 0  ;;  %v15980_v56 = vsel %vm2622_vm3, %v15927_v33, 0  ;;  %22508 = vmatmul.mubr.msk.bf16.vlgmr.msra.gmra.mrb[108].mxu0 %vm2368_vm2, %v15684_v52  ;;  %22514 = vmatmul.mubr.msk.bf16.vlgmr.msra.gmra.mrb[108].mxu1 %vm2368_vm2, %v15685_v31 }
0x2c18   : > { %22518 = vmatpush3.bf16.msra.mxu0 %v15934_v27  ;;  %22524 = vmatpush3.bf16.msra.mxu1 %v15980_v56  ;;  %v19985_v27 = vld [vmem:[%s26149_s15 + $0x6] ss:$0 sm:$0xff] }
0x2c19   : > { %22519 = vmatprep.mubr.msk.bf16.mxu0 %vm23478_vm0, %v23477_v1  ;;  %22525 = vmatprep.mubr.msk.bf16.mxu1 %vm23478_vm0, %v23477_v1 }
0x2c1a   : > { %v25682_v57 = vpop.f32.mrb[100].mxu0  ;;  %v25684_v61 = vpop.f32.mrb[100].mxu1  ;;  %22529 = vmatprep.subr.bf16.mxu0 %v23477_v1  ;;  %22535 = vmatprep.subr.bf16.mxu1 %v23477_v1 }
0x2c1b   : > { %v22483_v46 = vpop.f32.mrb[101].mxu0  ;;  %v22491_v62 = vpop.f32.mrb[101].mxu1  ;;  %v15677_v56 = vadd.f32 %v19986_v5, %v25684_v61 }
0x2c1c   : > { %v15627_v39 = vpop.f32.mrb[102].mxu0  ;;  %v15679_v59 = vpop.f32.mrb[102].mxu1  ;;  %v15625_v62 = vadd.f32 %v19985_v27, %v25682_v57 }
0x2c1d   : > { %v22484_v63 = vpop.f32.mrb[103].mxu0  ;;  %v22492_v17 = vpop.f32.mrb[103].mxu1 }
0x2c1e   : > { %v15929_v17 = vpack.c.bf16 %v15677_v56, %v15677_v56 }
0x2ce2   : > { %v15730_v0 = vpop.f32.mrb[104].mxu0  ;;  %v15776_v3 = vpop.f32.mrb[104].mxu1 }
0x2ce3   : > { %v15874_v55 = vmul.f32 0.35355338, %v15730_v0  ;;  %v15875_v44 = vmul.f32 0.35355338, %v15776_v3  ;;  %v22497_v9 = vpop.f32.mrb[105].mxu0  ;;  %v22503_v7 = vpop.f32.mrb[105].mxu1  ;;  %v15928_v3 = vpack.c.bf16 %v15625_v62, %v15625_v62 }
0x2ce4   : > { %v15733_v49 = vpop.f32.mrb[106].mxu0  ;;  %v15779_v8 = vpop.f32.mrb[106].mxu1  ;;  %v16072_v7 = vsel %vm2622_vm3, %v15929_v17, 0 }
0x2ce5   : > { %v22498_v13 = vpop.f32.mrb[107].mxu0  ;;  %v22504_v15 = vpop.f32.mrb[107].mxu1  ;;  %v15881_v19 = vsel %vm2368_vm2, %v15875_v44, -inf  ;;  %v15878_v60 = vsel %vm2368_vm2, %v15874_v55, -inf  ;;  %v16026_v61 = vsel %vm2622_vm3, %v15928_v3, 0 }
0x2ce6   : > { %15882 = vmax.xlane.f32.xlu1 %v15881_v19  ;;  %15879 = vmax.xlane.f32.xlu0 %v15878_v60  ;;  %v19947_v49 = vld [vmem:[%s26150_s16 + $0x14] sm:$0xf]  ;;  %v19946_v15 = vld [vmem:[%s26150_s16 + $0x10] sm:$0xf] }
0x2cea   : > { %v15822_v25 = vpop.f32.mrb[108].mxu0  ;;  %v15868_v28 = vpop.f32.mrb[108].mxu1 }
0x2ceb   : > { %v15876_v32 = vmul.f32 0.35355338, %v15822_v25  ;;  %v15877_v54 = vmul.f32 0.35355338, %v15868_v28  ;;  %v22509_v22 = vpop.f32.mrb[109].mxu0  ;;  %v22515_v24 = vpop.f32.mrb[109].mxu1 }
0x2cec   : > { %v15825_v6 = vpop.f32.mrb[110].mxu0  ;;  %v15871_v26 = vpop.f32.mrb[110].mxu1  ;;  %v16168_v25 = vsel %vm2622_vm3, %v19947_v49, 0  ;;  %v19948_v22 = vld [vmem:[%s26150_s16 + $0x18] sm:$0xf] }
0x2ced   : > { %v22510_v50 = vpop.f32.mrb[111].mxu0  ;;  %v22516_v16 = vpop.f32.mrb[111].mxu1  ;;  %v15887_v35 = vsel %vm2368_vm2, %v15877_v54, -inf  ;;  %v15884_v36 = vsel %vm2368_vm2, %v15876_v32, -inf }
0x2cee   : > { %15888 = vmax.xlane.f32.xlu1 %v15887_v35  ;;  %15885 = vmax.xlane.f32.xlu0 %v15884_v36 }
0x2d73   : > { %v15883_v37 = vpop.xlane.xlu1 %15882  ;;  %v15880_v38 = vpop.xlane.xlu0 %15879 }
0x2d74   : > { %v15891_v18 = vsub.f32 %v15875_v44, %v15883_v37  ;;  %v15890_v48 = vsub.f32 %v15874_v55, %v15880_v38  ;;  %v16214_v38 = vsel %vm2622_vm3, %v19948_v22, 0  ;;  %v20017_v22 = vld [vmem:[%s26152_s21 + $0x108] sm:$0xff] }
0x2d76   : > { %v15896_v43 = vmul.f32 1.442695, %v15891_v18  ;;  %v15894_v10 = vmul.f32 1.442695, %v15890_v48 }
0x2d78   : > { %23392 = vpow2.f32 %v15896_v43 }
0x2d79   : > { %23394 = vpow2.f32 %v15894_v10 }
0x2d7b   : > { %v15889_v45 = vpop.xlane.xlu1 %15888  ;;  %v15886_v29 = vpop.xlane.xlu0 %15885 }
0x2d7c   : > { %v15893_v42 = vsub.f32 %v15877_v54, %v15889_v45  ;;  %v15892_v47 = vsub.f32 %v15876_v32, %v15886_v29  ;;  %v16122_v32 = vsel %vm2622_vm3, %v19946_v15, 0  ;;  %v19949_v54 = vld [vmem:[%s26150_s16 + $0x1c] sm:$0xf] }
0x2d7d   : > { %v16260_v16 = vsel %vm2622_vm3, %v19949_v54, 0  ;;  %v20018_v54 = vld [vmem:[%s26152_s21 + $0x140] sm:$0xff] }
0x2d7e   : > { %v15900_v2 = vmul.f32 1.442695, %v15893_v42  ;;  %v15898_v30 = vmul.f32 1.442695, %v15892_v47 }
0x2d80   : > { %23396 = vpow2.f32 %v15900_v2 }
0x2d81   : > { %23398 = vpow2.f32 %v15898_v30 }
0x2d82   : > { %v23393_v51 = vpop.eup %23392 }
0x2d83   : > { %v23395_v40 = vpop.eup %23394  ;;  %v15905_v41 = vsel %vm2368_vm2, %v23393_v51, 0.0 }
0x2d84   : > { %15906 = vadd.xlane.f32.xlu1 %v15905_v41  ;;  %v15902_v4 = vsel %vm2368_vm2, %v23395_v40, 0.0 }
0x2d85   : > { %15903 = vadd.xlane.f32.xlu0 %v15902_v4 }
0x2d8a   : > { %v23397_v53 = vpop.eup %23396 }
0x2d8b   : > { %v23399_v52 = vpop.eup %23398  ;;  %v15911_v31 = vsel %vm2368_vm2, %v23397_v53, 0.0 }
0x2d8c   : > { %15912 = vadd.xlane.f32.xlu1 %v15911_v31  ;;  %v15908_v34 = vsel %vm2368_vm2, %v23399_v52, 0.0 }
0x2d8d   : > { %15909 = vadd.xlane.f32.xlu0 %v15908_v34 }
0x2e11   : > { %v15907_v33 = vpop.xlane.xlu1 %15906 }
0x2e12   : > { %23400 = vrcp.f32 %v15907_v33  ;;  %v15904_v58 = vpop.xlane.xlu0 %15903 }
0x2e13   : > { %23402 = vrcp.f32 %v15904_v58 }
0x2e19   : > { %v15913_v46 = vpop.xlane.xlu1 %15912 }
0x2e1a   : > { %23404 = vrcp.f32 %v15913_v46  ;;  %v15910_v39 = vpop.xlane.xlu0 %15909 }
0x2e1b   : > { %23406 = vrcp.f32 %v15910_v39 }
0x2e1c   : > { %v23401_v59 = vpop.eup %23400 }
0x2e1d   : > { %v23403_v63 = vpop.eup %23402  ;;  %v15917_v0 = vmul.f32 %v23401_v59, %v23393_v51 }
0x2e1e   : > { %v15915_v55 = vmul.f32 %v23403_v63, %v23395_v40 }
0x2e1f   : > { %v15923_v44 = vpack.c.bf16 %v15917_v0, %v15917_v0 }
0x2e20   : > { %v15922_v9 = vpack.c.bf16 %v15915_v55, %v15915_v55 }
0x2e21   : > { %22526 = vmatmul.mubr.msk.bf16.vlgmr.msra.gmra.mrb[112].mxu1 %vm2368_vm2, %v15923_v44 }
0x2e22   : > { %22520 = vmatmul.mubr.msk.bf16.vlgmr.msra.gmra.mrb[112].mxu0 %vm2368_vm2, %v15922_v9  ;;  %22536 = vmatpush3.bf16.msra.mxu1 %v16072_v7  ;;  %v20011_v9 = vld [vmem:[%s26151_s19 + $0x1] ss:$0 sm:$0xff] }
0x2e23   : > { %22530 = vmatpush3.bf16.msra.mxu0 %v16026_v61  ;;  %22531 = vmatprep.mubr.msk.bf16.mxu0 %vm23478_vm0, %v23477_v1 }
0x2e24   : > { %v23405_v57 = vpop.eup %23404  ;;  %22537 = vmatprep.mubr.msk.bf16.mxu1 %vm23478_vm0, %v23477_v1  ;;  %22541 = vmatprep.subr.bf16.mxu0 %v23477_v1 }
0x2e25   : > { %v23407_v8 = vpop.eup %23406  ;;  %v15921_v13 = vmul.f32 %v23405_v57, %v23397_v53  ;;  %22547 = vmatprep.subr.bf16.mxu1 %v23477_v1 }
0x2e26   : > { %v15919_v19 = vmul.f32 %v23407_v8, %v23399_v52 }
0x2e27   : > { %v15925_v60 = vpack.c.bf16 %v15921_v13, %v15921_v13 }
0x2e28   : > { %v15924_v28 = vpack.c.bf16 %v15919_v19, %v15919_v19 }
0x2e29   : > { %22538 = vmatmul.mubr.msk.bf16.vlgmr.msra.gmra.mrb[116].mxu1 %vm2368_vm2, %v15925_v60 }
0x2e2a   : > { %22532 = vmatmul.mubr.msk.bf16.vlgmr.msra.gmra.mrb[116].mxu0 %vm2368_vm2, %v15924_v28  ;;  %22548 = vmatpush3.bf16.msra.mxu1 %v16168_v25 }
0x2e2b   : > { %22542 = vmatpush3.bf16.msra.mxu0 %v16122_v32  ;;  %22543 = vmatprep.mubr.msk.bf16.mxu0 %vm23478_vm0, %v23477_v1  ;;  %v20016_v32 = vld [vmem:[%s26152_s21 + $0x100] sm:$0xff] }
0x2e2c   : > { %22549 = vmatprep.mubr.msk.bf16.mxu1 %vm23478_vm0, %v23477_v1  ;;  %22553 = vmatprep.subr.bf16.mxu0 %v23477_v1 }
0x2e2d   : > { %22559 = vmatprep.subr.bf16.mxu1 %v23477_v1 }
0x2ef4   : > { %v16016_v24 = vpop.f32.mrb[112].mxu1 }
0x2ef5   : > { %v15970_v6 = vpop.f32.mrb[112].mxu0  ;;  %v16115_v26 = vpack.c.bf16 %v16016_v24, %v16016_v24  ;;  %v22527_v50 = vpop.f32.mrb[113].mxu1  ;;  %v20026_v24 = vcombine.high %v20016_v32, %v20018_v54 }
0x2ef6   : > { %v16114_v35 = vpack.c.bf16 %v15970_v6, %v15970_v6  ;;  %v22521_v36 = vpop.f32.mrb[113].mxu0  ;;  %v16019_v37 = vpop.f32.mrb[114].mxu1  ;;  %v20019_v6 = vld [vmem:[%s26152_s21 + $0x148] sm:$0xff] }
0x2ef7   : > { %v15973_v18 = vpop.f32.mrb[114].mxu0  ;;  %v22528_v48 = vpop.f32.mrb[115].mxu1  ;;  %22550 = vmatmul.mubr.msk.bf16.vlgmr.msra.gmra.mrb[120].mxu1 %vm2368_vm2, %v16115_v26  ;;  %v20027_v26 = vcombine.low %v20017_v22, %v20019_v6  ;;  %v20028_v50 = vcombine.high %v20017_v22, %v20019_v6  ;;  %v20021_v36 = vld [vmem:[%s26152_s21 + $0x188] sm:$0xff]  ;;  %v23182_v22 = vld [vmem:[%s26155_s27 + $0x520] sm:$0xff]  }
0x2ef8   : > { %v22522_v43 = vpop.f32.mrb[115].mxu0  ;;  %22544 = vmatmul.mubr.msk.bf16.vlgmr.msra.gmra.mrb[120].mxu0 %vm2368_vm2, %v16114_v35  ;;  %22560 = vmatpush3.bf16.msra.mxu1 %v16260_v16  ;;  %v20020_v16 = vld [vmem:[%s26152_s21 + $0x180] sm:$0xff]  ;;  %v23184_v6 = vld [vmem:[%s26155_s27 + $0x568] sm:$0xff]  }
0x2ef9   : > { %22554 = vmatpush3.bf16.msra.mxu0 %v16214_v38  ;;  %22555 = vmatprep.mubr.msk.bf16.mxu0 %vm23478_vm0, %v23477_v1  ;;  %v20022_v35 = vld [vmem:[%s26152_s21 + $0x1c0] sm:$0xff]  ;;  %v20023_v38 = vld [vmem:[%s26152_s21 + $0x1c8] sm:$0xff] }
0x2efa   : > { %22561 = vmatprep.mubr.msk.bf16.mxu1 %vm23478_vm0, %v23477_v1  ;;  %16424 = vmatprep.subr.bf16.mxu0 %v20026_v24  ;;  %v20030_v37 = vcombine.high %v20020_v16, %v20022_v35  ;;  %v20029_v18 = vcombine.low %v20020_v16, %v20022_v35  ;;  %v20031_v48 = vcombine.low %v20021_v36, %v20023_v38  ;;  %v23183_v24 = vld [vmem:[%s26155_s27 + $0x5a0] sm:$0xff]   ;;  %v23188_v16 = vld [vmem:[%s26155_s27 + $0x570] sm:$0xff]  }
0x2efb   : > { %16465 = vmatprep.subr.bf16.mxu1 %v20028_v50  ;;  %v20032_v43 = vcombine.high %v20021_v36, %v20023_v38  ;;  %v23187_v50 = vld [vmem:[%s26155_s27 + $0x5a8] sm:$0xff]   ;;  %v23189_v35 = vld [vmem:[%s26155_s27 + $0x5f0] sm:$0xff]   ;;  %v23192_v38 = vld [vmem:[%s26155_s27 + $0x578] sm:$0xff]  }
0x2efc   : > { %v16108_v10 = vpop.f32.mrb[116].mxu1  ;;  %v23190_v36 = vld [vmem:[%s26155_s27 + $0x530] sm:$0xff]  }
0x2efd   : > { %v16062_v45 = vpop.f32.mrb[116].mxu0  ;;  %v16117_v29 = vpack.c.bf16 %v16108_v10, %v16108_v10  ;;  %v22539_v42 = vpop.f32.mrb[117].mxu1  ;;  %v20099_v10 = vld [vmem:[%s26152_s21 + $0x110] sm:$0xff] }
0x2efe   : > { %v16116_v47 = vpack.c.bf16 %v16062_v45, %v16062_v45  ;;  %v22533_v2 = vpop.f32.mrb[117].mxu0  ;;  %v16111_v30 = vpop.f32.mrb[118].mxu1  ;;  %v20101_v45 = vld [vmem:[%s26152_s21 + $0x150] sm:$0xff] }
0x2eff   : > { %v16065_v51 = vpop.f32.mrb[118].mxu0  ;;  %v22540_v40 = vpop.f32.mrb[119].mxu1  ;;  %22562 = vmatmul.mubr.msk.bf16.vlgmr.msra.gmra.mrb[124].mxu1 %vm2368_vm2, %v16117_v29  ;;  %v20100_v29 = vld [vmem:[%s26152_s21 + $0x118] sm:$0xff]  ;;  %v20109_v42 = vcombine.high %v20099_v10, %v20101_v45  ;;  %v20108_v2 = vcombine.low %v20099_v10, %v20101_v45  ;;  %v23196_v10 = vld [vmem:[%s26155_s27 + $0x440] sm:$0xff]  }
0x2f00   : > { %v22534_v41 = vpop.f32.mrb[119].mxu0  ;;  %22556 = vmatmul.mubr.msk.bf16.vlgmr.msra.gmra.mrb[124].mxu0 %vm2368_vm2, %v16116_v47  ;;  %16497 = vmatprep.mubr.bf16.mxu1 %v23479_v12  ;;  %v20102_v47 = vld [vmem:[%s26152_s21 + $0x158] sm:$0xff]  ;;  %v23197_v45 = vld [vmem:[%s26155_s27 + $0x4c0] sm:$0xff]  }
0x2f01   : > { %16456 = vmatprep.mubr.bf16.mxu0 %v23479_v12  ;;  %16466 = vmatpush1.bf16.msra.mxu1 %v20027_v26  ;;  %v20110_v30 = vcombine.low %v20100_v29, %v20102_v47  ;;  %v20111_v51 = vcombine.high %v20100_v29, %v20102_v47  ;;  %v23186_v26 = vld [vmem:[%s26155_s27 + $0x528] sm:$0xff]  }
0x2f02   : > { %16467 = vmatprep.subr.bf16.mxu1 %v20032_v43  ;;  %v23195_v43 = vld [vmem:[%s26155_s27 + $0x5b8] sm:$0xff]  }
0x2f05   : > { %16468 = vmatpush1.bf16.msra.mxu1 %v20031_v48  ;;  %v23194_v48 = vld [vmem:[%s26155_s27 + $0x538] sm:$0xff]  }
0x2f06   : > { %16690 = vmatprep.subr.bf16.mxu1 %v20111_v51 }
0x2fca   : > { %v16204_v4 = vpop.f32.mrb[120].mxu1 }
0x2fcb   : > { %v16158_v53 = vpop.f32.mrb[120].mxu0  ;;  %v16303_v52 = vsel %vm1696_vm1, %v16204_v4, 0.0  ;;  %v22551_v31 = vpop.f32.mrb[121].mxu1 }
0x2fcc   : > { %v16302_v34 = vsel %vm1696_vm1, %v16158_v53, 0.0  ;;  %v22545_v33 = vpop.f32.mrb[121].mxu0  ;;  %v16207_v58 = vpop.f32.mrb[122].mxu1 }
0x2fcd   : > { %v16304_v5 = vadd.f32 %v16303_v52, %v16302_v34  ;;  %v16161_v27 = vpop.f32.mrb[122].mxu0  ;;  %v22552_v56 = vpop.f32.mrb[123].mxu1  ;;  %v20014_v52 = vld [vmem:[%s26153_s24 + $0x1] ss:$0 sm:$0xff]  ;;  %v20103_v58 = vld [vmem:[%s26152_s21 + $0x190] sm:$0xff] }
0x2fce   : > { %v22546_v46 = vpop.f32.mrb[123].mxu0  ;;  %v20015_v34 = vld [vmem:[%s26154_s25 + $0x1] ss:$0 sm:$0xff]  ;;  %v20104_v27 = vld [vmem:[%s26152_s21 + $0x198] sm:$0xff] }
0x2fcf   : > { %v20106_v56 = vld [vmem:[%s26152_s21 + $0x1d8] sm:$0xff] }
0x2fd2   : > { %v16296_v62 = vpop.f32.mrb[124].mxu1 }
0x2fd3   : > { %v16250_v39 = vpop.f32.mrb[124].mxu0  ;;  %v22563_v59 = vpop.f32.mrb[125].mxu1  ;;  %v16307_v7 = vsel %vm1696_vm1, %v16296_v62, 0.0 }
0x2fd4   : > { %v16305_v63 = vsel %vm1696_vm1, %v16250_v39, 0.0  ;;  %v22557_v17 = vpop.f32.mrb[125].mxu0  ;;  %v16299_v0 = vpop.f32.mrb[126].mxu1  ;;  %v20115_v59 = vcombine.high %v20104_v27, %v20106_v56 }
0x2fd5   : > { %v16306_v3 = vadd.f32 %v16305_v63, %v16304_v5  ;;  %v16253_v55 = vpop.f32.mrb[126].mxu0  ;;  %v22564_v44 = vpop.f32.mrb[127].mxu1  ;;  %v20105_v5 = vld [vmem:[%s26152_s21 + $0x1d0] sm:$0xff]  ;;  %v20114_v17 = vcombine.low %v20104_v27, %v20106_v56  ;;  %v23164_v0 = vld [vmem:[%s26155_s27 + $0x540] sm:$0xff]  }
0x2fd6   : > { %v22558_v61 = vpop.f32.mrb[127].mxu0  ;;  %v20113_v39 = vcombine.high %v20103_v58, %v20105_v5  ;;  %v20112_v63 = vcombine.low %v20103_v58, %v20105_v5  ;;  %v23166_v55 = vld [vmem:[%s26155_s27 + $0x500] sm:$0xff]  }
0x2fd7   : > { %v16308_v57 = vadd.f32 %v16307_v7, %v16306_v3  ;;  %v23165_v3 = vld [vmem:[%s26155_s27 + $0x5c0] sm:$0xff]   ;;  %v23169_v7 = vld [vmem:[%s26155_s27 + $0x5c8] sm:$0xff]  }
0x2fd8   : > { %v23167_v44 = vld [vmem:[%s26155_s27 + $0x580] sm:$0xff]   ;;  %v23170_v61 = vld [vmem:[%s26155_s27 + $0x508] sm:$0xff]  }
0x2fd9   : > { %v16315_v49 = vadd.f32 %v20011_v9, %v16308_v57  ;;  %v23168_v9 = vld [vmem:[%s26155_s27 + $0x548] sm:$0xff]  }
0x2fda   : > { %v23171_v57 = vld [vmem:[%s26155_s27 + $0x588] sm:$0xff]  }
0x2fdb   : > { %v16316_v8 = vadd.f32 %v16315_v49, %v25562_v23  ;;  %v20025_v23 = vcombine.low %v20016_v32, %v20018_v54  ;;  %v23172_v49 = vld [vmem:[%s26155_s27 + $0x550] sm:$0xff]   ;;  %v23180_v32 = vld [vmem:[%s26155_s27 + $0x560] sm:$0xff]  }
0x2fdc   : > { %v23181_v54 = vld [vmem:[%s26155_s27 + $0x5e0] sm:$0xff]  }
0x2fdd   : > { %v16321_v13 = vsel %vm1696_vm1, %v16316_v8, 0.0  ;;  %16425 = vmatpush1.bf16.msra.mxu0 %v20025_v23  ;;  %v23185_v23 = vld [vmem:[%s26155_s27 + $0x5e8] sm:$0xff]  }
0x2fde   : > { %16322 = vadd.xlane.f32.xlu0 %v16321_v13  ;;  %16426 = vmatprep.subr.bf16.mxu0 %v20030_v37  ;;  %v23174_v13 = vld [vmem:[%s26155_s27 + $0x510] sm:$0xff]  }
0x2fdf   : > { %v23191_v37 = vld [vmem:[%s26155_s27 + $0x5b0] sm:$0xff]  }
0x2fe1   : > { %16427 = vmatpush1.bf16.msra.mxu0 %v20029_v18  ;;  %v23193_v18 = vld [vmem:[%s26155_s27 + $0x5f8] sm:$0xff]  }
0x2fe2   : > { %16649 = vmatprep.subr.bf16.mxu0 %v20109_v42 }
0x306b   : > { %v16323_v15 = vpop.xlane.xlu0 %16322 }
0x306c   : > { %v16324_v19 = vmul.f32 0.03125, %v16323_v15  ;;  %v23175_v15 = vld [vmem:[%s26155_s27 + $0x590] sm:$0xff]  }
0x306e   : > { %v16325_v60 = vsub.f32 %v16316_v8, %v16324_v19  ;;  %v23173_v8 = vld [vmem:[%s26155_s27 + $0x5d0] sm:$0xff]   ;;  %v23176_v19 = vld [vmem:[%s26155_s27 + $0x558] sm:$0xff]  }
0x3070   : > { %v16326_v25 = vmul.f32 %v16325_v60, %v16325_v60 }
0x3072   : > { %v16327_v28 = vsel %vm1696_vm1, %v16326_v25, 0.0  ;;  %v23178_v25 = vld [vmem:[%s26155_s27 + $0x518] sm:$0xff]  }
0x3073   : > { %16328 = vadd.xlane.f32.xlu1 %v16327_v28  ;;  %v23179_v28 = vld [vmem:[%s26155_s27 + $0x598] sm:$0xff]  }
0x3100   : > { %v16329_v40 = vpop.xlane.xlu1 %16328 }
0x3101   : > { %v16330_v41 = vmul.f32 0.03125, %v16329_v40 }
0x3103   : > { %v16331_v4 = vadd.f32 1e-05, %v16330_v41  ;;  %v20107_v41 = vld [vmem:[%s26156_s29 + $0x14] sm:$0xf] }
0x3104   : > { %v16596_v58 = vrot.slane %v20107_v41, %v24043_v11  ;;  %v16604_v5 = vrot.slane %v20107_v41, %v24045_v14 }
0x3105   : > { %23408 = vrsqrt.f32 %v16331_v4 }
0x310f   : > { %v23409_v53 = vpop.eup %23408 }
0x3110   : > { %v16333_v31 = vmul.f32 %v23409_v53, %v16325_v60  ;;  %v23177_v60 = vld [vmem:[%s26155_s27 + $0x5d8] sm:$0xff]  }
0x3112   : > { %v16340_v33 = vmul.f32 %v20014_v52, %v16333_v31 }
0x3114   : > { %v25762_v46 = vadd.f32 %v20015_v34, %v16340_v33  ;;  %v16592_v34 = vrot.slane %v20107_v41, %v24051_v20  ;;  %v16600_v33 = vrot.slane %v20107_v41, %v24053_v21  ;;  %v23216_v41 = vld [vmem:[%s26155_s27 + $0x468] sm:$0xff]  }
0x3116   : > { %v25766_v62 = vpack.c.bf16 %v25762_v46, %v25762_v46 }
0x3118   : > { %20033 = vmatmul.mubr.msk.bf16.vlgmr.msra.gmra.mrb[128].mxu0 %vm1696_vm1, %v25766_v62  ;;  %20034 = vmatmul.mubr.msk.bf16.vlgmr.msra.gmra.mrb[128].mxu1 %vm1696_vm1, %v25766_v62 }
0x3119   : > { %16650 = vmatpush1.bf16.msra.mxu0 %v20108_v2  ;;  %16691 = vmatpush1.bf16.msra.mxu1 %v20110_v30  ;;  %v25817_v30 = vld [vmem:[%s26156_s29 + $0x10] sm:$0xf] }
0x311a   : > { %16651 = vmatprep.subr.bf16.mxu0 %v20113_v39  ;;  %16692 = vmatprep.subr.bf16.mxu1 %v20115_v59  ;;  %v16368_v52 = vrot.slane %v25817_v30, %v24043_v11  ;;  %v16376_v31 = vrot.slane %v25817_v30, %v24045_v14 }
0x311b   : > { %16681 = vmatprep.mubr.bf16.mxu0 %v23479_v12  ;;  %16722 = vmatprep.mubr.bf16.mxu1 %v23479_v12 }
0x311d   : > { %16652 = vmatpush1.bf16.msra.mxu0 %v20112_v63  ;;  %16693 = vmatpush1.bf16.msra.mxu1 %v20114_v17 }
0x311e   : > { %21378 = vmatprep.subr.bf16.mxu0 %v23164_v0  ;;  %21400 = vmatprep.subr.bf16.mxu1 %v23165_v3 }
0x3120   : > { %20116 = vmatmul.mubr.msk.bf16.vlgmr.msra.gmra.mrb[132].mxu0 %vm1696_vm1, %v25766_v62  ;;  %20117 = vmatmul.mubr.msk.bf16.vlgmr.msra.gmra.mrb[132].mxu1 %vm1696_vm1, %v25766_v62 }
0x3121   : > { %21379 = vmatpush3.bf16.msra.mxu0 %v23166_v55  ;;  %21401 = vmatpush3.bf16.msra.mxu1 %v23167_v44 }
0x3122   : > { %21380 = vmatprep.subr.bf16.mxu0 %v23168_v9  ;;  %21402 = vmatprep.subr.bf16.mxu1 %v23169_v7 }
0x3125   : > { %21381 = vmatpush3.bf16.msra.mxu0 %v23170_v61  ;;  %21403 = vmatpush3.bf16.msra.mxu1 %v23171_v57 }
0x3126   : > { %21382 = vmatprep.subr.bf16.mxu0 %v23172_v49  ;;  %21404 = vmatprep.subr.bf16.mxu1 %v23173_v8 }
0x3129   : > { %21383 = vmatpush3.bf16.msra.mxu0 %v23174_v13  ;;  %21405 = vmatpush3.bf16.msra.mxu1 %v23175_v15 }
0x312a   : > { %21384 = vmatprep.subr.bf16.mxu0 %v23176_v19  ;;  %21406 = vmatprep.subr.bf16.mxu1 %v23177_v60 }
0x312d   : > { %21385 = vmatpush3.bf16.msra.mxu0 %v23178_v25  ;;  %21407 = vmatpush3.bf16.msra.mxu1 %v23179_v28 }
0x312e   : > { %21386 = vmatprep.subr.bf16.mxu0 %v23180_v32  ;;  %21408 = vmatprep.subr.bf16.mxu1 %v23181_v54  ;;  %v23198_v32 = vld [vmem:[%s26155_s27 + $0x400] sm:$0xff]  }
0x312f   : > { %v23199_v54 = vld [vmem:[%s26155_s27 + $0x480] sm:$0xff]  }
0x3131   : > { %21387 = vmatpush3.bf16.msra.mxu0 %v23182_v22  ;;  %21409 = vmatpush3.bf16.msra.mxu1 %v23183_v24 }
0x3132   : > { %21388 = vmatprep.subr.bf16.mxu0 %v23184_v6  ;;  %21410 = vmatprep.subr.bf16.mxu1 %v23185_v23  ;;  %v23200_v6 = vld [vmem:[%s26155_s27 + $0x448] sm:$0xff]  }
0x3133   : > { %v23201_v23 = vld [vmem:[%s26155_s27 + $0x4c8] sm:$0xff]  }
0x3135   : > { %21389 = vmatpush3.bf16.msra.mxu0 %v23186_v26  ;;  %21411 = vmatpush3.bf16.msra.mxu1 %v23187_v50 }
0x3136   : > { %21390 = vmatprep.subr.bf16.mxu0 %v23188_v16  ;;  %21412 = vmatprep.subr.bf16.mxu1 %v23189_v35  ;;  %v23202_v16 = vld [vmem:[%s26155_s27 + $0x408] sm:$0xff]  }
0x3137   : > { %v23203_v35 = vld [vmem:[%s26155_s27 + $0x488] sm:$0xff]  }
0x3139   : > { %21391 = vmatpush3.bf16.msra.mxu0 %v23190_v36  ;;  %21413 = vmatpush3.bf16.msra.mxu1 %v23191_v37  ;;  %v23204_v36 = vld [vmem:[%s26155_s27 + $0x450] sm:$0xff]  }
0x313a   : > { %21392 = vmatprep.subr.bf16.mxu0 %v23192_v38  ;;  %21414 = vmatprep.subr.bf16.mxu1 %v23193_v18  ;;  %v23205_v37 = vld [vmem:[%s26155_s27 + $0x4d0] sm:$0xff]  }
0x313b   : > { %v23206_v38 = vld [vmem:[%s26155_s27 + $0x410] sm:$0xff]  }
0x313c   : > { %v23207_v18 = vld [vmem:[%s26155_s27 + $0x490] sm:$0xff]  }
0x313d   : > { %21393 = vmatpush3.bf16.msra.mxu0 %v23194_v48  ;;  %21415 = vmatpush3.bf16.msra.mxu1 %v23195_v43  ;;  %v23208_v48 = vld [vmem:[%s26155_s27 + $0x458] sm:$0xff]  }
0x313e   : > { %21422 = vmatprep.subr.bf16.mxu0 %v23196_v10  ;;  %21444 = vmatprep.subr.bf16.mxu1 %v23197_v45  ;;  %v23209_v43 = vld [vmem:[%s26155_s27 + $0x4d8] sm:$0xff]  }
0x313f   : > { %v23210_v10 = vld [vmem:[%s26155_s27 + $0x418] sm:$0xff]  }
0x3140   : > { %v23211_v45 = vld [vmem:[%s26155_s27 + $0x498] sm:$0xff]  }
0x31eb   : > { %v25812_v29 = vpop.f32.mrb[128].mxu0  ;;  %v25814_v42 = vpop.f32.mrb[128].mxu1 }
0x31ec   : > { %v16460_v47 = vpop.f32.mrb[129].mxu0  ;;  %v16501_v2 = vpop.f32.mrb[129].mxu1 }
0x31ed   : > { %v16462_v51 = vpop.f32.mrb[130].mxu0  ;;  %v16503_v40 = vpop.f32.mrb[130].mxu1  ;;  %v16461_v39 = vadd.f32 %v16460_v47, %v16368_v52  ;;  %v16502_v59 = vadd.f32 %v16501_v2, %v16376_v31  ;;  %v23212_v47 = vld [vmem:[%s26155_s27 + $0x460] sm:$0xff]   ;;  %v23219_v52 = vld [vmem:[%s26155_s27 + $0x4a8] sm:$0xff]   ;;  %v16364_v31 = vrot.slane %v25817_v30, %v24051_v20 }
0x31ee   : > { %v16463_v4 = vpop.f32.mrb[131].mxu0  ;;  %v16504_v53 = vpop.f32.mrb[131].mxu1  ;;  %v23213_v2 = vld [vmem:[%s26155_s27 + $0x4e0] sm:$0xff]  }
0x31ef   : > { %v16507_v19 = vmax.f32 %v16461_v39, 0.0  ;;  %v16509_v60 = vmax.f32 %v16502_v59, 0.0  ;;  %v23214_v51 = vld [vmem:[%s26155_s27 + $0x420] sm:$0xff]   ;;  %v23217_v4 = vld [vmem:[%s26155_s27 + $0x4e8] sm:$0xff]   ;;  %v23225_v59 = vld [vmem:[%s26155_s27 + $0x4f8] sm:$0xff]  }
0x31f0   : > { %v23215_v40 = vld [vmem:[%s26155_s27 + $0x4a0] sm:$0xff]   ;;  %v23218_v53 = vld [vmem:[%s26155_s27 + $0x428] sm:$0xff]  }
0x31f1   : > { %v16511_v26 = vpack.c.bf16 %v16507_v19, %v16507_v19  ;;  %v16513_v50 = vpack.c.bf16 %v16509_v60, %v16509_v60 }
0x31f3   : > { %v16683_v27 = vpop.f32.mrb[132].mxu0  ;;  %v16724_v56 = vpop.f32.mrb[132].mxu1 }
0x31f4   : > { %v16684_v63 = vadd.f32 %v16683_v27, %v16592_v34  ;;  %v16725_v17 = vadd.f32 %v16724_v56, %v16600_v33  ;;  %v16685_v0 = vpop.f32.mrb[133].mxu0  ;;  %v16726_v3 = vpop.f32.mrb[133].mxu1  ;;  %v16372_v34 = vrot.slane %v25817_v30, %v24053_v21  ;;  %v23220_v33 = vld [vmem:[%s26155_s27 + $0x470] sm:$0xff]   ;;  %v16459_v56 = vadd.f32 %v25812_v29, %v16364_v31  ;;  %v23224_v30 = vld [vmem:[%s26155_s27 + $0x478] sm:$0xff]  }
0x31f5   : > { %v16686_v55 = vadd.f32 %v16685_v0, %v16596_v58  ;;  %v16727_v44 = vadd.f32 %v16726_v3, %v16604_v5  ;;  %v16687_v9 = vpop.f32.mrb[134].mxu0  ;;  %v16728_v7 = vpop.f32.mrb[134].mxu1  ;;  %v23221_v58 = vld [vmem:[%s26155_s27 + $0x4f0] sm:$0xff]   ;;  %v20247_v0 = vld [vmem:[%s26152_s21 + $0x128] sm:$0xff] }
0x31f6   : > { %v16731_v61 = vmax.f32 %v16684_v63, 0.0  ;;  %v16733_v57 = vmax.f32 %v16725_v17, 0.0  ;;  %v16688_v49 = vpop.f32.mrb[135].mxu0  ;;  %v16729_v8 = vpop.f32.mrb[135].mxu1  ;;  %v23222_v5 = vld [vmem:[%s26155_s27 + $0x430] sm:$0xff]   ;;  %v16500_v39 = vadd.f32 %v25814_v42, %v16372_v34  ;;  %v20246_v63 = vld [vmem:[%s26152_s21 + $0x120] sm:$0xff] }
0x31f7   : > { %v16732_v13 = vmax.f32 %v16686_v55, 0.0  ;;  %v16734_v15 = vmax.f32 %v16727_v44, 0.0  ;;  %v23223_v27 = vld [vmem:[%s26155_s27 + $0x4b0] sm:$0xff]   ;;  %v20248_v17 = vld [vmem:[%s26152_s21 + $0x160] sm:$0xff]  ;;  %v20249_v3 = vld [vmem:[%s26152_s21 + $0x168] sm:$0xff]  ;;  %v16506_v9 = vmax.f32 %v16459_v56, 0.0 }
0x31f8   : > { %v16735_v22 = vpack.c.bf16 %v16731_v61, %v16731_v61  ;;  %v16737_v24 = vpack.c.bf16 %v16733_v57, %v16733_v57  ;;  %v23226_v55 = vld [vmem:[%s26155_s27 + $0x438] sm:$0xff]   ;;  %v16508_v29 = vmax.f32 %v16500_v39, 0.0  ;;  %v20256_v42 = vcombine.high %v20246_v63, %v20248_v17  ;;  %v20250_v61 = vld [vmem:[%s26152_s21 + $0x1a0] sm:$0xff]  ;;  %v20251_v49 = vld [vmem:[%s26152_s21 + $0x1a8] sm:$0xff] }
0x31f9   : > { %v16736_v25 = vpack.c.bf16 %v16732_v13, %v16732_v13  ;;  %v16738_v28 = vpack.c.bf16 %v16734_v15, %v16734_v15  ;;  %v23227_v44 = vld [vmem:[%s26155_s27 + $0x4b8] sm:$0xff]   ;;  %v20258_v7 = vcombine.high %v20247_v0, %v20249_v3  ;;  %v20252_v57 = vld [vmem:[%s26152_s21 + $0x1e0] sm:$0xff]  ;;  %v20253_v8 = vld [vmem:[%s26152_s21 + $0x1e8] sm:$0xff]  ;;  %v20255_v13 = vcombine.low %v20246_v63, %v20248_v17 }
0x31fa   : > { %v20257_v15 = vcombine.low %v20247_v0, %v20249_v3  ;;  %v20260_v19 = vcombine.high %v20250_v61, %v20252_v57  ;;  %v16510_v60 = vpack.c.bf16 %v16506_v9, %v16506_v9  ;;  %v23252_v31 = vld [vmem:[%s26155_s27 + $0x670] sm:$0xff]   ;;  %v23258_v56 = vld [vmem:[%s26155_s27 + $0x638] sm:$0xff]  }
0x31fb   : > { %17027 = vmatprep.mubr.bf16.mxu0 %v16736_v25  ;;  %17067 = vmatprep.mubr.bf16.mxu1 %v16738_v28  ;;  %v16512_v25 = vpack.c.bf16 %v16508_v29, %v16508_v29  ;;  %v20262_v28 = vcombine.high %v20251_v49, %v20253_v8  ;;  %v23253_v34 = vld [vmem:[%s26155_s27 + $0x6f0] sm:$0xff]   ;;  %v23259_v39 = vld [vmem:[%s26155_s27 + $0x6b8] sm:$0xff]  }
0x31fc   : > { %17028 = vmatmul.mubr.bf16.vlgmr.msra.gmra.mrb[136].mxu0 %v16735_v22  ;;  %17068 = vmatmul.mubr.bf16.vlgmr.msra.gmra.mrb[136].mxu1 %v16737_v24  ;;  %v23228_v22 = vld [vmem:[%s26155_s27 + $0x640] sm:$0xff]   ;;  %v25917_v63 = vld [vmem:[%s26152_s21 + $0x138] sm:$0xff] }
0x31fd   : > { %21423 = vmatpush3.bf16.msra.mxu0 %v23198_v32  ;;  %21445 = vmatpush3.bf16.msra.mxu1 %v23199_v54  ;;  %v20259_v32 = vcombine.low %v20250_v61, %v20252_v57  ;;  %v20261_v54 = vcombine.low %v20251_v49, %v20253_v8  ;;  %v23229_v24 = vld [vmem:[%s26155_s27 + $0x6c0] sm:$0xff]   ;;  %v25922_v0 = vld [vmem:[%s26152_s21 + $0x178] sm:$0xff] }
0x31fe   : > { %17299 = vmatprep.mubr.bf16.mxu0 %v16511_v26  ;;  %17339 = vmatprep.mubr.bf16.mxu1 %v16513_v50  ;;  %v23232_v26 = vld [vmem:[%s26155_s27 + $0x648] sm:$0xff]  }
0x31ff   : > { %21424 = vmatprep.subr.bf16.mxu0 %v23200_v6  ;;  %21446 = vmatprep.subr.bf16.mxu1 %v23201_v23  ;;  %v23230_v6 = vld [vmem:[%s26155_s27 + $0x600] sm:$0xff]   ;;  %v23233_v50 = vld [vmem:[%s26155_s27 + $0x6c8] sm:$0xff]  }
0x3200   : > { %v23231_v23 = vld [vmem:[%s26155_s27 + $0x680] sm:$0xff]  }
0x3201   : > { %21425 = vmatpush3.bf16.msra.mxu0 %v23202_v16  ;;  %21447 = vmatpush3.bf16.msra.mxu1 %v23203_v35  ;;  %v23234_v16 = vld [vmem:[%s26155_s27 + $0x608] sm:$0xff]  }
0x3202   : > { %21426 = vmatprep.subr.bf16.mxu0 %v23204_v36  ;;  %21448 = vmatprep.subr.bf16.mxu1 %v23205_v37  ;;  %v23235_v35 = vld [vmem:[%s26155_s27 + $0x688] sm:$0xff]   ;;  %v23236_v36 = vld [vmem:[%s26155_s27 + $0x650] sm:$0xff]  }
0x3203   : > { %v23237_v37 = vld [vmem:[%s26155_s27 + $0x6d0] sm:$0xff]  }
0x3205   : > { %21427 = vmatpush3.bf16.msra.mxu0 %v23206_v38  ;;  %21449 = vmatpush3.bf16.msra.mxu1 %v23207_v18  ;;  %v23238_v38 = vld [vmem:[%s26155_s27 + $0x610] sm:$0xff]  }
0x3206   : > { %21428 = vmatprep.subr.bf16.mxu0 %v23208_v48  ;;  %21450 = vmatprep.subr.bf16.mxu1 %v23209_v43  ;;  %v23239_v18 = vld [vmem:[%s26155_s27 + $0x690] sm:$0xff]   ;;  %v23240_v48 = vld [vmem:[%s26155_s27 + $0x658] sm:$0xff]  }
0x3207   : > { %v23241_v43 = vld [vmem:[%s26155_s27 + $0x6d8] sm:$0xff]  }
0x3209   : > { %21429 = vmatpush3.bf16.msra.mxu0 %v23210_v10  ;;  %21451 = vmatpush3.bf16.msra.mxu1 %v23211_v45  ;;  %v23242_v10 = vld [vmem:[%s26155_s27 + $0x618] sm:$0xff]  }
0x320a   : > { %21430 = vmatprep.subr.bf16.mxu0 %v23212_v47  ;;  %21452 = vmatprep.subr.bf16.mxu1 %v23213_v2  ;;  %v23243_v45 = vld [vmem:[%s26155_s27 + $0x698] sm:$0xff]   ;;  %v23244_v47 = vld [vmem:[%s26155_s27 + $0x660] sm:$0xff]  }
0x320b   : > { %v23245_v2 = vld [vmem:[%s26155_s27 + $0x6e0] sm:$0xff]  }
0x320d   : > { %21431 = vmatpush3.bf16.msra.mxu0 %v23214_v51  ;;  %21453 = vmatpush3.bf16.msra.mxu1 %v23215_v40  ;;  %v23246_v51 = vld [vmem:[%s26155_s27 + $0x620] sm:$0xff]  }
0x320e   : > { %21432 = vmatprep.subr.bf16.mxu0 %v23216_v41  ;;  %21454 = vmatprep.subr.bf16.mxu1 %v23217_v4  ;;  %v23247_v40 = vld [vmem:[%s26155_s27 + $0x6a0] sm:$0xff]   ;;  %v23248_v41 = vld [vmem:[%s26155_s27 + $0x668] sm:$0xff]  }
0x320f   : > { %v23249_v4 = vld [vmem:[%s26155_s27 + $0x6e8] sm:$0xff]  }
0x3211   : > { %21433 = vmatpush3.bf16.msra.mxu0 %v23218_v53  ;;  %21455 = vmatpush3.bf16.msra.mxu1 %v23219_v52  ;;  %v23250_v53 = vld [vmem:[%s26155_s27 + $0x628] sm:$0xff]  }
0x3212   : > { %21434 = vmatprep.subr.bf16.mxu0 %v23220_v33  ;;  %21456 = vmatprep.subr.bf16.mxu1 %v23221_v58  ;;  %v23251_v52 = vld [vmem:[%s26155_s27 + $0x6a8] sm:$0xff]   ;;  %v23254_v33 = vld [vmem:[%s26155_s27 + $0x630] sm:$0xff]  }
0x3213   : > { %v23255_v58 = vld [vmem:[%s26155_s27 + $0x6b0] sm:$0xff]  }
0x3215   : > { %21435 = vmatpush3.bf16.msra.mxu0 %v23222_v5  ;;  %21457 = vmatpush3.bf16.msra.mxu1 %v23223_v27  ;;  %v23256_v5 = vld [vmem:[%s26155_s27 + $0x678] sm:$0xff]  }
0x3216   : > { %21436 = vmatprep.subr.bf16.mxu0 %v23224_v30  ;;  %21458 = vmatprep.subr.bf16.mxu1 %v23225_v59  ;;  %v23257_v27 = vld [vmem:[%s26155_s27 + $0x6f8] sm:$0xff]   ;;  %v25911_v30 = vld [vmem:[%s26152_s21 + $0x130] sm:$0xff] }
0x3217   : > { %v25914_v59 = vld [vmem:[%s26152_s21 + $0x170] sm:$0xff] }
0x3218   : > { %v20371_v17 = vcombine.high %v25911_v30, %v25914_v59  ;;  %v20370_v3 = vcombine.low %v25911_v30, %v25914_v59 }
0x3219   : > { %21437 = vmatpush3.bf16.msra.mxu0 %v23226_v55  ;;  %21459 = vmatpush3.bf16.msra.mxu1 %v23227_v44  ;;  %v20372_v55 = vcombine.low %v25917_v63, %v25922_v0  ;;  %v20373_v44 = vcombine.high %v25917_v63, %v25922_v0 }
0x321a   : > { %17417 = vmatprep.subr.bf16.mxu0 %v20256_v42  ;;  %17458 = vmatprep.subr.bf16.mxu1 %v20258_v7 }
0x321c   : > { %17300 = vmatmul.mubr.bf16.vlgmr.msra.gmra.mrb[140].mxu0 %v16510_v60  ;;  %17340 = vmatmul.mubr.bf16.vlgmr.msra.gmra.mrb[140].mxu1 %v16512_v25 }
0x321d   : > { %17418 = vmatpush1.bf16.msra.mxu0 %v20255_v13  ;;  %17459 = vmatpush1.bf16.msra.mxu1 %v20257_v15 }
0x321e   : > { %17419 = vmatprep.subr.bf16.mxu0 %v20260_v19  ;;  %17460 = vmatprep.subr.bf16.mxu1 %v20262_v28 }
0x321f   : > { %17449 = vmatprep.mubr.bf16.mxu0 %v23479_v12  ;;  %17490 = vmatprep.mubr.bf16.mxu1 %v23479_v12 }
0x3221   : > { %17420 = vmatpush1.bf16.msra.mxu0 %v20259_v32  ;;  %17461 = vmatpush1.bf16.msra.mxu1 %v20261_v54 }
0x3222   : > { %21466 = vmatprep.subr.bf16.mxu0 %v23228_v22  ;;  %21488 = vmatprep.subr.bf16.mxu1 %v23229_v24 }
0x3224   : > { %20263 = vmatmul.mubr.msk.bf16.vlgmr.msra.gmra.mrb[144].mxu0 %vm1696_vm1, %v25766_v62  ;;  %20264 = vmatmul.mubr.msk.bf16.vlgmr.msra.gmra.mrb[144].mxu1 %vm1696_vm1, %v25766_v62 }
0x3225   : > { %21467 = vmatpush3.bf16.msra.mxu0 %v23230_v6  ;;  %21489 = vmatpush3.bf16.msra.mxu1 %v23231_v23  ;;  %v20254_v23 = vld [vmem:[%s26156_s29 + $0x18] sm:$0xf] }
0x3226   : > { %21468 = vmatprep.subr.bf16.mxu0 %v23232_v26  ;;  %21490 = vmatprep.subr.bf16.mxu1 %v23233_v50 }
0x3229   : > { %21469 = vmatpush3.bf16.msra.mxu0 %v23234_v16  ;;  %21491 = vmatpush3.bf16.msra.mxu1 %v23235_v35  ;;  %v17360_v35 = vrot.slane %v20254_v23, %v24051_v20 }
0x322a   : > { %21470 = vmatprep.subr.bf16.mxu0 %v23236_v36  ;;  %21492 = vmatprep.subr.bf16.mxu1 %v23237_v37  ;;  %v17368_v36 = vrot.slane %v20254_v23, %v24053_v21 }
0x322d   : > { %21471 = vmatpush3.bf16.msra.mxu0 %v23238_v38  ;;  %21493 = vmatpush3.bf16.msra.mxu1 %v23239_v18  ;;  %v17364_v38 = vrot.slane %v20254_v23, %v24043_v11  ;;  %v17372_v18 = vrot.slane %v20254_v23, %v24045_v14  ;;  %v23281_v23 = vld [vmem:[%s26155_s27 + $0x7e8] sm:$0xff]  }
0x322e   : > { %21472 = vmatprep.subr.bf16.mxu0 %v23240_v48  ;;  %21494 = vmatprep.subr.bf16.mxu1 %v23241_v43 }
0x3231   : > { %21473 = vmatpush3.bf16.msra.mxu0 %v23242_v10  ;;  %21495 = vmatpush3.bf16.msra.mxu1 %v23243_v45 }
0x3232   : > { %21474 = vmatprep.subr.bf16.mxu0 %v23244_v47  ;;  %21496 = vmatprep.subr.bf16.mxu1 %v23245_v2 }
0x3235   : > { %21475 = vmatpush3.bf16.msra.mxu0 %v23246_v51  ;;  %21497 = vmatpush3.bf16.msra.mxu1 %v23247_v40 }
0x3236   : > { %21476 = vmatprep.subr.bf16.mxu0 %v23248_v41  ;;  %21498 = vmatprep.subr.bf16.mxu1 %v23249_v4 }
0x3239   : > { %21477 = vmatpush3.bf16.msra.mxu0 %v23250_v53  ;;  %21499 = vmatpush3.bf16.msra.mxu1 %v23251_v52 }
0x323a   : > { %21478 = vmatprep.subr.bf16.mxu0 %v23252_v31  ;;  %21500 = vmatprep.subr.bf16.mxu1 %v23253_v34 }
0x323d   : > { %21479 = vmatpush3.bf16.msra.mxu0 %v23254_v33  ;;  %21501 = vmatpush3.bf16.msra.mxu1 %v23255_v58  ;;  %v20365_v33 = vld [vmem:[%s26152_s21 + $0x1b0] sm:$0xff] }
0x323e   : > { %21480 = vmatprep.subr.bf16.mxu0 %v23256_v5  ;;  %21502 = vmatprep.subr.bf16.mxu1 %v23257_v27  ;;  %v20367_v27 = vld [vmem:[%s26152_s21 + $0x1f0] sm:$0xff] }
0x323f   : > { %v20375_v0 = vcombine.high %v20365_v33, %v20367_v27 }
0x3241   : > { %21481 = vmatpush3.bf16.msra.mxu0 %v23258_v56  ;;  %21503 = vmatpush3.bf16.msra.mxu1 %v23259_v39  ;;  %v20366_v56 = vld [vmem:[%s26152_s21 + $0x1b8] sm:$0xff] }
0x3242   : > { %17914 = vmatprep.subr.bf16.mxu0 %v20371_v17  ;;  %17955 = vmatprep.subr.bf16.mxu1 %v20373_v44  ;;  %v20368_v39 = vld [vmem:[%s26152_s21 + $0x1f8] sm:$0xff] }
0x3243   : > { %v20377_v44 = vcombine.high %v20366_v56, %v20368_v39 }
0x32cf   : > { %v21394_v9 = vpop.f32.mrb[136].mxu0  ;;  %v21416_v29 = vpop.f32.mrb[136].mxu1 }
0x32d0   : > { %v21395_v42 = vpop.f32.mrb[137].mxu0  ;;  %v21417_v7 = vpop.f32.mrb[137].mxu1 }
0x32d1   : > { %v21396_v61 = vadd.f32 %v21395_v42, %v21394_v9  ;;  %v21418_v57 = vadd.f32 %v21417_v7, %v21416_v29  ;;  %v21397_v49 = vpop.f32.mrb[138].mxu0  ;;  %v21419_v8 = vpop.f32.mrb[138].mxu1  ;;  %v20374_v9 = vcombine.low %v20365_v33, %v20367_v27  ;;  %v20376_v29 = vcombine.low %v20366_v56, %v20368_v39  ;;  %v23260_v42 = vld [vmem:[%s26155_s27 + $0x740] sm:$0xff]  }
0x32d2   : > { %v21398_v13 = vpop.f32.mrb[139].mxu0  ;;  %v21420_v15 = vpop.f32.mrb[139].mxu1  ;;  %v23261_v7 = vld [vmem:[%s26155_s27 + $0x7c0] sm:$0xff]   ;;  %v23267_v49 = vld [vmem:[%s26155_s27 + $0x788] sm:$0xff]   ;;  %v23268_v8 = vld [vmem:[%s26155_s27 + $0x750] sm:$0xff]  }
0x32d3   : > { %v17070_v19 = vadd.f32 %v21418_v57, %v21396_v61  ;;  %v23263_v61 = vld [vmem:[%s26155_s27 + $0x780] sm:$0xff]   ;;  %v23265_v57 = vld [vmem:[%s26155_s27 + $0x7c8] sm:$0xff]   ;;  %v23269_v13 = vld [vmem:[%s26155_s27 + $0x7d0] sm:$0xff]  }
0x32d4   : > { %v23270_v15 = vld [vmem:[%s26155_s27 + $0x710] sm:$0xff]  }
0x32ef   : > { %v21438_v60 = vpop.f32.mrb[140].mxu0  ;;  %v21460_v25 = vpop.f32.mrb[140].mxu1 }
0x32f0   : > { %v21439_v28 = vpop.f32.mrb[141].mxu0  ;;  %v21461_v32 = vpop.f32.mrb[141].mxu1 }
0x32f1   : > { %v21440_v54 = vadd.f32 %v21439_v28, %v21438_v60  ;;  %v21462_v22 = vadd.f32 %v21461_v32, %v21460_v25  ;;  %v21441_v24 = vpop.f32.mrb[142].mxu0  ;;  %v21463_v6 = vpop.f32.mrb[142].mxu1  ;;  %v23273_v60 = vld [vmem:[%s26155_s27 + $0x7d8] sm:$0xff]   ;;  %v23276_v32 = vld [vmem:[%s26155_s27 + $0x760] sm:$0xff]  }
0x32f2   : > { %v21442_v26 = vpop.f32.mrb[143].mxu0  ;;  %v21464_v50 = vpop.f32.mrb[143].mxu1  ;;  %v23274_v25 = vld [vmem:[%s26155_s27 + $0x718] sm:$0xff]   ;;  %v23279_v24 = vld [vmem:[%s26155_s27 + $0x7a0] sm:$0xff]   ;;  %v23280_v6 = vld [vmem:[%s26155_s27 + $0x768] sm:$0xff]  }
0x32f3   : > { %v17302_v16 = vadd.f32 %v21440_v54, %v17070_v19  ;;  %v23271_v19 = vld [vmem:[%s26155_s27 + $0x790] sm:$0xff]   ;;  %v23275_v28 = vld [vmem:[%s26155_s27 + $0x798] sm:$0xff]   ;;  %v23277_v54 = vld [vmem:[%s26155_s27 + $0x7e0] sm:$0xff]  }
0x32f4   : > { %v23282_v26 = vld [vmem:[%s26155_s27 + $0x728] sm:$0xff]  }
0x32f5   : > { %v25933_v37 = vadd.f32 %v21462_v22, %v17302_v16  ;;  %v23278_v22 = vld [vmem:[%s26155_s27 + $0x720] sm:$0xff]   ;;  %v23283_v50 = vld [vmem:[%s26155_s27 + $0x7a8] sm:$0xff]   ;;  %v23284_v16 = vld [vmem:[%s26155_s27 + $0x770] sm:$0xff]  }
0x32f7   : > { %v17451_v48 = vpop.f32.mrb[144].mxu0  ;;  %v17492_v43 = vpop.f32.mrb[144].mxu1 }
0x32f8   : > { %v17452_v10 = vadd.f32 %v17451_v48, %v17360_v35  ;;  %v17493_v45 = vadd.f32 %v17492_v43, %v17368_v36  ;;  %v17453_v47 = vpop.f32.mrb[145].mxu0  ;;  %v17494_v2 = vpop.f32.mrb[145].mxu1  ;;  %v23285_v35 = vld [vmem:[%s26155_s27 + $0x7f0] sm:$0xff]   ;;  %v23289_v48 = vld [vmem:[%s26155_s27 + $0x7f8] sm:$0xff]  }
0x32f9   : > { %v17454_v51 = vadd.f32 %v17453_v47, %v17364_v38  ;;  %v17495_v40 = vadd.f32 %v17494_v2, %v17372_v18  ;;  %v17455_v41 = vpop.f32.mrb[146].mxu0  ;;  %v17496_v4 = vpop.f32.mrb[146].mxu1  ;;  %v23286_v36 = vld [vmem:[%s26155_s27 + $0x730] sm:$0xff]   ;;  %v23288_v18 = vld [vmem:[%s26155_s27 + $0x778] sm:$0xff]  }
0x32fa   : > { %v17499_v53 = vmax.f32 %v17452_v10, 0.0  ;;  %v17501_v52 = vmax.f32 %v17493_v45, 0.0  ;;  %v17456_v31 = vpop.f32.mrb[147].mxu0  ;;  %v17497_v34 = vpop.f32.mrb[147].mxu1  ;;  %v23287_v38 = vld [vmem:[%s26155_s27 + $0x7b0] sm:$0xff]   ;;  %v23290_v43 = vld [vmem:[%s26155_s27 + $0x738] sm:$0xff]  }
0x32fb   : > { %v17500_v58 = vmax.f32 %v17454_v51, 0.0  ;;  %v17502_v5 = vmax.f32 %v17495_v40, 0.0  ;;  %v23291_v10 = vld [vmem:[%s26155_s27 + $0x7b8] sm:$0xff]  }
0x32fc   : > { %v17503_v63 = vpack.c.bf16 %v17499_v53, %v17499_v53  ;;  %v17505_v17 = vpack.c.bf16 %v17501_v52, %v17501_v52  ;;  %v20369_v52 = vld [vmem:[%s26156_s29 + $0x1c] sm:$0xf] }
0x32fd   : > { %v17504_v30 = vpack.c.bf16 %v17500_v58, %v17500_v58  ;;  %v17506_v59 = vpack.c.bf16 %v17502_v5, %v17502_v5  ;;  %v17857_v58 = vrot.slane %v20369_v52, %v24051_v20  ;;  %v17865_v5 = vrot.slane %v20369_v52, %v24053_v21 }
0x32fe   : > { %v17861_v56 = vrot.slane %v20369_v52, %v24043_v11  ;;  %v17869_v39 = vrot.slane %v20369_v52, %v24045_v14 }
0x32ff   : > { %17795 = vmatprep.mubr.bf16.mxu0 %v17504_v30  ;;  %17835 = vmatprep.mubr.bf16.mxu1 %v17506_v59 }
0x3300   : > { %17796 = vmatmul.mubr.bf16.vlgmr.msra.gmra.mrb[148].mxu0 %v17503_v63  ;;  %17836 = vmatmul.mubr.bf16.vlgmr.msra.gmra.mrb[148].mxu1 %v17505_v17 }
0x3301   : > { %17915 = vmatpush1.bf16.msra.mxu0 %v20370_v3  ;;  %17956 = vmatpush1.bf16.msra.mxu1 %v20372_v55  ;;  %v23262_v3 = vld [vmem:[%s26155_s27 + $0x700] sm:$0xff]   ;;  %v23264_v55 = vld [vmem:[%s26155_s27 + $0x748] sm:$0xff]  }
0x3302   : > { %17916 = vmatprep.subr.bf16.mxu0 %v20375_v0  ;;  %17957 = vmatprep.subr.bf16.mxu1 %v20377_v44 }
0x3303   : > { %17946 = vmatprep.mubr.bf16.mxu0 %v23479_v12  ;;  %17987 = vmatprep.mubr.bf16.mxu1 %v23479_v12  ;;  %v23266_v12 = vld [vmem:[%s26155_s27 + $0x708] sm:$0xff]  }
0x3305   : > { %17917 = vmatpush1.bf16.msra.mxu0 %v20374_v9  ;;  %17958 = vmatpush1.bf16.msra.mxu1 %v20376_v29 }
0x3306   : > { %21510 = vmatprep.subr.bf16.mxu0 %v23260_v42  ;;  %21532 = vmatprep.subr.bf16.mxu1 %v23261_v7 }
0x3308   : > { %20378 = vmatmul.mubr.msk.bf16.vlgmr.msra.gmra.mrb[152].mxu0 %vm1696_vm1, %v25766_v62  ;;  %20379 = vmatmul.mubr.msk.bf16.vlgmr.msra.gmra.mrb[152].mxu1 %vm1696_vm1, %v25766_v62  ;;  %v23272_v62 = vld [vmem:[%s26155_s27 + $0x758] sm:$0xff]  }
0x3309   : > { %21511 = vmatpush3.bf16.msra.mxu0 %v23262_v3  ;;  %21533 = vmatpush3.bf16.msra.mxu1 %v23263_v61 }
0x330a   : > { %21512 = vmatprep.subr.bf16.mxu0 %v23264_v55  ;;  %21534 = vmatprep.subr.bf16.mxu1 %v23265_v57 }
0x330d   : > { %21513 = vmatpush3.bf16.msra.mxu0 %v23266_v12  ;;  %21535 = vmatpush3.bf16.msra.mxu1 %v23267_v49 }
0x330e   : > { %21514 = vmatprep.subr.bf16.mxu0 %v23268_v8  ;;  %21536 = vmatprep.subr.bf16.mxu1 %v23269_v13 }
0x3311   : > { %21515 = vmatpush3.bf16.msra.mxu0 %v23270_v15  ;;  %21537 = vmatpush3.bf16.msra.mxu1 %v23271_v19 }
0x3312   : > { %21516 = vmatprep.subr.bf16.mxu0 %v23272_v62  ;;  %21538 = vmatprep.subr.bf16.mxu1 %v23273_v60 }
0x3315   : > { %21517 = vmatpush3.bf16.msra.mxu0 %v23274_v25  ;;  %21539 = vmatpush3.bf16.msra.mxu1 %v23275_v28 }
0x3316   : > { %21518 = vmatprep.subr.bf16.mxu0 %v23276_v32  ;;  %21540 = vmatprep.subr.bf16.mxu1 %v23277_v54 }
0x3319   : > { %21519 = vmatpush3.bf16.msra.mxu0 %v23278_v22  ;;  %21541 = vmatpush3.bf16.msra.mxu1 %v23279_v24  ;;  %v20477_v24 = vld [vmem:[%s26157_s30 + $0x1] ss:$0 sm:$0xff] }
0x331a   : > { %21520 = vmatprep.subr.bf16.mxu0 %v23280_v6  ;;  %21542 = vmatprep.subr.bf16.mxu1 %v23281_v23 }
0x331d   : > { %21521 = vmatpush3.bf16.msra.mxu0 %v23282_v26  ;;  %21543 = vmatpush3.bf16.msra.mxu1 %v23283_v50 }
0x331e   : > { %21522 = vmatprep.subr.bf16.mxu0 %v23284_v16  ;;  %21544 = vmatprep.subr.bf16.mxu1 %v23285_v35 }
0x3321   : > { %21523 = vmatpush3.bf16.msra.mxu0 %v23286_v36  ;;  %21545 = vmatpush3.bf16.msra.mxu1 %v23287_v38 }
0x3322   : > { %21524 = vmatprep.subr.bf16.mxu0 %v23288_v18  ;;  %21546 = vmatprep.subr.bf16.mxu1 %v23289_v48 }
0x3325   : > { %21525 = vmatpush3.bf16.msra.mxu0 %v23290_v43  ;;  %21547 = vmatpush3.bf16.msra.mxu1 %v23291_v10 }
0x3326   : > { %22565 = vmatprep.subr.bf16.mxu0 %v23477_v1 }
0x33d3   : > { %v21482_v45 = vpop.f32.mrb[148].mxu0  ;;  %v21504_v47 = vpop.f32.mrb[148].mxu1 }
0x33d4   : > { %v21483_v2 = vpop.f32.mrb[149].mxu0  ;;  %v21505_v51 = vpop.f32.mrb[149].mxu1 }
0x33d5   : > { %v21484_v40 = vadd.f32 %v21483_v2, %v21482_v45  ;;  %v21506_v41 = vadd.f32 %v21505_v51, %v21504_v47  ;;  %v21485_v4 = vpop.f32.mrb[150].mxu0  ;;  %v21507_v53 = vpop.f32.mrb[150].mxu1  ;;  %v20480_v45 = vld [vmem:[%s26159_s20 + $0x1] ss:$0 sm:$0xff] }
0x33d6   : > { %v21486_v31 = vpop.f32.mrb[151].mxu0  ;;  %v21508_v34 = vpop.f32.mrb[151].mxu1  ;;  %v20481_v47 = vld [vmem:[%s26160_s0 + $0x1] ss:$0 sm:$0xff]  ;;  %s26163_s0 = sld [smem:[#allocation51_spill]] }
0x33d7   : > { %v17838_v33 = vadd.f32 %v21506_v41, %v21484_v40  ;;  %v23292_v34 = vld [vmem:[%s23738_s17] sm:$0xff]  }
0x33d9   : > { %v17843_v27 = vadd.f32 %v17838_v33, %v25933_v37  ;;  %v23293_v33 = vld [vmem:[%s23738_s17 + $0x8] sm:$0xff]  }
0x33db   : > { %v17948_v30 = vpop.f32.mrb[152].mxu0  ;;  %v17989_v59 = vpop.f32.mrb[152].mxu1 }
0x33dc   : > { %v17949_v63 = vadd.f32 %v17948_v30, %v17857_v58  ;;  %v17990_v17 = vadd.f32 %v17989_v59, %v17865_v5  ;;  %v17950_v0 = vpop.f32.mrb[153].mxu0  ;;  %v17991_v44 = vpop.f32.mrb[153].mxu1  ;;  %v20483_v59 = vld [vmem:[%s23733_s4] ss:$0 sm:$0xff]  ;;  %s1589_s1 = scalar_lea.vmem %s26163_s0, %s26162_s28 }
0x33dd   : > { %v17951_v9 = vadd.f32 %v17950_v0, %v17861_v56  ;;  %v17992_v29 = vadd.f32 %v17991_v44, %v17869_v39  ;;  %v17952_v42 = vpop.f32.mrb[154].mxu0  ;;  %v17993_v7 = vpop.f32.mrb[154].mxu1  ;;  %v20482_v39 = vld [vmem:[%s26161_s3] ss:$0 sm:$0xff] }
0x33de   : > { %v17996_v3 = vmax.f32 %v17949_v63, 0.0  ;;  %v17998_v20 = vmax.f32 %v17990_v17, 0.0  ;;  %v17953_v61 = vpop.f32.mrb[155].mxu0  ;;  %v17994_v21 = vpop.f32.mrb[155].mxu1  ;;  %v20484_v44 = vld [vmem:[%s23743_s9] ss:$0 sm:$0xff] }
0x33df   : > { %v17997_v55 = vmax.f32 %v17951_v9, 0.0  ;;  %v17999_v37 = vmax.f32 %v17992_v29, 0.0 }
0x33e0   : > { %v18000_v12 = vpack.c.bf16 %v17996_v3, %v17996_v3  ;;  %v18002_v14 = vpack.c.bf16 %v17998_v20, %v17998_v20 }
0x33e1   : > { %v18001_v57 = vpack.c.bf16 %v17997_v55, %v17997_v55  ;;  %v18003_v11 = vpack.c.bf16 %v17999_v37, %v17999_v37 }
0x33e3   : > { %18292 = vmatprep.mubr.bf16.mxu0 %v18001_v57  ;;  %18332 = vmatprep.mubr.bf16.mxu1 %v18003_v11 }
0x33e4   : > { %18293 = vmatmul.mubr.bf16.vlgmr.msra.gmra.mrb[156].mxu0 %v18000_v12  ;;  %18333 = vmatmul.mubr.bf16.vlgmr.msra.gmra.mrb[156].mxu1 %v18002_v14 }
0x33e5   : > { %22569 = vmatprep.mubr.msk.bf16.mxu0 %vm23478_vm0, %v23477_v1  ;;  %22566 = vmatpush3.bf16.msra.mxu0 %v23292_v34 }
0x33e6   : > { %22567 = vmatprep.subr.bf16.mxu0 %v23477_v1 }
0x33e9   : > { %22568 = vmatpush3.bf16.msra.mxu0 %v23293_v33 }
0x34b7   : > { %v21526_v49 = vpop.f32.mrb[156].mxu0  ;;  %v21548_v8 = vpop.f32.mrb[156].mxu1 }
0x34b8   : > { %v21527_v13 = vpop.f32.mrb[157].mxu0  ;;  %v21549_v15 = vpop.f32.mrb[157].mxu1 }
0x34b9   : > { %v21528_v19 = vadd.f32 %v21527_v13, %v21526_v49  ;;  %v21550_v62 = vadd.f32 %v21549_v15, %v21548_v8  ;;  %v21529_v60 = vpop.f32.mrb[158].mxu0  ;;  %v21551_v25 = vpop.f32.mrb[158].mxu1 }
0x34ba   : > { %v21530_v28 = vpop.f32.mrb[159].mxu0  ;;  %v21552_v32 = vpop.f32.mrb[159].mxu1 }
0x34bb   : > { %v18335_v54 = vadd.f32 %v21550_v62, %v21528_v19 }
0x34bd   : > { %v18340_v22 = vadd.f32 %v18335_v54, %v17843_v27 }
0x34bf   : > { %v18341_v6 = vadd.f32 %v18340_v22, %v25762_v46 }
0x34c1   : > { %v18350_v23 = vadd.f32 %v20477_v24, %v18341_v6 }
0x34c3   : > { %v18355_v26 = vsel %vm1696_vm1, %v18350_v23, 0.0 }
0x34c4   : > { %18356 = vadd.xlane.f32.xlu0 %v18355_v26 }
0x3551   : > { %v18357_v50 = vpop.xlane.xlu0 %18356 }
0x3552   : > { %v18358_v16 = vmul.f32 0.03125, %v18357_v50 }
0x3554   : > { %v18359_v35 = vsub.f32 %v18350_v23, %v18358_v16 }
0x3556   : > { %v18360_v36 = vmul.f32 %v18359_v35, %v18359_v35 }
0x3558   : > { %v18361_v38 = vsel %vm1696_vm1, %v18360_v36, 0.0 }
0x3559   : > { %18362 = vadd.xlane.f32.xlu1 %v18361_v38 }
0x35e6   : > { %v18363_v18 = vpop.xlane.xlu1 %18362 }
0x35e7   : > { %v18364_v48 = vmul.f32 0.03125, %v18363_v18 }
0x35e9   : > { %v18365_v43 = vadd.f32 1e-05, %v18364_v48 }
0x35eb   : > { %23410 = vrsqrt.f32 %v18365_v43 }
0x35f5   : > { %v23411_v10 = vpop.eup %23410 }
0x35f6   : > { %v18367_v46 = vmul.f32 %v23411_v10, %v18359_v35 }
0x35f8   : > { %v18374_v2 = vmul.f32 %v20480_v45, %v18367_v46 }
0x35fa   : > { %v18381_v51 = vadd.f32 %v20481_v47, %v18374_v2 }
0x35fc   : > { %v18384_v40 = vsel %vm1696_vm1, %v18381_v51, 0.0 }
0x35fd   : > { %18385 = vadd.xlane.f32.xlu0 %v18384_v40 }
0x368a   : > { %v18386_v41 = vpop.xlane.xlu0 %18385 }
0x368b   : > { %v18387_v4 = vmul.f32 0.03125, %v18386_v41 }
0x368d   : > { %v18388_v53 = vsub.f32 %v18381_v51, %v18387_v4 }
0x368f   : > { %v18389_v52 = vmul.f32 %v18388_v53, %v18388_v53 }
0x3691   : > { %v18390_v31 = vsel %vm1696_vm1, %v18389_v52, 0.0 }
0x3692   : > { %18391 = vadd.xlane.f32.xlu1 %v18390_v31 }
0x371f   : > { %v18392_v58 = vpop.xlane.xlu1 %18391 }
0x3720   : > { %v18393_v5 = vmul.f32 0.03125, %v18392_v58 }
0x3722   : > { %v18394_v27 = vadd.f32 1e-05, %v18393_v5 }
0x3724   : > { %23412 = vrsqrt.f32 %v18394_v27 }
0x372e   : > { %v23413_v56 = vpop.eup %23412 }
0x372f   : > { %v18396_v30 = vmul.f32 %v23413_v56, %v18388_v53 }
0x3731   : > { %v18403_v63 = vmul.f32 %v20482_v39, %v18396_v30 }
0x3733   : > { %v18410_v17 = vadd.f32 %v20483_v59, %v18403_v63 }
0x3735   : > { %v18411_v0 = vpack.c.bf16 %v18410_v17, %v18410_v17 }
0x3737   : > { %22570 = vmatmul.mubr.msk.bf16.vlgmr.msra.gmra.mrb[160].mxu0 %vm1696_vm1, %v18411_v0 }
0x380a   : > { %v18472_v1 = vpop.f32.mrb[160].mxu0 }
0x380b   : > { %v18473_v9 = vadd.f32 %v20484_v44, %v18472_v1  ;;  %v22571_v29 = vpop.f32.mrb[161].mxu0 }
0x380c   : > { %v18475_v42 = vpop.f32.mrb[162].mxu0 }
0x380d   : > { %18478 = vst [vmem:[%s1589_s1] sm:$0xff] %v18473_v9  ;;  %v22572_v7 = vpop.f32.mrb[163].mxu0 }
0x380e PF: > { %s26164_s2 = sld [smem:[#allocation52_spill]] }
0x3814   : > { %s115_s28 = sadd.s32 1, %s26164_s2  }
0x3815   : > { %p112_p4 = scmp.ge.s32.totalorder %s115_s28, 4  }
0x3817   :  { %114 = sbr.rel (!%p112_p4) target bundleno = 125 (0x7d), region = 361 }

</bundles_post_ra>
